<compile_context>
chip_gen: v6e
topology: v6e:2x2x1
jax: 0.10.0
libtpu: 0.0.40
codegen_flags: <defaults>
</compile_context>

<pallas_src>
import math

import numpy as np
import jax
import jax.numpy as jnp
from jax.experimental import pallas as pl
from jax.experimental.pallas import tpu as pltpu

# ---------------------------------------------------------------- config ----
NUM_VIEWS = 24        # fixed by the vertex table in __init__
HIDDEN = 32           # small test size (module default is 384)
NCLASSES = 2
SCORE_CLASSES = 40    # View_selector score head width (reference view-GCN)
K_NEIGHBORS = 4
LEAKY_SLOPE = 0.2

VERTICES = np.array(
    [[0.10351321, -0.26623718, 0.95833333], [0.58660347, 0.17076373, 0.79166667],
     [-0.43415312, 0.21421034, 0.875], [-0.36647685, -0.60328982, 0.70833333],
     [0.01976488, -0.9563158, 0.29166667], [0.67752135, -0.49755606, 0.54166667],
     [-0.15182544, 0.76571799, 0.625], [-0.88358265, -0.09598052, 0.45833333],
     [-0.67542972, 0.70738385, 0.20833333], [0.61193796, 0.6963526, 0.375],
     [0.98993913, -0.06629874, 0.125], [-0.78018082, -0.62416487, 0.04166667],
     [0.15366374, 0.98724432, -0.04166667], [0.5497027, -0.82595517, -0.125],
     [-0.94957016, 0.23433679, -0.20833333], [0.83957118, 0.45831298, -0.29166667],
     [-0.29994434, -0.87715928, -0.375], [-0.35602319, 0.81435744, -0.45833333],
     [0.76855365, -0.34047396, -0.54166667], [-0.73985756, -0.24896947, -0.625],
     [0.34123727, 0.61791667, -0.70833333], [0.1434854, -0.59386516, -0.79166667],
     [-0.40171157, 0.27019033, -0.875], [0.28246466, 0.04255512, -0.95833333]],
    dtype=np.float32)


# ------------------------------------------------------------ small helpers
def _leaky(x):
    return jnp.where(x >= 0.0, x, LEAKY_SLOPE * x)


def _bf16(x):
    return x.astype(jnp.bfloat16)


# ----------------------------------------- trace-time (numpy) geometry -----
def _np_knn(k, xyz, new_xyz):
    d = ((new_xyz[:, None, :] - xyz[None, :, :]) ** 2).sum(-1)    # (S, N)
    return np.argsort(d, axis=-1)[:, :k].astype(np.int32)         # (S, k)


def _np_fps(xyz, npoint):
    # TODO(synk): reference impl starts from a random index; fixed to 0 here.
    N = xyz.shape[0]
    dist = np.full((N,), 1e10, np.float64)
    far = 0
    out = []
    for _ in range(npoint):
        out.append(far)
        d = ((xyz - xyz[far]) ** 2).sum(-1)
        dist = np.minimum(dist, d)
        far = int(np.argmax(dist))
    return np.asarray(out, np.int32)


def _np_gcn_geom(xyz, idx):
    """vF features for KNN_dist, in neighbor-major (k, nv, 10) layout."""
    v = xyz[idx]                                                   # (nv, k, 3)
    v0 = np.repeat(v[:, :1, :], v.shape[1], axis=1)
    d = v0 - v
    n = np.linalg.norm(d, axis=-1, keepdims=True)
    vF = np.concatenate([v0, v, d, n], axis=-1).astype(np.float32)  # (nv, k, 10)
    return np.ascontiguousarray(np.transpose(vF, (1, 0, 2)))      # (k, nv, 10)


# Stage-1 geometry is fully determined by the constant vertex table.
_IDX1 = _np_knn(K_NEIGHBORS, VERTICES, VERTICES)                   # (24, 4)
_VF1 = _np_gcn_geom(VERTICES, _IDX1)                               # (4, 24, 10)
_FPS1 = _np_fps(VERTICES, NUM_VIEWS // 2)                          # (12,)
_VERTS1 = VERTICES[_FPS1]                                          # (12, 3)
_IDKNN1 = _np_knn(K_NEIGHBORS, VERTICES, _VERTS1)                  # (12, 4)
_VSEL1 = VERTICES[_IDKNN1].astype(np.float32)                      # (12, 4, 3)


# ------------------------------------------------------------ Pallas kernels
def _local_gcn_body(vF_ref, Fn_ref, r0w, r0b, r1w, r1b, r2wT, r2b, cw, cb):
    """KNN_dist MLP per neighbor + VPU weighted sum + conv + leaky.

    vF_ref / Fn_ref blocks are (1, k, nv, 10/H); the per-neighbor loop keeps
    the aggregation in exact f32 on the VPU (no 0/1 selection matmul).
    """
    k = vF_ref.shape[1]
    Fagg = None
    for j in range(k):                                   # static unroll, k=4
        x = vF_ref[0, j]                                 # (nv, 10)
        h = jnp.dot(_bf16(x), r0w[...],
                    preferred_element_type=jnp.float32) + r0b[...]
        h = jnp.maximum(h, 0.0)
        h = jnp.dot(_bf16(h), r1w[...],
                    preferred_element_type=jnp.float32) + r1b[...]
        h = jnp.maximum(h, 0.0)
        # r2 has out_features=1: lane-reduce in f32 instead of an N=1 matmul.
        wgt = jnp.sum(h * r2wT[...], axis=-1, keepdims=True) + r2b[...]  # (nv,1)
        contrib = wgt * Fn_ref[0, j]                     # (nv, H)  VPU
        Fagg = contrib if Fagg is None else Fagg + contrib
    y = jnp.dot(_bf16(Fagg), cw[...],
                preferred_element_type=jnp.float32) + cb[...]
    return _leaky(y)                                     # (nv, H)


def _stage_kernel(vF_ref, Fn_ref, Ri_ref, Rj_ref, Si_ref,
                  r0w_ref, r0b_ref, r1w_ref, r1b_ref, r2wT_ref, r2b_ref,
                  cw_ref, cb_ref,
                  w0i_ref, w0j_ref, b0_ref, w1_ref, b1_ref,
                  fwf_ref, fwm_ref, fb_ref,
                  o_ref, pooled_ref):
    """Fused LocalGCN + view-max pooling + NonLocalMP for one batch element."""
    y = _local_gcn_body(vF_ref, Fn_ref, r0w_ref, r0b_ref, r1w_ref, r1b_ref,
                        r2wT_ref, r2b_ref, cw_ref, cb_ref)        # (V, H)
    pooled_ref[0] = jnp.max(y, axis=0, keepdims=True)             # torch.max(y,1)

    # NonLocalMP: cat(F_i,F_j)@rel0 split as F_i@w0i + F_j@w0j; pairwise slab
    # built in VMEM with bf16 0/1 selection matmuls (exact 0/1, f32 accum).
    yb = _bf16(y)
    Ai = jnp.dot(yb, w0i_ref[...], preferred_element_type=jnp.float32)   # (V,2H)
    Aj = jnp.dot(yb, w0j_ref[...], preferred_element_type=jnp.float32)   # (V,2H)
    P = (jnp.dot(Ri_ref[...], _bf16(Ai), preferred_element_type=jnp.float32)
         + jnp.dot(Rj_ref[...], _bf16(Aj), preferred_element_type=jnp.float32)
         + b0_ref[...])                                           # (V*V, 2H)
    P = jnp.maximum(P, 0.0)
    M2 = jnp.dot(_bf16(P), w1_ref[...],
                 preferred_element_type=jnp.float32) + b1_ref[...]
    M2 = jnp.maximum(M2, 0.0)                                     # (V*V, H)
    Msum = jnp.dot(Si_ref[...], _bf16(M2),
                   preferred_element_type=jnp.float32)            # (V, H)
    out = (jnp.dot(yb, fwf_ref[...], preferred_element_type=jnp.float32)
           + jnp.dot(_bf16(Msum), fwm_ref[...], preferred_element_type=jnp.float32)
           + fb_ref[...])
    o_ref[0] = jnp.maximum(out, 0.0)


def _final_kernel(vF_ref, Fn_ref, p1_ref, p2_ref,
                  r0w_ref, r0b_ref, r1w_ref, r1b_ref, r2wT_ref, r2b_ref,
                  cw_ref, cb_ref,
                  c0wa_ref, c0wb_ref, c0wc_ref, c0b_ref,
                  c1w_ref, c1b_ref, c2w_ref, c2b_ref,
                  logits_ref):
    """Fused LocalGCN3 + view-max pooling + 3-layer classifier head."""
    y = _local_gcn_body(vF_ref, Fn_ref, r0w_ref, r0b_ref, r1w_ref, r1b_ref,
                        r2wT_ref, r2b_ref, cw_ref, cb_ref)        # (V3, H)
    pooled3 = jnp.max(y, axis=0, keepdims=True)                   # (1, H)
    # cat(p1,p2,p3) @ W0  ==  p1@W0[:H] + p2@W0[H:2H] + p3@W0[2H:]
    h = (jnp.dot(_bf16(p1_ref[0]), c0wa_ref[...], preferred_element_type=jnp.float32)
         + jnp.dot(_bf16(p2_ref[0]), c0wb_ref[...], preferred_element_type=jnp.float32)
         + jnp.dot(_bf16(pooled3), c0wc_ref[...], preferred_element_type=jnp.float32)
         + c0b_ref[...])
    h = _leaky(h)
    h = jnp.dot(_bf16(h), c1w_ref[...],
                preferred_element_type=jnp.float32) + c1b_ref[...]
    # TODO(synk): nn.Dropout() treated as eval-mode identity (torch RNG not reproducible).
    h = _leaky(h)
    logits_ref[0] = jnp.dot(_bf16(h), c2w_ref[...],
                            preferred_element_type=jnp.float32) + c2b_ref[...]


def _selector_head_kernel(x_ref, w0_ref, b0_ref, w1_ref, b1_ref, o_ref):
    """Fused View_selector score head: leaky(x @ cls0 + b0) @ cls1 + b1."""
    h = jnp.dot(_bf16(x_ref[...]), w0_ref[...],
                preferred_element_type=jnp.float32) + b0_ref[...]
    h = _leaky(h)
    o_ref[...] = jnp.dot(_bf16(h), w1_ref[...],
                         preferred_element_type=jnp.float32) + b1_ref[...]


# -------------------------------------------------------- BlockSpec helpers
def _batch_spec(shape):
    rest = (0,) * (len(shape) - 1)
    return pl.BlockSpec((1,) + tuple(shape[1:]), lambda b: (b,) + rest)


def _const_spec(shape):
    zeros = (0,) * len(shape)
    return pl.BlockSpec(tuple(shape), lambda b: zeros)


# --------------------------------------------------------------- glue (JAX)
def _square_distance(src, dst):
    return jnp.sum((src[:, :, None, :] - dst[:, None, :, :]) ** 2, axis=-1)


def _knn(nsample, xyz, new_xyz):
    sqrdists = _square_distance(new_xyz, xyz)         # (B, S, N)
    _, idx = jax.lax.top_k(-sqrdists, nsample)        # k smallest distances
    return idx                                        # (B, S, k)


def _index_points(points, idx):
    B = points.shape[0]
    bidx = jnp.arange(B).reshape((B,) + (1,) * (idx.ndim - 1))
    return points[bidx, idx]


def _farthest_point_sample(xyz, npoint):
    # TODO(synk): reference impl starts from a random index per batch; fixed to 0.
    B, N, _ = xyz.shape
    distance = jnp.full((B, N), 1e10, jnp.float32)
    farthest = jnp.zeros((B,), jnp.int32)
    out = []
    for _ in range(npoint):
        out.append(farthest)
        centroid = xyz[jnp.arange(B), farthest][:, None, :]
        d = jnp.sum((xyz - centroid) ** 2, axis=-1)
        distance = jnp.minimum(distance, d)
        farthest = jnp.argmax(distance, axis=-1).astype(jnp.int32)
    return jnp.stack(out, axis=1)


def _gcn_inputs(F, V_xyz, k):
    """Dynamic-geometry LocalGCN inputs in neighbor-major (B,k,nv,*) layout."""
    idx = _knn(k, V_xyz, V_xyz)                       # (B, nv, k)
    Fn = _index_points(F, idx)                        # (B, nv, k, H)
    v = _index_points(V_xyz, idx)                     # (B, nv, k, 3)
    v0 = jnp.repeat(v[:, :, :1, :], k, axis=2)
    d = v0 - v
    vF = jnp.concatenate(
        [v0, v, d, jnp.linalg.norm(d, axis=-1, keepdims=True)], axis=-1)
    return (jnp.transpose(vF, (0, 2, 1, 3)).astype(jnp.float32),   # (B,k,nv,10)
            jnp.transpose(Fn, (0, 2, 1, 3)).astype(jnp.float32))   # (B,k,nv,H)


# ----------------------------------------------------------- stage wrappers
def _stage(lg_p, nl_p, vF, Fn, n_views, hidden):
    """Fused LocalGCN + NonLocalMP stage. Returns (nonlocal_out, pooled)."""
    B, k = Fn.shape[0], Fn.shape[1]
    V, H = n_views, hidden

    eyeV = np.eye(V, dtype=np.float32)
    Ri = jnp.asarray(np.repeat(eyeV, V, axis=0)).astype(jnp.bfloat16)  # (V*V, V)
    Rj = jnp.asarray(np.tile(eyeV, (V, 1))).astype(jnp.bfloat16)       # (V*V, V)
    Si = jnp.asarray(np.repeat(eyeV, V, axis=1)).astype(jnp.bfloat16)  # (V, V*V)

    r0w = _bf16(lg_p["r0"]["w"]); r0b = lg_p["r0"]["b"].reshape(1, -1)
    r1w = _bf16(lg_p["r1"]["w"]); r1b = lg_p["r1"]["b"].reshape(1, -1)
    r2wT = lg_p["r2"]["w"].reshape(1, -1)
    r2b = lg_p["r2"]["b"].reshape(1, 1)
    cw = _bf16(lg_p["conv"]["w"]); cb = lg_p["conv"]["b"].reshape(1, -1)

    w0 = nl_p["rel0"]["w"]
    w0i = _bf16(w0[:H]); w0j = _bf16(w0[H:])
    b0 = nl_p["rel0"]["b"].reshape(1, -1)
    w1 = _bf16(nl_p["rel1"]["w"]); b1 = nl_p["rel1"]["b"].reshape(1, -1)
    fw = nl_p["fus"]["w"]
    fwf = _bf16(fw[:H]); fwm = _bf16(fw[H:])
    fb = nl_p["fus"]["b"].reshape(1, -1)

    out2, pooled = pl.pallas_call(
        _stage_kernel,
        out_shape=(jax.ShapeDtypeStruct((B, V, H), jnp.float32),
                   jax.ShapeDtypeStruct((B, 1, H), jnp.float32)),
        grid=(B,),
        in_specs=[
            _batch_spec((B, k, V, 10)),
            _batch_spec((B, k, V, H)),
            _const_spec((V * V, V)),
            _const_spec((V * V, V)),
            _const_spec((V, V * V)),
            _const_spec((10, 10)), _const_spec((1, 10)),
            _const_spec((10, 10)), _const_spec((1, 10)),
            _const_spec((1, 10)), _const_spec((1, 1)),
            _const_spec((H, H)), _const_spec((1, H)),
            _const_spec((H, 2 * H)), _const_spec((H, 2 * H)), _const_spec((1, 2 * H)),
            _const_spec((2 * H, H)), _const_spec((1, H)),
            _const_spec((H, H)), _const_spec((H, H)), _const_spec((1, H)),
        ],
        out_specs=(pl.BlockSpec((1, V, H), lambda b: (b, 0, 0)),
                   pl.BlockSpec((1, 1, H), lambda b: (b, 0, 0))),
        compiler_params=pltpu.CompilerParams(dimension_semantics=("parallel",)),
    )(vF, Fn, Ri, Rj, Si, r0w, r0b, r1w, r1b, r2wT, r2b, cw, cb,
      w0i, w0j, b0, w1, b1, fwf, fwm, fb)
    return out2, pooled


def _final_stage(params, vF, Fn, pooled1, pooled2, n_views, hidden):
    """Fused LocalGCN3 + pooling + classifier head."""
    B, k = Fn.shape[0], Fn.shape[1]
    V, H = n_views, hidden
    lg_p = params["lg3"]

    r0w = _bf16(lg_p["r0"]["w"]); r0b = lg_p["r0"]["b"].reshape(1, -1)
    r1w = _bf16(lg_p["r1"]["w"]); r1b = lg_p["r1"]["b"].reshape(1, -1)
    r2wT = lg_p["r2"]["w"].reshape(1, -1)
    r2b = lg_p["r2"]["b"].reshape(1, 1)
    cw = _bf16(lg_p["conv"]["w"]); cb = lg_p["conv"]["b"].reshape(1, -1)

    c0 = params["cls0"]["w"]                                   # (3H, H)
    c0wa = _bf16(c0[:H]); c0wb = _bf16(c0[H:2 * H]); c0wc = _bf16(c0[2 * H:])
    c0b = params["cls0"]["b"].reshape(1, -1)
    c1w = _bf16(params["cls1"]["w"]); c1b = params["cls1"]["b"].reshape(1, -1)
    c2w = _bf16(params["cls2"]["w"]); c2b = params["cls2"]["b"].reshape(1, -1)

    logits = pl.pallas_call(
        _final_kernel,
        out_shape=jax.ShapeDtypeStruct((B, 1, NCLASSES), jnp.float32),
        grid=(B,),
        in_specs=[
            _batch_spec((B, k, V, 10)),
            _batch_spec((B, k, V, H)),
            _batch_spec((B, 1, H)),
            _batch_spec((B, 1, H)),
            _const_spec((10, 10)), _const_spec((1, 10)),
            _const_spec((10, 10)), _const_spec((1, 10)),
            _const_spec((1, 10)), _const_spec((1, 1)),
            _const_spec((H, H)), _const_spec((1, H)),
            _const_spec((H, H)), _const_spec((H, H)), _const_spec((H, H)),
            _const_spec((1, H)),
            _const_spec((H, H)), _const_spec((1, H)),
            _const_spec((H, NCLASSES)), _const_spec((1, NCLASSES)),
        ],
        out_specs=pl.BlockSpec((1, 1, NCLASSES), lambda b: (b, 0, 0)),
        compiler_params=pltpu.CompilerParams(dimension_semantics=("parallel",)),
    )(vF, Fn, pooled1, pooled2, r0w, r0b, r1w, r1b, r2wT, r2b, cw, cb,
      c0wa, c0wb, c0wc, c0b, c1w, c1b, c2w, c2b)
    return logits.reshape(B, NCLASSES)


def _selector_head(p, x):
    M = x.shape[0]
    N = p["cls1"]["w"].shape[1]
    w0 = _bf16(p["cls0"]["w"]); b0 = p["cls0"]["b"].reshape(1, -1)
    w1 = _bf16(p["cls1"]["w"]); b1 = p["cls1"]["b"].reshape(1, -1)
    return pl.pallas_call(
        _selector_head_kernel,
        out_shape=jax.ShapeDtypeStruct((M, N), jnp.float32),
    )(x.astype(jnp.float32), w0, b0, w1, b1)


def _view_selector(p, F, vertices, k, s_views, hidden, const_geom=None):
    B = F.shape[0]
    if const_geom is not None:
        # Stage-1 geometry is a trace-time constant (vertex table is fixed).
        id_knn_np, v_np = const_geom
        F_knn = F[:, jnp.asarray(id_knn_np)]                          # (B,S,k,H)
        v = jnp.broadcast_to(jnp.asarray(v_np)[None], (B, s_views, k, 3))
    else:
        idx = _farthest_point_sample(vertices, s_views)               # (B, S)
        vertices1 = _index_points(vertices, idx)                      # (B, S, 3)
        id_knn = _knn(k, vertices, vertices1)                         # (B, S, k)
        F_knn = _index_points(F, id_knn)                              # (B, S, k, H)
        v = _index_points(vertices, id_knn)                           # (B, S, k, 3)
    F1 = jnp.transpose(F_knn, (0, 2, 1, 3)).reshape(B * k, s_views * hidden)
    h = _selector_head(p, F1)                                         # (B*k, 40*S)
    F_score = jnp.transpose(
        h.reshape(B, k, s_views, SCORE_CLASSES), (0, 2, 1, 3))        # (B,S,k,C)
    F1_ = jax.nn.softmax(F_score, axis=-3)
    F1_ = jnp.max(F1_, axis=-1)                                       # (B, S, k)
    F1_id = jnp.argmax(F1_, axis=-1)                                  # (B, S)
    onehot = jax.nn.one_hot(F1_id, k, dtype=jnp.float32)              # (B, S, k)
    F_new = jnp.sum(onehot[..., None] * F_knn, axis=-2)               # (B, S, H)
    vertices_new = jnp.sum(onehot[..., None] * v, axis=-2)            # (B, S, 3)
    return F_new, F_score, vertices_new


# ----------------------------------------------------------------- params --
def _linear_init(key, fan_in, fan_out):
    kw, kb = jax.random.split(key)
    wb = math.sqrt(6.0 / fan_in)                       # kaiming_uniform_ (a=0)
    w = jax.random.uniform(kw, (fan_in, fan_out), jnp.float32, -wb, wb)
    bb = 1.0 / math.sqrt(fan_in)
    b = jax.random.uniform(kb, (fan_out,), jnp.float32, -bb, bb)
    return {"w": w, "b": b}


def init_params(key):
    H = HIDDEN
    keys = iter(jax.random.split(key, 64))
    nxt = lambda: next(keys)

    def local_gcn_p():
        return {"r0": _linear_init(nxt(), 10, 10),
                "r1": _linear_init(nxt(), 10, 10),
                "r2": _linear_init(nxt(), 10, 1),
                "conv": _linear_init(nxt(), H, H)}

    def nonlocal_p():
        return {"rel0": _linear_init(nxt(), 2 * H, 2 * H),
                "rel1": _linear_init(nxt(), 2 * H, H),
                "fus": _linear_init(nxt(), 2 * H, H)}

    def selector_p(s):
        return {"cls0": _linear_init(nxt(), H * s, (H // 2) * s),
                "cls1": _linear_init(nxt(), (H // 2) * s, SCORE_CLASSES * s)}

    return {
        "lg1": local_gcn_p(), "nl1": nonlocal_p(), "vs1": selector_p(NUM_VIEWS // 2),
        "lg2": local_gcn_p(), "nl2": nonlocal_p(), "vs2": selector_p(NUM_VIEWS // 4),
        "lg3": local_gcn_p(),
        "cls0": _linear_init(nxt(), 3 * H, H),
        "cls1": _linear_init(nxt(), H, H),
        "cls2": _linear_init(nxt(), H, NCLASSES),
    }


# ---------------------------------------------------------------- forward --
def forward(params, x):
    H, V, k = HIDDEN, NUM_VIEWS, K_NEIGHBORS
    B = x.shape[0] // V
    y = x.reshape(B, V, H).astype(jnp.float32)

    # ---- stage 1 (constant geometry, fused LocalGCN1 + NonLocalMP1)
    vF1 = jnp.broadcast_to(jnp.asarray(_VF1)[None], (B, k, V, 10))
    Fn1 = jnp.transpose(y[:, jnp.asarray(_IDX1)], (0, 2, 1, 3))       # (B,k,V,H)
    y2, pooled1 = _stage(params["lg1"], params["nl1"], vF1, Fn1, V, H)

    z_in, f_score, vertices2 = _view_selector(
        params["vs1"], y2, None, k, V // 2, H, const_geom=(_IDKNN1, _VSEL1))

    # ---- stage 2 (dynamic geometry, fused LocalGCN2 + NonLocalMP2)
    vF2, Fn2 = _gcn_inputs(z_in, vertices2, k)
    z2, pooled2 = _stage(params["lg2"], params["nl2"], vF2, Fn2, V // 2, H)

    w_in, f_score2, vertices3 = _view_selector(
        params["vs2"], z2, vertices2, k, V // 4, H)

    # ---- stage 3 (fused LocalGCN3 + pooling + classifier head)
    vF3, Fn3 = _gcn_inputs(w_in, vertices3, k)
    logits = _final_stage(params, vF3, Fn3, pooled1, pooled2, V // 4, H)
    return logits, f_score, f_score2


# ------------------------------------------------------------------- main --
if __name__ == "__main__":
    key = jax.random.PRNGKey(0)
    pkey, xkey = jax.random.split(key)
    params = init_params(pkey)

    B = 2  # number of 3D objects; input is (B * num_views, hidden) view features
    x = jax.random.normal(xkey, (B * NUM_VIEWS, HIDDEN), dtype=jnp.float32)

    fwd = jax.jit(forward)
    logits, f_score, f_score2 = fwd(params, x)
    jax.block_until_ready((logits, f_score, f_score2))

    assert logits.shape == (B, NCLASSES)
    assert f_score.shape == (B, NUM_VIEWS // 2, K_NEIGHBORS, SCORE_CLASSES)
    assert f_score2.shape == (B, NUM_VIEWS // 4, K_NEIGHBORS, SCORE_CLASSES)
    assert bool(jnp.all(jnp.isfinite(logits)))
    print("KERNEL_OK")
</pallas_src>

<mosaic_0001>
module attributes {stable_mosaic.version = 11 : i64} {
  func.func @_stage_kernel(%arg0: i32, %arg1: memref<1x4x24x10xf32, #tpu.memory_space<vmem>>, %arg2: memref<1x4x24x32xf32, #tpu.memory_space<vmem>>, %arg3: memref<576x24xbf16, #tpu.memory_space<vmem>>, %arg4: memref<576x24xbf16, #tpu.memory_space<vmem>>, %arg5: memref<24x576xbf16, #tpu.memory_space<vmem>>, %arg6: memref<10x10xbf16, #tpu.memory_space<vmem>>, %arg7: memref<1x10xf32, #tpu.memory_space<vmem>>, %arg8: memref<10x10xbf16, #tpu.memory_space<vmem>>, %arg9: memref<1x10xf32, #tpu.memory_space<vmem>>, %arg10: memref<1x10xf32, #tpu.memory_space<vmem>>, %arg11: memref<1x1xf32, #tpu.memory_space<vmem>>, %arg12: memref<32x32xbf16, #tpu.memory_space<vmem>>, %arg13: memref<1x32xf32, #tpu.memory_space<vmem>>, %arg14: memref<32x64xbf16, #tpu.memory_space<vmem>>, %arg15: memref<32x64xbf16, #tpu.memory_space<vmem>>, %arg16: memref<1x64xf32, #tpu.memory_space<vmem>>, %arg17: memref<64x32xbf16, #tpu.memory_space<vmem>>, %arg18: memref<1x32xf32, #tpu.memory_space<vmem>>, %arg19: memref<32x32xbf16, #tpu.memory_space<vmem>>, %arg20: memref<32x32xbf16, #tpu.memory_space<vmem>>, %arg21: memref<1x32xf32, #tpu.memory_space<vmem>>, %arg22: memref<1x24x32xf32, #tpu.memory_space<vmem>>, %arg23: memref<1x1x32xf32, #tpu.memory_space<vmem>>) attributes {dimension_semantics = [#tpu.dimension_semantics<parallel>], iteration_bounds = array<i64: 2>, scalar_prefetch = 0 : i64, scratch_operands = 0 : i64, tpu.core_type = #tpu.core_type<tc>, window_params = [{transform_indices = @transform_0, window_bounds = array<i64: 1, 4, 24, 10>}, {transform_indices = @transform_1, window_bounds = array<i64: 1, 4, 24, 32>}, {pipeline_mode = #tpu.pipeline_mode<synchronous>, transform_indices = @transform_2, window_bounds = array<i64: 576, 24>}, {pipeline_mode = #tpu.pipeline_mode<synchronous>, transform_indices = @transform_3, window_bounds = array<i64: 576, 24>}, {pipeline_mode = #tpu.pipeline_mode<synchronous>, transform_indices = @transform_4, window_bounds = array<i64: 24, 576>}, {pipeline_mode = #tpu.pipeline_mode<synchronous>, transform_indices = @transform_5, window_bounds = array<i64: 10, 10>}, {pipeline_mode = #tpu.pipeline_mode<synchronous>, transform_indices = @transform_6, window_bounds = array<i64: 1, 10>}, {pipeline_mode = #tpu.pipeline_mode<synchronous>, transform_indices = @transform_7, window_bounds = array<i64: 10, 10>}, {pipeline_mode = #tpu.pipeline_mode<synchronous>, transform_indices = @transform_8, window_bounds = array<i64: 1, 10>}, {pipeline_mode = #tpu.pipeline_mode<synchronous>, transform_indices = @transform_9, window_bounds = array<i64: 1, 10>}, {pipeline_mode = #tpu.pipeline_mode<synchronous>, transform_indices = @transform_10, window_bounds = array<i64: 1, 1>}, {pipeline_mode = #tpu.pipeline_mode<synchronous>, transform_indices = @transform_11, window_bounds = array<i64: 32, 32>}, {pipeline_mode = #tpu.pipeline_mode<synchronous>, transform_indices = @transform_12, window_bounds = array<i64: 1, 32>}, {pipeline_mode = #tpu.pipeline_mode<synchronous>, transform_indices = @transform_13, window_bounds = array<i64: 32, 64>}, {pipeline_mode = #tpu.pipeline_mode<synchronous>, transform_indices = @transform_14, window_bounds = array<i64: 32, 64>}, {pipeline_mode = #tpu.pipeline_mode<synchronous>, transform_indices = @transform_15, window_bounds = array<i64: 1, 64>}, {pipeline_mode = #tpu.pipeline_mode<synchronous>, transform_indices = @transform_16, window_bounds = array<i64: 64, 32>}, {pipeline_mode = #tpu.pipeline_mode<synchronous>, transform_indices = @transform_17, window_bounds = array<i64: 1, 32>}, {pipeline_mode = #tpu.pipeline_mode<synchronous>, transform_indices = @transform_18, window_bounds = array<i64: 32, 32>}, {pipeline_mode = #tpu.pipeline_mode<synchronous>, transform_indices = @transform_19, window_bounds = array<i64: 32, 32>}, {pipeline_mode = #tpu.pipeline_mode<synchronous>, transform_indices = @transform_20, window_bounds = array<i64: 1, 32>}, {transform_indices = @transform_21, window_bounds = array<i64: 1, 24, 32>}, {transform_indices = @transform_22, window_bounds = array<i64: 1, 1, 32>}]} {
    %c0 = arith.constant 0 : index
    %c0_0 = arith.constant 0 : index
    %c0_1 = arith.constant 0 : index
    %c0_2 = arith.constant 0 : index
    %0 = vector.load %arg1[%c0, %c0_0, %c0_1, %c0_2] : memref<1x4x24x10xf32, #tpu.memory_space<vmem>>, vector<1x1x24x10xf32>
    %1 = vector.shape_cast %0 : vector<1x1x24x10xf32> to vector<24x10xf32>
    %2 = arith.truncf %1 : vector<24x10xf32> to vector<24x10xbf16>
    %c0_3 = arith.constant 0 : index
    %c0_4 = arith.constant 0 : index
    %3 = vector.load %arg6[%c0_3, %c0_4] : memref<10x10xbf16, #tpu.memory_space<vmem>>, vector<10x10xbf16>
    %cst = arith.constant dense<0.000000e+00> : vector<24x10xf32>
    %4 = tpu.matmul %2, %3, %cst {dimension_numbers = #tpu.dot_dimension_numbers<[1], [0], [0], [1], [0, 0, 1, 1], [], []>} : vector<24x10xbf16>, vector<10x10xbf16>, vector<24x10xf32> -> vector<24x10xf32>
    %c0_5 = arith.constant 0 : index
    %c0_6 = arith.constant 0 : index
    %5 = vector.load %arg7[%c0_5, %c0_6] : memref<1x10xf32, #tpu.memory_space<vmem>>, vector<1x10xf32>
    %6 = vector.broadcast %5 : vector<1x10xf32> to vector<24x10xf32>
    %7 = arith.addf %4, %6 : vector<24x10xf32>
    %cst_7 = arith.constant 0.000000e+00 : f32
    %8 = vector.broadcast %cst_7 : f32 to vector<24x10xf32>
    %9 = arith.maximumf %7, %8 : vector<24x10xf32>
    %10 = arith.truncf %9 : vector<24x10xf32> to vector<24x10xbf16>
    %c0_8 = arith.constant 0 : index
    %c0_9 = arith.constant 0 : index
    %11 = vector.load %arg8[%c0_8, %c0_9] : memref<10x10xbf16, #tpu.memory_space<vmem>>, vector<10x10xbf16>
    %cst_10 = arith.constant dense<0.000000e+00> : vector<24x10xf32>
    %12 = tpu.matmul %10, %11, %cst_10 {dimension_numbers = #tpu.dot_dimension_numbers<[1], [0], [0], [1], [0, 0, 1, 1], [], []>} : vector<24x10xbf16>, vector<10x10xbf16>, vector<24x10xf32> -> vector<24x10xf32>
    %c0_11 = arith.constant 0 : index
    %c0_12 = arith.constant 0 : index
    %13 = vector.load %arg9[%c0_11, %c0_12] : memref<1x10xf32, #tpu.memory_space<vmem>>, vector<1x10xf32>
    %14 = vector.broadcast %13 : vector<1x10xf32> to vector<24x10xf32>
    %15 = arith.addf %12, %14 : vector<24x10xf32>
    %cst_13 = arith.constant 0.000000e+00 : f32
    %16 = vector.broadcast %cst_13 : f32 to vector<24x10xf32>
    %17 = arith.maximumf %15, %16 : vector<24x10xf32>
    %c0_14 = arith.constant 0 : index
    %c0_15 = arith.constant 0 : index
    %18 = vector.load %arg10[%c0_14, %c0_15] : memref<1x10xf32, #tpu.memory_space<vmem>>, vector<1x10xf32>
    %19 = vector.broadcast %18 : vector<1x10xf32> to vector<24x10xf32>
    %20 = arith.mulf %17, %19 : vector<24x10xf32>
    %cst_16 = arith.constant dense<0.000000e+00> : vector<24xf32>
    %21 = vector.multi_reduction <add>, %20, %cst_16 [1] : vector<24x10xf32> to vector<24xf32>
    %22 = vector.shape_cast %21 : vector<24xf32> to vector<24x1xf32>
    %c0_17 = arith.constant 0 : index
    %c0_18 = arith.constant 0 : index
    %23 = vector.load %arg11[%c0_17, %c0_18] : memref<1x1xf32, #tpu.memory_space<vmem>>, vector<1x1xf32>
    %24 = vector.broadcast %23 : vector<1x1xf32> to vector<24x1xf32>
    %25 = arith.addf %22, %24 : vector<24x1xf32>
    %c0_19 = arith.constant 0 : index
    %c0_20 = arith.constant 0 : index
    %c0_21 = arith.constant 0 : index
    %c0_22 = arith.constant 0 : index
    %26 = vector.load %arg2[%c0_19, %c0_20, %c0_21, %c0_22] : memref<1x4x24x32xf32, #tpu.memory_space<vmem>>, vector<1x1x24x32xf32>
    %27 = vector.shape_cast %26 : vector<1x1x24x32xf32> to vector<24x32xf32>
    %28 = vector.broadcast %25 : vector<24x1xf32> to vector<24x32xf32>
    %29 = arith.mulf %28, %27 : vector<24x32xf32>
    %c0_23 = arith.constant 0 : index
    %c1 = arith.constant 1 : index
    %c0_24 = arith.constant 0 : index
    %c0_25 = arith.constant 0 : index
    %30 = vector.load %arg1[%c0_23, %c1, %c0_24, %c0_25] : memref<1x4x24x10xf32, #tpu.memory_space<vmem>>, vector<1x1x24x10xf32>
    %31 = vector.shape_cast %30 : vector<1x1x24x10xf32> to vector<24x10xf32>
    %32 = arith.truncf %31 : vector<24x10xf32> to vector<24x10xbf16>
    %c0_26 = arith.constant 0 : index
    %c0_27 = arith.constant 0 : index
    %33 = vector.load %arg6[%c0_26, %c0_27] : memref<10x10xbf16, #tpu.memory_space<vmem>>, vector<10x10xbf16>
    %cst_28 = arith.constant dense<0.000000e+00> : vector<24x10xf32>
    %34 = tpu.matmul %32, %33, %cst_28 {dimension_numbers = #tpu.dot_dimension_numbers<[1], [0], [0], [1], [0, 0, 1, 1], [], []>} : vector<24x10xbf16>, vector<10x10xbf16>, vector<24x10xf32> -> vector<24x10xf32>
    %c0_29 = arith.constant 0 : index
    %c0_30 = arith.constant 0 : index
    %35 = vector.load %arg7[%c0_29, %c0_30] : memref<1x10xf32, #tpu.memory_space<vmem>>, vector<1x10xf32>
    %36 = vector.broadcast %35 : vector<1x10xf32> to vector<24x10xf32>
    %37 = arith.addf %34, %36 : vector<24x10xf32>
    %cst_31 = arith.constant 0.000000e+00 : f32
    %38 = vector.broadcast %cst_31 : f32 to vector<24x10xf32>
    %39 = arith.maximumf %37, %38 : vector<24x10xf32>
    %40 = arith.truncf %39 : vector<24x10xf32> to vector<24x10xbf16>
    %c0_32 = arith.constant 0 : index
    %c0_33 = arith.constant 0 : index
    %41 = vector.load %arg8[%c0_32, %c0_33] : memref<10x10xbf16, #tpu.memory_space<vmem>>, vector<10x10xbf16>
    %cst_34 = arith.constant dense<0.000000e+00> : vector<24x10xf32>
    %42 = tpu.matmul %40, %41, %cst_34 {dimension_numbers = #tpu.dot_dimension_numbers<[1], [0], [0], [1], [0, 0, 1, 1], [], []>} : vector<24x10xbf16>, vector<10x10xbf16>, vector<24x10xf32> -> vector<24x10xf32>
    %c0_35 = arith.constant 0 : index
    %c0_36 = arith.constant 0 : index
    %43 = vector.load %arg9[%c0_35, %c0_36] : memref<1x10xf32, #tpu.memory_space<vmem>>, vector<1x10xf32>
    %44 = vector.broadcast %43 : vector<1x10xf32> to vector<24x10xf32>
    %45 = arith.addf %42, %44 : vector<24x10xf32>
    %cst_37 = arith.constant 0.000000e+00 : f32
    %46 = vector.broadcast %cst_37 : f32 to vector<24x10xf32>
    %47 = arith.maximumf %45, %46 : vector<24x10xf32>
    %c0_38 = arith.constant 0 : index
    %c0_39 = arith.constant 0 : index
    %48 = vector.load %arg10[%c0_38, %c0_39] : memref<1x10xf32, #tpu.memory_space<vmem>>, vector<1x10xf32>
    %49 = vector.broadcast %48 : vector<1x10xf32> to vector<24x10xf32>
    %50 = arith.mulf %47, %49 : vector<24x10xf32>
    %cst_40 = arith.constant dense<0.000000e+00> : vector<24xf32>
    %51 = vector.multi_reduction <add>, %50, %cst_40 [1] : vector<24x10xf32> to vector<24xf32>
    %52 = vector.shape_cast %51 : vector<24xf32> to vector<24x1xf32>
    %c0_41 = arith.constant 0 : index
    %c0_42 = arith.constant 0 : index
    %53 = vector.load %arg11[%c0_41, %c0_42] : memref<1x1xf32, #tpu.memory_space<vmem>>, vector<1x1xf32>
    %54 = vector.broadcast %53 : vector<1x1xf32> to vector<24x1xf32>
    %55 = arith.addf %52, %54 : vector<24x1xf32>
    %c0_43 = arith.constant 0 : index
    %c1_44 = arith.constant 1 : index
    %c0_45 = arith.constant 0 : index
    %c0_46 = arith.constant 0 : index
    %56 = vector.load %arg2[%c0_43, %c1_44, %c0_45, %c0_46] : memref<1x4x24x32xf32, #tpu.memory_space<vmem>>, vector<1x1x24x32xf32>
    %57 = vector.shape_cast %56 : vector<1x1x24x32xf32> to vector<24x32xf32>
    %58 = vector.broadcast %55 : vector<24x1xf32> to vector<24x32xf32>
    %59 = arith.mulf %58, %57 : vector<24x32xf32>
    %60 = arith.addf %29, %59 : vector<24x32xf32>
    %c0_47 = arith.constant 0 : index
    %c2 = arith.constant 2 : index
    %c0_48 = arith.constant 0 : index
    %c0_49 = arith.constant 0 : index
    %61 = vector.load %arg1[%c0_47, %c2, %c0_48, %c0_49] : memref<1x4x24x10xf32, #tpu.memory_space<vmem>>, vector<1x1x24x10xf32>
    %62 = vector.shape_cast %61 : vector<1x1x24x10xf32> to vector<24x10xf32>
    %63 = arith.truncf %62 : vector<24x10xf32> to vector<24x10xbf16>
    %c0_50 = arith.constant 0 : index
    %c0_51 = arith.constant 0 : index
    %64 = vector.load %arg6[%c0_50, %c0_51] : memref<10x10xbf16, #tpu.memory_space<vmem>>, vector<10x10xbf16>
    %cst_52 = arith.constant dense<0.000000e+00> : vector<24x10xf32>
    %65 = tpu.matmul %63, %64, %cst_52 {dimension_numbers = #tpu.dot_dimension_numbers<[1], [0], [0], [1], [0, 0, 1, 1], [], []>} : vector<24x10xbf16>, vector<10x10xbf16>, vector<24x10xf32> -> vector<24x10xf32>
    %c0_53 = arith.constant 0 : index
    %c0_54 = arith.constant 0 : index
    %66 = vector.load %arg7[%c0_53, %c0_54] : memref<1x10xf32, #tpu.memory_space<vmem>>, vector<1x10xf32>
    %67 = vector.broadcast %66 : vector<1x10xf32> to vector<24x10xf32>
    %68 = arith.addf %65, %67 : vector<24x10xf32>
    %cst_55 = arith.constant 0.000000e+00 : f32
    %69 = vector.broadcast %cst_55 : f32 to vector<24x10xf32>
    %70 = arith.maximumf %68, %69 : vector<24x10xf32>
    %71 = arith.truncf %70 : vector<24x10xf32> to vector<24x10xbf16>
    %c0_56 = arith.constant 0 : index
    %c0_57 = arith.constant 0 : index
    %72 = vector.load %arg8[%c0_56, %c0_57] : memref<10x10xbf16, #tpu.memory_space<vmem>>, vector<10x10xbf16>
    %cst_58 = arith.constant dense<0.000000e+00> : vector<24x10xf32>
    %73 = tpu.matmul %71, %72, %cst_58 {dimension_numbers = #tpu.dot_dimension_numbers<[1], [0], [0], [1], [0, 0, 1, 1], [], []>} : vector<24x10xbf16>, vector<10x10xbf16>, vector<24x10xf32> -> vector<24x10xf32>
    %c0_59 = arith.constant 0 : index
    %c0_60 = arith.constant 0 : index
    %74 = vector.load %arg9[%c0_59, %c0_60] : memref<1x10xf32, #tpu.memory_space<vmem>>, vector<1x10xf32>
    %75 = vector.broadcast %74 : vector<1x10xf32> to vector<24x10xf32>
    %76 = arith.addf %73, %75 : vector<24x10xf32>
    %cst_61 = arith.constant 0.000000e+00 : f32
    %77 = vector.broadcast %cst_61 : f32 to vector<24x10xf32>
    %78 = arith.maximumf %76, %77 : vector<24x10xf32>
    %c0_62 = arith.constant 0 : index
    %c0_63 = arith.constant 0 : index
    %79 = vector.load %arg10[%c0_62, %c0_63] : memref<1x10xf32, #tpu.memory_space<vmem>>, vector<1x10xf32>
    %80 = vector.broadcast %79 : vector<1x10xf32> to vector<24x10xf32>
    %81 = arith.mulf %78, %80 : vector<24x10xf32>
    %cst_64 = arith.constant dense<0.000000e+00> : vector<24xf32>
    %82 = vector.multi_reduction <add>, %81, %cst_64 [1] : vector<24x10xf32> to vector<24xf32>
    %83 = vector.shape_cast %82 : vector<24xf32> to vector<24x1xf32>
    %c0_65 = arith.constant 0 : index
    %c0_66 = arith.constant 0 : index
    %84 = vector.load %arg11[%c0_65, %c0_66] : memref<1x1xf32, #tpu.memory_space<vmem>>, vector<1x1xf32>
    %85 = vector.broadcast %84 : vector<1x1xf32> to vector<24x1xf32>
    %86 = arith.addf %83, %85 : vector<24x1xf32>
    %c0_67 = arith.constant 0 : index
    %c2_68 = arith.constant 2 : index
    %c0_69 = arith.constant 0 : index
    %c0_70 = arith.constant 0 : index
    %87 = vector.load %arg2[%c0_67, %c2_68, %c0_69, %c0_70] : memref<1x4x24x32xf32, #tpu.memory_space<vmem>>, vector<1x1x24x32xf32>
    %88 = vector.shape_cast %87 : vector<1x1x24x32xf32> to vector<24x32xf32>
    %89 = vector.broadcast %86 : vector<24x1xf32> to vector<24x32xf32>
    %90 = arith.mulf %89, %88 : vector<24x32xf32>
    %91 = arith.addf %60, %90 : vector<24x32xf32>
    %c0_71 = arith.constant 0 : index
    %c3 = arith.constant 3 : index
    %c0_72 = arith.constant 0 : index
    %c0_73 = arith.constant 0 : index
    %92 = vector.load %arg1[%c0_71, %c3, %c0_72, %c0_73] : memref<1x4x24x10xf32, #tpu.memory_space<vmem>>, vector<1x1x24x10xf32>
    %93 = vector.shape_cast %92 : vector<1x1x24x10xf32> to vector<24x10xf32>
    %94 = arith.truncf %93 : vector<24x10xf32> to vector<24x10xbf16>
    %c0_74 = arith.constant 0 : index
    %c0_75 = arith.constant 0 : index
    %95 = vector.load %arg6[%c0_74, %c0_75] : memref<10x10xbf16, #tpu.memory_space<vmem>>, vector<10x10xbf16>
    %cst_76 = arith.constant dense<0.000000e+00> : vector<24x10xf32>
    %96 = tpu.matmul %94, %95, %cst_76 {dimension_numbers = #tpu.dot_dimension_numbers<[1], [0], [0], [1], [0, 0, 1, 1], [], []>} : vector<24x10xbf16>, vector<10x10xbf16>, vector<24x10xf32> -> vector<24x10xf32>
    %c0_77 = arith.constant 0 : index
    %c0_78 = arith.constant 0 : index
    %97 = vector.load %arg7[%c0_77, %c0_78] : memref<1x10xf32, #tpu.memory_space<vmem>>, vector<1x10xf32>
    %98 = vector.broadcast %97 : vector<1x10xf32> to vector<24x10xf32>
    %99 = arith.addf %96, %98 : vector<24x10xf32>
    %cst_79 = arith.constant 0.000000e+00 : f32
    %100 = vector.broadcast %cst_79 : f32 to vector<24x10xf32>
    %101 = arith.maximumf %99, %100 : vector<24x10xf32>
    %102 = arith.truncf %101 : vector<24x10xf32> to vector<24x10xbf16>
    %c0_80 = arith.constant 0 : index
    %c0_81 = arith.constant 0 : index
    %103 = vector.load %arg8[%c0_80, %c0_81] : memref<10x10xbf16, #tpu.memory_space<vmem>>, vector<10x10xbf16>
    %cst_82 = arith.constant dense<0.000000e+00> : vector<24x10xf32>
    %104 = tpu.matmul %102, %103, %cst_82 {dimension_numbers = #tpu.dot_dimension_numbers<[1], [0], [0], [1], [0, 0, 1, 1], [], []>} : vector<24x10xbf16>, vector<10x10xbf16>, vector<24x10xf32> -> vector<24x10xf32>
    %c0_83 = arith.constant 0 : index
    %c0_84 = arith.constant 0 : index
    %105 = vector.load %arg9[%c0_83, %c0_84] : memref<1x10xf32, #tpu.memory_space<vmem>>, vector<1x10xf32>
    %106 = vector.broadcast %105 : vector<1x10xf32> to vector<24x10xf32>
    %107 = arith.addf %104, %106 : vector<24x10xf32>
    %cst_85 = arith.constant 0.000000e+00 : f32
    %108 = vector.broadcast %cst_85 : f32 to vector<24x10xf32>
    %109 = arith.maximumf %107, %108 : vector<24x10xf32>
    %c0_86 = arith.constant 0 : index
    %c0_87 = arith.constant 0 : index
    %110 = vector.load %arg10[%c0_86, %c0_87] : memref<1x10xf32, #tpu.memory_space<vmem>>, vector<1x10xf32>
    %111 = vector.broadcast %110 : vector<1x10xf32> to vector<24x10xf32>
    %112 = arith.mulf %109, %111 : vector<24x10xf32>
    %cst_88 = arith.constant dense<0.000000e+00> : vector<24xf32>
    %113 = vector.multi_reduction <add>, %112, %cst_88 [1] : vector<24x10xf32> to vector<24xf32>
    %114 = vector.shape_cast %113 : vector<24xf32> to vector<24x1xf32>
    %c0_89 = arith.constant 0 : index
    %c0_90 = arith.constant 0 : index
    %115 = vector.load %arg11[%c0_89, %c0_90] : memref<1x1xf32, #tpu.memory_space<vmem>>, vector<1x1xf32>
    %116 = vector.broadcast %115 : vector<1x1xf32> to vector<24x1xf32>
    %117 = arith.addf %114, %116 : vector<24x1xf32>
    %c0_91 = arith.constant 0 : index
    %c3_92 = arith.constant 3 : index
    %c0_93 = arith.constant 0 : index
    %c0_94 = arith.constant 0 : index
    %118 = vector.load %arg2[%c0_91, %c3_92, %c0_93, %c0_94] : memref<1x4x24x32xf32, #tpu.memory_space<vmem>>, vector<1x1x24x32xf32>
    %119 = vector.shape_cast %118 : vector<1x1x24x32xf32> to vector<24x32xf32>
    %120 = vector.broadcast %117 : vector<24x1xf32> to vector<24x32xf32>
    %121 = arith.mulf %120, %119 : vector<24x32xf32>
    %122 = arith.addf %91, %121 : vector<24x32xf32>
    %123 = arith.truncf %122 : vector<24x32xf32> to vector<24x32xbf16>
    %c0_95 = arith.constant 0 : index
    %c0_96 = arith.constant 0 : index
    %124 = vector.load %arg12[%c0_95, %c0_96] : memref<32x32xbf16, #tpu.memory_space<vmem>>, vector<32x32xbf16>
    %cst_97 = arith.constant dense<0.000000e+00> : vector<24x32xf32>
    %125 = tpu.matmul %123, %124, %cst_97 {dimension_numbers = #tpu.dot_dimension_numbers<[1], [0], [0], [1], [0, 0, 1, 1], [], []>} : vector<24x32xbf16>, vector<32x32xbf16>, vector<24x32xf32> -> vector<24x32xf32>
    %c0_98 = arith.constant 0 : index
    %c0_99 = arith.constant 0 : index
    %126 = vector.load %arg13[%c0_98, %c0_99] : memref<1x32xf32, #tpu.memory_space<vmem>>, vector<1x32xf32>
    %127 = vector.broadcast %126 : vector<1x32xf32> to vector<24x32xf32>
    %128 = arith.addf %125, %127 : vector<24x32xf32>
    %cst_100 = arith.constant 0.000000e+00 : f32
    %129 = vector.broadcast %cst_100 : f32 to vector<24x32xf32>
    %130 = arith.cmpf oge, %128, %129 : vector<24x32xf32>
    %cst_101 = arith.constant 2.000000e-01 : f32
    %131 = vector.broadcast %cst_101 : f32 to vector<24x32xf32>
    %132 = arith.mulf %131, %128 : vector<24x32xf32>
    %133 = arith.select %130, %128, %132 : vector<24x32xi1>, vector<24x32xf32>
    %cst_102 = arith.constant dense<0xFF800000> : vector<32xf32>
    %134 = vector.multi_reduction <maximumf>, %133, %cst_102 [0] : vector<24x32xf32> to vector<32xf32>
    %135 = vector.shape_cast %134 : vector<32xf32> to vector<1x32xf32>
    %c0_103 = arith.constant 0 : index
    %c0_104 = arith.constant 0 : index
    %c0_105 = arith.constant 0 : index
    %136 = vector.load %arg23[%c0_103, %c0_104, %c0_105] : memref<1x1x32xf32, #tpu.memory_space<vmem>>, vector<1x1x32xf32>
    %137 = vector.shape_cast %136 : vector<1x1x32xf32> to vector<1x32xf32>
    %138 = vector.shape_cast %135 : vector<1x32xf32> to vector<1x1x32xf32>
    tpu.vector_store %arg23[%c0_103, %c0_104, %c0_105], %138 {strides = array<i32>} : memref<1x1x32xf32, #tpu.memory_space<vmem>>, vector<1x1x32xf32>,
    %139 = arith.truncf %133 : vector<24x32xf32> to vector<24x32xbf16>
    %c0_106 = arith.constant 0 : index
    %c0_107 = arith.constant 0 : index
    %140 = vector.load %arg14[%c0_106, %c0_107] : memref<32x64xbf16, #tpu.memory_space<vmem>>, vector<32x64xbf16>
    %cst_108 = arith.constant dense<0.000000e+00> : vector<24x64xf32>
    %141 = tpu.matmul %139, %140, %cst_108 {dimension_numbers = #tpu.dot_dimension_numbers<[1], [0], [0], [1], [0, 0, 1, 1], [], []>} : vector<24x32xbf16>, vector<32x64xbf16>, vector<24x64xf32> -> vector<24x64xf32>
    %c0_109 = arith.constant 0 : index
    %c0_110 = arith.constant 0 : index
    %142 = vector.load %arg15[%c0_109, %c0_110] : memref<32x64xbf16, #tpu.memory_space<vmem>>, vector<32x64xbf16>
    %cst_111 = arith.constant dense<0.000000e+00> : vector<24x64xf32>
    %143 = tpu.matmul %139, %142, %cst_111 {dimension_numbers = #tpu.dot_dimension_numbers<[1], [0], [0], [1], [0, 0, 1, 1], [], []>} : vector<24x32xbf16>, vector<32x64xbf16>, vector<24x64xf32> -> vector<24x64xf32>
    %c0_112 = arith.constant 0 : index
    %c0_113 = arith.constant 0 : index
    %144 = vector.load %arg3[%c0_112, %c0_113] : memref<576x24xbf16, #tpu.memory_space<vmem>>, vector<576x24xbf16>
    %145 = arith.truncf %141 : vector<24x64xf32> to vector<24x64xbf16>
    %cst_114 = arith.constant dense<0.000000e+00> : vector<576x64xf32>
    %146 = tpu.matmul %144, %145, %cst_114 {dimension_numbers = #tpu.dot_dimension_numbers<[1], [0], [0], [1], [0, 0, 1, 1], [], []>} : vector<576x24xbf16>, vector<24x64xbf16>, vector<576x64xf32> -> vector<576x64xf32>
    %c0_115 = arith.constant 0 : index
    %c0_116 = arith.constant 0 : index
    %147 = vector.load %arg4[%c0_115, %c0_116] : memref<576x24xbf16, #tpu.memory_space<vmem>>, vector<576x24xbf16>
    %148 = arith.truncf %143 : vector<24x64xf32> to vector<24x64xbf16>
    %cst_117 = arith.constant dense<0.000000e+00> : vector<576x64xf32>
    %149 = tpu.matmul %147, %148, %cst_117 {dimension_numbers = #tpu.dot_dimension_numbers<[1], [0], [0], [1], [0, 0, 1, 1], [], []>} : vector<576x24xbf16>, vector<24x64xbf16>, vector<576x64xf32> -> vector<576x64xf32>
    %150 = arith.addf %146, %149 : vector<576x64xf32>
    %c0_118 = arith.constant 0 : index
    %c0_119 = arith.constant 0 : index
    %151 = vector.load %arg16[%c0_118, %c0_119] : memref<1x64xf32, #tpu.memory_space<vmem>>, vector<1x64xf32>
    %152 = vector.broadcast %151 : vector<1x64xf32> to vector<576x64xf32>
    %153 = arith.addf %150, %152 : vector<576x64xf32>
    %cst_120 = arith.constant 0.000000e+00 : f32
    %154 = vector.broadcast %cst_120 : f32 to vector<576x64xf32>
    %155 = arith.maximumf %153, %154 : vector<576x64xf32>
    %156 = arith.truncf %155 : vector<576x64xf32> to vector<576x64xbf16>
    %c0_121 = arith.constant 0 : index
    %c0_122 = arith.constant 0 : index
    %157 = vector.load %arg17[%c0_121, %c0_122] : memref<64x32xbf16, #tpu.memory_space<vmem>>, vector<64x32xbf16>
    %cst_123 = arith.constant dense<0.000000e+00> : vector<576x32xf32>
    %158 = tpu.matmul %156, %157, %cst_123 {dimension_numbers = #tpu.dot_dimension_numbers<[1], [0], [0], [1], [0, 0, 1, 1], [], []>} : vector<576x64xbf16>, vector<64x32xbf16>, vector<576x32xf32> -> vector<576x32xf32>
    %c0_124 = arith.constant 0 : index
    %c0_125 = arith.constant 0 : index
    %159 = vector.load %arg18[%c0_124, %c0_125] : memref<1x32xf32, #tpu.memory_space<vmem>>, vector<1x32xf32>
    %160 = vector.broadcast %159 : vector<1x32xf32> to vector<576x32xf32>
    %161 = arith.addf %158, %160 : vector<576x32xf32>
    %cst_126 = arith.constant 0.000000e+00 : f32
    %162 = vector.broadcast %cst_126 : f32 to vector<576x32xf32>
    %163 = arith.maximumf %161, %162 : vector<576x32xf32>
    %c0_127 = arith.constant 0 : index
    %c0_128 = arith.constant 0 : index
    %164 = vector.load %arg5[%c0_127, %c0_128] : memref<24x576xbf16, #tpu.memory_space<vmem>>, vector<24x576xbf16>
    %165 = arith.truncf %163 : vector<576x32xf32> to vector<576x32xbf16>
    %cst_129 = arith.constant dense<0.000000e+00> : vector<24x32xf32>
    %166 = tpu.matmul %164, %165, %cst_129 {dimension_numbers = #tpu.dot_dimension_numbers<[1], [0], [0], [1], [0, 0, 1, 1], [], []>} : vector<24x576xbf16>, vector<576x32xbf16>, vector<24x32xf32> -> vector<24x32xf32>
    %c0_130 = arith.constant 0 : index
    %c0_131 = arith.constant 0 : index
    %167 = vector.load %arg19[%c0_130, %c0_131] : memref<32x32xbf16, #tpu.memory_space<vmem>>, vector<32x32xbf16>
    %cst_132 = arith.constant dense<0.000000e+00> : vector<24x32xf32>
    %168 = tpu.matmul %139, %167, %cst_132 {dimension_numbers = #tpu.dot_dimension_numbers<[1], [0], [0], [1], [0, 0, 1, 1], [], []>} : vector<24x32xbf16>, vector<32x32xbf16>, vector<24x32xf32> -> vector<24x32xf32>
    %169 = arith.truncf %166 : vector<24x32xf32> to vector<24x32xbf16>
    %c0_133 = arith.constant 0 : index
    %c0_134 = arith.constant 0 : index
    %170 = vector.load %arg20[%c0_133, %c0_134] : memref<32x32xbf16, #tpu.memory_space<vmem>>, vector<32x32xbf16>
    %cst_135 = arith.constant dense<0.000000e+00> : vector<24x32xf32>
    %171 = tpu.matmul %169, %170, %cst_135 {dimension_numbers = #tpu.dot_dimension_numbers<[1], [0], [0], [1], [0, 0, 1, 1], [], []>} : vector<24x32xbf16>, vector<32x32xbf16>, vector<24x32xf32> -> vector<24x32xf32>
    %172 = arith.addf %168, %171 : vector<24x32xf32>
    %c0_136 = arith.constant 0 : index
    %c0_137 = arith.constant 0 : index
    %173 = vector.load %arg21[%c0_136, %c0_137] : memref<1x32xf32, #tpu.memory_space<vmem>>, vector<1x32xf32>
    %174 = vector.broadcast %173 : vector<1x32xf32> to vector<24x32xf32>
    %175 = arith.addf %172, %174 : vector<24x32xf32>
    %cst_138 = arith.constant 0.000000e+00 : f32
    %176 = vector.broadcast %cst_138 : f32 to vector<24x32xf32>
    %177 = arith.maximumf %175, %176 : vector<24x32xf32>
    %c0_139 = arith.constant 0 : index
    %c0_140 = arith.constant 0 : index
    %c0_141 = arith.constant 0 : index
    %178 = vector.load %arg22[%c0_139, %c0_140, %c0_141] : memref<1x24x32xf32, #tpu.memory_space<vmem>>, vector<1x24x32xf32>
    %179 = vector.shape_cast %178 : vector<1x24x32xf32> to vector<24x32xf32>
    %180 = vector.shape_cast %177 : vector<24x32xf32> to vector<1x24x32xf32>
    tpu.vector_store %arg22[%c0_139, %c0_140, %c0_141], %180 {strides = array<i32>} : memref<1x24x32xf32, #tpu.memory_space<vmem>>, vector<1x24x32xf32>,
    return
  }
  func.func @transform_0(%arg0: i32) -> (i32, i32, i32, i32) {
    %c0_i32 = arith.constant 0 : i32
    %c0_i32_0 = arith.constant 0 : i32
    %c0_i32_1 = arith.constant 0 : i32
    %c0_i32_2 = arith.constant 0 : i32
    return %arg0, %c0_i32, %c0_i32_0, %c0_i32_1 : i32, i32, i32, i32
  }
  func.func @transform_1(%arg0: i32) -> (i32, i32, i32, i32) {
    %c0_i32 = arith.constant 0 : i32
    %c0_i32_0 = arith.constant 0 : i32
    %c0_i32_1 = arith.constant 0 : i32
    %c0_i32_2 = arith.constant 0 : i32
    return %arg0, %c0_i32, %c0_i32_0, %c0_i32_1 : i32, i32, i32, i32
  }
  func.func @transform_2(%arg0: i32) -> (i32, i32) {
    %c0_i32 = arith.constant 0 : i32
    %c0_i32_0 = arith.constant 0 : i32
    %c0_i32_1 = arith.constant 0 : i32
    return %c0_i32, %c0_i32_0 : i32, i32
  }
  func.func @transform_3(%arg0: i32) -> (i32, i32) {
    %c0_i32 = arith.constant 0 : i32
    %c0_i32_0 = arith.constant 0 : i32
    %c0_i32_1 = arith.constant 0 : i32
    return %c0_i32, %c0_i32_0 : i32, i32
  }
  func.func @transform_4(%arg0: i32) -> (i32, i32) {
    %c0_i32 = arith.constant 0 : i32
    %c0_i32_0 = arith.constant 0 : i32
    %c0_i32_1 = arith.constant 0 : i32
    return %c0_i32, %c0_i32_0 : i32, i32
  }
  func.func @transform_5(%arg0: i32) -> (i32, i32) {
    %c0_i32 = arith.constant 0 : i32
    %c0_i32_0 = arith.constant 0 : i32
    %c0_i32_1 = arith.constant 0 : i32
    return %c0_i32, %c0_i32_0 : i32, i32
  }
  func.func @transform_6(%arg0: i32) -> (i32, i32) {
    %c0_i32 = arith.constant 0 : i32
    %c0_i32_0 = arith.constant 0 : i32
    %c0_i32_1 = arith.constant 0 : i32
    return %c0_i32, %c0_i32_0 : i32, i32
  }
  func.func @transform_7(%arg0: i32) -> (i32, i32) {
    %c0_i32 = arith.constant 0 : i32
    %c0_i32_0 = arith.constant 0 : i32
    %c0_i32_1 = arith.constant 0 : i32
    return %c0_i32, %c0_i32_0 : i32, i32
  }
  func.func @transform_8(%arg0: i32) -> (i32, i32) {
    %c0_i32 = arith.constant 0 : i32
    %c0_i32_0 = arith.constant 0 : i32
    %c0_i32_1 = arith.constant 0 : i32
    return %c0_i32, %c0_i32_0 : i32, i32
  }
  func.func @transform_9(%arg0: i32) -> (i32, i32) {
    %c0_i32 = arith.constant 0 : i32
    %c0_i32_0 = arith.constant 0 : i32
    %c0_i32_1 = arith.constant 0 : i32
    return %c0_i32, %c0_i32_0 : i32, i32
  }
  func.func @transform_10(%arg0: i32) -> (i32, i32) {
    %c0_i32 = arith.constant 0 : i32
    %c0_i32_0 = arith.constant 0 : i32
    %c0_i32_1 = arith.constant 0 : i32
    return %c0_i32, %c0_i32_0 : i32, i32
  }
  func.func @transform_11(%arg0: i32) -> (i32, i32) {
    %c0_i32 = arith.constant 0 : i32
    %c0_i32_0 = arith.constant 0 : i32
    %c0_i32_1 = arith.constant 0 : i32
    return %c0_i32, %c0_i32_0 : i32, i32
  }
  func.func @transform_12(%arg0: i32) -> (i32, i32) {
    %c0_i32 = arith.constant 0 : i32
    %c0_i32_0 = arith.constant 0 : i32
    %c0_i32_1 = arith.constant 0 : i32
    return %c0_i32, %c0_i32_0 : i32, i32
  }
  func.func @transform_13(%arg0: i32) -> (i32, i32) {
    %c0_i32 = arith.constant 0 : i32
    %c0_i32_0 = arith.constant 0 : i32
    %c0_i32_1 = arith.constant 0 : i32
    return %c0_i32, %c0_i32_0 : i32, i32
  }
  func.func @transform_14(%arg0: i32) -> (i32, i32) {
    %c0_i32 = arith.constant 0 : i32
    %c0_i32_0 = arith.constant 0 : i32
    %c0_i32_1 = arith.constant 0 : i32
    return %c0_i32, %c0_i32_0 : i32, i32
  }
  func.func @transform_15(%arg0: i32) -> (i32, i32) {
    %c0_i32 = arith.constant 0 : i32
    %c0_i32_0 = arith.constant 0 : i32
    %c0_i32_1 = arith.constant 0 : i32
    return %c0_i32, %c0_i32_0 : i32, i32
  }
  func.func @transform_16(%arg0: i32) -> (i32, i32) {
    %c0_i32 = arith.constant 0 : i32
    %c0_i32_0 = arith.constant 0 : i32
    %c0_i32_1 = arith.constant 0 : i32
    return %c0_i32, %c0_i32_0 : i32, i32
  }
  func.func @transform_17(%arg0: i32) -> (i32, i32) {
    %c0_i32 = arith.constant 0 : i32
    %c0_i32_0 = arith.constant 0 : i32
    %c0_i32_1 = arith.constant 0 : i32
    return %c0_i32, %c0_i32_0 : i32, i32
  }
  func.func @transform_18(%arg0: i32) -> (i32, i32) {
    %c0_i32 = arith.constant 0 : i32
    %c0_i32_0 = arith.constant 0 : i32
    %c0_i32_1 = arith.constant 0 : i32
    return %c0_i32, %c0_i32_0 : i32, i32
  }
  func.func @transform_19(%arg0: i32) -> (i32, i32) {
    %c0_i32 = arith.constant 0 : i32
    %c0_i32_0 = arith.constant 0 : i32
    %c0_i32_1 = arith.constant 0 : i32
    return %c0_i32, %c0_i32_0 : i32, i32
  }
  func.func @transform_20(%arg0: i32) -> (i32, i32) {
    %c0_i32 = arith.constant 0 : i32
    %c0_i32_0 = arith.constant 0 : i32
    %c0_i32_1 = arith.constant 0 : i32
    return %c0_i32, %c0_i32_0 : i32, i32
  }
  func.func @transform_21(%arg0: i32) -> (i32, i32, i32) {
    %c0_i32 = arith.constant 0 : i32
    %c0_i32_0 = arith.constant 0 : i32
    %c0_i32_1 = arith.constant 0 : i32
    return %arg0, %c0_i32, %c0_i32_0 : i32, i32, i32
  }
  func.func @transform_22(%arg0: i32) -> (i32, i32, i32) {
    %c0_i32 = arith.constant 0 : i32
    %c0_i32_0 = arith.constant 0 : i32
    %c0_i32_1 = arith.constant 0 : i32
    return %arg0, %c0_i32, %c0_i32_0 : i32, i32, i32
  }
}

module attributes {stable_mosaic.version = 11 : i64} {
  func.func @_selector_head_kernel(%arg0: memref<8x384xf32, #tpu.memory_space<vmem>>, %arg1: memref<384x192xbf16, #tpu.memory_space<vmem>>, %arg2: memref<1x192xf32, #tpu.memory_space<vmem>>, %arg3: memref<192x480xbf16, #tpu.memory_space<vmem>>, %arg4: memref<1x480xf32, #tpu.memory_space<vmem>>, %arg5: memref<8x480xf32, #tpu.memory_space<vmem>>) attributes {dimension_semantics = [], scalar_prefetch = 0 : i64, scratch_operands = 0 : i64, tpu.core_type = #tpu.core_type<tc>} {
    %c0 = arith.constant 0 : index
    %c0_0 = arith.constant 0 : index
    %0 = vector.load %arg0[%c0, %c0_0] : memref<8x384xf32, #tpu.memory_space<vmem>>, vector<8x384xf32>
    %1 = arith.truncf %0 : vector<8x384xf32> to vector<8x384xbf16>
    %c0_1 = arith.constant 0 : index
    %c0_2 = arith.constant 0 : index
    %2 = vector.load %arg1[%c0_1, %c0_2] : memref<384x192xbf16, #tpu.memory_space<vmem>>, vector<384x192xbf16>
    %cst = arith.constant dense<0.000000e+00> : vector<8x192xf32>
    %3 = tpu.matmul %1, %2, %cst {dimension_numbers = #tpu.dot_dimension_numbers<[1], [0], [0], [1], [0, 0, 1, 1], [], []>} : vector<8x384xbf16>, vector<384x192xbf16>, vector<8x192xf32> -> vector<8x192xf32>
    %c0_3 = arith.constant 0 : index
    %c0_4 = arith.constant 0 : index
    %4 = vector.load %arg2[%c0_3, %c0_4] : memref<1x192xf32, #tpu.memory_space<vmem>>, vector<1x192xf32>
    %5 = vector.broadcast %4 : vector<1x192xf32> to vector<8x192xf32>
    %6 = arith.addf %3, %5 : vector<8x192xf32>
    %cst_5 = arith.constant 0.000000e+00 : f32
    %7 = vector.broadcast %cst_5 : f32 to vector<8x192xf32>
    %8 = arith.cmpf oge, %6, %7 : vector<8x192xf32>
    %cst_6 = arith.constant 2.000000e-01 : f32
    %9 = vector.broadcast %cst_6 : f32 to vector<8x192xf32>
    %10 = arith.mulf %9, %6 : vector<8x192xf32>
    %11 = arith.select %8, %6, %10 : vector<8x192xi1>, vector<8x192xf32>
    %12 = arith.truncf %11 : vector<8x192xf32> to vector<8x192xbf16>
    %c0_7 = arith.constant 0 : index
    %c0_8 = arith.constant 0 : index
    %13 = vector.load %arg3[%c0_7, %c0_8] : memref<192x480xbf16, #tpu.memory_space<vmem>>, vector<192x480xbf16>
    %cst_9 = arith.constant dense<0.000000e+00> : vector<8x480xf32>
    %14 = tpu.matmul %12, %13, %cst_9 {dimension_numbers = #tpu.dot_dimension_numbers<[1], [0], [0], [1], [0, 0, 1, 1], [], []>} : vector<8x192xbf16>, vector<192x480xbf16>, vector<8x480xf32> -> vector<8x480xf32>
    %c0_10 = arith.constant 0 : index
    %c0_11 = arith.constant 0 : index
    %15 = vector.load %arg4[%c0_10, %c0_11] : memref<1x480xf32, #tpu.memory_space<vmem>>, vector<1x480xf32>
    %16 = vector.broadcast %15 : vector<1x480xf32> to vector<8x480xf32>
    %17 = arith.addf %14, %16 : vector<8x480xf32>
    %c0_12 = arith.constant 0 : index
    %c0_13 = arith.constant 0 : index
    %18 = vector.load %arg5[%c0_12, %c0_13] : memref<8x480xf32, #tpu.memory_space<vmem>>, vector<8x480xf32>
    tpu.vector_store %arg5[%c0_12, %c0_13], %17 {strides = array<i32>} : memref<8x480xf32, #tpu.memory_space<vmem>>, vector<8x480xf32>,
    return
  }
}

module attributes {stable_mosaic.version = 11 : i64} {
  func.func @_stage_kernel(%arg0: i32, %arg1: memref<1x4x12x10xf32, #tpu.memory_space<vmem>>, %arg2: memref<1x4x12x32xf32, #tpu.memory_space<vmem>>, %arg3: memref<144x12xbf16, #tpu.memory_space<vmem>>, %arg4: memref<144x12xbf16, #tpu.memory_space<vmem>>, %arg5: memref<12x144xbf16, #tpu.memory_space<vmem>>, %arg6: memref<10x10xbf16, #tpu.memory_space<vmem>>, %arg7: memref<1x10xf32, #tpu.memory_space<vmem>>, %arg8: memref<10x10xbf16, #tpu.memory_space<vmem>>, %arg9: memref<1x10xf32, #tpu.memory_space<vmem>>, %arg10: memref<1x10xf32, #tpu.memory_space<vmem>>, %arg11: memref<1x1xf32, #tpu.memory_space<vmem>>, %arg12: memref<32x32xbf16, #tpu.memory_space<vmem>>, %arg13: memref<1x32xf32, #tpu.memory_space<vmem>>, %arg14: memref<32x64xbf16, #tpu.memory_space<vmem>>, %arg15: memref<32x64xbf16, #tpu.memory_space<vmem>>, %arg16: memref<1x64xf32, #tpu.memory_space<vmem>>, %arg17: memref<64x32xbf16, #tpu.memory_space<vmem>>, %arg18: memref<1x32xf32, #tpu.memory_space<vmem>>, %arg19: memref<32x32xbf16, #tpu.memory_space<vmem>>, %arg20: memref<32x32xbf16, #tpu.memory_space<vmem>>, %arg21: memref<1x32xf32, #tpu.memory_space<vmem>>, %arg22: memref<1x12x32xf32, #tpu.memory_space<vmem>>, %arg23: memref<1x1x32xf32, #tpu.memory_space<vmem>>) attributes {dimension_semantics = [#tpu.dimension_semantics<parallel>], iteration_bounds = array<i64: 2>, scalar_prefetch = 0 : i64, scratch_operands = 0 : i64, tpu.core_type = #tpu.core_type<tc>, window_params = [{transform_indices = @transform_0, window_bounds = array<i64: 1, 4, 12, 10>}, {transform_indices = @transform_1, window_bounds = array<i64: 1, 4, 12, 32>}, {pipeline_mode = #tpu.pipeline_mode<synchronous>, transform_indices = @transform_2, window_bounds = array<i64: 144, 12>}, {pipeline_mode = #tpu.pipeline_mode<synchronous>, transform_indices = @transform_3, window_bounds = array<i64: 144, 12>}, {pipeline_mode = #tpu.pipeline_mode<synchronous>, transform_indices = @transform_4, window_bounds = array<i64: 12, 144>}, {pipeline_mode = #tpu.pipeline_mode<synchronous>, transform_indices = @transform_5, window_bounds = array<i64: 10, 10>}, {pipeline_mode = #tpu.pipeline_mode<synchronous>, transform_indices = @transform_6, window_bounds = array<i64: 1, 10>}, {pipeline_mode = #tpu.pipeline_mode<synchronous>, transform_indices = @transform_7, window_bounds = array<i64: 10, 10>}, {pipeline_mode = #tpu.pipeline_mode<synchronous>, transform_indices = @transform_8, window_bounds = array<i64: 1, 10>}, {pipeline_mode = #tpu.pipeline_mode<synchronous>, transform_indices = @transform_9, window_bounds = array<i64: 1, 10>}, {pipeline_mode = #tpu.pipeline_mode<synchronous>, transform_indices = @transform_10, window_bounds = array<i64: 1, 1>}, {pipeline_mode = #tpu.pipeline_mode<synchronous>, transform_indices = @transform_11, window_bounds = array<i64: 32, 32>}, {pipeline_mode = #tpu.pipeline_mode<synchronous>, transform_indices = @transform_12, window_bounds = array<i64: 1, 32>}, {pipeline_mode = #tpu.pipeline_mode<synchronous>, transform_indices = @transform_13, window_bounds = array<i64: 32, 64>}, {pipeline_mode = #tpu.pipeline_mode<synchronous>, transform_indices = @transform_14, window_bounds = array<i64: 32, 64>}, {pipeline_mode = #tpu.pipeline_mode<synchronous>, transform_indices = @transform_15, window_bounds = array<i64: 1, 64>}, {pipeline_mode = #tpu.pipeline_mode<synchronous>, transform_indices = @transform_16, window_bounds = array<i64: 64, 32>}, {pipeline_mode = #tpu.pipeline_mode<synchronous>, transform_indices = @transform_17, window_bounds = array<i64: 1, 32>}, {pipeline_mode = #tpu.pipeline_mode<synchronous>, transform_indices = @transform_18, window_bounds = array<i64: 32, 32>}, {pipeline_mode = #tpu.pipeline_mode<synchronous>, transform_indices = @transform_19, window_bounds = array<i64: 32, 32>}, {pipeline_mode = #tpu.pipeline_mode<synchronous>, transform_indices = @transform_20, window_bounds = array<i64: 1, 32>}, {transform_indices = @transform_21, window_bounds = array<i64: 1, 12, 32>}, {transform_indices = @transform_22, window_bounds = array<i64: 1, 1, 32>}]} {
    %c0 = arith.constant 0 : index
    %c0_0 = arith.constant 0 : index
    %c0_1 = arith.constant 0 : index
    %c0_2 = arith.constant 0 : index
    %0 = vector.load %arg1[%c0, %c0_0, %c0_1, %c0_2] : memref<1x4x12x10xf32, #tpu.memory_space<vmem>>, vector<1x1x12x10xf32>
    %1 = vector.shape_cast %0 : vector<1x1x12x10xf32> to vector<12x10xf32>
    %2 = arith.truncf %1 : vector<12x10xf32> to vector<12x10xbf16>
    %c0_3 = arith.constant 0 : index
    %c0_4 = arith.constant 0 : index
    %3 = vector.load %arg6[%c0_3, %c0_4] : memref<10x10xbf16, #tpu.memory_space<vmem>>, vector<10x10xbf16>
    %cst = arith.constant dense<0.000000e+00> : vector<12x10xf32>
    %4 = tpu.matmul %2, %3, %cst {dimension_numbers = #tpu.dot_dimension_numbers<[1], [0], [0], [1], [0, 0, 1, 1], [], []>} : vector<12x10xbf16>, vector<10x10xbf16>, vector<12x10xf32> -> vector<12x10xf32>
    %c0_5 = arith.constant 0 : index
    %c0_6 = arith.constant 0 : index
    %5 = vector.load %arg7[%c0_5, %c0_6] : memref<1x10xf32, #tpu.memory_space<vmem>>, vector<1x10xf32>
    %6 = vector.broadcast %5 : vector<1x10xf32> to vector<12x10xf32>
    %7 = arith.addf %4, %6 : vector<12x10xf32>
    %cst_7 = arith.constant 0.000000e+00 : f32
    %8 = vector.broadcast %cst_7 : f32 to vector<12x10xf32>
    %9 = arith.maximumf %7, %8 : vector<12x10xf32>
    %10 = arith.truncf %9 : vector<12x10xf32> to vector<12x10xbf16>
    %c0_8 = arith.constant 0 : index
    %c0_9 = arith.constant 0 : index
    %11 = vector.load %arg8[%c0_8, %c0_9] : memref<10x10xbf16, #tpu.memory_space<vmem>>, vector<10x10xbf16>
    %cst_10 = arith.constant dense<0.000000e+00> : vector<12x10xf32>
    %12 = tpu.matmul %10, %11, %cst_10 {dimension_numbers = #tpu.dot_dimension_numbers<[1], [0], [0], [1], [0, 0, 1, 1], [], []>} : vector<12x10xbf16>, vector<10x10xbf16>, vector<12x10xf32> -> vector<12x10xf32>
    %c0_11 = arith.constant 0 : index
    %c0_12 = arith.constant 0 : index
    %13 = vector.load %arg9[%c0_11, %c0_12] : memref<1x10xf32, #tpu.memory_space<vmem>>, vector<1x10xf32>
    %14 = vector.broadcast %13 : vector<1x10xf32> to vector<12x10xf32>
    %15 = arith.addf %12, %14 : vector<12x10xf32>
    %cst_13 = arith.constant 0.000000e+00 : f32
    %16 = vector.broadcast %cst_13 : f32 to vector<12x10xf32>
    %17 = arith.maximumf %15, %16 : vector<12x10xf32>
    %c0_14 = arith.constant 0 : index
    %c0_15 = arith.constant 0 : index
    %18 = vector.load %arg10[%c0_14, %c0_15] : memref<1x10xf32, #tpu.memory_space<vmem>>, vector<1x10xf32>
    %19 = vector.broadcast %18 : vector<1x10xf32> to vector<12x10xf32>
    %20 = arith.mulf %17, %19 : vector<12x10xf32>
    %cst_16 = arith.constant dense<0.000000e+00> : vector<12xf32>
    %21 = vector.multi_reduction <add>, %20, %cst_16 [1] : vector<12x10xf32> to vector<12xf32>
    %22 = vector.shape_cast %21 : vector<12xf32> to vector<12x1xf32>
    %c0_17 = arith.constant 0 : index
    %c0_18 = arith.constant 0 : index
    %23 = vector.load %arg11[%c0_17, %c0_18] : memref<1x1xf32, #tpu.memory_space<vmem>>, vector<1x1xf32>
    %24 = vector.broadcast %23 : vector<1x1xf32> to vector<12x1xf32>
    %25 = arith.addf %22, %24 : vector<12x1xf32>
    %c0_19 = arith.constant 0 : index
    %c0_20 = arith.constant 0 : index
    %c0_21 = arith.constant 0 : index
    %c0_22 = arith.constant 0 : index
    %26 = vector.load %arg2[%c0_19, %c0_20, %c0_21, %c0_22] : memref<1x4x12x32xf32, #tpu.memory_space<vmem>>, vector<1x1x12x32xf32>
    %27 = vector.shape_cast %26 : vector<1x1x12x32xf32> to vector<12x32xf32>
    %28 = vector.broadcast %25 : vector<12x1xf32> to vector<12x32xf32>
    %29 = arith.mulf %28, %27 : vector<12x32xf32>
    %c0_23 = arith.constant 0 : index
    %c1 = arith.constant 1 : index
    %c0_24 = arith.constant 0 : index
    %c0_25 = arith.constant 0 : index
    %30 = vector.load %arg1[%c0_23, %c1, %c0_24, %c0_25] : memref<1x4x12x10xf32, #tpu.memory_space<vmem>>, vector<1x1x12x10xf32>
    %31 = vector.shape_cast %30 : vector<1x1x12x10xf32> to vector<12x10xf32>
    %32 = arith.truncf %31 : vector<12x10xf32> to vector<12x10xbf16>
    %c0_26 = arith.constant 0 : index
    %c0_27 = arith.constant 0 : index
    %33 = vector.load %arg6[%c0_26, %c0_27] : memref<10x10xbf16, #tpu.memory_space<vmem>>, vector<10x10xbf16>
    %cst_28 = arith.constant dense<0.000000e+00> : vector<12x10xf32>
    %34 = tpu.matmul %32, %33, %cst_28 {dimension_numbers = #tpu.dot_dimension_numbers<[1], [0], [0], [1], [0, 0, 1, 1], [], []>} : vector<12x10xbf16>, vector<10x10xbf16>, vector<12x10xf32> -> vector<12x10xf32>
    %c0_29 = arith.constant 0 : index
    %c0_30 = arith.constant 0 : index
    %35 = vector.load %arg7[%c0_29, %c0_30] : memref<1x10xf32, #tpu.memory_space<vmem>>, vector<1x10xf32>
    %36 = vector.broadcast %35 : vector<1x10xf32> to vector<12x10xf32>
    %37 = arith.addf %34, %36 : vector<12x10xf32>
    %cst_31 = arith.constant 0.000000e+00 : f32
    %38 = vector.broadcast %cst_31 : f32 to vector<12x10xf32>
    %39 = arith.maximumf %37, %38 : vector<12x10xf32>
    %40 = arith.truncf %39 : vector<12x10xf32> to vector<12x10xbf16>
    %c0_32 = arith.constant 0 : index
    %c0_33 = arith.constant 0 : index
    %41 = vector.load %arg8[%c0_32, %c0_33] : memref<10x10xbf16, #tpu.memory_space<vmem>>, vector<10x10xbf16>
    %cst_34 = arith.constant dense<0.000000e+00> : vector<12x10xf32>
    %42 = tpu.matmul %40, %41, %cst_34 {dimension_numbers = #tpu.dot_dimension_numbers<[1], [0], [0], [1], [0, 0, 1, 1], [], []>} : vector<12x10xbf16>, vector<10x10xbf16>, vector<12x10xf32> -> vector<12x10xf32>
    %c0_35 = arith.constant 0 : index
    %c0_36 = arith.constant 0 : index
    %43 = vector.load %arg9[%c0_35, %c0_36] : memref<1x10xf32, #tpu.memory_space<vmem>>, vector<1x10xf32>
    %44 = vector.broadcast %43 : vector<1x10xf32> to vector<12x10xf32>
    %45 = arith.addf %42, %44 : vector<12x10xf32>
    %cst_37 = arith.constant 0.000000e+00 : f32
    %46 = vector.broadcast %cst_37 : f32 to vector<12x10xf32>
    %47 = arith.maximumf %45, %46 : vector<12x10xf32>
    %c0_38 = arith.constant 0 : index
    %c0_39 = arith.constant 0 : index
    %48 = vector.load %arg10[%c0_38, %c0_39] : memref<1x10xf32, #tpu.memory_space<vmem>>, vector<1x10xf32>
    %49 = vector.broadcast %48 : vector<1x10xf32> to vector<12x10xf32>
    %50 = arith.mulf %47, %49 : vector<12x10xf32>
    %cst_40 = arith.constant dense<0.000000e+00> : vector<12xf32>
    %51 = vector.multi_reduction <add>, %50, %cst_40 [1] : vector<12x10xf32> to vector<12xf32>
    %52 = vector.shape_cast %51 : vector<12xf32> to vector<12x1xf32>
    %c0_41 = arith.constant 0 : index
    %c0_42 = arith.constant 0 : index
    %53 = vector.load %arg11[%c0_41, %c0_42] : memref<1x1xf32, #tpu.memory_space<vmem>>, vector<1x1xf32>
    %54 = vector.broadcast %53 : vector<1x1xf32> to vector<12x1xf32>
    %55 = arith.addf %52, %54 : vector<12x1xf32>
    %c0_43 = arith.constant 0 : index
    %c1_44 = arith.constant 1 : index
    %c0_45 = arith.constant 0 : index
    %c0_46 = arith.constant 0 : index
    %56 = vector.load %arg2[%c0_43, %c1_44, %c0_45, %c0_46] : memref<1x4x12x32xf32, #tpu.memory_space<vmem>>, vector<1x1x12x32xf32>
    %57 = vector.shape_cast %56 : vector<1x1x12x32xf32> to vector<12x32xf32>
    %58 = vector.broadcast %55 : vector<12x1xf32> to vector<12x32xf32>
    %59 = arith.mulf %58, %57 : vector<12x32xf32>
    %60 = arith.addf %29, %59 : vector<12x32xf32>
    %c0_47 = arith.constant 0 : index
    %c2 = arith.constant 2 : index
    %c0_48 = arith.constant 0 : index
    %c0_49 = arith.constant 0 : index
    %61 = vector.load %arg1[%c0_47, %c2, %c0_48, %c0_49] : memref<1x4x12x10xf32, #tpu.memory_space<vmem>>, vector<1x1x12x10xf32>
    %62 = vector.shape_cast %61 : vector<1x1x12x10xf32> to vector<12x10xf32>
    %63 = arith.truncf %62 : vector<12x10xf32> to vector<12x10xbf16>
    %c0_50 = arith.constant 0 : index
    %c0_51 = arith.constant 0 : index
    %64 = vector.load %arg6[%c0_50, %c0_51] : memref<10x10xbf16, #tpu.memory_space<vmem>>, vector<10x10xbf16>
    %cst_52 = arith.constant dense<0.000000e+00> : vector<12x10xf32>
    %65 = tpu.matmul %63, %64, %cst_52 {dimension_numbers = #tpu.dot_dimension_numbers<[1], [0], [0], [1], [0, 0, 1, 1], [], []>} : vector<12x10xbf16>, vector<10x10xbf16>, vector<12x10xf32> -> vector<12x10xf32>
    %c0_53 = arith.constant 0 : index
    %c0_54 = arith.constant 0 : index
    %66 = vector.load %arg7[%c0_53, %c0_54] : memref<1x10xf32, #tpu.memory_space<vmem>>, vector<1x10xf32>
    %67 = vector.broadcast %66 : vector<1x10xf32> to vector<12x10xf32>
    %68 = arith.addf %65, %67 : vector<12x10xf32>
    %cst_55 = arith.constant 0.000000e+00 : f32
    %69 = vector.broadcast %cst_55 : f32 to vector<12x10xf32>
    %70 = arith.maximumf %68, %69 : vector<12x10xf32>
    %71 = arith.truncf %70 : vector<12x10xf32> to vector<12x10xbf16>
    %c0_56 = arith.constant 0 : index
    %c0_57 = arith.constant 0 : index
    %72 = vector.load %arg8[%c0_56, %c0_57] : memref<10x10xbf16, #tpu.memory_space<vmem>>, vector<10x10xbf16>
    %cst_58 = arith.constant dense<0.000000e+00> : vector<12x10xf32>
    %73 = tpu.matmul %71, %72, %cst_58 {dimension_numbers = #tpu.dot_dimension_numbers<[1], [0], [0], [1], [0, 0, 1, 1], [], []>} : vector<12x10xbf16>, vector<10x10xbf16>, vector<12x10xf32> -> vector<12x10xf32>
    %c0_59 = arith.constant 0 : index
    %c0_60 = arith.constant 0 : index
    %74 = vector.load %arg9[%c0_59, %c0_60] : memref<1x10xf32, #tpu.memory_space<vmem>>, vector<1x10xf32>
    %75 = vector.broadcast %74 : vector<1x10xf32> to vector<12x10xf32>
    %76 = arith.addf %73, %75 : vector<12x10xf32>
    %cst_61 = arith.constant 0.000000e+00 : f32
    %77 = vector.broadcast %cst_61 : f32 to vector<12x10xf32>
    %78 = arith.maximumf %76, %77 : vector<12x10xf32>
    %c0_62 = arith.constant 0 : index
    %c0_63 = arith.constant 0 : index
    %79 = vector.load %arg10[%c0_62, %c0_63] : memref<1x10xf32, #tpu.memory_space<vmem>>, vector<1x10xf32>
    %80 = vector.broadcast %79 : vector<1x10xf32> to vector<12x10xf32>
    %81 = arith.mulf %78, %80 : vector<12x10xf32>
    %cst_64 = arith.constant dense<0.000000e+00> : vector<12xf32>
    %82 = vector.multi_reduction <add>, %81, %cst_64 [1] : vector<12x10xf32> to vector<12xf32>
    %83 = vector.shape_cast %82 : vector<12xf32> to vector<12x1xf32>
    %c0_65 = arith.constant 0 : index
    %c0_66 = arith.constant 0 : index
    %84 = vector.load %arg11[%c0_65, %c0_66] : memref<1x1xf32, #tpu.memory_space<vmem>>, vector<1x1xf32>
    %85 = vector.broadcast %84 : vector<1x1xf32> to vector<12x1xf32>
    %86 = arith.addf %83, %85 : vector<12x1xf32>
    %c0_67 = arith.constant 0 : index
    %c2_68 = arith.constant 2 : index
    %c0_69 = arith.constant 0 : index
    %c0_70 = arith.constant 0 : index
    %87 = vector.load %arg2[%c0_67, %c2_68, %c0_69, %c0_70] : memref<1x4x12x32xf32, #tpu.memory_space<vmem>>, vector<1x1x12x32xf32>
    %88 = vector.shape_cast %87 : vector<1x1x12x32xf32> to vector<12x32xf32>
    %89 = vector.broadcast %86 : vector<12x1xf32> to vector<12x32xf32>
    %90 = arith.mulf %89, %88 : vector<12x32xf32>
    %91 = arith.addf %60, %90 : vector<12x32xf32>
    %c0_71 = arith.constant 0 : index
    %c3 = arith.constant 3 : index
    %c0_72 = arith.constant 0 : index
    %c0_73 = arith.constant 0 : index
    %92 = vector.load %arg1[%c0_71, %c3, %c0_72, %c0_73] : memref<1x4x12x10xf32, #tpu.memory_space<vmem>>, vector<1x1x12x10xf32>
    %93 = vector.shape_cast %92 : vector<1x1x12x10xf32> to vector<12x10xf32>
    %94 = arith.truncf %93 : vector<12x10xf32> to vector<12x10xbf16>
    %c0_74 = arith.constant 0 : index
    %c0_75 = arith.constant 0 : index
    %95 = vector.load %arg6[%c0_74, %c0_75] : memref<10x10xbf16, #tpu.memory_space<vmem>>, vector<10x10xbf16>
    %cst_76 = arith.constant dense<0.000000e+00> : vector<12x10xf32>
    %96 = tpu.matmul %94, %95, %cst_76 {dimension_numbers = #tpu.dot_dimension_numbers<[1], [0], [0], [1], [0, 0, 1, 1], [], []>} : vector<12x10xbf16>, vector<10x10xbf16>, vector<12x10xf32> -> vector<12x10xf32>
    %c0_77 = arith.constant 0 : index
    %c0_78 = arith.constant 0 : index
    %97 = vector.load %arg7[%c0_77, %c0_78] : memref<1x10xf32, #tpu.memory_space<vmem>>, vector<1x10xf32>
    %98 = vector.broadcast %97 : vector<1x10xf32> to vector<12x10xf32>
    %99 = arith.addf %96, %98 : vector<12x10xf32>
    %cst_79 = arith.constant 0.000000e+00 : f32
    %100 = vector.broadcast %cst_79 : f32 to vector<12x10xf32>
    %101 = arith.maximumf %99, %100 : vector<12x10xf32>
    %102 = arith.truncf %101 : vector<12x10xf32> to vector<12x10xbf16>
    %c0_80 = arith.constant 0 : index
    %c0_81 = arith.constant 0 : index
    %103 = vector.load %arg8[%c0_80, %c0_81] : memref<10x10xbf16, #tpu.memory_space<vmem>>, vector<10x10xbf16>
    %cst_82 = arith.constant dense<0.000000e+00> : vector<12x10xf32>
    %104 = tpu.matmul %102, %103, %cst_82 {dimension_numbers = #tpu.dot_dimension_numbers<[1], [0], [0], [1], [0, 0, 1, 1], [], []>} : vector<12x10xbf16>, vector<10x10xbf16>, vector<12x10xf32> -> vector<12x10xf32>
    %c0_83 = arith.constant 0 : index
    %c0_84 = arith.constant 0 : index
    %105 = vector.load %arg9[%c0_83, %c0_84] : memref<1x10xf32, #tpu.memory_space<vmem>>, vector<1x10xf32>
    %106 = vector.broadcast %105 : vector<1x10xf32> to vector<12x10xf32>
    %107 = arith.addf %104, %106 : vector<12x10xf32>
    %cst_85 = arith.constant 0.000000e+00 : f32
    %108 = vector.broadcast %cst_85 : f32 to vector<12x10xf32>
    %109 = arith.maximumf %107, %108 : vector<12x10xf32>
    %c0_86 = arith.constant 0 : index
    %c0_87 = arith.constant 0 : index
    %110 = vector.load %arg10[%c0_86, %c0_87] : memref<1x10xf32, #tpu.memory_space<vmem>>, vector<1x10xf32>
    %111 = vector.broadcast %110 : vector<1x10xf32> to vector<12x10xf32>
    %112 = arith.mulf %109, %111 : vector<12x10xf32>
    %cst_88 = arith.constant dense<0.000000e+00> : vector<12xf32>
    %113 = vector.multi_reduction <add>, %112, %cst_88 [1] : vector<12x10xf32> to vector<12xf32>
    %114 = vector.shape_cast %113 : vector<12xf32> to vector<12x1xf32>
    %c0_89 = arith.constant 0 : index
    %c0_90 = arith.constant 0 : index
    %115 = vector.load %arg11[%c0_89, %c0_90] : memref<1x1xf32, #tpu.memory_space<vmem>>, vector<1x1xf32>
    %116 = vector.broadcast %115 : vector<1x1xf32> to vector<12x1xf32>
    %117 = arith.addf %114, %116 : vector<12x1xf32>
    %c0_91 = arith.constant 0 : index
    %c3_92 = arith.constant 3 : index
    %c0_93 = arith.constant 0 : index
    %c0_94 = arith.constant 0 : index
    %118 = vector.load %arg2[%c0_91, %c3_92, %c0_93, %c0_94] : memref<1x4x12x32xf32, #tpu.memory_space<vmem>>, vector<1x1x12x32xf32>
    %119 = vector.shape_cast %118 : vector<1x1x12x32xf32> to vector<12x32xf32>
    %120 = vector.broadcast %117 : vector<12x1xf32> to vector<12x32xf32>
    %121 = arith.mulf %120, %119 : vector<12x32xf32>
    %122 = arith.addf %91, %121 : vector<12x32xf32>
    %123 = arith.truncf %122 : vector<12x32xf32> to vector<12x32xbf16>
    %c0_95 = arith.constant 0 : index
    %c0_96 = arith.constant 0 : index
    %124 = vector.load %arg12[%c0_95, %c0_96] : memref<32x32xbf16, #tpu.memory_space<vmem>>, vector<32x32xbf16>
    %cst_97 = arith.constant dense<0.000000e+00> : vector<12x32xf32>
    %125 = tpu.matmul %123, %124, %cst_97 {dimension_numbers = #tpu.dot_dimension_numbers<[1], [0], [0], [1], [0, 0, 1, 1], [], []>} : vector<12x32xbf16>, vector<32x32xbf16>, vector<12x32xf32> -> vector<12x32xf32>
    %c0_98 = arith.constant 0 : index
    %c0_99 = arith.constant 0 : index
    %126 = vector.load %arg13[%c0_98, %c0_99] : memref<1x32xf32, #tpu.memory_space<vmem>>, vector<1x32xf32>
    %127 = vector.broadcast %126 : vector<1x32xf32> to vector<12x32xf32>
    %128 = arith.addf %125, %127 : vector<12x32xf32>
    %cst_100 = arith.constant 0.000000e+00 : f32
    %129 = vector.broadcast %cst_100 : f32 to vector<12x32xf32>
    %130 = arith.cmpf oge, %128, %129 : vector<12x32xf32>
    %cst_101 = arith.constant 2.000000e-01 : f32
    %131 = vector.broadcast %cst_101 : f32 to vector<12x32xf32>
    %132 = arith.mulf %131, %128 : vector<12x32xf32>
    %133 = arith.select %130, %128, %132 : vector<12x32xi1>, vector<12x32xf32>
    %cst_102 = arith.constant dense<0xFF800000> : vector<32xf32>
    %134 = vector.multi_reduction <maximumf>, %133, %cst_102 [0] : vector<12x32xf32> to vector<32xf32>
    %135 = vector.shape_cast %134 : vector<32xf32> to vector<1x32xf32>
    %c0_103 = arith.constant 0 : index
    %c0_104 = arith.constant 0 : index
    %c0_105 = arith.constant 0 : index
    %136 = vector.load %arg23[%c0_103, %c0_104, %c0_105] : memref<1x1x32xf32, #tpu.memory_space<vmem>>, vector<1x1x32xf32>
    %137 = vector.shape_cast %136 : vector<1x1x32xf32> to vector<1x32xf32>
    %138 = vector.shape_cast %135 : vector<1x32xf32> to vector<1x1x32xf32>
    tpu.vector_store %arg23[%c0_103, %c0_104, %c0_105], %138 {strides = array<i32>} : memref<1x1x32xf32, #tpu.memory_space<vmem>>, vector<1x1x32xf32>,
    %139 = arith.truncf %133 : vector<12x32xf32> to vector<12x32xbf16>
    %c0_106 = arith.constant 0 : index
    %c0_107 = arith.constant 0 : index
    %140 = vector.load %arg14[%c0_106, %c0_107] : memref<32x64xbf16, #tpu.memory_space<vmem>>, vector<32x64xbf16>
    %cst_108 = arith.constant dense<0.000000e+00> : vector<12x64xf32>
    %141 = tpu.matmul %139, %140, %cst_108 {dimension_numbers = #tpu.dot_dimension_numbers<[1], [0], [0], [1], [0, 0, 1, 1], [], []>} : vector<12x32xbf16>, vector<32x64xbf16>, vector<12x64xf32> -> vector<12x64xf32>
    %c0_109 = arith.constant 0 : index
    %c0_110 = arith.constant 0 : index
    %142 = vector.load %arg15[%c0_109, %c0_110] : memref<32x64xbf16, #tpu.memory_space<vmem>>, vector<32x64xbf16>
    %cst_111 = arith.constant dense<0.000000e+00> : vector<12x64xf32>
    %143 = tpu.matmul %139, %142, %cst_111 {dimension_numbers = #tpu.dot_dimension_numbers<[1], [0], [0], [1], [0, 0, 1, 1], [], []>} : vector<12x32xbf16>, vector<32x64xbf16>, vector<12x64xf32> -> vector<12x64xf32>
    %c0_112 = arith.constant 0 : index
    %c0_113 = arith.constant 0 : index
    %144 = vector.load %arg3[%c0_112, %c0_113] : memref<144x12xbf16, #tpu.memory_space<vmem>>, vector<144x12xbf16>
    %145 = arith.truncf %141 : vector<12x64xf32> to vector<12x64xbf16>
    %cst_114 = arith.constant dense<0.000000e+00> : vector<144x64xf32>
    %146 = tpu.matmul %144, %145, %cst_114 {dimension_numbers = #tpu.dot_dimension_numbers<[1], [0], [0], [1], [0, 0, 1, 1], [], []>} : vector<144x12xbf16>, vector<12x64xbf16>, vector<144x64xf32> -> vector<144x64xf32>
    %c0_115 = arith.constant 0 : index
    %c0_116 = arith.constant 0 : index
    %147 = vector.load %arg4[%c0_115, %c0_116] : memref<144x12xbf16, #tpu.memory_space<vmem>>, vector<144x12xbf16>
    %148 = arith.truncf %143 : vector<12x64xf32> to vector<12x64xbf16>
    %cst_117 = arith.constant dense<0.000000e+00> : vector<144x64xf32>
    %149 = tpu.matmul %147, %148, %cst_117 {dimension_numbers = #tpu.dot_dimension_numbers<[1], [0], [0], [1], [0, 0, 1, 1], [], []>} : vector<144x12xbf16>, vector<12x64xbf16>, vector<144x64xf32> -> vector<144x64xf32>
    %150 = arith.addf %146, %149 : vector<144x64xf32>
    %c0_118 = arith.constant 0 : index
    %c0_119 = arith.constant 0 : index
    %151 = vector.load %arg16[%c0_118, %c0_119] : memref<1x64xf32, #tpu.memory_space<vmem>>, vector<1x64xf32>
    %152 = vector.broadcast %151 : vector<1x64xf32> to vector<144x64xf32>
    %153 = arith.addf %150, %152 : vector<144x64xf32>
    %cst_120 = arith.constant 0.000000e+00 : f32
    %154 = vector.broadcast %cst_120 : f32 to vector<144x64xf32>
    %155 = arith.maximumf %153, %154 : vector<144x64xf32>
    %156 = arith.truncf %155 : vector<144x64xf32> to vector<144x64xbf16>
    %c0_121 = arith.constant 0 : index
    %c0_122 = arith.constant 0 : index
    %157 = vector.load %arg17[%c0_121, %c0_122] : memref<64x32xbf16, #tpu.memory_space<vmem>>, vector<64x32xbf16>
    %cst_123 = arith.constant dense<0.000000e+00> : vector<144x32xf32>
    %158 = tpu.matmul %156, %157, %cst_123 {dimension_numbers = #tpu.dot_dimension_numbers<[1], [0], [0], [1], [0, 0, 1, 1], [], []>} : vector<144x64xbf16>, vector<64x32xbf16>, vector<144x32xf32> -> vector<144x32xf32>
    %c0_124 = arith.constant 0 : index
    %c0_125 = arith.constant 0 : index
    %159 = vector.load %arg18[%c0_124, %c0_125] : memref<1x32xf32, #tpu.memory_space<vmem>>, vector<1x32xf32>
    %160 = vector.broadcast %159 : vector<1x32xf32> to vector<144x32xf32>
    %161 = arith.addf %158, %160 : vector<144x32xf32>
    %cst_126 = arith.constant 0.000000e+00 : f32
    %162 = vector.broadcast %cst_126 : f32 to vector<144x32xf32>
    %163 = arith.maximumf %161, %162 : vector<144x32xf32>
    %c0_127 = arith.constant 0 : index
    %c0_128 = arith.constant 0 : index
    %164 = vector.load %arg5[%c0_127, %c0_128] : memref<12x144xbf16, #tpu.memory_space<vmem>>, vector<12x144xbf16>
    %165 = arith.truncf %163 : vector<144x32xf32> to vector<144x32xbf16>
    %cst_129 = arith.constant dense<0.000000e+00> : vector<12x32xf32>
    %166 = tpu.matmul %164, %165, %cst_129 {dimension_numbers = #tpu.dot_dimension_numbers<[1], [0], [0], [1], [0, 0, 1, 1], [], []>} : vector<12x144xbf16>, vector<144x32xbf16>, vector<12x32xf32> -> vector<12x32xf32>
    %c0_130 = arith.constant 0 : index
    %c0_131 = arith.constant 0 : index
    %167 = vector.load %arg19[%c0_130, %c0_131] : memref<32x32xbf16, #tpu.memory_space<vmem>>, vector<32x32xbf16>
    %cst_132 = arith.constant dense<0.000000e+00> : vector<12x32xf32>
    %168 = tpu.matmul %139, %167, %cst_132 {dimension_numbers = #tpu.dot_dimension_numbers<[1], [0], [0], [1], [0, 0, 1, 1], [], []>} : vector<12x32xbf16>, vector<32x32xbf16>, vector<12x32xf32> -> vector<12x32xf32>
    %169 = arith.truncf %166 : vector<12x32xf32> to vector<12x32xbf16>
    %c0_133 = arith.constant 0 : index
    %c0_134 = arith.constant 0 : index
    %170 = vector.load %arg20[%c0_133, %c0_134] : memref<32x32xbf16, #tpu.memory_space<vmem>>, vector<32x32xbf16>
    %cst_135 = arith.constant dense<0.000000e+00> : vector<12x32xf32>
    %171 = tpu.matmul %169, %170, %cst_135 {dimension_numbers = #tpu.dot_dimension_numbers<[1], [0], [0], [1], [0, 0, 1, 1], [], []>} : vector<12x32xbf16>, vector<32x32xbf16>, vector<12x32xf32> -> vector<12x32xf32>
    %172 = arith.addf %168, %171 : vector<12x32xf32>
    %c0_136 = arith.constant 0 : index
    %c0_137 = arith.constant 0 : index
    %173 = vector.load %arg21[%c0_136, %c0_137] : memref<1x32xf32, #tpu.memory_space<vmem>>, vector<1x32xf32>
    %174 = vector.broadcast %173 : vector<1x32xf32> to vector<12x32xf32>
    %175 = arith.addf %172, %174 : vector<12x32xf32>
    %cst_138 = arith.constant 0.000000e+00 : f32
    %176 = vector.broadcast %cst_138 : f32 to vector<12x32xf32>
    %177 = arith.maximumf %175, %176 : vector<12x32xf32>
    %c0_139 = arith.constant 0 : index
    %c0_140 = arith.constant 0 : index
    %c0_141 = arith.constant 0 : index
    %178 = vector.load %arg22[%c0_139, %c0_140, %c0_141] : memref<1x12x32xf32, #tpu.memory_space<vmem>>, vector<1x12x32xf32>
    %179 = vector.shape_cast %178 : vector<1x12x32xf32> to vector<12x32xf32>
    %180 = vector.shape_cast %177 : vector<12x32xf32> to vector<1x12x32xf32>
    tpu.vector_store %arg22[%c0_139, %c0_140, %c0_141], %180 {strides = array<i32>} : memref<1x12x32xf32, #tpu.memory_space<vmem>>, vector<1x12x32xf32>,
    return
  }
  func.func @transform_0(%arg0: i32) -> (i32, i32, i32, i32) {
    %c0_i32 = arith.constant 0 : i32
    %c0_i32_0 = arith.constant 0 : i32
    %c0_i32_1 = arith.constant 0 : i32
    %c0_i32_2 = arith.constant 0 : i32
    return %arg0, %c0_i32, %c0_i32_0, %c0_i32_1 : i32, i32, i32, i32
  }
  func.func @transform_1(%arg0: i32) -> (i32, i32, i32, i32) {
    %c0_i32 = arith.constant 0 : i32
    %c0_i32_0 = arith.constant 0 : i32
    %c0_i32_1 = arith.constant 0 : i32
    %c0_i32_2 = arith.constant 0 : i32
    return %arg0, %c0_i32, %c0_i32_0, %c0_i32_1 : i32, i32, i32, i32
  }
  func.func @transform_2(%arg0: i32) -> (i32, i32) {
    %c0_i32 = arith.constant 0 : i32
    %c0_i32_0 = arith.constant 0 : i32
    %c0_i32_1 = arith.constant 0 : i32
    return %c0_i32, %c0_i32_0 : i32, i32
  }
  func.func @transform_3(%arg0: i32) -> (i32, i32) {
    %c0_i32 = arith.constant 0 : i32
    %c0_i32_0 = arith.constant 0 : i32
    %c0_i32_1 = arith.constant 0 : i32
    return %c0_i32, %c0_i32_0 : i32, i32
  }
  func.func @transform_4(%arg0: i32) -> (i32, i32) {
    %c0_i32 = arith.constant 0 : i32
    %c0_i32_0 = arith.constant 0 : i32
    %c0_i32_1 = arith.constant 0 : i32
    return %c0_i32, %c0_i32_0 : i32, i32
  }
  func.func @transform_5(%arg0: i32) -> (i32, i32) {
    %c0_i32 = arith.constant 0 : i32
    %c0_i32_0 = arith.constant 0 : i32
    %c0_i32_1 = arith.constant 0 : i32
    return %c0_i32, %c0_i32_0 : i32, i32
  }
  func.func @transform_6(%arg0: i32) -> (i32, i32) {
    %c0_i32 = arith.constant 0 : i32
    %c0_i32_0 = arith.constant 0 : i32
    %c0_i32_1 = arith.constant 0 : i32
    return %c0_i32, %c0_i32_0 : i32, i32
  }
  func.func @transform_7(%arg0: i32) -> (i32, i32) {
    %c0_i32 = arith.constant 0 : i32
    %c0_i32_0 = arith.constant 0 : i32
    %c0_i32_1 = arith.constant 0 : i32
    return %c0_i32, %c0_i32_0 : i32, i32
  }
  func.func @transform_8(%arg0: i32) -> (i32, i32) {
    %c0_i32 = arith.constant 0 : i32
    %c0_i32_0 = arith.constant 0 : i32
    %c0_i32_1 = arith.constant 0 : i32
    return %c0_i32, %c0_i32_0 : i32, i32
  }
  func.func @transform_9(%arg0: i32) -> (i32, i32) {
    %c0_i32 = arith.constant 0 : i32
    %c0_i32_0 = arith.constant 0 : i32
    %c0_i32_1 = arith.constant 0 : i32
    return %c0_i32, %c0_i32_0 : i32, i32
  }
  func.func @transform_10(%arg0: i32) -> (i32, i32) {
    %c0_i32 = arith.constant 0 : i32
    %c0_i32_0 = arith.constant 0 : i32
    %c0_i32_1 = arith.constant 0 : i32
    return %c0_i32, %c0_i32_0 : i32, i32
  }
  func.func @transform_11(%arg0: i32) -> (i32, i32) {
    %c0_i32 = arith.constant 0 : i32
    %c0_i32_0 = arith.constant 0 : i32
    %c0_i32_1 = arith.constant 0 : i32
    return %c0_i32, %c0_i32_0 : i32, i32
  }
  func.func @transform_12(%arg0: i32) -> (i32, i32) {
    %c0_i32 = arith.constant 0 : i32
    %c0_i32_0 = arith.constant 0 : i32
    %c0_i32_1 = arith.constant 0 : i32
    return %c0_i32, %c0_i32_0 : i32, i32
  }
  func.func @transform_13(%arg0: i32) -> (i32, i32) {
    %c0_i32 = arith.constant 0 : i32
    %c0_i32_0 = arith.constant 0 : i32
    %c0_i32_1 = arith.constant 0 : i32
    return %c0_i32, %c0_i32_0 : i32, i32
  }
  func.func @transform_14(%arg0: i32) -> (i32, i32) {
    %c0_i32 = arith.constant 0 : i32
    %c0_i32_0 = arith.constant 0 : i32
    %c0_i32_1 = arith.constant 0 : i32
    return %c0_i32, %c0_i32_0 : i32, i32
  }
  func.func @transform_15(%arg0: i32) -> (i32, i32) {
    %c0_i32 = arith.constant 0 : i32
    %c0_i32_0 = arith.constant 0 : i32
    %c0_i32_1 = arith.constant 0 : i32
    return %c0_i32, %c0_i32_0 : i32, i32
  }
  func.func @transform_16(%arg0: i32) -> (i32, i32) {
    %c0_i32 = arith.constant 0 : i32
    %c0_i32_0 = arith.constant 0 : i32
    %c0_i32_1 = arith.constant 0 : i32
    return %c0_i32, %c0_i32_0 : i32, i32
  }
  func.func @transform_17(%arg0: i32) -> (i32, i32) {
    %c0_i32 = arith.constant 0 : i32
    %c0_i32_0 = arith.constant 0 : i32
    %c0_i32_1 = arith.constant 0 : i32
    return %c0_i32, %c0_i32_0 : i32, i32
  }
  func.func @transform_18(%arg0: i32) -> (i32, i32) {
    %c0_i32 = arith.constant 0 : i32
    %c0_i32_0 = arith.constant 0 : i32
    %c0_i32_1 = arith.constant 0 : i32
    return %c0_i32, %c0_i32_0 : i32, i32
  }
  func.func @transform_19(%arg0: i32) -> (i32, i32) {
    %c0_i32 = arith.constant 0 : i32
    %c0_i32_0 = arith.constant 0 : i32
    %c0_i32_1 = arith.constant 0 : i32
    return %c0_i32, %c0_i32_0 : i32, i32
  }
  func.func @transform_20(%arg0: i32) -> (i32, i32) {
    %c0_i32 = arith.constant 0 : i32
    %c0_i32_0 = arith.constant 0 : i32
    %c0_i32_1 = arith.constant 0 : i32
    return %c0_i32, %c0_i32_0 : i32, i32
  }
  func.func @transform_21(%arg0: i32) -> (i32, i32, i32) {
    %c0_i32 = arith.constant 0 : i32
    %c0_i32_0 = arith.constant 0 : i32
    %c0_i32_1 = arith.constant 0 : i32
    return %arg0, %c0_i32, %c0_i32_0 : i32, i32, i32
  }
  func.func @transform_22(%arg0: i32) -> (i32, i32, i32) {
    %c0_i32 = arith.constant 0 : i32
    %c0_i32_0 = arith.constant 0 : i32
    %c0_i32_1 = arith.constant 0 : i32
    return %arg0, %c0_i32, %c0_i32_0 : i32, i32, i32
  }
}

module attributes {stable_mosaic.version = 11 : i64} {
  func.func @_selector_head_kernel(%arg0: memref<8x192xf32, #tpu.memory_space<vmem>>, %arg1: memref<192x96xbf16, #tpu.memory_space<vmem>>, %arg2: memref<1x96xf32, #tpu.memory_space<vmem>>, %arg3: memref<96x240xbf16, #tpu.memory_space<vmem>>, %arg4: memref<1x240xf32, #tpu.memory_space<vmem>>, %arg5: memref<8x240xf32, #tpu.memory_space<vmem>>) attributes {dimension_semantics = [], scalar_prefetch = 0 : i64, scratch_operands = 0 : i64, tpu.core_type = #tpu.core_type<tc>} {
    %c0 = arith.constant 0 : index
    %c0_0 = arith.constant 0 : index
    %0 = vector.load %arg0[%c0, %c0_0] : memref<8x192xf32, #tpu.memory_space<vmem>>, vector<8x192xf32>
    %1 = arith.truncf %0 : vector<8x192xf32> to vector<8x192xbf16>
    %c0_1 = arith.constant 0 : index
    %c0_2 = arith.constant 0 : index
    %2 = vector.load %arg1[%c0_1, %c0_2] : memref<192x96xbf16, #tpu.memory_space<vmem>>, vector<192x96xbf16>
    %cst = arith.constant dense<0.000000e+00> : vector<8x96xf32>
    %3 = tpu.matmul %1, %2, %cst {dimension_numbers = #tpu.dot_dimension_numbers<[1], [0], [0], [1], [0, 0, 1, 1], [], []>} : vector<8x192xbf16>, vector<192x96xbf16>, vector<8x96xf32> -> vector<8x96xf32>
    %c0_3 = arith.constant 0 : index
    %c0_4 = arith.constant 0 : index
    %4 = vector.load %arg2[%c0_3, %c0_4] : memref<1x96xf32, #tpu.memory_space<vmem>>, vector<1x96xf32>
    %5 = vector.broadcast %4 : vector<1x96xf32> to vector<8x96xf32>
    %6 = arith.addf %3, %5 : vector<8x96xf32>
    %cst_5 = arith.constant 0.000000e+00 : f32
    %7 = vector.broadcast %cst_5 : f32 to vector<8x96xf32>
    %8 = arith.cmpf oge, %6, %7 : vector<8x96xf32>
    %cst_6 = arith.constant 2.000000e-01 : f32
    %9 = vector.broadcast %cst_6 : f32 to vector<8x96xf32>
    %10 = arith.mulf %9, %6 : vector<8x96xf32>
    %11 = arith.select %8, %6, %10 : vector<8x96xi1>, vector<8x96xf32>
    %12 = arith.truncf %11 : vector<8x96xf32> to vector<8x96xbf16>
    %c0_7 = arith.constant 0 : index
    %c0_8 = arith.constant 0 : index
    %13 = vector.load %arg3[%c0_7, %c0_8] : memref<96x240xbf16, #tpu.memory_space<vmem>>, vector<96x240xbf16>
    %cst_9 = arith.constant dense<0.000000e+00> : vector<8x240xf32>
    %14 = tpu.matmul %12, %13, %cst_9 {dimension_numbers = #tpu.dot_dimension_numbers<[1], [0], [0], [1], [0, 0, 1, 1], [], []>} : vector<8x96xbf16>, vector<96x240xbf16>, vector<8x240xf32> -> vector<8x240xf32>
    %c0_10 = arith.constant 0 : index
    %c0_11 = arith.constant 0 : index
    %15 = vector.load %arg4[%c0_10, %c0_11] : memref<1x240xf32, #tpu.memory_space<vmem>>, vector<1x240xf32>
    %16 = vector.broadcast %15 : vector<1x240xf32> to vector<8x240xf32>
    %17 = arith.addf %14, %16 : vector<8x240xf32>
    %c0_12 = arith.constant 0 : index
    %c0_13 = arith.constant 0 : index
    %18 = vector.load %arg5[%c0_12, %c0_13] : memref<8x240xf32, #tpu.memory_space<vmem>>, vector<8x240xf32>
    tpu.vector_store %arg5[%c0_12, %c0_13], %17 {strides = array<i32>} : memref<8x240xf32, #tpu.memory_space<vmem>>, vector<8x240xf32>,
    return
  }
}

module attributes {stable_mosaic.version = 11 : i64} {
  func.func @_final_kernel(%arg0: i32, %arg1: memref<1x4x6x10xf32, #tpu.memory_space<vmem>>, %arg2: memref<1x4x6x32xf32, #tpu.memory_space<vmem>>, %arg3: memref<1x1x32xf32, #tpu.memory_space<vmem>>, %arg4: memref<1x1x32xf32, #tpu.memory_space<vmem>>, %arg5: memref<10x10xbf16, #tpu.memory_space<vmem>>, %arg6: memref<1x10xf32, #tpu.memory_space<vmem>>, %arg7: memref<10x10xbf16, #tpu.memory_space<vmem>>, %arg8: memref<1x10xf32, #tpu.memory_space<vmem>>, %arg9: memref<1x10xf32, #tpu.memory_space<vmem>>, %arg10: memref<1x1xf32, #tpu.memory_space<vmem>>, %arg11: memref<32x32xbf16, #tpu.memory_space<vmem>>, %arg12: memref<1x32xf32, #tpu.memory_space<vmem>>, %arg13: memref<32x32xbf16, #tpu.memory_space<vmem>>, %arg14: memref<32x32xbf16, #tpu.memory_space<vmem>>, %arg15: memref<32x32xbf16, #tpu.memory_space<vmem>>, %arg16: memref<1x32xf32, #tpu.memory_space<vmem>>, %arg17: memref<32x32xbf16, #tpu.memory_space<vmem>>, %arg18: memref<1x32xf32, #tpu.memory_space<vmem>>, %arg19: memref<32x2xbf16, #tpu.memory_space<vmem>>, %arg20: memref<1x2xf32, #tpu.memory_space<vmem>>, %arg21: memref<1x1x2xf32, #tpu.memory_space<vmem>>) attributes {dimension_semantics = [#tpu.dimension_semantics<parallel>], iteration_bounds = array<i64: 2>, scalar_prefetch = 0 : i64, scratch_operands = 0 : i64, tpu.core_type = #tpu.core_type<tc>, window_params = [{transform_indices = @transform_0, window_bounds = array<i64: 1, 4, 6, 10>}, {transform_indices = @transform_1, window_bounds = array<i64: 1, 4, 6, 32>}, {transform_indices = @transform_2, window_bounds = array<i64: 1, 1, 32>}, {transform_indices = @transform_3, window_bounds = array<i64: 1, 1, 32>}, {pipeline_mode = #tpu.pipeline_mode<synchronous>, transform_indices = @transform_4, window_bounds = array<i64: 10, 10>}, {pipeline_mode = #tpu.pipeline_mode<synchronous>, transform_indices = @transform_5, window_bounds = array<i64: 1, 10>}, {pipeline_mode = #tpu.pipeline_mode<synchronous>, transform_indices = @transform_6, window_bounds = array<i64: 10, 10>}, {pipeline_mode = #tpu.pipeline_mode<synchronous>, transform_indices = @transform_7, window_bounds = array<i64: 1, 10>}, {pipeline_mode = #tpu.pipeline_mode<synchronous>, transform_indices = @transform_8, window_bounds = array<i64: 1, 10>}, {pipeline_mode = #tpu.pipeline_mode<synchronous>, transform_indices = @transform_9, window_bounds = array<i64: 1, 1>}, {pipeline_mode = #tpu.pipeline_mode<synchronous>, transform_indices = @transform_10, window_bounds = array<i64: 32, 32>}, {pipeline_mode = #tpu.pipeline_mode<synchronous>, transform_indices = @transform_11, window_bounds = array<i64: 1, 32>}, {pipeline_mode = #tpu.pipeline_mode<synchronous>, transform_indices = @transform_12, window_bounds = array<i64: 32, 32>}, {pipeline_mode = #tpu.pipeline_mode<synchronous>, transform_indices = @transform_13, window_bounds = array<i64: 32, 32>}, {pipeline_mode = #tpu.pipeline_mode<synchronous>, transform_indices = @transform_14, window_bounds = array<i64: 32, 32>}, {pipeline_mode = #tpu.pipeline_mode<synchronous>, transform_indices = @transform_15, window_bounds = array<i64: 1, 32>}, {pipeline_mode = #tpu.pipeline_mode<synchronous>, transform_indices = @transform_16, window_bounds = array<i64: 32, 32>}, {pipeline_mode = #tpu.pipeline_mode<synchronous>, transform_indices = @transform_17, window_bounds = array<i64: 1, 32>}, {pipeline_mode = #tpu.pipeline_mode<synchronous>, transform_indices = @transform_18, window_bounds = array<i64: 32, 2>}, {pipeline_mode = #tpu.pipeline_mode<synchronous>, transform_indices = @transform_19, window_bounds = array<i64: 1, 2>}, {transform_indices = @transform_20, window_bounds = array<i64: 1, 1, 2>}]} {
    %c0 = arith.constant 0 : index
    %c0_0 = arith.constant 0 : index
    %c0_1 = arith.constant 0 : index
    %c0_2 = arith.constant 0 : index
    %0 = vector.load %arg1[%c0, %c0_0, %c0_1, %c0_2] : memref<1x4x6x10xf32, #tpu.memory_space<vmem>>, vector<1x1x6x10xf32>
    %1 = vector.shape_cast %0 : vector<1x1x6x10xf32> to vector<6x10xf32>
    %2 = arith.truncf %1 : vector<6x10xf32> to vector<6x10xbf16>
    %c0_3 = arith.constant 0 : index
    %c0_4 = arith.constant 0 : index
    %3 = vector.load %arg5[%c0_3, %c0_4] : memref<10x10xbf16, #tpu.memory_space<vmem>>, vector<10x10xbf16>
    %cst = arith.constant dense<0.000000e+00> : vector<6x10xf32>
    %4 = tpu.matmul %2, %3, %cst {dimension_numbers = #tpu.dot_dimension_numbers<[1], [0], [0], [1], [0, 0, 1, 1], [], []>} : vector<6x10xbf16>, vector<10x10xbf16>, vector<6x10xf32> -> vector<6x10xf32>
    %c0_5 = arith.constant 0 : index
    %c0_6 = arith.constant 0 : index
    %5 = vector.load %arg6[%c0_5, %c0_6] : memref<1x10xf32, #tpu.memory_space<vmem>>, vector<1x10xf32>
    %6 = vector.broadcast %5 : vector<1x10xf32> to vector<6x10xf32>
    %7 = arith.addf %4, %6 : vector<6x10xf32>
    %cst_7 = arith.constant 0.000000e+00 : f32
    %8 = vector.broadcast %cst_7 : f32 to vector<6x10xf32>
    %9 = arith.maximumf %7, %8 : vector<6x10xf32>
    %10 = arith.truncf %9 : vector<6x10xf32> to vector<6x10xbf16>
    %c0_8 = arith.constant 0 : index
    %c0_9 = arith.constant 0 : index
    %11 = vector.load %arg7[%c0_8, %c0_9] : memref<10x10xbf16, #tpu.memory_space<vmem>>, vector<10x10xbf16>
    %cst_10 = arith.constant dense<0.000000e+00> : vector<6x10xf32>
    %12 = tpu.matmul %10, %11, %cst_10 {dimension_numbers = #tpu.dot_dimension_numbers<[1], [0], [0], [1], [0, 0, 1, 1], [], []>} : vector<6x10xbf16>, vector<10x10xbf16>, vector<6x10xf32> -> vector<6x10xf32>
    %c0_11 = arith.constant 0 : index
    %c0_12 = arith.constant 0 : index
    %13 = vector.load %arg8[%c0_11, %c0_12] : memref<1x10xf32, #tpu.memory_space<vmem>>, vector<1x10xf32>
    %14 = vector.broadcast %13 : vector<1x10xf32> to vector<6x10xf32>
    %15 = arith.addf %12, %14 : vector<6x10xf32>
    %cst_13 = arith.constant 0.000000e+00 : f32
    %16 = vector.broadcast %cst_13 : f32 to vector<6x10xf32>
    %17 = arith.maximumf %15, %16 : vector<6x10xf32>
    %c0_14 = arith.constant 0 : index
    %c0_15 = arith.constant 0 : index
    %18 = vector.load %arg9[%c0_14, %c0_15] : memref<1x10xf32, #tpu.memory_space<vmem>>, vector<1x10xf32>
    %19 = vector.broadcast %18 : vector<1x10xf32> to vector<6x10xf32>
    %20 = arith.mulf %17, %19 : vector<6x10xf32>
    %cst_16 = arith.constant dense<0.000000e+00> : vector<6xf32>
    %21 = vector.multi_reduction <add>, %20, %cst_16 [1] : vector<6x10xf32> to vector<6xf32>
    %22 = vector.shape_cast %21 : vector<6xf32> to vector<6x1xf32>
    %c0_17 = arith.constant 0 : index
    %c0_18 = arith.constant 0 : index
    %23 = vector.load %arg10[%c0_17, %c0_18] : memref<1x1xf32, #tpu.memory_space<vmem>>, vector<1x1xf32>
    %24 = vector.broadcast %23 : vector<1x1xf32> to vector<6x1xf32>
    %25 = arith.addf %22, %24 : vector<6x1xf32>
    %c0_19 = arith.constant 0 : index
    %c0_20 = arith.constant 0 : index
    %c0_21 = arith.constant 0 : index
    %c0_22 = arith.constant 0 : index
    %26 = vector.load %arg2[%c0_19, %c0_20, %c0_21, %c0_22] : memref<1x4x6x32xf32, #tpu.memory_space<vmem>>, vector<1x1x6x32xf32>
    %27 = vector.shape_cast %26 : vector<1x1x6x32xf32> to vector<6x32xf32>
    %28 = vector.broadcast %25 : vector<6x1xf32> to vector<6x32xf32>
    %29 = arith.mulf %28, %27 : vector<6x32xf32>
    %c0_23 = arith.constant 0 : index
    %c1 = arith.constant 1 : index
    %c0_24 = arith.constant 0 : index
    %c0_25 = arith.constant 0 : index
    %30 = vector.load %arg1[%c0_23, %c1, %c0_24, %c0_25] : memref<1x4x6x10xf32, #tpu.memory_space<vmem>>, vector<1x1x6x10xf32>
    %31 = vector.shape_cast %30 : vector<1x1x6x10xf32> to vector<6x10xf32>
    %32 = arith.truncf %31 : vector<6x10xf32> to vector<6x10xbf16>
    %c0_26 = arith.constant 0 : index
    %c0_27 = arith.constant 0 : index
    %33 = vector.load %arg5[%c0_26, %c0_27] : memref<10x10xbf16, #tpu.memory_space<vmem>>, vector<10x10xbf16>
    %cst_28 = arith.constant dense<0.000000e+00> : vector<6x10xf32>
    %34 = tpu.matmul %32, %33, %cst_28 {dimension_numbers = #tpu.dot_dimension_numbers<[1], [0], [0], [1], [0, 0, 1, 1], [], []>} : vector<6x10xbf16>, vector<10x10xbf16>, vector<6x10xf32> -> vector<6x10xf32>
    %c0_29 = arith.constant 0 : index
    %c0_30 = arith.constant 0 : index
    %35 = vector.load %arg6[%c0_29, %c0_30] : memref<1x10xf32, #tpu.memory_space<vmem>>, vector<1x10xf32>
    %36 = vector.broadcast %35 : vector<1x10xf32> to vector<6x10xf32>
    %37 = arith.addf %34, %36 : vector<6x10xf32>
    %cst_31 = arith.constant 0.000000e+00 : f32
    %38 = vector.broadcast %cst_31 : f32 to vector<6x10xf32>
    %39 = arith.maximumf %37, %38 : vector<6x10xf32>
    %40 = arith.truncf %39 : vector<6x10xf32> to vector<6x10xbf16>
    %c0_32 = arith.constant 0 : index
    %c0_33 = arith.constant 0 : index
    %41 = vector.load %arg7[%c0_32, %c0_33] : memref<10x10xbf16, #tpu.memory_space<vmem>>, vector<10x10xbf16>
    %cst_34 = arith.constant dense<0.000000e+00> : vector<6x10xf32>
    %42 = tpu.matmul %40, %41, %cst_34 {dimension_numbers = #tpu.dot_dimension_numbers<[1], [0], [0], [1], [0, 0, 1, 1], [], []>} : vector<6x10xbf16>, vector<10x10xbf16>, vector<6x10xf32> -> vector<6x10xf32>
    %c0_35 = arith.constant 0 : index
    %c0_36 = arith.constant 0 : index
    %43 = vector.load %arg8[%c0_35, %c0_36] : memref<1x10xf32, #tpu.memory_space<vmem>>, vector<1x10xf32>
    %44 = vector.broadcast %43 : vector<1x10xf32> to vector<6x10xf32>
    %45 = arith.addf %42, %44 : vector<6x10xf32>
    %cst_37 = arith.constant 0.000000e+00 : f32
    %46 = vector.broadcast %cst_37 : f32 to vector<6x10xf32>
    %47 = arith.maximumf %45, %46 : vector<6x10xf32>
    %c0_38 = arith.constant 0 : index
    %c0_39 = arith.constant 0 : index
    %48 = vector.load %arg9[%c0_38, %c0_39] : memref<1x10xf32, #tpu.memory_space<vmem>>, vector<1x10xf32>
    %49 = vector.broadcast %48 : vector<1x10xf32> to vector<6x10xf32>
    %50 = arith.mulf %47, %49 : vector<6x10xf32>
    %cst_40 = arith.constant dense<0.000000e+00> : vector<6xf32>
    %51 = vector.multi_reduction <add>, %50, %cst_40 [1] : vector<6x10xf32> to vector<6xf32>
    %52 = vector.shape_cast %51 : vector<6xf32> to vector<6x1xf32>
    %c0_41 = arith.constant 0 : index
    %c0_42 = arith.constant 0 : index
    %53 = vector.load %arg10[%c0_41, %c0_42] : memref<1x1xf32, #tpu.memory_space<vmem>>, vector<1x1xf32>
    %54 = vector.broadcast %53 : vector<1x1xf32> to vector<6x1xf32>
    %55 = arith.addf %52, %54 : vector<6x1xf32>
    %c0_43 = arith.constant 0 : index
    %c1_44 = arith.constant 1 : index
    %c0_45 = arith.constant 0 : index
    %c0_46 = arith.constant 0 : index
    %56 = vector.load %arg2[%c0_43, %c1_44, %c0_45, %c0_46] : memref<1x4x6x32xf32, #tpu.memory_space<vmem>>, vector<1x1x6x32xf32>
    %57 = vector.shape_cast %56 : vector<1x1x6x32xf32> to vector<6x32xf32>
    %58 = vector.broadcast %55 : vector<6x1xf32> to vector<6x32xf32>
    %59 = arith.mulf %58, %57 : vector<6x32xf32>
    %60 = arith.addf %29, %59 : vector<6x32xf32>
    %c0_47 = arith.constant 0 : index
    %c2 = arith.constant 2 : index
    %c0_48 = arith.constant 0 : index
    %c0_49 = arith.constant 0 : index
    %61 = vector.load %arg1[%c0_47, %c2, %c0_48, %c0_49] : memref<1x4x6x10xf32, #tpu.memory_space<vmem>>, vector<1x1x6x10xf32>
    %62 = vector.shape_cast %61 : vector<1x1x6x10xf32> to vector<6x10xf32>
    %63 = arith.truncf %62 : vector<6x10xf32> to vector<6x10xbf16>
    %c0_50 = arith.constant 0 : index
    %c0_51 = arith.constant 0 : index
    %64 = vector.load %arg5[%c0_50, %c0_51] : memref<10x10xbf16, #tpu.memory_space<vmem>>, vector<10x10xbf16>
    %cst_52 = arith.constant dense<0.000000e+00> : vector<6x10xf32>
    %65 = tpu.matmul %63, %64, %cst_52 {dimension_numbers = #tpu.dot_dimension_numbers<[1], [0], [0], [1], [0, 0, 1, 1], [], []>} : vector<6x10xbf16>, vector<10x10xbf16>, vector<6x10xf32> -> vector<6x10xf32>
    %c0_53 = arith.constant 0 : index
    %c0_54 = arith.constant 0 : index
    %66 = vector.load %arg6[%c0_53, %c0_54] : memref<1x10xf32, #tpu.memory_space<vmem>>, vector<1x10xf32>
    %67 = vector.broadcast %66 : vector<1x10xf32> to vector<6x10xf32>
    %68 = arith.addf %65, %67 : vector<6x10xf32>
    %cst_55 = arith.constant 0.000000e+00 : f32
    %69 = vector.broadcast %cst_55 : f32 to vector<6x10xf32>
    %70 = arith.maximumf %68, %69 : vector<6x10xf32>
    %71 = arith.truncf %70 : vector<6x10xf32> to vector<6x10xbf16>
    %c0_56 = arith.constant 0 : index
    %c0_57 = arith.constant 0 : index
    %72 = vector.load %arg7[%c0_56, %c0_57] : memref<10x10xbf16, #tpu.memory_space<vmem>>, vector<10x10xbf16>
    %cst_58 = arith.constant dense<0.000000e+00> : vector<6x10xf32>
    %73 = tpu.matmul %71, %72, %cst_58 {dimension_numbers = #tpu.dot_dimension_numbers<[1], [0], [0], [1], [0, 0, 1, 1], [], []>} : vector<6x10xbf16>, vector<10x10xbf16>, vector<6x10xf32> -> vector<6x10xf32>
    %c0_59 = arith.constant 0 : index
    %c0_60 = arith.constant 0 : index
    %74 = vector.load %arg8[%c0_59, %c0_60] : memref<1x10xf32, #tpu.memory_space<vmem>>, vector<1x10xf32>
    %75 = vector.broadcast %74 : vector<1x10xf32> to vector<6x10xf32>
    %76 = arith.addf %73, %75 : vector<6x10xf32>
    %cst_61 = arith.constant 0.000000e+00 : f32
    %77 = vector.broadcast %cst_61 : f32 to vector<6x10xf32>
    %78 = arith.maximumf %76, %77 : vector<6x10xf32>
    %c0_62 = arith.constant 0 : index
    %c0_63 = arith.constant 0 : index
    %79 = vector.load %arg9[%c0_62, %c0_63] : memref<1x10xf32, #tpu.memory_space<vmem>>, vector<1x10xf32>
    %80 = vector.broadcast %79 : vector<1x10xf32> to vector<6x10xf32>
    %81 = arith.mulf %78, %80 : vector<6x10xf32>
    %cst_64 = arith.constant dense<0.000000e+00> : vector<6xf32>
    %82 = vector.multi_reduction <add>, %81, %cst_64 [1] : vector<6x10xf32> to vector<6xf32>
    %83 = vector.shape_cast %82 : vector<6xf32> to vector<6x1xf32>
    %c0_65 = arith.constant 0 : index
    %c0_66 = arith.constant 0 : index
    %84 = vector.load %arg10[%c0_65, %c0_66] : memref<1x1xf32, #tpu.memory_space<vmem>>, vector<1x1xf32>
    %85 = vector.broadcast %84 : vector<1x1xf32> to vector<6x1xf32>
    %86 = arith.addf %83, %85 : vector<6x1xf32>
    %c0_67 = arith.constant 0 : index
    %c2_68 = arith.constant 2 : index
    %c0_69 = arith.constant 0 : index
    %c0_70 = arith.constant 0 : index
    %87 = vector.load %arg2[%c0_67, %c2_68, %c0_69, %c0_70] : memref<1x4x6x32xf32, #tpu.memory_space<vmem>>, vector<1x1x6x32xf32>
    %88 = vector.shape_cast %87 : vector<1x1x6x32xf32> to vector<6x32xf32>
    %89 = vector.broadcast %86 : vector<6x1xf32> to vector<6x32xf32>
    %90 = arith.mulf %89, %88 : vector<6x32xf32>
    %91 = arith.addf %60, %90 : vector<6x32xf32>
    %c0_71 = arith.constant 0 : index
    %c3 = arith.constant 3 : index
    %c0_72 = arith.constant 0 : index
    %c0_73 = arith.constant 0 : index
    %92 = vector.load %arg1[%c0_71, %c3, %c0_72, %c0_73] : memref<1x4x6x10xf32, #tpu.memory_space<vmem>>, vector<1x1x6x10xf32>
    %93 = vector.shape_cast %92 : vector<1x1x6x10xf32> to vector<6x10xf32>
    %94 = arith.truncf %93 : vector<6x10xf32> to vector<6x10xbf16>
    %c0_74 = arith.constant 0 : index
    %c0_75 = arith.constant 0 : index
    %95 = vector.load %arg5[%c0_74, %c0_75] : memref<10x10xbf16, #tpu.memory_space<vmem>>, vector<10x10xbf16>
    %cst_76 = arith.constant dense<0.000000e+00> : vector<6x10xf32>
    %96 = tpu.matmul %94, %95, %cst_76 {dimension_numbers = #tpu.dot_dimension_numbers<[1], [0], [0], [1], [0, 0, 1, 1], [], []>} : vector<6x10xbf16>, vector<10x10xbf16>, vector<6x10xf32> -> vector<6x10xf32>
    %c0_77 = arith.constant 0 : index
    %c0_78 = arith.constant 0 : index
    %97 = vector.load %arg6[%c0_77, %c0_78] : memref<1x10xf32, #tpu.memory_space<vmem>>, vector<1x10xf32>
    %98 = vector.broadcast %97 : vector<1x10xf32> to vector<6x10xf32>
    %99 = arith.addf %96, %98 : vector<6x10xf32>
    %cst_79 = arith.constant 0.000000e+00 : f32
    %100 = vector.broadcast %cst_79 : f32 to vector<6x10xf32>
    %101 = arith.maximumf %99, %100 : vector<6x10xf32>
    %102 = arith.truncf %101 : vector<6x10xf32> to vector<6x10xbf16>
    %c0_80 = arith.constant 0 : index
    %c0_81 = arith.constant 0 : index
    %103 = vector.load %arg7[%c0_80, %c0_81] : memref<10x10xbf16, #tpu.memory_space<vmem>>, vector<10x10xbf16>
    %cst_82 = arith.constant dense<0.000000e+00> : vector<6x10xf32>
    %104 = tpu.matmul %102, %103, %cst_82 {dimension_numbers = #tpu.dot_dimension_numbers<[1], [0], [0], [1], [0, 0, 1, 1], [], []>} : vector<6x10xbf16>, vector<10x10xbf16>, vector<6x10xf32> -> vector<6x10xf32>
    %c0_83 = arith.constant 0 : index
    %c0_84 = arith.constant 0 : index
    %105 = vector.load %arg8[%c0_83, %c0_84] : memref<1x10xf32, #tpu.memory_space<vmem>>, vector<1x10xf32>
    %106 = vector.broadcast %105 : vector<1x10xf32> to vector<6x10xf32>
    %107 = arith.addf %104, %106 : vector<6x10xf32>
    %cst_85 = arith.constant 0.000000e+00 : f32
    %108 = vector.broadcast %cst_85 : f32 to vector<6x10xf32>
    %109 = arith.maximumf %107, %108 : vector<6x10xf32>
    %c0_86 = arith.constant 0 : index
    %c0_87 = arith.constant 0 : index
    %110 = vector.load %arg9[%c0_86, %c0_87] : memref<1x10xf32, #tpu.memory_space<vmem>>, vector<1x10xf32>
    %111 = vector.broadcast %110 : vector<1x10xf32> to vector<6x10xf32>
    %112 = arith.mulf %109, %111 : vector<6x10xf32>
    %cst_88 = arith.constant dense<0.000000e+00> : vector<6xf32>
    %113 = vector.multi_reduction <add>, %112, %cst_88 [1] : vector<6x10xf32> to vector<6xf32>
    %114 = vector.shape_cast %113 : vector<6xf32> to vector<6x1xf32>
    %c0_89 = arith.constant 0 : index
    %c0_90 = arith.constant 0 : index
    %115 = vector.load %arg10[%c0_89, %c0_90] : memref<1x1xf32, #tpu.memory_space<vmem>>, vector<1x1xf32>
    %116 = vector.broadcast %115 : vector<1x1xf32> to vector<6x1xf32>
    %117 = arith.addf %114, %116 : vector<6x1xf32>
    %c0_91 = arith.constant 0 : index
    %c3_92 = arith.constant 3 : index
    %c0_93 = arith.constant 0 : index
    %c0_94 = arith.constant 0 : index
    %118 = vector.load %arg2[%c0_91, %c3_92, %c0_93, %c0_94] : memref<1x4x6x32xf32, #tpu.memory_space<vmem>>, vector<1x1x6x32xf32>
    %119 = vector.shape_cast %118 : vector<1x1x6x32xf32> to vector<6x32xf32>
    %120 = vector.broadcast %117 : vector<6x1xf32> to vector<6x32xf32>
    %121 = arith.mulf %120, %119 : vector<6x32xf32>
    %122 = arith.addf %91, %121 : vector<6x32xf32>
    %123 = arith.truncf %122 : vector<6x32xf32> to vector<6x32xbf16>
    %c0_95 = arith.constant 0 : index
    %c0_96 = arith.constant 0 : index
    %124 = vector.load %arg11[%c0_95, %c0_96] : memref<32x32xbf16, #tpu.memory_space<vmem>>, vector<32x32xbf16>
    %cst_97 = arith.constant dense<0.000000e+00> : vector<6x32xf32>
    %125 = tpu.matmul %123, %124, %cst_97 {dimension_numbers = #tpu.dot_dimension_numbers<[1], [0], [0], [1], [0, 0, 1, 1], [], []>} : vector<6x32xbf16>, vector<32x32xbf16>, vector<6x32xf32> -> vector<6x32xf32>
    %c0_98 = arith.constant 0 : index
    %c0_99 = arith.constant 0 : index
    %126 = vector.load %arg12[%c0_98, %c0_99] : memref<1x32xf32, #tpu.memory_space<vmem>>, vector<1x32xf32>
    %127 = vector.broadcast %126 : vector<1x32xf32> to vector<6x32xf32>
    %128 = arith.addf %125, %127 : vector<6x32xf32>
    %cst_100 = arith.constant 0.000000e+00 : f32
    %129 = vector.broadcast %cst_100 : f32 to vector<6x32xf32>
    %130 = arith.cmpf oge, %128, %129 : vector<6x32xf32>
    %cst_101 = arith.constant 2.000000e-01 : f32
    %131 = vector.broadcast %cst_101 : f32 to vector<6x32xf32>
    %132 = arith.mulf %131, %128 : vector<6x32xf32>
    %133 = arith.select %130, %128, %132 : vector<6x32xi1>, vector<6x32xf32>
    %cst_102 = arith.constant dense<0xFF800000> : vector<32xf32>
    %134 = vector.multi_reduction <maximumf>, %133, %cst_102 [0] : vector<6x32xf32> to vector<32xf32>
    %135 = vector.shape_cast %134 : vector<32xf32> to vector<1x32xf32>
    %c0_103 = arith.constant 0 : index
    %c0_104 = arith.constant 0 : index
    %c0_105 = arith.constant 0 : index
    %136 = vector.load %arg3[%c0_103, %c0_104, %c0_105] : memref<1x1x32xf32, #tpu.memory_space<vmem>>, vector<1x1x32xf32>
    %137 = vector.shape_cast %136 : vector<1x1x32xf32> to vector<1x32xf32>
    %138 = arith.truncf %137 : vector<1x32xf32> to vector<1x32xbf16>
    %c0_106 = arith.constant 0 : index
    %c0_107 = arith.constant 0 : index
    %139 = vector.load %arg13[%c0_106, %c0_107] : memref<32x32xbf16, #tpu.memory_space<vmem>>, vector<32x32xbf16>
    %cst_108 = arith.constant dense<0.000000e+00> : vector<1x32xf32>
    %140 = tpu.matmul %138, %139, %cst_108 {dimension_numbers = #tpu.dot_dimension_numbers<[1], [0], [0], [1], [0, 0, 1, 1], [], []>} : vector<1x32xbf16>, vector<32x32xbf16>, vector<1x32xf32> -> vector<1x32xf32>
    %c0_109 = arith.constant 0 : index
    %c0_110 = arith.constant 0 : index
    %c0_111 = arith.constant 0 : index
    %141 = vector.load %arg4[%c0_109, %c0_110, %c0_111] : memref<1x1x32xf32, #tpu.memory_space<vmem>>, vector<1x1x32xf32>
    %142 = vector.shape_cast %141 : vector<1x1x32xf32> to vector<1x32xf32>
    %143 = arith.truncf %142 : vector<1x32xf32> to vector<1x32xbf16>
    %c0_112 = arith.constant 0 : index
    %c0_113 = arith.constant 0 : index
    %144 = vector.load %arg14[%c0_112, %c0_113] : memref<32x32xbf16, #tpu.memory_space<vmem>>, vector<32x32xbf16>
    %cst_114 = arith.constant dense<0.000000e+00> : vector<1x32xf32>
    %145 = tpu.matmul %143, %144, %cst_114 {dimension_numbers = #tpu.dot_dimension_numbers<[1], [0], [0], [1], [0, 0, 1, 1], [], []>} : vector<1x32xbf16>, vector<32x32xbf16>, vector<1x32xf32> -> vector<1x32xf32>
    %146 = arith.addf %140, %145 : vector<1x32xf32>
    %147 = arith.truncf %135 : vector<1x32xf32> to vector<1x32xbf16>
    %c0_115 = arith.constant 0 : index
    %c0_116 = arith.constant 0 : index
    %148 = vector.load %arg15[%c0_115, %c0_116] : memref<32x32xbf16, #tpu.memory_space<vmem>>, vector<32x32xbf16>
    %cst_117 = arith.constant dense<0.000000e+00> : vector<1x32xf32>
    %149 = tpu.matmul %147, %148, %cst_117 {dimension_numbers = #tpu.dot_dimension_numbers<[1], [0], [0], [1], [0, 0, 1, 1], [], []>} : vector<1x32xbf16>, vector<32x32xbf16>, vector<1x32xf32> -> vector<1x32xf32>
    %150 = arith.addf %146, %149 : vector<1x32xf32>
    %c0_118 = arith.constant 0 : index
    %c0_119 = arith.constant 0 : index
    %151 = vector.load %arg16[%c0_118, %c0_119] : memref<1x32xf32, #tpu.memory_space<vmem>>, vector<1x32xf32>
    %152 = arith.addf %150, %151 : vector<1x32xf32>
    %cst_120 = arith.constant 0.000000e+00 : f32
    %153 = vector.broadcast %cst_120 : f32 to vector<1x32xf32>
    %154 = arith.cmpf oge, %152, %153 : vector<1x32xf32>
    %cst_121 = arith.constant 2.000000e-01 : f32
    %155 = vector.broadcast %cst_121 : f32 to vector<1x32xf32>
    %156 = arith.mulf %155, %152 : vector<1x32xf32>
    %157 = arith.select %154, %152, %156 : vector<1x32xi1>, vector<1x32xf32>
    %158 = arith.truncf %157 : vector<1x32xf32> to vector<1x32xbf16>
    %c0_122 = arith.constant 0 : index
    %c0_123 = arith.constant 0 : index
    %159 = vector.load %arg17[%c0_122, %c0_123] : memref<32x32xbf16, #tpu.memory_space<vmem>>, vector<32x32xbf16>
    %cst_124 = arith.constant dense<0.000000e+00> : vector<1x32xf32>
    %160 = tpu.matmul %158, %159, %cst_124 {dimension_numbers = #tpu.dot_dimension_numbers<[1], [0], [0], [1], [0, 0, 1, 1], [], []>} : vector<1x32xbf16>, vector<32x32xbf16>, vector<1x32xf32> -> vector<1x32xf32>
    %c0_125 = arith.constant 0 : index
    %c0_126 = arith.constant 0 : index
    %161 = vector.load %arg18[%c0_125, %c0_126] : memref<1x32xf32, #tpu.memory_space<vmem>>, vector<1x32xf32>
    %162 = arith.addf %160, %161 : vector<1x32xf32>
    %cst_127 = arith.constant 0.000000e+00 : f32
    %163 = vector.broadcast %cst_127 : f32 to vector<1x32xf32>
    %164 = arith.cmpf oge, %162, %163 : vector<1x32xf32>
    %cst_128 = arith.constant 2.000000e-01 : f32
    %165 = vector.broadcast %cst_128 : f32 to vector<1x32xf32>
    %166 = arith.mulf %165, %162 : vector<1x32xf32>
    %167 = arith.select %164, %162, %166 : vector<1x32xi1>, vector<1x32xf32>
    %168 = arith.truncf %167 : vector<1x32xf32> to vector<1x32xbf16>
    %c0_129 = arith.constant 0 : index
    %c0_130 = arith.constant 0 : index
    %169 = vector.load %arg19[%c0_129, %c0_130] : memref<32x2xbf16, #tpu.memory_space<vmem>>, vector<32x2xbf16>
    %cst_131 = arith.constant dense<0.000000e+00> : vector<1x2xf32>
    %170 = tpu.matmul %168, %169, %cst_131 {dimension_numbers = #tpu.dot_dimension_numbers<[1], [0], [0], [1], [0, 0, 1, 1], [], []>} : vector<1x32xbf16>, vector<32x2xbf16>, vector<1x2xf32> -> vector<1x2xf32>
    %c0_132 = arith.constant 0 : index
    %c0_133 = arith.constant 0 : index
    %171 = vector.load %arg20[%c0_132, %c0_133] : memref<1x2xf32, #tpu.memory_space<vmem>>, vector<1x2xf32>
    %172 = arith.addf %170, %171 : vector<1x2xf32>
    %c0_134 = arith.constant 0 : index
    %c0_135 = arith.constant 0 : index
    %c0_136 = arith.constant 0 : index
    %173 = vector.load %arg21[%c0_134, %c0_135, %c0_136] : memref<1x1x2xf32, #tpu.memory_space<vmem>>, vector<1x1x2xf32>
    %174 = vector.shape_cast %173 : vector<1x1x2xf32> to vector<1x2xf32>
    %175 = vector.shape_cast %172 : vector<1x2xf32> to vector<1x1x2xf32>
    tpu.vector_store %arg21[%c0_134, %c0_135, %c0_136], %175 {strides = array<i32>} : memref<1x1x2xf32, #tpu.memory_space<vmem>>, vector<1x1x2xf32>,
    return
  }
  func.func @transform_0(%arg0: i32) -> (i32, i32, i32, i32) {
    %c0_i32 = arith.constant 0 : i32
    %c0_i32_0 = arith.constant 0 : i32
    %c0_i32_1 = arith.constant 0 : i32
    %c0_i32_2 = arith.constant 0 : i32
    return %arg0, %c0_i32, %c0_i32_0, %c0_i32_1 : i32, i32, i32, i32
  }
  func.func @transform_1(%arg0: i32) -> (i32, i32, i32, i32) {
    %c0_i32 = arith.constant 0 : i32
    %c0_i32_0 = arith.constant 0 : i32
    %c0_i32_1 = arith.constant 0 : i32
    %c0_i32_2 = arith.constant 0 : i32
    return %arg0, %c0_i32, %c0_i32_0, %c0_i32_1 : i32, i32, i32, i32
  }
  func.func @transform_2(%arg0: i32) -> (i32, i32, i32) {
    %c0_i32 = arith.constant 0 : i32
    %c0_i32_0 = arith.constant 0 : i32
    %c0_i32_1 = arith.constant 0 : i32
    return %arg0, %c0_i32, %c0_i32_0 : i32, i32, i32
  }
  func.func @transform_3(%arg0: i32) -> (i32, i32, i32) {
    %c0_i32 = arith.constant 0 : i32
    %c0_i32_0 = arith.constant 0 : i32
    %c0_i32_1 = arith.constant 0 : i32
    return %arg0, %c0_i32, %c0_i32_0 : i32, i32, i32
  }
  func.func @transform_4(%arg0: i32) -> (i32, i32) {
    %c0_i32 = arith.constant 0 : i32
    %c0_i32_0 = arith.constant 0 : i32
    %c0_i32_1 = arith.constant 0 : i32
    return %c0_i32, %c0_i32_0 : i32, i32
  }
  func.func @transform_5(%arg0: i32) -> (i32, i32) {
    %c0_i32 = arith.constant 0 : i32
    %c0_i32_0 = arith.constant 0 : i32
    %c0_i32_1 = arith.constant 0 : i32
    return %c0_i32, %c0_i32_0 : i32, i32
  }
  func.func @transform_6(%arg0: i32) -> (i32, i32) {
    %c0_i32 = arith.constant 0 : i32
    %c0_i32_0 = arith.constant 0 : i32
    %c0_i32_1 = arith.constant 0 : i32
    return %c0_i32, %c0_i32_0 : i32, i32
  }
  func.func @transform_7(%arg0: i32) -> (i32, i32) {
    %c0_i32 = arith.constant 0 : i32
    %c0_i32_0 = arith.constant 0 : i32
    %c0_i32_1 = arith.constant 0 : i32
    return %c0_i32, %c0_i32_0 : i32, i32
  }
  func.func @transform_8(%arg0: i32) -> (i32, i32) {
    %c0_i32 = arith.constant 0 : i32
    %c0_i32_0 = arith.constant 0 : i32
    %c0_i32_1 = arith.constant 0 : i32
    return %c0_i32, %c0_i32_0 : i32, i32
  }
  func.func @transform_9(%arg0: i32) -> (i32, i32) {
    %c0_i32 = arith.constant 0 : i32
    %c0_i32_0 = arith.constant 0 : i32
    %c0_i32_1 = arith.constant 0 : i32
    return %c0_i32, %c0_i32_0 : i32, i32
  }
  func.func @transform_10(%arg0: i32) -> (i32, i32) {
    %c0_i32 = arith.constant 0 : i32
    %c0_i32_0 = arith.constant 0 : i32
    %c0_i32_1 = arith.constant 0 : i32
    return %c0_i32, %c0_i32_0 : i32, i32
  }
  func.func @transform_11(%arg0: i32) -> (i32, i32) {
    %c0_i32 = arith.constant 0 : i32
    %c0_i32_0 = arith.constant 0 : i32
    %c0_i32_1 = arith.constant 0 : i32
    return %c0_i32, %c0_i32_0 : i32, i32
  }
  func.func @transform_12(%arg0: i32) -> (i32, i32) {
    %c0_i32 = arith.constant 0 : i32
    %c0_i32_0 = arith.constant 0 : i32
    %c0_i32_1 = arith.constant 0 : i32
    return %c0_i32, %c0_i32_0 : i32, i32
  }
  func.func @transform_13(%arg0: i32) -> (i32, i32) {
    %c0_i32 = arith.constant 0 : i32
    %c0_i32_0 = arith.constant 0 : i32
    %c0_i32_1 = arith.constant 0 : i32
    return %c0_i32, %c0_i32_0 : i32, i32
  }
  func.func @transform_14(%arg0: i32) -> (i32, i32) {
    %c0_i32 = arith.constant 0 : i32
    %c0_i32_0 = arith.constant 0 : i32
    %c0_i32_1 = arith.constant 0 : i32
    return %c0_i32, %c0_i32_0 : i32, i32
  }
  func.func @transform_15(%arg0: i32) -> (i32, i32) {
    %c0_i32 = arith.constant 0 : i32
    %c0_i32_0 = arith.constant 0 : i32
    %c0_i32_1 = arith.constant 0 : i32
    return %c0_i32, %c0_i32_0 : i32, i32
  }
  func.func @transform_16(%arg0: i32) -> (i32, i32) {
    %c0_i32 = arith.constant 0 : i32
    %c0_i32_0 = arith.constant 0 : i32
    %c0_i32_1 = arith.constant 0 : i32
    return %c0_i32, %c0_i32_0 : i32, i32
  }
  func.func @transform_17(%arg0: i32) -> (i32, i32) {
    %c0_i32 = arith.constant 0 : i32
    %c0_i32_0 = arith.constant 0 : i32
    %c0_i32_1 = arith.constant 0 : i32
    return %c0_i32, %c0_i32_0 : i32, i32
  }
  func.func @transform_18(%arg0: i32) -> (i32, i32) {
    %c0_i32 = arith.constant 0 : i32
    %c0_i32_0 = arith.constant 0 : i32
    %c0_i32_1 = arith.constant 0 : i32
    return %c0_i32, %c0_i32_0 : i32, i32
  }
  func.func @transform_19(%arg0: i32) -> (i32, i32) {
    %c0_i32 = arith.constant 0 : i32
    %c0_i32_0 = arith.constant 0 : i32
    %c0_i32_1 = arith.constant 0 : i32
    return %c0_i32, %c0_i32_0 : i32, i32
  }
  func.func @transform_20(%arg0: i32) -> (i32, i32, i32) {
    %c0_i32 = arith.constant 0 : i32
    %c0_i32_0 = arith.constant 0 : i32
    %c0_i32_1 = arith.constant 0 : i32
    return %arg0, %c0_i32, %c0_i32_0 : i32, i32, i32
  }
}

</mosaic_0001>

<bundles_post_ra>
// kernel: neg.3
= control target key start
LH: loop header
LB: loop body
LE: loop exit
PB: predicated region body
PF: predicated region fallthrough
CT: control target
= control target key end

     0   :  { %s200_s0 = inlined_call_operand.vmem [shape: f32[2,12,12], index: 0, kind: input, shape index: {}]   ;;  %s201_s1 = inlined_call_operand.vmem [shape: f32[2,12,12], index: 1, kind: output, shape index: {}]  }
   0x1   :  { %v2_v0 = vld [vmem:[%s200_s0] sm:$0x3]  ;;  %v96_v1 = vld [vmem:[%s200_s0 + $0x2] sm:$0x3]  ;;  %v98_v2 = vld [vmem:[%s200_s0 + $0x4] sm:$0x3] }
   0x2   :  { %v5_v3 = vxor.u32 2147483648, %v2_v0  ;;  %v12_v4 = vxor.u32 2147483648, %v96_v1  ;;  %v20_v5 = vxor.u32 2147483648, %v98_v2  ;;  %v100_v6 = vld [vmem:[%s200_s0 + $0x6] sm:$0x3] }
   0x3   :  { %v28_v7 = vxor.u32 2147483648, %v100_v6  ;;  %v102_v8 = vld [vmem:[%s200_s0 + $0x8] sm:$0x3]  ;;  %v104_v9 = vld [vmem:[%s200_s0 + $0xa] sm:$0x3] }
   0x4   :  { %7 = vst [vmem:[%s201_s1] sm:$0x3] %v5_v3  ;;  %97 = vst [vmem:[%s201_s1 + $0x2] sm:$0x3] %v12_v4  ;;  %v36_v10 = vxor.u32 2147483648, %v102_v8  ;;  %v44_v11 = vxor.u32 2147483648, %v104_v9 }
   0x5   :  { %99 = vst [vmem:[%s201_s1 + $0x4] sm:$0x3] %v20_v5  ;;  %v106_v12 = vld [vmem:[%s200_s0 + $0xc] sm:$0x3]  ;;  %v108_v13 = vld [vmem:[%s200_s0 + $0xe] sm:$0x3] }
   0x6   :  { %101 = vst [vmem:[%s201_s1 + $0x6] sm:$0x3] %v28_v7  ;;  %v52_v14 = vxor.u32 2147483648, %v106_v12  ;;  %v60_v15 = vxor.u32 2147483648, %v108_v13  ;;  %v110_v16 = vld [vmem:[%s200_s0 + $0x10] sm:$0x3] }
   0x7   :  { %v112_v17 = vld [vmem:[%s200_s0 + $0x12] sm:$0x3]  ;;  %103 = vst [vmem:[%s201_s1 + $0x8] sm:$0x3] %v36_v10  ;;  %105 = vst [vmem:[%s201_s1 + $0xa] sm:$0x3] %v44_v11 }
   0x8   :  { %v68_v18 = vxor.u32 2147483648, %v110_v16  ;;  %v76_v19 = vxor.u32 2147483648, %v112_v17  ;;  %v114_v20 = vld [vmem:[%s200_s0 + $0x14] sm:$0x3]  ;;  %v116_v21 = vld [vmem:[%s200_s0 + $0x16] sm:$0x3] }
   0x9   :  { %107 = vst [vmem:[%s201_s1 + $0xc] sm:$0x3] %v52_v14  ;;  %109 = vst [vmem:[%s201_s1 + $0xe] sm:$0x3] %v60_v15  ;;  %v84_v22 = vxor.u32 2147483648, %v114_v20  ;;  %v92_v23 = vxor.u32 2147483648, %v116_v21 }
   0xa   :  { %111 = vst [vmem:[%s201_s1 + $0x10] sm:$0x3] %v68_v18  ;;  %113 = vst [vmem:[%s201_s1 + $0x12] sm:$0x3] %v76_v19 }
   0xb   :  { %115 = vst [vmem:[%s201_s1 + $0x14] sm:$0x3] %v84_v22  ;;  %117 = vst [vmem:[%s201_s1 + $0x16] sm:$0x3] %v92_v23 }

// kernel: forward.6
= control target key start
LH: loop header
LB: loop body
LE: loop exit
PB: predicated region body
PF: predicated region fallthrough
CT: control target
= control target key end

     0   :  { %v1065_v1 = vmov 0   ;;  %vm727_vm2 = vcmask 523264   ;;  %vm816_vm3 = vcmask 785408   ;;  %s1411_s1 = inlined_call_operand.vmem [shape: bf16[384,192], index: 1, kind: input, shape index: {}]   ;;  %s1412_s0 = inlined_call_operand.vmem [shape: f32[8,384], index: 0, kind: input, shape index: {}]   ;;  %s1413_s3 = inlined_call_operand.vmem [shape: bf16[192,480], index: 3, kind: input, shape index: {}]   ;;  %s1414_s2 = inlined_call_operand.vmem [shape: f32[1,192], index: 2, kind: input, shape index: {}]   ;;  %s1415_s4 = inlined_call_operand.vmem [shape: f32[1,480], index: 4, kind: input, shape index: {}]   ;;  %s1416_s5 = inlined_call_operand.vmem [shape: f32[8,480], index: 5, kind: output, shape index: {}]  }
   0x1   :  { %v921_v0 = vld [vmem:[%s1411_s1 + $0x74] ss:$8 sps:$4 sm:$0xff]   ;;  %400 = vmatprep.mubr.bf16.mxu1 %v1065_v1  ;;  %v923_v2 = vld [vmem:[%s1411_s1 + $0x70] ss:$8 sps:$4 sm:$0xff]   ;;  %v924_v3 = vld [vmem:[%s1411_s1 + $0x64] ss:$8 sps:$4 sm:$0xff]  }
   0x2   :  { %327 = vmatprep.subr.bf16.mxu0 %v921_v0  ;;  %v926_v4 = vld [vmem:[%s1411_s1 + $0x60] ss:$8 sps:$4 sm:$0xff]   ;;  %v927_v5 = vld [vmem:[%s1411_s1 + $0x54] ss:$8 sps:$4 sm:$0xff]   ;;  %v929_v6 = vld [vmem:[%s1411_s1 + $0x50] ss:$8 sps:$4 sm:$0xff]  }
   0x3   :  { %328 = vmatpush1.bf16.msra.mxu0 %v923_v2  ;;  %v930_v7 = vld [vmem:[%s1411_s1 + $0x44] ss:$8 sps:$4 sm:$0xff]   ;;  %v932_v8 = vld [vmem:[%s1411_s1 + $0x40] ss:$8 sps:$4 sm:$0xff]   ;;  %v944_v9 = vld [vmem:[%s1411_s1 + $0x174] ss:$8 sps:$4 sm:$0xff]  }
   0x4   :  { %329 = vmatprep.subr.bf16.mxu0 %v924_v3  ;;  %v947_v10 = vld [vmem:[%s1411_s1 + $0x170] ss:$8 sps:$4 sm:$0xff]   ;;  %v933_v11 = vld [vmem:[%s1411_s1 + $0x34] ss:$8 sps:$4 sm:$0xff]   ;;  %368 = vmatprep.subr.bf16.mxu1 %v944_v9  ;;  %v950_v12 = vld [vmem:[%s1411_s1 + $0x164] ss:$8 sps:$4 sm:$0xff]  }
   0x5   :  { %369 = vmatpush1.bf16.msra.mxu1 %v947_v10  ;;  %v953_v13 = vld [vmem:[%s1411_s1 + $0x160] ss:$8 sps:$4 sm:$0xff]   ;;  %v935_v14 = vld [vmem:[%s1411_s1 + $0x30] ss:$8 sps:$4 sm:$0xff]   ;;  %v936_v15 = vld [vmem:[%s1411_s1 + $0x24] ss:$8 sps:$4 sm:$0xff]  }
   0x6   :  { %370 = vmatprep.subr.bf16.mxu1 %v950_v12  ;;  %v956_v16 = vld [vmem:[%s1411_s1 + $0x154] ss:$8 sps:$4 sm:$0xff]   ;;  %v959_v17 = vld [vmem:[%s1411_s1 + $0x150] ss:$8 sps:$4 sm:$0xff]   ;;  %v938_v18 = vld [vmem:[%s1411_s1 + $0x20] ss:$8 sps:$4 sm:$0xff]  }
   0x7   :  { %330 = vmatpush1.bf16.msra.mxu0 %v926_v4  ;;  %v962_v19 = vld [vmem:[%s1411_s1 + $0x144] ss:$8 sps:$4 sm:$0xff]   ;;  %v939_v20 = vld [vmem:[%s1411_s1 + $0x14] ss:$8 sps:$4 sm:$0xff]   ;;  %v941_v21 = vld [vmem:[%s1411_s1 + $0x10] ss:$8 sps:$4 sm:$0xff]  }
   0x8   :  { %331 = vmatprep.subr.bf16.mxu0 %v927_v5  ;;  %v965_v22 = vld [vmem:[%s1411_s1 + $0x140] ss:$8 sps:$4 sm:$0xff]   ;;  %v968_v23 = vld [vmem:[%s1411_s1 + $0x134] ss:$8 sps:$4 sm:$0xff]   ;;  %v942_v24 = vld [vmem:[%s1411_s1 + $0x4] ss:$8 sps:$4 sm:$0xff]  }
   0x9   :  { %371 = vmatpush1.bf16.msra.mxu1 %v953_v13  ;;  %v971_v25 = vld [vmem:[%s1411_s1 + $0x130] ss:$8 sps:$4 sm:$0xff]   ;;  %v946_v26 = vld [vmem:[%s1411_s1] ss:$8 sps:$4 sm:$0xff]   ;;  %v974_v27 = vld [vmem:[%s1411_s1 + $0x124] ss:$8 sps:$4 sm:$0xff]  }
   0xa   :  { %372 = vmatprep.subr.bf16.mxu1 %v956_v16  ;;  %v948_v28 = vld [vmem:[%s1411_s1 + $0xf4] ss:$8 sps:$4 sm:$0xff]   ;;  %v977_v29 = vld [vmem:[%s1411_s1 + $0x120] ss:$8 sps:$4 sm:$0xff]   ;;  %v952_v30 = vld [vmem:[%s1411_s1 + $0xf0] ss:$8 sps:$4 sm:$0xff]  }
   0xb   :  { %332 = vmatpush1.bf16.msra.mxu0 %v929_v6  ;;  %v980_v31 = vld [vmem:[%s1411_s1 + $0x114] ss:$8 sps:$4 sm:$0xff]   ;;  %v954_v32 = vld [vmem:[%s1411_s1 + $0xe4] ss:$8 sps:$4 sm:$0xff]   ;;  %v983_v35 = vld [vmem:[%s1411_s1 + $0x110] ss:$8 sps:$4 sm:$0xff]  }
   0xc   :  { %333 = vmatprep.subr.bf16.mxu0 %v930_v7  ;;  %v22_v33 = vld [vmem:[%s1412_s0 + $0x8] sm:$0xff]  ;;  %v960_v38 = vld [vmem:[%s1411_s1 + $0xd4] ss:$8 sps:$4 sm:$0xff]   ;;  %v964_v41 = vld [vmem:[%s1411_s1 + $0xd0] ss:$8 sps:$4 sm:$0xff]  }
   0xd   :  { %373 = vmatpush1.bf16.msra.mxu1 %v959_v17  ;;  %v25_v34 = vpack.c.bf16 %v22_v33, %v22_v33  ;;  %v958_v36 = vld [vmem:[%s1411_s1 + $0xe0] ss:$8 sps:$4 sm:$0xff]   ;;  %v986_v37 = vld [vmem:[%s1411_s1 + $0x104] ss:$8 sps:$4 sm:$0xff]   ;;  %v23_v40 = vld [vmem:[%s1412_s0 + $0x10] sm:$0xff] }
   0xe   :  { %374 = vmatprep.subr.bf16.mxu1 %v962_v19  ;;  %v989_v39 = vld [vmem:[%s1411_s1 + $0x100] ss:$8 sps:$4 sm:$0xff]   ;;  %v995_v42 = vld [vmem:[%s1413_s3 + $0xe4] ss:$16 sps:$4 sm:$0xff]   ;;  %v26_v44 = vpack.c.bf16 %v23_v40, %v23_v40  ;;  %v976_v50 = vld [vmem:[%s1411_s1 + $0xb0] ss:$8 sps:$4 sm:$0xff]  }
   0xf   :  { %334 = vmatpush1.bf16.msra.mxu0 %v932_v8  ;;  %359 = vmatprep.mubr.bf16.mxu0 %v25_v34  ;;  %v966_v43 = vld [vmem:[%s1411_s1 + $0xc4] ss:$8 sps:$4 sm:$0xff]   ;;  %v993_v45 = vld [vmem:[%s1413_s3 + $0xe0] ss:$16 sps:$4 sm:$0xff]   ;;  %v972_v48 = vld [vmem:[%s1411_s1 + $0xb4] ss:$8 sps:$4 sm:$0xff]  }
  0x10   :  { %335 = vmatprep.subr.bf16.mxu0 %v933_v11  ;;  %v970_v46 = vld [vmem:[%s1411_s1 + $0xc0] ss:$8 sps:$4 sm:$0xff]   ;;  %v1001_v47 = vld [vmem:[%s1413_s3 + $0xc4] ss:$16 sps:$4 sm:$0xff]   ;;  %v988_v57 = vld [vmem:[%s1411_s1 + $0x90] ss:$8 sps:$4 sm:$0xff]  }
  0x11   :  { %375 = vmatpush1.bf16.msra.mxu1 %v965_v22  ;;  %v999_v49 = vld [vmem:[%s1413_s3 + $0xc0] ss:$16 sps:$4 sm:$0xff]   ;;  %v1007_v51 = vld [vmem:[%s1413_s3 + $0xa4] ss:$16 sps:$4 sm:$0xff]   ;;  %v998_v1 = vld [vmem:[%s1413_s3 + $0xec] ss:$16 sps:$4 sm:$0xff]  }
  0x12   :  { %376 = vmatprep.subr.bf16.mxu1 %v968_v23  ;;  %v978_v52 = vld [vmem:[%s1411_s1 + $0xa4] ss:$8 sps:$4 sm:$0xff]   ;;  %v1005_v53 = vld [vmem:[%s1413_s3 + $0xa0] ss:$16 sps:$4 sm:$0xff]   ;;  %v984_v56 = vld [vmem:[%s1411_s1 + $0x94] ss:$8 sps:$4 sm:$0xff]  }
  0x13   :  { %336 = vmatpush1.bf16.msra.mxu0 %v935_v14  ;;  %v982_v54 = vld [vmem:[%s1411_s1 + $0xa0] ss:$8 sps:$4 sm:$0xff]   ;;  %v1013_v55 = vld [vmem:[%s1413_s3 + $0x84] ss:$16 sps:$4 sm:$0xff]   ;;  %v1004_v6 = vld [vmem:[%s1413_s3 + $0xcc] ss:$16 sps:$4 sm:$0xff]  }
  0x14   :  { %337 = vmatprep.subr.bf16.mxu0 %v936_v15  ;;  %v1011_v58 = vld [vmem:[%s1413_s3 + $0x80] ss:$16 sps:$4 sm:$0xff]   ;;  %v990_v59 = vld [vmem:[%s1411_s1 + $0x84] ss:$8 sps:$4 sm:$0xff]   ;;  %v996_v4 = vld [vmem:[%s1413_s3 + $0xe8] ss:$16 sps:$4 sm:$0xff]  }
  0x15   :  { %377 = vmatpush1.bf16.msra.mxu1 %v971_v25  ;;  %v1019_v60 = vld [vmem:[%s1413_s3 + $0x64] ss:$16 sps:$4 sm:$0xff]   ;;  %v1017_v61 = vld [vmem:[%s1413_s3 + $0x60] ss:$16 sps:$4 sm:$0xff]   ;;  %v1002_v8 = vld [vmem:[%s1413_s3 + $0xc8] ss:$16 sps:$4 sm:$0xff]  }
  0x16   :  { %378 = vmatprep.subr.bf16.mxu1 %v974_v27  ;;  %v992_v62 = vld [vmem:[%s1411_s1 + $0x80] ss:$8 sps:$4 sm:$0xff]   ;;  %v1025_v0 = vld [vmem:[%s1413_s3 + $0x44] ss:$16 sps:$4 sm:$0xff]   ;;  %v1010_v10 = vld [vmem:[%s1413_s3 + $0xac] ss:$16 sps:$4 sm:$0xff]  }
  0x17   :  { %338 = vmatpush1.bf16.msra.mxu0 %v938_v18  ;;  %v21_v63 = vld [vmem:[%s1412_s0] sm:$0xff]  ;;  %v1008_v12 = vld [vmem:[%s1413_s3 + $0xa8] ss:$16 sps:$4 sm:$0xff]   ;;  %v1016_v13 = vld [vmem:[%s1413_s3 + $0x8c] ss:$16 sps:$4 sm:$0xff]  }
  0x18   :  { %339 = vmatprep.subr.bf16.mxu0 %v939_v20  ;;  %v24_v2 = vpack.c.bf16 %v21_v63, %v21_v63  ;;  %v1023_v3 = vld [vmem:[%s1413_s3 + $0x40] ss:$16 sps:$4 sm:$0xff]   ;;  %v1031_v5 = vld [vmem:[%s1413_s3 + $0x24] ss:$16 sps:$4 sm:$0xff]   ;;  %v1014_v14 = vld [vmem:[%s1413_s3 + $0x88] ss:$16 sps:$4 sm:$0xff]  }
  0x19   :  { %379 = vmatpush1.bf16.msra.mxu1 %v977_v29  ;;  %v1029_v7 = vld [vmem:[%s1413_s3 + $0x20] ss:$16 sps:$4 sm:$0xff]   ;;  %v1037_v9 = vld [vmem:[%s1413_s3 + $0x4] ss:$16 sps:$4 sm:$0xff]   ;;  %v1022_v15 = vld [vmem:[%s1413_s3 + $0x6c] ss:$16 sps:$4 sm:$0xff]  }
  0x1a   :  { %380 = vmatprep.subr.bf16.mxu1 %v980_v31  ;;  %v1035_v11 = vld [vmem:[%s1413_s3] ss:$16 sps:$4 sm:$0xff]   ;;  %v1020_v16 = vld [vmem:[%s1413_s3 + $0x68] ss:$16 sps:$4 sm:$0xff]   ;;  %v1028_v17 = vld [vmem:[%s1413_s3 + $0x4c] ss:$16 sps:$4 sm:$0xff]  }
  0x1b   :  { %340 = vmatpush1.bf16.msra.mxu0 %v941_v21  ;;  %v1026_v18 = vld [vmem:[%s1413_s3 + $0x48] ss:$16 sps:$4 sm:$0xff]   ;;  %v1034_v19 = vld [vmem:[%s1413_s3 + $0x2c] ss:$16 sps:$4 sm:$0xff]   ;;  %v1041_v23 = vld [vmem:[%s1413_s3 + $0x160] ss:$16 sps:$4 sm:$0xff]  }
  0x1c   :  { %341 = vmatprep.subr.bf16.mxu0 %v942_v24  ;;  %v1032_v20 = vld [vmem:[%s1413_s3 + $0x28] ss:$16 sps:$4 sm:$0xff]   ;;  %v1040_v21 = vld [vmem:[%s1413_s3 + $0xc] ss:$16 sps:$4 sm:$0xff]   ;;  %v1043_v24 = vld [vmem:[%s1413_s3 + $0x164] ss:$16 sps:$4 sm:$0xff]  }
  0x1d   :  { %381 = vmatpush1.bf16.msra.mxu1 %v983_v35  ;;  %v1038_v22 = vld [vmem:[%s1413_s3 + $0x8] ss:$16 sps:$4 sm:$0xff]   ;;  %v1049_v27 = vld [vmem:[%s1413_s3 + $0x144] ss:$16 sps:$4 sm:$0xff]   ;;  %v1047_v29 = vld [vmem:[%s1413_s3 + $0x140] ss:$16 sps:$4 sm:$0xff]  }
  0x1e   :  { %382 = vmatprep.subr.bf16.mxu1 %v986_v37  ;;  %v1044_v25 = vld [vmem:[%s1413_s3 + $0x168] ss:$16 sps:$4 sm:$0xff]   ;;  %v1055_v31 = vld [vmem:[%s1413_s3 + $0x124] ss:$16 sps:$4 sm:$0xff]   ;;  %v1053_v33 = vld [vmem:[%s1413_s3 + $0x120] ss:$16 sps:$4 sm:$0xff]  }
  0x1f   :  { %342 = vmatpush1.bf16.msra.mxu0 %v946_v26  ;;  %v1046_v26 = vld [vmem:[%s1413_s3 + $0x16c] ss:$16 sps:$4 sm:$0xff]   ;;  %v1056_v34 = vld [vmem:[%s1413_s3 + $0x128] ss:$16 sps:$4 sm:$0xff]   ;;  %v1061_v35 = vld [vmem:[%s1413_s3 + $0x104] ss:$16 sps:$4 sm:$0xff]  }
  0x20   :  { %343 = vmatprep.subr.bf16.mxu0 %v948_v28  ;;  %v1052_v28 = vld [vmem:[%s1413_s3 + $0x14c] ss:$16 sps:$4 sm:$0xff]   ;;  %v1059_v37 = vld [vmem:[%s1413_s3 + $0x100] ss:$16 sps:$4 sm:$0xff]  }
  0x21   :  { %383 = vmatpush1.bf16.msra.mxu1 %v989_v39 }
  0x22   :  { %731 = vmatprep.subr.bf16.mxu1 %v995_v42  ;;  %v77_v42 = vlaneseq }
  0x23   :  { %344 = vmatpush2.bf16.msra.mxu0 %v952_v30  ;;  %v1050_v30 = vld [vmem:[%s1413_s3 + $0x148] ss:$16 sps:$4 sm:$0xff]  }
  0x24   :  { %345 = vmatprep.subr.bf16.mxu0 %v954_v32  ;;  %401 = vmatmul.mubr.bf16.vlgmr.msra.gmra.mxu1 %v26_v44  ;;  %v1058_v32 = vld [vmem:[%s1413_s3 + $0x12c] ss:$16 sps:$4 sm:$0xff]   ;;  %v78_v44 = vshrl.u32 %v77_v42, 7 }
  0x25   :  { %732 = vmatpush1.bf16.msra.mxu1 %v993_v45 }
  0x26   :  { %733 = vmatprep.subr.bf16.mxu1 %v1001_v47  ;;  %v79_v45 = vsub.s32 0, %v78_v44  ;;  %v83_v47 = vsub.s32 1, %v78_v44 }
  0x27   :  { %346 = vmatpush2.bf16.msra.mxu0 %v958_v36  ;;  %v1064_v36 = vld [vmem:[%s1413_s3 + $0x10c] ss:$16 sps:$4 sm:$0xff]  }
  0x28   :  { %347 = vmatprep.subr.bf16.mxu0 %v960_v38  ;;  %v1062_v38 = vld [vmem:[%s1413_s3 + $0x108] ss:$16 sps:$4 sm:$0xff]  }
  0x29   :  { %734 = vmatpush1.bf16.msra.mxu1 %v999_v49 }
  0x2a   :  { %735 = vmatprep.subr.bf16.mxu1 %v1007_v51 }
  0x2b   :  { %348 = vmatpush2.bf16.msra.mxu0 %v964_v41 }
  0x2c   :  { %349 = vmatprep.subr.bf16.mxu0 %v966_v43 }
  0x2d   :  { %736 = vmatpush1.bf16.msra.mxu1 %v1005_v53 }
  0x2e   :  { %737 = vmatprep.subr.bf16.mxu1 %v1013_v55 }
  0x2f   :  { %350 = vmatpush2.bf16.msra.mxu0 %v970_v46  ;;  %v75_v46 = vld [vmem:[%s1414_s2] sm:$0x3] }
  0x30   :  { %351 = vmatprep.subr.bf16.mxu0 %v972_v48  ;;  %v80_v48 = vrot.slane %v75_v46, %v79_v45  ;;  %v84_v49 = vrot.slane %v75_v46, %v83_v47 }
  0x31   :  { %738 = vmatpush1.bf16.msra.mxu1 %v1011_v58 }
  0x32   :  { %739 = vmatprep.subr.bf16.mxu1 %v1019_v60 }
  0x33   :  { %352 = vmatpush2.bf16.msra.mxu0 %v976_v50 }
  0x34   :  { %353 = vmatprep.subr.bf16.mxu0 %v978_v52 }
  0x35   :  { %740 = vmatpush1.bf16.msra.mxu1 %v1017_v61 }
  0x36   :  { %741 = vmatprep.subr.bf16.mxu1 %v1025_v0  ;;  %v477_v0 = vsub.s32 2, %v78_v44 }
  0x37   :  { %354 = vmatpush2.bf16.msra.mxu0 %v982_v54 }
  0x38   :  { %355 = vmatprep.subr.bf16.mxu0 %v984_v56 }
  0x39   :  { %742 = vmatpush1.bf16.msra.mxu1 %v1023_v3 }
  0x3a   :  { %743 = vmatprep.subr.bf16.mxu1 %v1031_v5 }
  0x3b   :  { %356 = vmatpush2.bf16.msra.mxu0 %v988_v57 }
  0x3c   :  { %357 = vmatprep.subr.bf16.mxu0 %v990_v59 }
  0x3d   :  { %744 = vmatpush1.bf16.msra.mxu1 %v1029_v7 }
  0x3e   :  { %745 = vmatprep.subr.bf16.mxu1 %v1037_v9 }
  0x3f   :  { %358 = vmatpush2.bf16.msra.mxu0 %v992_v62 }
  0x40   :  { %772 = vmatprep.subr.bf16.mxu0 %v998_v1  ;;  %v465_v1 = vld [vmem:[%s1415_s4] sm:$0xf] }
  0x41   :  { %746 = vmatpush1.bf16.msra.mxu1 %v1035_v11  ;;  %v470_v3 = vrot.slane %v465_v1, %v79_v45  ;;  %v474_v5 = vrot.slane %v465_v1, %v83_v47 }
  0x42   :  { %360 = vmatmul.mubr.bf16.vlgmr.msra.gmra.mxu0 %v24_v2  ;;  %755 = vmatprep.subr.bf16.mxu1 %v1043_v24  ;;  %v481_v2 = vsub.s32 3, %v78_v44 }
  0x43   :  { %773 = vmatpush1.bf16.msra.mxu0 %v996_v4  ;;  %v478_v4 = vrot.slane %v465_v1, %v477_v0 }
  0x44   :  { %774 = vmatprep.subr.bf16.mxu0 %v1004_v6  ;;  %v482_v6 = vrot.slane %v465_v1, %v481_v2 }
  0x45   :  { %756 = vmatpush2.bf16.msra.mxu1 %v1041_v23 }
  0x46   :  { %757 = vmatprep.subr.bf16.mxu1 %v1049_v27 }
  0x47   :  { %775 = vmatpush1.bf16.msra.mxu0 %v1002_v8 }
  0x48   :  { %776 = vmatprep.subr.bf16.mxu0 %v1010_v10 }
  0x49   :  { %758 = vmatpush2.bf16.msra.mxu1 %v1047_v29 }
  0x4a   :  { %759 = vmatprep.subr.bf16.mxu1 %v1055_v31 }
  0x4b   :  { %777 = vmatpush1.bf16.msra.mxu0 %v1008_v12 }
  0x4c   :  { %778 = vmatprep.subr.bf16.mxu0 %v1016_v13 }
  0x4d   :  { %760 = vmatpush2.bf16.msra.mxu1 %v1053_v33 }
  0x4e   :  { %761 = vmatprep.subr.bf16.mxu1 %v1061_v35 }
  0x4f   :  { %779 = vmatpush1.bf16.msra.mxu0 %v1014_v14 }
  0x50   :  { %780 = vmatprep.subr.bf16.mxu0 %v1022_v15 }
  0x51   :  { %762 = vmatpush2.bf16.msra.mxu1 %v1059_v37 }
  0x53   :  { %781 = vmatpush1.bf16.msra.mxu0 %v1020_v16 }
  0x54   :  { %782 = vmatprep.subr.bf16.mxu0 %v1028_v17 }
  0x57   :  { %783 = vmatpush1.bf16.msra.mxu0 %v1026_v18 }
  0x58   :  { %784 = vmatprep.subr.bf16.mxu0 %v1034_v19 }
  0x5b   :  { %785 = vmatpush1.bf16.msra.mxu0 %v1032_v20 }
  0x5c   :  { %786 = vmatprep.subr.bf16.mxu0 %v1040_v21 }
  0x5f   :  { %787 = vmatpush1.bf16.msra.mxu0 %v1038_v22 }
  0x60   :  { %796 = vmatprep.subr.bf16.mxu0 %v1046_v26 }
  0x63   :  { %797 = vmatpush2.bf16.msra.mxu0 %v1044_v25 }
  0x64   :  { %798 = vmatprep.subr.bf16.mxu0 %v1052_v28 }
  0x67   :  { %799 = vmatpush2.bf16.msra.mxu0 %v1050_v30 }
  0x68   :  { %800 = vmatprep.subr.bf16.mxu0 %v1058_v32 }
  0x6b   :  { %801 = vmatpush2.bf16.msra.mxu0 %v1056_v34 }
  0x6c   :  { %802 = vmatprep.subr.bf16.mxu0 %v1064_v36 }
  0x6f   :  { %803 = vmatpush2.bf16.msra.mxu0 %v1062_v38 }
  0xe4   :  { %v402_v39 = vpop.f32.mrf.mxu1 }
  0xe6   :  { %v404_v40 = vpop.f32.mrf.mxu1 }
  0xe8   :  { %v406_v41 = vpop.f32.mrf.mxu1 }
  0xea   :  { %v407_v43 = vpop.f32.mrf.mxu1 }
 0x102   :  { %v361_v50 = vpop.f32.mrf.mxu0 }
 0x103   :  { %v362_v51 = vadd.f32 %v361_v50, %v80_v48 }
 0x104   :  { %v363_v52 = vpop.f32.mrf.mxu0 }
 0x105   :  { %v403_v53 = vadd.f32 %v402_v39, %v362_v51  ;;  %v364_v54 = vadd.f32 %v363_v52, %v84_v49 }
 0x106   :  { %v365_v55 = vpop.f32.mrf.mxu0 }
 0x107   :  { %vm409_vm0 = vcmp.ge.f32.partialorder %v403_v53, 0.0  ;;  %v411_v56 = vmul.f32 0.2, %v403_v53  ;;  %v405_v57 = vadd.f32 %v404_v40, %v364_v54 }
 0x108   :  { %v366_v58 = vpop.f32.mrf.mxu0 }
 0x109   :  { %vm410_vm1 = vcmp.ge.f32.partialorder %v405_v57, 0.0  ;;  %v412_v59 = vmul.f32 0.2, %v405_v57  ;;  %v413_v60 = vsel %vm409_vm0, %v403_v53, %v411_v56 }
 0x10a   :  { %v415_v63 = vpack.c.bf16 %v413_v60, %v413_v60 }
 0x10b   :  { %v414_v61 = vsel %vm410_vm1, %v405_v57, %v412_v59 }
 0x10c   :  { %v416_v62 = vpack.c.bf16 %v414_v61, %v414_v61 }
 0x10e   :  { %918 = vmatprep.mubr.msk.bf16.mxu1 %vm727_vm2, %v416_v62  ;;  %919 = vmatprep.mubr.msk.bf16.mxu0 %vm727_vm2, %v416_v62 }
 0x10f   :  { %764 = vmatmul.mubr.bf16.vlgmr.msra.gmra.mxu1 %v415_v63  ;;  %805 = vmatmul.mubr.bf16.vlgmr.msra.gmra.mxu0 %v415_v63 }
 0x1cf   :  { %v765_v7 = vpop.f32.mrf.mxu1  ;;  %v806_v8 = vpop.f32.mrf.mxu0 }
 0x1d0   :  { %v766_v9 = vadd.f32 %v765_v7, %v470_v3  ;;  %v807_v10 = vadd.f32 %v806_v8, %v478_v4 }
 0x1d1   :  { %v767_v11 = vpop.f32.mrf.mxu1  ;;  %v808_v12 = vpop.f32.mrf.mxu0 }
 0x1d2   :  { %813 = vst [vmem:[%s1416_s5] sm:$0xff] %v766_v9  ;;  %815 = vst [vmem:[%s1416_s5 + $0x10] sm:$0xff] %v807_v10  ;;  %v768_v13 = vadd.f32 %v767_v11, %v474_v5  ;;  %v809_v14 = vadd.f32 %v808_v12, %v482_v6 }
 0x1d3   :  { %v769_v15 = vpop.f32.mrf.mxu1  ;;  %v810_v16 = vpop.f32.mrf.mxu0 }
 0x1d4   :  { %814 = vst [vmem:[%s1416_s5 + $0x8] sm:$0xff] %v768_v13  ;;  %817 = vst.msk [vmem:[%s1416_s5 + $0x18] sm:$0xff] %vm816_vm3, %v809_v14 }
 0x1d5   :  { %v770_v17 = vpop.f32.mrf.mxu1  ;;  %v811_v18 = vpop.f32.mrf.mxu0 }

// kernel: forward.5
= control target key start
LH: loop header
LB: loop body
LE: loop exit
PB: predicated region body
PF: predicated region fallthrough
CT: control target
= control target key end

     0   :  { %s5309_s29 = smov 0   ;;  %s6236_s0 = inlined_call_operand.vmem [shape: f32[2,4,24,10], index: 0, kind: input, shape index: {}]   ;;  %s6237_s1 = inlined_call_operand.vmem [shape: f32[2,4,24,32], index: 1, kind: input, shape index: {}]   ;;  %s6238_s2 = inlined_call_operand.vmem [shape: bf16[576,24], index: 2, kind: input, shape index: {}]   ;;  %s6239_s3 = inlined_call_operand.vmem [shape: bf16[576,24], index: 3, kind: input, shape index: {}]   ;;  %s6240_s4 = inlined_call_operand.vmem [shape: bf16[24,576], index: 4, kind: input, shape index: {}]   ;;  %s6241_s5 = inlined_call_operand.vmem [shape: bf16[10,10], index: 5, kind: input, shape index: {}]   ;;  %s6242_s6 = inlined_call_operand.vmem [shape: f32[1,10], index: 6, kind: input, shape index: {}]   ;;  %s6243_s7 = inlined_call_operand.vmem [shape: bf16[10,10], index: 7, kind: input, shape index: {}]   ;;  %s6244_s8 = inlined_call_operand.vmem [shape: f32[1,10], index: 8, kind: input, shape index: {}]   ;;  %s6245_s9 = inlined_call_operand.vmem [shape: f32[1,10], index: 9, kind: input, shape index: {}]   ;;  %s6246_s10 = inlined_call_operand.<no memory space> [shape: f32[1,1], index: 10, kind: input, shape index: {}]   ;;  %s6247_s11 = inlined_call_operand.vmem [shape: bf16[32,32], index: 11, kind: input, shape index: {}]   ;;  %s6248_s12 = inlined_call_operand.vmem [shape: f32[1,32], index: 12, kind: input, shape index: {}]   ;;  %s6249_s13 = inlined_call_operand.vmem [shape: bf16[32,64], index: 13, kind: input, shape index: {}]   ;;  %s6250_s14 = inlined_call_operand.vmem [shape: bf16[32,64], index: 14, kind: input, shape index: {}]   ;;  %s6251_s15 = inlined_call_operand.vmem [shape: f32[1,64], index: 15, kind: input, shape index: {}]   ;;  %s6252_s16 = inlined_call_operand.vmem [shape: bf16[64,32], index: 16, kind: input, shape index: {}]   ;;  %s6253_s17 = inlined_call_operand.vmem [shape: f32[1,32], index: 17, kind: input, shape index: {}]   ;;  %s6254_s18 = inlined_call_operand.vmem [shape: bf16[32,32], index: 18, kind: input, shape index: {}]   ;;  %s6255_s19 = inlined_call_operand.vmem [shape: bf16[32,32], index: 19, kind: input, shape index: {}]   ;;  %s6256_s20 = inlined_call_operand.vmem [shape: f32[1,32], index: 20, kind: input, shape index: {}]   ;;  %s6257_s21 = inlined_call_operand.vmem [shape: f32[2,24,32], index: 21, kind: output, shape index: {0}]   ;;  %s6258_s22 = inlined_call_operand.vmem [shape: f32[2,1,32], index: 22, kind: output, shape index: {1}]  }
   0x1   :  { %6262 = sst [smem:[#allocation3_spill]] %s6236_s0  ;;  %v28_v0 = vstv %s6246_s10 }
   0x2   :  { %6263 = sst [smem:[#allocation4_spill]] %s6237_s1  ;;  %29 = vst [vmem:[#allocation2] sm:$0x1] %v28_v0 }
   0x3   :  { %6264 = sst [smem:[#allocation5_spill]] %s6238_s2 }
   0x4   :  { %6265 = sst [smem:[#allocation6_spill]] %s6239_s3 }
   0x5   :  { %6266 = sst [smem:[#allocation7_spill]] %s6240_s4 }
   0x6   :  { %6267 = sst [smem:[#allocation8_spill]] %s6241_s5 }
   0x7   :  { %6268 = sst [smem:[#allocation9_spill]] %s6242_s6 }
   0x8 LB: > { %s4230_s30 = sadd.s32 4294967295, %s5188_s29   ;;  %p4234_p0 = scmp.ge.s32.totalorder %s5188_s29, 1  ;;  %s5188_s29 = sphi %s5309_s29, %s35_s29  }
   0x9   : > { %p627_p1 = scmp.lt.s32.totalorder %s5188_s29, 3 }
   0xb   : > { %p628_p2 = pnand %p4234_p0, %p627_p1 }
   0xc   : > { %s6269_s23 = sld [smem:[#allocation8_spill]] (!%p628_p2)  ;;  %p697_p3 = scmp.lt.s32.totalorder (!%p628_p2), %s4230_s30, 1 }
   0xd   : > { %631 = sbr.rel (%p628_p2) target bundleno = 2180 (0x884), region = 104  ;;  %s6270_s24 = sld [smem:[#allocation3_spill]] (!%p628_p2) }
   0xe   : > { %s6271_s3 = sld [smem:[#allocation9_spill]] (!%p628_p2) }
   0xf   : > { %s6272_s2 = sld [smem:[#allocation4_spill]] (!%p628_p2) }
  0x10   : > { %s6275_s26 = sld [smem:[#allocation7_spill]] (!%p628_p2) }
  0x12   : > { %v5082_v1 = vld [vmem:[%s6269_s23] sm:$0x1f]   ;;  %vm742_vm0 = vcmask 1044480   ;;  %s6277_s30 = smov (!%p697_p3, %s4230_s30), 1  ;;  %vm735_vm1 = vcmask 80896   ;;  %vm1434_vm2 = vcmask 261120  }
  0x13   : > { %5058 = vmatprep.subr.msk.bf16.mxu0 %vm742_vm0, %v5082_v1  ;;  %v744_v2 = vsel %vm742_vm0, %v5082_v1, 0  ;;  %s5069_s10 = smul.u32 96, %s6277_s30  ;;  %v5083_v23 = vld [vmem:[%s6243_s7] sm:$0x1f]   ;;  %vm1509_vm6 = vcmask 253952   ;;  %vm1975_vm7 = vcmask 195584  }
  0x14   : > { %4723 = vmatpush3.bf16.msra.mxu0 %v744_v2  ;;  %5059 = vmatprep.subr.msk.bf16.mxu1 %vm742_vm0, %v5083_v23  ;;  %v820_v24 = vsel %vm742_vm0, %v5083_v23, 0  ;;  %v4238_v26 = vld [vmem:[%s6271_s3] ss:$0 sm:$0xff]  ;;  %s6273_s3 = sld [smem:[#allocation6_spill]]  ;;  %vm2084_vm8 = vcmask 1043456   ;;  %vm3247_vm9 = vcmask 523264  }
  0x15   : > { %5060 = vmatprep.subr.msk.bf16.mxu0 %vm742_vm0, %v5082_v1  ;;  %s701_s6 = scalar_lea.vmem %s6270_s24, %s5069_s10  ;;  %4729 = vmatpush3.bf16.msra.mxu1 %v820_v24  ;;  %s706_s27 = scalar_lea.vmem %s6272_s2, %s5069_s10 }
  0x16   : > { %v716_v3 = vld [vmem:[%s701_s6] sm:$0xff]  ;;  %v717_v4 = vld [vmem:[%s701_s6 + $0x8] sm:$0xff]  ;;  %v718_v5 = vld [vmem:[%s701_s6 + $0x10] sm:$0xff]  ;;  %5061 = vmatprep.subr.msk.bf16.mxu1 %vm742_vm0, %v5083_v23  ;;  %s714_s2 = scalar_lea.vmem %s6258_s22, %s6277_s30  ;;  %s6274_s24 = sld [smem:[#allocation5_spill]] }
  0x17   : > { %v719_v6 = vpack.c.bf16 %v717_v4, %v716_v3  ;;  %v720_v7 = vpack.c.bf16 %v718_v5, %v718_v5  ;;  %v4248_v8 = vld [vmem:[%s701_s6 + $0x18] sm:$0xff]  ;;  %v4249_v9 = vld [vmem:[%s701_s6 + $0x20] sm:$0xff]  ;;  %v4250_v11 = vld [vmem:[%s701_s6 + $0x28] sm:$0xff]  ;;  %s5070_s10 = smul.u32 24, %s6277_s30 }
  0x18   : > { %v927_v10 = vpack.c.bf16 %v4249_v9, %v4248_v8  ;;  %v4258_v12 = vld [vmem:[%s701_s6 + $0x30] sm:$0xff]  ;;  %v4259_v13 = vld [vmem:[%s701_s6 + $0x38] sm:$0xff]  ;;  %v928_v14 = vpack.c.bf16 %v4250_v11, %v4250_v11  ;;  %v4260_v16 = vld [vmem:[%s701_s6 + $0x40] sm:$0xff] }
  0x19   : > { %4724 = vmatprep.mubr.msk.bf16.mxu0 %vm735_vm1, %v719_v6  ;;  %v1089_v15 = vpack.c.bf16 %v4259_v13, %v4258_v12  ;;  %v4268_v17 = vld [vmem:[%s701_s6 + $0x48] sm:$0xff]  ;;  %v4269_v18 = vld [vmem:[%s701_s6 + $0x50] sm:$0xff]  ;;  %v1090_v19 = vpack.c.bf16 %v4260_v16, %v4260_v16  ;;  %v4270_v21 = vld [vmem:[%s701_s6 + $0x58] sm:$0xff]  ;;  %s711_s1 = scalar_lea.vmem %s6257_s21, %s5070_s10 }
  0x1a   : > { %4725 = vmatmul.mubr.msk.bf16.vlgmr.msra.gmra.mxu0 %vm735_vm1, %v720_v7  ;;  %v1251_v20 = vpack.c.bf16 %v4269_v18, %v4268_v17  ;;  %v1252_v22 = vpack.c.bf16 %v4270_v21, %v4270_v21 }
  0x1b   : > { %4735 = vmatpush3.bf16.msra.mxu0 %v744_v2  ;;  %4736 = vmatprep.mubr.msk.bf16.mxu0 %vm735_vm1, %v927_v10  ;;  %v5363_v10 = vld [vmem:[%s6244_s8] ss:$0 sm:$0xff] }
  0x1c   : > { %5062 = vmatprep.subr.msk.bf16.mxu0 %vm742_vm0, %v5082_v1 }
  0x22   : > { %4737 = vmatmul.mubr.msk.bf16.vlgmr.msra.gmra.mxu0 %vm735_vm1, %v928_v14  ;;  %v5369_v14 = vld [vmem:[%s6245_s9] ss:$0 sm:$0xff] }
  0x23   : > { %4747 = vmatpush3.bf16.msra.mxu0 %v744_v2  ;;  %4748 = vmatprep.mubr.msk.bf16.mxu0 %vm735_vm1, %v1089_v15 }
  0x24   : > { %5064 = vmatprep.subr.msk.bf16.mxu0 %vm742_vm0, %v5082_v1 }
  0x2a   : > { %4749 = vmatmul.mubr.msk.bf16.vlgmr.msra.gmra.mxu0 %vm735_vm1, %v1090_v19 }
  0x2b   : > { %4759 = vmatpush3.bf16.msra.mxu0 %v744_v2  ;;  %4760 = vmatprep.mubr.msk.bf16.mxu0 %vm735_vm1, %v1251_v20 }
  0x32   : > { %4761 = vmatmul.mubr.msk.bf16.vlgmr.msra.gmra.mxu0 %vm735_vm1, %v1252_v22 }
  0xda   : > { %v4726_v25 = vpop.f32.mrf.mxu0 }
  0xdb   : > { %v789_v28 = vadd.f32 %v4726_v25, %v4238_v26 }
  0xdc   : > { %v780_v27 = vpop.f32.mrf.mxu0 }
  0xdd   : > { %v781_v30 = vadd.f32 %v4238_v26, %v780_v27  ;;  %v796_v33 = vmax.f32 %v789_v28, 0.0 }
  0xde   : > { %v4727_v29 = vpop.f32.mrf.mxu0 }
  0xdf   : > { %v794_v35 = vmax.f32 %v781_v30, 0.0  ;;  %v798_v39 = vpack.c.bf16 %v796_v33, %v796_v33 }
  0xe0   : > { %v783_v31 = vpop.f32.mrf.mxu0 }
  0xe1   : > { %v784_v32 = vadd.f32 %v4238_v26, %v783_v31 }
  0xe2   : > { %v4738_v34 = vpop.f32.mrf.mxu0 }
  0xe3   : > { %v795_v36 = vmax.f32 %v784_v32, 0.0  ;;  %v978_v40 = vadd.f32 %v4738_v34, %v4238_v26 }
  0xe4   : > { %v969_v37 = vpop.f32.mrf.mxu0 }
  0xe5   : > { %v797_v38 = vpack.c.bf16 %v795_v36, %v794_v35  ;;  %v970_v42 = vadd.f32 %v4238_v26, %v969_v37  ;;  %v985_v45 = vmax.f32 %v978_v40, 0.0 }
  0xe6   : > { %v4739_v41 = vpop.f32.mrf.mxu0 }
  0xe7   : > { %4730 = vmatprep.mubr.msk.bf16.mxu1 %vm735_vm1, %v797_v38  ;;  %v983_v47 = vmax.f32 %v970_v42, 0.0  ;;  %v987_v53 = vpack.c.bf16 %v985_v45, %v985_v45 }
  0xe8   : > { %4731 = vmatmul.mubr.msk.bf16.vlgmr.msra.gmra.mxu1 %vm735_vm1, %v798_v39  ;;  %v972_v43 = vpop.f32.mrf.mxu0 }
  0xe9   : > { %v973_v44 = vadd.f32 %v4238_v26, %v972_v43  ;;  %4741 = vmatpush3.bf16.msra.mxu1 %v820_v24 }
  0xea   : > { %v4750_v46 = vpop.f32.mrf.mxu0  ;;  %5063 = vmatprep.subr.msk.bf16.mxu1 %vm742_vm0, %v5083_v23 }
  0xeb   : > { %v984_v48 = vmax.f32 %v973_v44, 0.0  ;;  %v1140_v49 = vadd.f32 %v4750_v46, %v4238_v26 }
  0xec   : > { %v1131_v50 = vpop.f32.mrf.mxu0 }
  0xed   : > { %v986_v51 = vpack.c.bf16 %v984_v48, %v983_v47  ;;  %v1132_v52 = vadd.f32 %v4238_v26, %v1131_v50  ;;  %v1147_v55 = vmax.f32 %v1140_v49, 0.0  ;;  %v5190_v48 = vmov 0  }
  0xee   : > { %v4751_v54 = vpop.f32.mrf.mxu0  ;;  %5080 = vset.pattern.permute.xlu1 %v5190_v48  ;;  %5081 = vset.pattern.permute.xlu0 %v5190_v48 }
  0xef   : > { %4742 = vmatprep.mubr.msk.bf16.mxu1 %vm735_vm1, %v986_v51  ;;  %v1145_v57 = vmax.f32 %v1132_v52, 0.0  ;;  %v1149_v61 = vpack.c.bf16 %v1147_v55, %v1147_v55 }
  0xf0   : > { %4743 = vmatmul.mubr.msk.bf16.vlgmr.msra.gmra.mxu1 %vm735_vm1, %v987_v53  ;;  %v1134_v56 = vpop.f32.mrf.mxu0 }
  0xf1   : > { %v1135_v58 = vadd.f32 %v4238_v26, %v1134_v56  ;;  %4753 = vmatpush3.bf16.msra.mxu1 %v820_v24 }
  0xf2   : > { %v4762_v59 = vpop.f32.mrf.mxu0  ;;  %5065 = vmatprep.subr.msk.bf16.mxu1 %vm742_vm0, %v5083_v23 }
  0xf3   : > { %v1146_v60 = vmax.f32 %v1135_v58, 0.0  ;;  %v1302_v62 = vadd.f32 %v4762_v59, %v4238_v26 }
  0xf4   : > { %v1293_v63 = vpop.f32.mrf.mxu0 }
  0xf5   : > { %v1148_v0 = vpack.c.bf16 %v1146_v60, %v1145_v57  ;;  %v1294_v1 = vadd.f32 %v4238_v26, %v1293_v63  ;;  %v1309_v3 = vmax.f32 %v1302_v62, 0.0 }
  0xf6   : > { %v4763_v2 = vpop.f32.mrf.mxu0 }
  0xf7   : > { %4754 = vmatprep.mubr.msk.bf16.mxu1 %vm735_vm1, %v1148_v0  ;;  %v1307_v5 = vmax.f32 %v1294_v1, 0.0  ;;  %v1311_v8 = vpack.c.bf16 %v1309_v3, %v1309_v3 }
  0xf8   : > { %4755 = vmatmul.mubr.msk.bf16.vlgmr.msra.gmra.mxu1 %vm735_vm1, %v1149_v61  ;;  %v1296_v4 = vpop.f32.mrf.mxu0 }
  0xf9   : > { %v1297_v6 = vadd.f32 %v4238_v26, %v1296_v4  ;;  %4765 = vmatpush3.bf16.msra.mxu1 %v820_v24 }
  0xfb   : > { %v1308_v7 = vmax.f32 %v1297_v6, 0.0 }
  0xfd   : > { %v1310_v9 = vpack.c.bf16 %v1308_v7, %v1307_v5 }
  0xff   : > { %4766 = vmatprep.mubr.msk.bf16.mxu1 %vm735_vm1, %v1310_v9 }
 0x100   : > { %4767 = vmatmul.mubr.msk.bf16.vlgmr.msra.gmra.mxu1 %vm735_vm1, %v1311_v8 }
 0x1a8   : > { %v4732_v11 = vpop.f32.mrf.mxu1 }
 0x1a9   : > { %v865_v12 = vadd.f32 %v4732_v11, %v5363_v10 }
 0x1aa   : > { %v856_v13 = vpop.f32.mrf.mxu1 }
 0x1ab   : > { %v872_v15 = vmax.f32 %v865_v12, 0.0  ;;  %v857_v16 = vadd.f32 %v5363_v10, %v856_v13 }
 0x1ac   : > { %v4733_v17 = vpop.f32.mrf.mxu1 }
 0x1ad   : > { %v870_v18 = vmax.f32 %v857_v16, 0.0  ;;  %v882_v19 = vmul.f32 %v5369_v14, %v872_v15  ;;  %v4247_v15 = vld [vmem:[#allocation2] ss:$0 sm:$0xff] }
 0x1ae   : > { %v859_v20 = vpop.f32.mrf.mxu1 }
 0x1af   : > { %v860_v21 = vadd.f32 %v5363_v10, %v859_v20  ;;  %v889_v22 = vsel %vm735_vm1, %v882_v19, 0.0  ;;  %v880_v23 = vmul.f32 %v5369_v14, %v870_v18 }
 0x1b0   : > { %890 = vadd.xlane.f32.xlu0 %v889_v22  ;;  %v4744_v24 = vpop.f32.mrf.mxu1 }
 0x1b1   : > { %v871_v25 = vmax.f32 %v860_v21, 0.0  ;;  %v1037_v26 = vadd.f32 %v4744_v24, %v5363_v10  ;;  %v883_v30 = vsel %vm735_vm1, %v880_v23, 0.0 }
 0x1b2   : > { %v1028_v27 = vpop.f32.mrf.mxu1 }
 0x1b3   : > { %v1044_v28 = vmax.f32 %v1037_v26, 0.0  ;;  %v1029_v29 = vadd.f32 %v5363_v10, %v1028_v27  ;;  %v881_v31 = vmul.f32 %v5369_v14, %v871_v25 }
 0x1b4   : > { %v4745_v32 = vpop.f32.mrf.mxu1  ;;  %884 = vadd.xlane.f32.xlu0 %v883_v30 }
 0x1b5   : > { %v1042_v33 = vmax.f32 %v1029_v29, 0.0  ;;  %v1047_v34 = vmul.f32 %v5369_v14, %v1044_v28  ;;  %v886_v38 = vsel %vm735_vm1, %v881_v31, 0.0 }
 0x1b6   : > { %v1031_v35 = vpop.f32.mrf.mxu1 }
 0x1b7   : > { %v1032_v36 = vadd.f32 %v5363_v10, %v1031_v35  ;;  %v1054_v37 = vsel %vm735_vm1, %v1047_v34, 0.0  ;;  %v1045_v39 = vmul.f32 %v5369_v14, %v1042_v33  ;;  %v5084_v35 = vld [vmem:[%s6247_s11 + $0x8] sm:$0xff]  }
 0x1b8   : > { %1055 = vadd.xlane.f32.xlu1 %v1054_v37  ;;  %v4756_v40 = vpop.f32.mrf.mxu1  ;;  %887 = vadd.xlane.f32.xlu0 %v886_v38  ;;  %v5085_v38 = vld [vmem:[%s6247_s11] sm:$0xff]  }
 0x1b9   : > { %v1043_v41 = vmax.f32 %v1032_v36, 0.0  ;;  %v1199_v42 = vadd.f32 %v4756_v40, %v5363_v10  ;;  %v1048_v46 = vsel %vm735_vm1, %v1045_v39, 0.0  ;;  %4770 = vmatprep.subr.bf16.mxu0 %v5084_v35 }
 0x1ba   : > { %v1190_v43 = vpop.f32.mrf.mxu1  ;;  %4771 = vmatpush3.bf16.msra.mxu0 %v5084_v35 }
 0x1bb   : > { %v1206_v44 = vmax.f32 %v1199_v42, 0.0  ;;  %v1191_v45 = vadd.f32 %v5363_v10, %v1190_v43  ;;  %v1046_v47 = vmul.f32 %v5369_v14, %v1043_v41  ;;  %4772 = vmatprep.subr.bf16.mxu0 %v5085_v38 }
 0x1bc   : > { %v4757_v49 = vpop.f32.mrf.mxu1  ;;  %1049 = vadd.xlane.f32.xlu1 %v1048_v46 }
 0x1bd   : > { %v1204_v50 = vmax.f32 %v1191_v45, 0.0  ;;  %v1209_v51 = vmul.f32 %v5369_v14, %v1206_v44  ;;  %v1051_v54 = vsel %vm735_vm1, %v1046_v47, 0.0  ;;  %v4255_v47 = vld [vmem:[%s706_s27 + $0x18] sm:$0xff]  ;;  %v4257_v49 = vld [vmem:[%s706_s27 + $0x28] sm:$0xff] }
 0x1be   : > { %v1193_v52 = vpop.f32.mrf.mxu1  ;;  %4773 = vmatpush3.bf16.msra.mxu0 %v5085_v38 }
 0x1bf   : > { %v1194_v53 = vadd.f32 %v5363_v10, %v1193_v52  ;;  %v1216_v55 = vsel %vm735_vm1, %v1209_v51, 0.0  ;;  %v1207_v56 = vmul.f32 %v5369_v14, %v1204_v50  ;;  %v902_v50 = vld [vmem:[%s706_s27] sm:$0xff]  ;;  %v4265_v52 = vld [vmem:[%s706_s27 + $0x30] sm:$0xff] }
 0x1c0   : > { %v4768_v57 = vpop.f32.mrf.mxu1  ;;  %1052 = vadd.xlane.f32.xlu1 %v1051_v54  ;;  %1217 = vadd.xlane.f32.xlu0 %v1216_v55  ;;  %v4256_v51 = vld [vmem:[%s706_s27 + $0x20] sm:$0xff]  ;;  %v904_v54 = vld [vmem:[%s706_s27 + $0x10] sm:$0xff] }
 0x1c1   : > { %v1205_v58 = vmax.f32 %v1194_v53, 0.0  ;;  %v1361_v59 = vadd.f32 %v4768_v57, %v5363_v10  ;;  %v1210_v62 = vsel %vm735_vm1, %v1207_v56, 0.0  ;;  %v4267_v56 = vld [vmem:[%s706_s27 + $0x40] sm:$0xff]  ;;  %v903_v57 = vld [vmem:[%s706_s27 + $0x8] sm:$0xff] }
 0x1c2   : > { %v1352_v60 = vpop.f32.mrf.mxu1 }
 0x1c3   : > { %v1353_v61 = vadd.f32 %v5363_v10, %v1352_v60  ;;  %v1208_v63 = vmul.f32 %v5369_v14, %v1205_v58  ;;  %v1368_v1 = vmax.f32 %v1361_v59, 0.0  ;;  %v4266_v59 = vld [vmem:[%s706_s27 + $0x38] sm:$0xff] }
 0x1c4   : > { %v4769_v0 = vpop.f32.mrf.mxu1  ;;  %1211 = vadd.xlane.f32.xlu0 %v1210_v62 }
 0x1c5   : > { %v1366_v2 = vmax.f32 %v1353_v61, 0.0  ;;  %v1213_v3 = vsel %vm735_vm1, %v1208_v63, 0.0  ;;  %v1371_v9 = vmul.f32 %v5369_v14, %v1368_v1  ;;  %v4277_v63 = vld [vmem:[%s706_s27 + $0x58] sm:$0xff] }
 0x1c6   : > { %v1355_v4 = vpop.f32.mrf.mxu1  ;;  %1214 = vadd.xlane.f32.xlu1 %v1213_v3 }
 0x1c7   : > { %v1356_v5 = vadd.f32 %v5363_v10, %v1355_v4  ;;  %v1369_v6 = vmul.f32 %v5369_v14, %v1366_v2  ;;  %v1378_v12 = vsel %vm735_vm1, %v1371_v9, 0.0 }
 0x1c9   : > { %v1367_v7 = vmax.f32 %v1356_v5, 0.0  ;;  %v1372_v8 = vsel %vm735_vm1, %v1369_v6, 0.0 }
 0x1ca   : > { %1373 = vadd.xlane.f32.xlu1 %v1372_v8  ;;  %v4275_v8 = vld [vmem:[%s706_s27 + $0x48] sm:$0xff] }
 0x1cb   : > { %v1370_v11 = vmul.f32 %v5369_v14, %v1367_v7 }
 0x1cd   : > { %v1375_v13 = vsel %vm735_vm1, %v1370_v11, 0.0  ;;  %v4276_v11 = vld [vmem:[%s706_s27 + $0x50] sm:$0xff] }
 0x1ce   : > { %1379 = vadd.xlane.f32.xlu1 %v1378_v12  ;;  %1376 = vadd.xlane.f32.xlu0 %v1375_v13 }
 0x239   : > { %v891_v16 = vpop.xlane.xlu0 %890 }
 0x23a   : > { %v901_v17 = vadd.f32 %v4247_v15, %v891_v16 }
 0x23c   : > { %917 = vperm.xlu1 %5080, %v901_v17  }
 0x23d   : > { %v885_v10 = vpop.xlane.xlu0 %884 }
 0x23e   : > { %v899_v18 = vadd.f32 %v4247_v15, %v885_v10 }
 0x240   : > { %907 = vperm.xlu0 %5081, %v899_v18  }
 0x241   : > { %v1056_v19 = vpop.xlane.xlu1 %1055  ;;  %v888_v20 = vpop.xlane.xlu0 %887 }
 0x242   : > { %v900_v21 = vadd.f32 %v4247_v15, %v888_v20  ;;  %v1059_v23 = vadd.f32 %v4247_v15, %v1056_v19 }
 0x244   : > { %912 = vperm.xlu1 %5080, %v900_v21  }
 0x245   : > { %v1050_v22 = vpop.xlane.xlu1 %1049 }
 0x246   : > { %v1057_v14 = vadd.f32 %v4247_v15, %v1050_v22 }
 0x248   : > { %1076 = vperm.xlu1 %5080, %v1059_v23  }
 0x249   : > { %v1053_v24 = vpop.xlane.xlu1 %1052  ;;  %v1218_v25 = vpop.xlane.xlu0 %1217 }
 0x24a   : > { %v1058_v26 = vadd.f32 %v4247_v15, %v1053_v24  ;;  %v1221_v28 = vadd.f32 %v4247_v15, %v1218_v25  ;;  %v5087_v24 = vld [vmem:[%s6250_s14 + $0x8] sm:$0xff]   ;;  %v5088_v25 = vld [vmem:[%s6249_s13] sm:$0xff]  }
 0x24b   : > { %4786 = vmatprep.subr.bf16.mxu0 %v5087_v24 }
 0x24c   : > { %1066 = vperm.xlu1 %5080, %v1057_v14   ;;  %v5086_v14 = vld [vmem:[%s6249_s13 + $0x8] sm:$0xff]  }
 0x24d   : > { %v1212_v29 = vpop.xlane.xlu0 %1211  ;;  %4778 = vmatprep.subr.bf16.mxu1 %v5086_v14 }
 0x24e   : > { %v1219_v32 = vadd.f32 %v4247_v15, %v1212_v29  ;;  %4779 = vmatpush3.bf16.msra.mxu1 %v5086_v14  ;;  %v5124_v14 = vld [vmem:[%s6273_s3 + $0x88] sm:$0xff]  }
 0x24f   : > { %v1215_v27 = vpop.xlane.xlu1 %1214  ;;  %4780 = vmatprep.subr.bf16.mxu1 %v5088_v25 }
 0x250   : > { %1071 = vperm.xlu1 %5080, %v1058_v26   ;;  %v1220_v36 = vadd.f32 %v4247_v15, %v1215_v27  ;;  %v5089_v26 = vld [vmem:[%s6250_s14] sm:$0xff]  }
 0x251   : > { %v4278_v27 = vld [vmem:[%s6248_s12] ss:$0 sm:$0xff] }
 0x252   : > { %4781 = vmatpush3.bf16.msra.mxu1 %v5088_v25  ;;  %v5126_v25 = vld [vmem:[%s6273_s3 + $0x90] sm:$0xff]  }
 0x253   : > { %v1374_v30 = vpop.xlane.xlu1 %1373 }
 0x254   : > { %v1381_v31 = vadd.f32 %v4247_v15, %v1374_v30  ;;  %1238 = vperm.xlu1 %5080, %v1221_v28  }
 0x256   : > { %1390 = vperm.xlu0 %5081, %v1381_v31  }
 0x257   : > { %v1380_v33 = vpop.xlane.xlu1 %1379  ;;  %v1377_v37 = vpop.xlane.xlu0 %1376 }
 0x258   : > { %v1383_v34 = vadd.f32 %v4247_v15, %v1380_v33  ;;  %1228 = vperm.xlu1 %5080, %v1219_v32   ;;  %v1382_v39 = vadd.f32 %v4247_v15, %v1377_v37 }
 0x25a   : > { %1400 = vperm.xlu0 %5081, %v1383_v34  }
 0x25c   : > { %1233 = vperm.xlu1 %5080, %v1220_v36  }
 0x260   : > { %1395 = vperm.xlu1 %5080, %v1382_v39  }
 0x2b7   : > { %v918_v40 = vpop.permute.xlu1 %917 }
 0x2b8   : > { %v922_v1 = vmul.f32 %v918_v40, %v904_v54  ;;  %v5090_v54 = vld [vmem:[%s6273_s3] sm:$0xff]  }
 0x2bb   : > { %v908_v45 = vpop.permute.xlu0 %907 }
 0x2bc   : > { %v920_v60 = vmul.f32 %v908_v45, %v902_v50 }
 0x2bf   : > { %v913_v41 = vpop.permute.xlu1 %912 }
 0x2c0   : > { %v921_v4 = vmul.f32 %v913_v41, %v903_v57 }
 0x2c3   : > { %v1077_v42 = vpop.permute.xlu1 %1076 }
 0x2c4   : > { %v1081_v58 = vmul.f32 %v4257_v49, %v1077_v42 }
 0x2c6   : > { %v1084_v7 = vadd.f32 %v1081_v58, %v922_v1 }
 0x2c7   : > { %v1067_v43 = vpop.permute.xlu1 %1066 }
 0x2c8   : > { %v1079_v55 = vmul.f32 %v4255_v47, %v1067_v43 }
 0x2ca   : > { %v1082_v5 = vadd.f32 %v1079_v55, %v920_v60  ;;  %v5106_v55 = vld [vmem:[%s6273_s3 + $0x40] sm:$0xff]  }
 0x2cb   : > { %v1072_v44 = vpop.permute.xlu1 %1071 }
 0x2cc   : > { %v1080_v61 = vmul.f32 %v4256_v51, %v1072_v44 }
 0x2ce   : > { %v1083_v12 = vadd.f32 %v1080_v61, %v921_v4  ;;  %v5107_v4 = vld [vmem:[%s6273_s3 + $0x48] sm:$0xff]  }
 0x2cf   : > { %v1239_v46 = vpop.permute.xlu1 %1238 }
 0x2d0   : > { %v1243_v2 = vmul.f32 %v4267_v56, %v1239_v46 }
 0x2d1   : > { %v1391_v48 = vpop.permute.xlu0 %1390 }
 0x2d2   : > { %v1246_v15 = vadd.f32 %v1243_v2, %v1084_v7  ;;  %v1403_v17 = vmul.f32 %v4275_v8, %v1391_v48  ;;  %v5110_v7 = vld [vmem:[%s6273_s3 + $0x50] sm:$0xff]  }
 0x2d3   : > { %v1229_v53 = vpop.permute.xlu1 %1228 }
 0x2d4   : > { %v1241_v62 = vmul.f32 %v4265_v52, %v1229_v53 }
 0x2d5   : > { %v1401_v0 = vpop.permute.xlu0 %1400 }
 0x2d6   : > { %v1405_v9 = vmul.f32 %v4277_v63, %v1401_v0  ;;  %v1244_v13 = vadd.f32 %v1241_v62, %v1082_v5 }
 0x2d7   : > { %v1234_v3 = vpop.permute.xlu1 %1233 }
 0x2d8   : > { %v1242_v6 = vmul.f32 %v4266_v59, %v1234_v3  ;;  %v1408_v19 = vadd.f32 %v1405_v9, %v1246_v15  ;;  %v1406_v20 = vadd.f32 %v1403_v17, %v1244_v13  ;;  %v5091_v3 = vld [vmem:[%s6273_s3 + $0x8] sm:$0xff]   ;;  %v5094_v13 = vld [vmem:[%s6273_s3 + $0x20] sm:$0xff]  }
 0x2d9   : > { %v5114_v15 = vld [vmem:[%s6273_s3 + $0x60] sm:$0xff]   ;;  %v5115_v17 = vld [vmem:[%s6273_s3 + $0x68] sm:$0xff]  }
 0x2da   : > { %v1245_v10 = vadd.f32 %v1242_v6, %v1083_v12  ;;  %v1410_v23 = vpack.c.bf16 %v1408_v19, %v1408_v19  ;;  %v5092_v6 = vld [vmem:[%s6273_s3 + $0x10] sm:$0xff]   ;;  %v5111_v12 = vld [vmem:[%s6273_s3 + $0x58] sm:$0xff]  }
 0x2db   : > { %v1396_v16 = vpop.permute.xlu1 %1395  ;;  %v5097_v19 = vld [vmem:[%s6273_s3 + $0x38] sm:$0xff]  }
 0x2dc   : > { %v1404_v18 = vmul.f32 %v4276_v11, %v1396_v16  ;;  %v5093_v11 = vld [vmem:[%s6273_s3 + $0x18] sm:$0xff]   ;;  %v5095_v16 = vld [vmem:[%s6273_s3 + $0x28] sm:$0xff]  }
 0x2de   : > { %v1407_v21 = vadd.f32 %v1404_v18, %v1245_v10  ;;  %v5096_v10 = vld [vmem:[%s6273_s3 + $0x30] sm:$0xff]  }
 0x2df   : > { %v5118_v18 = vld [vmem:[%s6273_s3 + $0x70] sm:$0xff]  }
 0x2e0   : > { %v1409_v22 = vpack.c.bf16 %v1407_v21, %v1406_v20  ;;  %v5119_v20 = vld [vmem:[%s6273_s3 + $0x78] sm:$0xff]   ;;  %v5098_v21 = vld [vmem:[%s6274_s24] sm:$0xff]  }
 0x2e2   : > { %4774 = vmatprep.mubr.msk.bf16.mxu0 %vm1434_vm2, %v1409_v22  ;;  %v5122_v22 = vld [vmem:[%s6273_s3 + $0x80] sm:$0xff]  }
 0x2e3   : > { %4775 = vmatmul.mubr.msk.bf16.vlgmr.msra.gmra.mxu0 %vm1434_vm2, %v1410_v23  ;;  %v5099_v23 = vld [vmem:[%s6274_s24 + $0x8] sm:$0xff]  }
 0x2e4   : > { %4787 = vmatpush3.bf16.msra.mxu0 %v5087_v24  ;;  %v5100_v24 = vld [vmem:[%s6274_s24 + $0x10] sm:$0xff]  }
 0x2e5   : > { %4788 = vmatprep.subr.bf16.mxu0 %v5089_v26 }
 0x2e8   : > { %4789 = vmatpush3.bf16.msra.mxu0 %v5089_v26  ;;  %v5101_v26 = vld [vmem:[%s6274_s24 + $0x18] sm:$0xff]  }
 0x3a3   : > { %v4776_v28 = vpop.f32.mrf.mxu0 }
 0x3a4   : > { %v1484_v29 = vadd.f32 %v4776_v28, %v4278_v27  ;;  %v5102_v28 = vld [vmem:[%s6274_s24 + $0x20] sm:$0xff]  }
 0x3a5   : > { %v1475_v30 = vpop.f32.mrf.mxu0 }
 0x3a6   : > { %v1476_v31 = vadd.f32 %v4278_v27, %v1475_v30  ;;  %v1494_v34 = vmul.f32 0.2, %v1484_v29  ;;  %vm1491_vm4 = vcmp.ge.f32.partialorder %v1484_v29, 0.0  ;;  %v5103_v30 = vld [vmem:[%s6274_s24 + $0x28] sm:$0xff]  }
 0x3a7   : > { %v4777_v32 = vpop.f32.mrf.mxu0 }
 0x3a8   : > { %v1492_v33 = vmul.f32 0.2, %v1476_v31  ;;  %vm1489_vm3 = vcmp.ge.f32.partialorder %v1476_v31, 0.0  ;;  %v1497_v39 = vsel %vm1491_vm4, %v1484_v29, %v1494_v34  ;;  %v5130_v29 = vld [vmem:[%s6273_s3 + $0xa0] sm:$0xff]   ;;  %v5104_v32 = vld [vmem:[%s6274_s24 + $0x30] sm:$0xff]   ;;  %v5105_v34 = vld [vmem:[%s6274_s24 + $0x38] sm:$0xff]  }
 0x3a9   : > { %v1478_v35 = vpop.f32.mrf.mxu0  ;;  %v5438_v44 = vpack.c.bf16 %v1497_v39, %v1497_v39  ;;  %v1500_v46 = vsel %vm1434_vm2, %v1497_v39, -inf  ;;  %v5140_v39 = vld [vmem:[%s6273_s3 + $0xc8] sm:$0xff]  }
 0x3aa   : > { %v1479_v36 = vadd.f32 %v4278_v27, %v1478_v35  ;;  %v1495_v37 = vsel %vm1489_vm3, %v1476_v31, %v1492_v33  ;;  %v5128_v27 = vld [vmem:[%s6273_s3 + $0x98] sm:$0xff]   ;;  %v5132_v31 = vld [vmem:[%s6273_s3 + $0xa8] sm:$0xff]   ;;  %v5134_v33 = vld [vmem:[%s6273_s3 + $0xb0] sm:$0xff]  }
 0x3ab   : > { %v1498_v41 = vsel %vm1434_vm2, %v1495_v37, -inf  ;;  %v5136_v35 = vld [vmem:[%s6273_s3 + $0xb8] sm:$0xff]  }
 0x3ac   : > { %vm1490_vm5 = vcmp.ge.f32.partialorder %v1479_v36, 0.0  ;;  %v1493_v38 = vmul.f32 0.2, %v1479_v36 }
 0x3ae   : > { %v1496_v40 = vsel %vm1490_vm5, %v1479_v36, %v1493_v38  ;;  %v5108_v36 = vld [vmem:[%s6274_s24 + $0x40] sm:$0xff]   ;;  %v5109_v38 = vld [vmem:[%s6274_s24 + $0x48] sm:$0xff]  }
 0x3af   : > { %v1499_v42 = vsel %vm1434_vm2, %v1496_v40, -inf  ;;  %v5436_v43 = vpack.c.bf16 %v1496_v40, %v1495_v37  ;;  %v5138_v37 = vld [vmem:[%s6273_s3 + $0xc0] sm:$0xff]   ;;  %v5112_v40 = vld [vmem:[%s6274_s24 + $0x50] sm:$0xff]  }
 0x3b0   : > { %v1501_v45 = vmax.f32 %v1498_v41, %v1499_v42  ;;  %v5142_v41 = vld [vmem:[%s6273_s3 + $0xd0] sm:$0xff]   ;;  %v5113_v42 = vld [vmem:[%s6274_s24 + $0x58] sm:$0xff]  }
 0x3b1   : > { %4782 = vmatprep.mubr.msk.bf16.mxu1 %vm1434_vm2, %v5436_v43  ;;  %4790 = vmatprep.mubr.msk.bf16.mxu0 %vm1434_vm2, %v5436_v43 }
 0x3b2   : > { %v1502_v47 = vmax.f32 %v1501_v45, %v1500_v46  ;;  %4783 = vmatmul.mubr.msk.bf16.vlgmr.msra.gmra.mxu1 %vm1434_vm2, %v5438_v44  ;;  %4791 = vmatmul.mubr.msk.bf16.vlgmr.msra.gmra.mxu0 %vm1434_vm2, %v5438_v44  ;;  %v5144_v45 = vld [vmem:[%s6273_s3 + $0xd8] sm:$0xff]   ;;  %v5116_v46 = vld [vmem:[%s6274_s24 + $0x60] sm:$0xff]  }
 0x3b3   : > { %4798 = vmatprep.mubr.msk.bf16.mxu0 %vm1975_vm7, %v5090_v54  ;;  %4814 = vmatprep.mubr.msk.bf16.mxu1 %vm1975_vm7, %v5106_v55  ;;  %v5152_v54 = vld [vmem:[%s6273_s3 + $0xf8] sm:$0xff]   ;;  %v5123_v55 = vld [vmem:[%s6274_s24 + $0x80] sm:$0xff]  }
 0x3b4   : > { %v1503_v48 = vrot.slane %v1502_v47, 4 }
 0x3b6   : > { %v1504_v49 = vmax.f32 %v1502_v47, %v1503_v48  ;;  %v5146_v47 = vld [vmem:[%s6273_s3 + $0xe0] sm:$0xff]   ;;  %v5117_v48 = vld [vmem:[%s6274_s24 + $0x68] sm:$0xff]  }
 0x3b8   : > { %v1505_v50 = vrot.slane %v1504_v49, 2 }
 0x3ba   : > { %v1506_v51 = vmax.f32 %v1504_v49, %v1505_v50  ;;  %v5148_v49 = vld [vmem:[%s6273_s3 + $0xe8] sm:$0xff]   ;;  %v5120_v50 = vld [vmem:[%s6274_s24 + $0x70] sm:$0xff]  }
 0x3bc   : > { %v1507_v52 = vrot.slane %v1506_v51, 1 }
 0x3be   : > { %v1508_v53 = vmax.f32 %v1506_v51, %v1507_v52  ;;  %v5150_v51 = vld [vmem:[%s6273_s3 + $0xf0] sm:$0xff]   ;;  %v5162_v52 = vld [vmem:[%s6252_s16 + $0x18] sm:$0xff]  }
 0x3c0   : > { %1510 = vst.msk [vmem:[%s714_s2] sm:$0x1] %vm1509_vm6, %v1508_v53  ;;  %v5121_v53 = vld [vmem:[%s6274_s24 + $0x78] sm:$0xff]  }
 0x472   : > { %v4784_v56 = vpop.f32.mrf.mxu1  ;;  %v4792_v57 = vpop.f32.mrf.mxu0 }
 0x473   : > { %v1794_v58 = vpack.c.bf16 %v4792_v57, %v4792_v57  ;;  %v1720_v2 = vpack.c.bf16 %v4784_v56, %v4784_v56  ;;  %v5154_v56 = vld [vmem:[%s6273_s3 + $0x100] sm:$0xff]   ;;  %v5125_v57 = vld [vmem:[%s6274_s24 + $0x88] sm:$0xff]  }
 0x474   : > { %v1569_v59 = vpop.f32.mrf.mxu1  ;;  %v1633_v60 = vpop.f32.mrf.mxu0 }
 0x475   : > { %5066 = vmatprep.subr.msk.bf16.mxu0 %vm2084_vm8, %v1794_v58  ;;  %5067 = vmatprep.subr.msk.bf16.mxu1 %vm2084_vm8, %v1794_v58  ;;  %v2086_v61 = vsel %vm2084_vm8, %v1794_v58, 0  ;;  %v2698_v8 = vsel %vm2084_vm8, %v1720_v2, 0  ;;  %v5156_v58 = vld [vmem:[%s6273_s3 + $0x108] sm:$0xff]  }
 0x476   : > { %v4785_v62 = vpop.f32.mrf.mxu1  ;;  %v4793_v63 = vpop.f32.mrf.mxu0  ;;  %4795 = vmatpush3.bf16.msra.mxu0 %v2086_v61  ;;  %5056 = vmatpush3.bf16.msra.mxu1 %v2086_v61  ;;  %v5163_v61 = vld [vmem:[%s6252_s16 + $0x10] sm:$0xff]  }
 0x477   : > { %v5129_v62 = vld [vmem:[%s6274_s24 + $0x98] sm:$0xff]  }
 0x478   : > { %v1636_v0 = vpop.f32.mrf.mxu0  ;;  %v1572_v5 = vpop.f32.mrf.mxu1  ;;  %v5160_v63 = vld [vmem:[%s6273_s3 + $0x118] sm:$0xff]  }
 0x479   : > { %v1793_v1 = vpack.c.bf16 %v1636_v0, %v1633_v60  ;;  %v1719_v9 = vpack.c.bf16 %v1572_v5, %v1569_v59  ;;  %v5127_v59 = vld [vmem:[%s6274_s24 + $0x90] sm:$0xff]   ;;  %v5131_v0 = vld [vmem:[%s6274_s24 + $0xa0] sm:$0xff]   ;;  %v5137_v5 = vld [vmem:[%s6274_s24 + $0xb8] sm:$0xff]  }
 0x47a   : > { %v5158_v60 = vld [vmem:[%s6273_s3 + $0x110] sm:$0xff]  }
 0x47b   : > { %4796 = vmatprep.subr.bf16.mxu0 %v1793_v1  ;;  %5055 = vmatprep.subr.bf16.mxu1 %v1793_v1 }
 0x47c   : > { %4797 = vmatpush3.bf16.msra.mxu0 %v1793_v1  ;;  %5057 = vmatpush3.bf16.msra.mxu1 %v1793_v1  ;;  %v5164_v1 = vld [vmem:[%s6252_s16 + $0x8] sm:$0xff]  }
 0x47d   : > { %5068 = vmatprep.subr.msk.bf16.mxu0 %vm2084_vm8, %v1720_v2  ;;  %4946 = vmatprep.subr.bf16.mxu1 %v5162_v52  ;;  %v5165_v2 = vld [vmem:[%s6252_s16] sm:$0xff]  }
 0x47f   : > { %4799 = vmatmul.mubr.msk.bf16.vlgmr.msra.gmra.mxu0 %vm1975_vm7, %v5091_v3  ;;  %4815 = vmatmul.mubr.msk.bf16.vlgmr.msra.gmra.mxu1 %vm1975_vm7, %v5107_v4  ;;  %v5133_v3 = vld [vmem:[%s6274_s24 + $0xa8] sm:$0xff]   ;;  %v5135_v4 = vld [vmem:[%s6274_s24 + $0xb0] sm:$0xff]  }
 0x480   : > { %4871 = vmatpush3.bf16.msra.mxu0 %v2698_v8  ;;  %4802 = vmatprep.mubr.msk.bf16.mxu0 %vm1975_vm7, %v5092_v6  ;;  %v5139_v6 = vld [vmem:[%s6274_s24 + $0xc0] sm:$0xff]   ;;  %v5143_v8 = vld [vmem:[%s6274_s24 + $0xd0] sm:$0xff]  }
 0x481   : > { %4872 = vmatprep.subr.bf16.mxu0 %v1719_v9  ;;  %4818 = vmatprep.mubr.msk.bf16.mxu1 %vm1975_vm7, %v5110_v7  ;;  %v5141_v7 = vld [vmem:[%s6274_s24 + $0xc8] sm:$0xff]  }
 0x482   : > { %4947 = vmatpush3.bf16.msra.mxu1 %v5162_v52 }
 0x483   : > { %4948 = vmatprep.subr.bf16.mxu1 %v5163_v61 }
 0x484   : > { %4873 = vmatpush3.bf16.msra.mxu0 %v1719_v9  ;;  %v5145_v9 = vld [vmem:[%s6274_s24 + $0xd8] sm:$0xff]  }
 0x486   : > { %4949 = vmatpush3.bf16.msra.mxu1 %v5163_v61 }
 0x487   : > { %4803 = vmatmul.mubr.msk.bf16.gmra.mxu0 %vm1975_vm7, %v5093_v11  ;;  %4819 = vmatmul.mubr.msk.bf16.gmra.mxu1 %vm1975_vm7, %v5111_v12  ;;  %v5147_v11 = vld [vmem:[%s6274_s24 + $0xe0] sm:$0xff]   ;;  %v5149_v12 = vld [vmem:[%s6274_s24 + $0xe8] sm:$0xff]  }
 0x488   : > { %4806 = vmatprep.mubr.msk.bf16.mxu0 %vm1975_vm7, %v5094_v13  ;;  %4822 = vmatprep.mubr.msk.bf16.mxu1 %vm1975_vm7, %v5114_v15  ;;  %v5151_v13 = vld [vmem:[%s6274_s24 + $0xf0] sm:$0xff]   ;;  %v5153_v15 = vld [vmem:[%s6274_s24 + $0xf8] sm:$0xff]  }
 0x489   : > { %4950 = vmatprep.subr.bf16.mxu1 %v5164_v1 }
 0x48a   : > { %4951 = vmatpush3.bf16.msra.mxu1 %v5164_v1 }
 0x48b   : > { %4952 = vmatprep.subr.bf16.mxu1 %v5165_v2 }
 0x48e   : > { %4953 = vmatpush3.bf16.msra.mxu1 %v5165_v2 }
 0x48f   : > { %4807 = vmatmul.mubr.msk.bf16.gmra.mxu0 %vm1975_vm7, %v5095_v16  ;;  %4823 = vmatmul.mubr.msk.bf16.gmra.mxu1 %vm1975_vm7, %v5115_v17  ;;  %v5155_v16 = vld [vmem:[%s6274_s24 + $0x100] sm:$0xff]   ;;  %v5157_v17 = vld [vmem:[%s6274_s24 + $0x108] sm:$0xff]  }
 0x490   : > { %4810 = vmatprep.mubr.msk.bf16.mxu0 %vm1975_vm7, %v5096_v10  ;;  %4826 = vmatprep.mubr.msk.bf16.mxu1 %vm1975_vm7, %v5118_v18  ;;  %v5159_v10 = vld [vmem:[%s6274_s24 + $0x110] sm:$0xff]   ;;  %v5161_v18 = vld [vmem:[%s6274_s24 + $0x118] sm:$0xff]  }
 0x497   : > { %4811 = vmatmul.mubr.msk.bf16.gmra.mxu0 %vm1975_vm7, %v5097_v19  ;;  %4827 = vmatmul.mubr.msk.bf16.gmra.mxu1 %vm1975_vm7, %v5119_v20 }
 0x498   : > { %4874 = vmatprep.mubr.msk.bf16.mxu0 %vm1975_vm7, %v5098_v21  ;;  %4830 = vmatprep.mubr.msk.bf16.mxu1 %vm1975_vm7, %v5122_v22 }
 0x49f   : > { %4875 = vmatmul.mubr.msk.bf16.vlgmr.msra.gmra.mxu0 %vm1975_vm7, %v5099_v23  ;;  %4831 = vmatmul.mubr.msk.bf16.gmra.mxu1 %vm1975_vm7, %v5124_v14 }
 0x4a0   : > { %4878 = vmatprep.mubr.msk.bf16.mxu0 %vm1975_vm7, %v5100_v24  ;;  %4834 = vmatprep.mubr.msk.bf16.mxu1 %vm1975_vm7, %v5126_v25 }
 0x4a7   : > { %4879 = vmatmul.mubr.msk.bf16.gmra.mxu0 %vm1975_vm7, %v5101_v26  ;;  %4835 = vmatmul.mubr.msk.bf16.gmra.mxu1 %vm1975_vm7, %v5128_v27 }
 0x4a8   : > { %4882 = vmatprep.mubr.msk.bf16.mxu0 %vm1975_vm7, %v5102_v28  ;;  %4838 = vmatprep.mubr.msk.bf16.mxu1 %vm1975_vm7, %v5130_v29 }
 0x4af   : > { %4883 = vmatmul.mubr.msk.bf16.gmra.mxu0 %vm1975_vm7, %v5103_v30  ;;  %4839 = vmatmul.mubr.msk.bf16.gmra.mxu1 %vm1975_vm7, %v5132_v31 }
 0x4b0   : > { %4886 = vmatprep.mubr.msk.bf16.mxu0 %vm1975_vm7, %v5104_v32  ;;  %4842 = vmatprep.mubr.msk.bf16.mxu1 %vm1975_vm7, %v5134_v33 }
 0x4b7   : > { %4887 = vmatmul.mubr.msk.bf16.gmra.mxu0 %vm1975_vm7, %v5105_v34  ;;  %4843 = vmatmul.mubr.msk.bf16.gmra.mxu1 %vm1975_vm7, %v5136_v35 }
 0x4b8   : > { %4890 = vmatprep.mubr.msk.bf16.mxu0 %vm1975_vm7, %v5108_v36  ;;  %4846 = vmatprep.mubr.msk.bf16.mxu1 %vm1975_vm7, %v5138_v37 }
 0x4bf   : > { %4891 = vmatmul.mubr.msk.bf16.gmra.mxu0 %vm1975_vm7, %v5109_v38  ;;  %4847 = vmatmul.mubr.msk.bf16.gmra.mxu1 %vm1975_vm7, %v5140_v39 }
 0x4c0   : > { %4894 = vmatprep.mubr.msk.bf16.mxu0 %vm1975_vm7, %v5112_v40  ;;  %4850 = vmatprep.mubr.msk.bf16.mxu1 %vm1975_vm7, %v5142_v41 }
 0x4c7   : > { %4895 = vmatmul.mubr.msk.bf16.gmra.mxu0 %vm1975_vm7, %v5113_v42  ;;  %4851 = vmatmul.mubr.msk.bf16.gmra.mxu1 %vm1975_vm7, %v5144_v45 }
 0x4c8   : > { %4898 = vmatprep.mubr.msk.bf16.mxu0 %vm1975_vm7, %v5116_v46  ;;  %4854 = vmatprep.mubr.msk.bf16.mxu1 %vm1975_vm7, %v5146_v47 }
 0x4cf   : > { %4899 = vmatmul.mubr.msk.bf16.gmra.mxu0 %vm1975_vm7, %v5117_v48  ;;  %4855 = vmatmul.mubr.msk.bf16.gmra.mxu1 %vm1975_vm7, %v5148_v49 }
 0x4d0   : > { %4902 = vmatprep.mubr.msk.bf16.mxu0 %vm1975_vm7, %v5120_v50  ;;  %4858 = vmatprep.mubr.msk.bf16.mxu1 %vm1975_vm7, %v5150_v51 }
 0x4d7   : > { %4903 = vmatmul.mubr.msk.bf16.gmra.mxu0 %vm1975_vm7, %v5121_v53  ;;  %4859 = vmatmul.mubr.msk.bf16.gmra.mxu1 %vm1975_vm7, %v5152_v54 }
 0x4d8   : > { %4906 = vmatprep.mubr.msk.bf16.mxu0 %vm1975_vm7, %v5123_v55  ;;  %4862 = vmatprep.mubr.msk.bf16.mxu1 %vm1975_vm7, %v5154_v56 }
 0x4df   : > { %4907 = vmatmul.mubr.msk.bf16.gmra.mxu0 %vm1975_vm7, %v5125_v57  ;;  %4863 = vmatmul.mubr.msk.bf16.gmra.mxu1 %vm1975_vm7, %v5156_v58 }
 0x4e0   : > { %4910 = vmatprep.mubr.msk.bf16.mxu0 %vm1975_vm7, %v5127_v59  ;;  %4866 = vmatprep.mubr.msk.bf16.mxu1 %vm1975_vm7, %v5158_v60  ;;  %v5813_v60 = vld [vmem:[%s6251_s15] ss:$0 sm:$0xff] }
 0x4e7   : > { %4911 = vmatmul.mubr.msk.bf16.gmra.mxu0 %vm1975_vm7, %v5129_v62  ;;  %4867 = vmatmul.mubr.msk.bf16.gmra.mxu1 %vm1975_vm7, %v5160_v63 }
 0x4e8   : > { %4914 = vmatprep.mubr.msk.bf16.mxu0 %vm1975_vm7, %v5131_v0 }
 0x4ef   : > { %4915 = vmatmul.mubr.msk.bf16.gmra.mxu0 %vm1975_vm7, %v5133_v3 }
 0x4f0   : > { %4918 = vmatprep.mubr.msk.bf16.mxu0 %vm1975_vm7, %v5135_v4 }
 0x4f7   : > { %4919 = vmatmul.mubr.msk.bf16.gmra.mxu0 %vm1975_vm7, %v5137_v5 }
 0x4f8   : > { %4922 = vmatprep.mubr.msk.bf16.mxu0 %vm1975_vm7, %v5139_v6 }
 0x4ff   : > { %4923 = vmatmul.mubr.msk.bf16.gmra.mxu0 %vm1975_vm7, %v5141_v7 }
 0x500   : > { %4926 = vmatprep.mubr.msk.bf16.mxu0 %vm1975_vm7, %v5143_v8 }
 0x507   : > { %4927 = vmatmul.mubr.msk.bf16.gmra.mxu0 %vm1975_vm7, %v5145_v9 }
 0x508   : > { %4930 = vmatprep.mubr.msk.bf16.mxu0 %vm1975_vm7, %v5147_v11 }
 0x50f   : > { %4931 = vmatmul.mubr.msk.bf16.gmra.mxu0 %vm1975_vm7, %v5149_v12 }
 0x510   : > { %4934 = vmatprep.mubr.msk.bf16.mxu0 %vm1975_vm7, %v5151_v13 }
 0x517   : > { %4935 = vmatmul.mubr.msk.bf16.gmra.mxu0 %vm1975_vm7, %v5153_v15 }
 0x518   : > { %4938 = vmatprep.mubr.msk.bf16.mxu0 %vm1975_vm7, %v5155_v16 }
 0x51f   : > { %4939 = vmatmul.mubr.msk.bf16.gmra.mxu0 %vm1975_vm7, %v5157_v17 }
 0x520   : > { %4942 = vmatprep.mubr.msk.bf16.mxu0 %vm1975_vm7, %v5159_v10 }
 0x527   : > { %4943 = vmatmul.mubr.msk.bf16.gmra.mxu0 %vm1975_vm7, %v5161_v18 }
 0x53f   : > { %v4800_v19 = vpop.f32.mrf.mxu0  ;;  %v5758_v20 = vpop.f32.mrf.mxu1 }
 0x541   : > { %v2122_v21 = vpop.f32.mrf.mxu0  ;;  %v5760_v22 = vpop.f32.mrf.mxu1 }
 0x543   : > { %v4801_v23 = vpop.f32.mrf.mxu0  ;;  %v5762_v14 = vpop.f32.mrf.mxu1 }
 0x545   : > { %v2125_v24 = vpop.f32.mrf.mxu0  ;;  %v5764_v25 = vpop.f32.mrf.mxu1 }
 0x547   : > { %v4804_v26 = vpop.f32.mrf.mxu0  ;;  %v5766_v27 = vpop.f32.mrf.mxu1 }
 0x549   : > { %v2138_v28 = vpop.f32.mrf.mxu0  ;;  %v5768_v29 = vpop.f32.mrf.mxu1 }
 0x54b   : > { %v4805_v30 = vpop.f32.mrf.mxu0  ;;  %v5770_v31 = vpop.f32.mrf.mxu1 }
 0x54d   : > { %v2141_v32 = vpop.f32.mrf.mxu0  ;;  %v5772_v33 = vpop.f32.mrf.mxu1 }
 0x54f   : > { %v5774_v34 = vpop.f32.mrf.mxu0  ;;  %v5776_v35 = vpop.f32.mrf.mxu1 }
 0x551   : > { %v2154_v36 = vpop.f32.mrf.mxu0  ;;  %v5778_v37 = vpop.f32.mrf.mxu1 }
 0x553   : > { %v5780_v38 = vpop.f32.mrf.mxu0  ;;  %v5782_v39 = vpop.f32.mrf.mxu1 }
 0x555   : > { %v5784_v40 = vpop.f32.mrf.mxu0  ;;  %v5786_v41 = vpop.f32.mrf.mxu1 }
 0x557   : > { %v5788_v42 = vpop.f32.mrf.mxu0  ;;  %v5790_v45 = vpop.f32.mrf.mxu1 }
 0x559   : > { %v5792_v46 = vpop.f32.mrf.mxu0  ;;  %v5794_v47 = vpop.f32.mrf.mxu1 }
 0x55b   : > { %v5796_v48 = vpop.f32.mrf.mxu0  ;;  %v5798_v49 = vpop.f32.mrf.mxu1 }
 0x55d   : > { %v5800_v50 = vpop.f32.mrf.mxu0  ;;  %v5802_v51 = vpop.f32.mrf.mxu1 }
 0x55f   : > { %v4876_v52 = vpop.f32.mrf.mxu0  ;;  %v5804_v53 = vpop.f32.mrf.mxu1 }
 0x560   : > { %v2743_v57 = vadd.f32 %v4876_v52, %v4800_v19 }
 0x561   : > { %v2734_v54 = vpop.f32.mrf.mxu0  ;;  %v5806_v55 = vpop.f32.mrf.mxu1 }
 0x562   : > { %v2735_v56 = vadd.f32 %v2734_v54, %v2122_v21  ;;  %v3030_v3 = vadd.f32 %v5813_v60, %v2743_v57 }
 0x563   : > { %v4877_v58 = vpop.f32.mrf.mxu0  ;;  %v5808_v59 = vpop.f32.mrf.mxu1 }
 0x564   : > { %v2746_v61 = vadd.f32 %v4877_v58, %v4801_v23  ;;  %v3028_v0 = vadd.f32 %v5813_v60, %v2735_v56  ;;  %v3102_v15 = vmax.f32 %v3030_v3, 0.0 }
 0x565   : > { %v2737_v62 = vpop.f32.mrf.mxu0  ;;  %v5815_v63 = vpop.f32.mrf.mxu1 }
 0x566   : > { %v3031_v1 = vadd.f32 %v5813_v60, %v2746_v61  ;;  %v2738_v2 = vadd.f32 %v2737_v62, %v2125_v24  ;;  %v3100_v11 = vmax.f32 %v3028_v0, 0.0 }
 0x567   : > { %v4880_v4 = vpop.f32.mrf.mxu0  ;;  %v5820_v5 = vpop.f32.mrf.mxu1 }
 0x568   : > { %v3029_v6 = vadd.f32 %v5813_v60, %v2738_v2  ;;  %v3103_v7 = vmax.f32 %v3031_v1, 0.0  ;;  %v2759_v16 = vadd.f32 %v4880_v4, %v4804_v26 }
 0x569   : > { %v2750_v8 = vpop.f32.mrf.mxu0  ;;  %v5823_v9 = vpop.f32.mrf.mxu1 }
 0x56a   : > { %v3101_v12 = vmax.f32 %v3029_v6, 0.0  ;;  %v2751_v13 = vadd.f32 %v2750_v8, %v2138_v28  ;;  %v3173_v21 = vpack.c.bf16 %v3103_v7, %v3102_v15  ;;  %v3034_v28 = vadd.f32 %v5813_v60, %v2759_v16 }
 0x56b   : > { %v4881_v17 = vpop.f32.mrf.mxu0  ;;  %v5825_v10 = vpop.f32.mrf.mxu1 }
 0x56c   : > { %v3172_v18 = vpack.c.bf16 %v3101_v12, %v3100_v11  ;;  %v2762_v19 = vadd.f32 %v4881_v17, %v4805_v30  ;;  %v3032_v52 = vadd.f32 %v5813_v60, %v2751_v13  ;;  %v3106_v2 = vmax.f32 %v3034_v28, 0.0 }
 0x56d   : > { %v2753_v23 = vpop.f32.mrf.mxu0  ;;  %v5827_v24 = vpop.f32.mrf.mxu1 }
 0x56e   : > { %v3035_v54 = vadd.f32 %v5813_v60, %v2762_v19  ;;  %v2754_v56 = vadd.f32 %v2753_v23, %v2141_v32  ;;  %4954 = vmatprep.mubr.msk.bf16.mxu1 %vm3247_vm9, %v3172_v18  ;;  %v3104_v62 = vmax.f32 %v3032_v52, 0.0 }
 0x56f   : > { %v4884_v26 = vpop.f32.mrf.mxu0  ;;  %4955 = vmatmul.mubr.msk.bf16.vlgmr.msra.gmra.mxu1 %vm3247_vm9, %v3173_v21  ;;  %v5835_v61 = vpop.f32.mrf.mxu1 }
 0x570   : > { %v3033_v57 = vadd.f32 %v5813_v60, %v2754_v56  ;;  %v3107_v58 = vmax.f32 %v3035_v54, 0.0  ;;  %v2775_v3 = vadd.f32 %v4884_v26, %v5774_v34 }
 0x571   : > { %v2766_v30 = vpop.f32.mrf.mxu0  ;;  %v5839_v11 = vpop.f32.mrf.mxu1 }
 0x572   : > { %v3105_v0 = vmax.f32 %v3033_v57, 0.0  ;;  %v2767_v1 = vadd.f32 %v2766_v30, %v2154_v36  ;;  %v3175_v7 = vpack.c.bf16 %v3107_v58, %v3106_v2  ;;  %v3038_v36 = vadd.f32 %v5813_v60, %v2775_v3 }
 0x573   : > { %v4885_v32 = vpop.f32.mrf.mxu0  ;;  %v5848_v18 = vpop.f32.mrf.mxu1 }
 0x574   : > { %v3174_v4 = vpack.c.bf16 %v3105_v0, %v3104_v62  ;;  %v2778_v6 = vadd.f32 %v4885_v32, %v5780_v38  ;;  %v3036_v12 = vadd.f32 %v5813_v60, %v2767_v1  ;;  %v3110_v52 = vmax.f32 %v3038_v36, 0.0 }
 0x575   : > { %v2769_v8 = vpop.f32.mrf.mxu0  ;;  %v5853_v58 = vpop.f32.mrf.mxu1 }
 0x576   : > { %v3039_v13 = vadd.f32 %v5813_v60, %v2778_v6  ;;  %v2770_v15 = vadd.f32 %v2769_v8, %v5784_v40  ;;  %4958 = vmatprep.mubr.msk.bf16.mxu1 %vm3247_vm9, %v3174_v4  ;;  %v3108_v19 = vmax.f32 %v3036_v12, 0.0 }
 0x577   : > { %v4888_v16 = vpop.f32.mrf.mxu0  ;;  %4959 = vmatmul.mubr.msk.bf16.gmra.mxu1 %vm3247_vm9, %v3175_v7  ;;  %v5862_v3 = vpop.f32.mrf.mxu1 }
 0x578   : > { %v3037_v34 = vadd.f32 %v5813_v60, %v2770_v15  ;;  %v3111_v38 = vmax.f32 %v3039_v13, 0.0  ;;  %v2791_v40 = vadd.f32 %v4888_v16, %v5788_v42 }
 0x579   : > { %v2782_v17 = vpop.f32.mrf.mxu0  ;;  %v5867_v16 = vpop.f32.mrf.mxu1 }
 0x57a   : > { %v3109_v21 = vmax.f32 %v3037_v34, 0.0  ;;  %v2783_v23 = vadd.f32 %v2782_v17, %v5792_v46  ;;  %v3177_v26 = vpack.c.bf16 %v3111_v38, %v3110_v52  ;;  %v3042_v46 = vadd.f32 %v5813_v60, %v2791_v40 }
 0x57b   : > { %v4889_v54 = vpop.f32.mrf.mxu0 }
 0x57c   : > { %v3176_v56 = vpack.c.bf16 %v3109_v21, %v3108_v19  ;;  %v2794_v28 = vadd.f32 %v4889_v54, %v5796_v48  ;;  %v3040_v30 = vadd.f32 %v5813_v60, %v2783_v23  ;;  %v3114_v7 = vmax.f32 %v3042_v46, 0.0  ;;  %v5876_v23 = vpop.f32.mrf.mxu1 }
 0x57d   : > { %v2785_v57 = vpop.f32.mrf.mxu0 }
 0x57e   : > { %v3043_v62 = vadd.f32 %v5813_v60, %v2794_v28  ;;  %v2786_v0 = vadd.f32 %v2785_v57, %v5800_v50  ;;  %4962 = vmatprep.mubr.msk.bf16.mxu1 %vm3247_vm9, %v3176_v56  ;;  %v3112_v32 = vmax.f32 %v3040_v30, 0.0 }
 0x57f   : > { %v4892_v1 = vpop.f32.mrf.mxu0  ;;  %4963 = vmatmul.mubr.msk.bf16.gmra.mxu1 %vm3247_vm9, %v3177_v26 }
 0x580   : > { %v3041_v42 = vadd.f32 %v5813_v60, %v2786_v0  ;;  %v3115_v48 = vmax.f32 %v3043_v62, 0.0  ;;  %v2807_v50 = vadd.f32 %v4892_v1, %v5758_v20  ;;  %v5881_v0 = vpop.f32.mrf.mxu1 }
 0x581   : > { %v2798_v2 = vpop.f32.mrf.mxu0 }
 0x582   : > { %v3113_v4 = vmax.f32 %v3041_v42, 0.0  ;;  %v2799_v6 = vadd.f32 %v2798_v2, %v5760_v22  ;;  %v3179_v15 = vpack.c.bf16 %v3115_v48, %v3114_v7  ;;  %v3046_v22 = vadd.f32 %v5813_v60, %v2807_v50 }
 0x583   : > { %v4893_v8 = vpop.f32.mrf.mxu0 }
 0x584   : > { %v3178_v12 = vpack.c.bf16 %v3113_v4, %v3112_v32  ;;  %v2810_v13 = vadd.f32 %v4893_v8, %v5762_v14  ;;  %v3044_v34 = vadd.f32 %v5813_v60, %v2799_v6  ;;  %v3118_v56 = vmax.f32 %v3046_v22, 0.0  ;;  %v5890_v32 = vpop.f32.mrf.mxu1 }
 0x585   : > { %v2801_v36 = vpop.f32.mrf.mxu0 }
 0x586   : > { %v3047_v38 = vadd.f32 %v5813_v60, %v2810_v13  ;;  %v2802_v17 = vadd.f32 %v2801_v36, %v5764_v25  ;;  %4966 = vmatprep.mubr.msk.bf16.mxu1 %vm3247_vm9, %v3178_v12  ;;  %v3116_v52 = vmax.f32 %v3044_v34, 0.0  ;;  %v5895_v34 = vpop.f32.mrf.mxu1 }
 0x587   : > { %v4896_v19 = vpop.f32.mrf.mxu0  ;;  %4967 = vmatmul.mubr.msk.bf16.gmra.mxu1 %vm3247_vm9, %v3179_v15 }
 0x588   : > { %v3045_v20 = vadd.f32 %v5813_v60, %v2802_v17  ;;  %v3119_v14 = vmax.f32 %v3047_v38, 0.0  ;;  %v2823_v25 = vadd.f32 %v4896_v19, %v5766_v27 }
 0x589   : > { %v2814_v21 = vpop.f32.mrf.mxu0 }
 0x58a   : > { %v3117_v40 = vmax.f32 %v3045_v20, 0.0  ;;  %v2815_v54 = vadd.f32 %v2814_v21, %v5768_v29  ;;  %v3181_v30 = vpack.c.bf16 %v3119_v14, %v3118_v56  ;;  %v3050_v29 = vadd.f32 %v5813_v60, %v2823_v25  ;;  %v5904_v14 = vpop.f32.mrf.mxu1 }
 0x58b   : > { %v4897_v28 = vpop.f32.mrf.mxu0 }
 0x58c   : > { %v3180_v26 = vpack.c.bf16 %v3117_v40, %v3116_v52  ;;  %v2826_v57 = vadd.f32 %v4897_v28, %v5770_v31  ;;  %v3048_v46 = vadd.f32 %v5813_v60, %v2815_v54  ;;  %v3122_v50 = vmax.f32 %v3050_v29, 0.0 }
 0x58d   : > { %v2817_v62 = vpop.f32.mrf.mxu0 }
 0x58e   : > { %v3051_v1 = vadd.f32 %v5813_v60, %v2826_v57  ;;  %v2818_v42 = vadd.f32 %v2817_v62, %v5772_v33  ;;  %4970 = vmatprep.mubr.msk.bf16.mxu1 %vm3247_vm9, %v3180_v26  ;;  %v3120_v4 = vmax.f32 %v3048_v46, 0.0 }
 0x58f   : > { %v4900_v48 = vpop.f32.mrf.mxu0  ;;  %4971 = vmatmul.mubr.msk.bf16.gmra.mxu1 %vm3247_vm9, %v3181_v30  ;;  %v5909_v30 = vpop.f32.mrf.mxu1 }
 0x590   : > { %v3049_v27 = vadd.f32 %v5813_v60, %v2818_v42  ;;  %v3123_v31 = vmax.f32 %v3051_v1, 0.0  ;;  %v2839_v33 = vadd.f32 %v4900_v48, %v5776_v35 }
 0x591   : > { %v2830_v2 = vpop.f32.mrf.mxu0  ;;  %v5918_v48 = vpop.f32.mrf.mxu1 }
 0x592   : > { %v3121_v6 = vmax.f32 %v3049_v27, 0.0  ;;  %v2831_v7 = vadd.f32 %v2830_v2, %v5778_v37  ;;  %v3183_v15 = vpack.c.bf16 %v3123_v31, %v3122_v50  ;;  %v3054_v37 = vadd.f32 %v5813_v60, %v2839_v33 }
 0x593   : > { %v4901_v8 = vpop.f32.mrf.mxu0 }
 0x594   : > { %v3182_v12 = vpack.c.bf16 %v3121_v6, %v3120_v4  ;;  %v2842_v13 = vadd.f32 %v4901_v8, %v5782_v39  ;;  %v3052_v38 = vadd.f32 %v5813_v60, %v2831_v7  ;;  %v3126_v54 = vmax.f32 %v3054_v37, 0.0 }
 0x595   : > { %v2833_v36 = vpop.f32.mrf.mxu0 }
 0x596   : > { %v3055_v17 = vadd.f32 %v5813_v60, %v2842_v13  ;;  %v2834_v22 = vadd.f32 %v2833_v36, %v5786_v41  ;;  %4974 = vmatprep.mubr.msk.bf16.mxu1 %vm3247_vm9, %v3182_v12  ;;  %v3124_v21 = vmax.f32 %v3052_v38, 0.0  ;;  %v5923_v12 = vpop.f32.mrf.mxu1 }
 0x597   : > { %v4904_v19 = vpop.f32.mrf.mxu0  ;;  %4975 = vmatmul.mubr.msk.bf16.gmra.mxu1 %vm3247_vm9, %v3183_v15 }
 0x598   : > { %v3053_v35 = vadd.f32 %v5813_v60, %v2834_v22  ;;  %v3127_v39 = vmax.f32 %v3055_v17, 0.0  ;;  %v2855_v41 = vadd.f32 %v4904_v19, %v5790_v45  ;;  %v5932_v22 = vpop.f32.mrf.mxu1 }
 0x599   : > { %v2846_v20 = vpop.f32.mrf.mxu0 }
 0x59a   : > { %v3125_v52 = vmax.f32 %v3053_v35, 0.0  ;;  %v2847_v40 = vadd.f32 %v2846_v20, %v5794_v47  ;;  %v3185_v26 = vpack.c.bf16 %v3127_v39, %v3126_v54  ;;  %v3058_v47 = vadd.f32 %v5813_v60, %v2855_v41  ;;  %v5937_v41 = vpop.f32.mrf.mxu1 }
 0x59b   : > { %v4905_v56 = vpop.f32.mrf.mxu0 }
 0x59c   : > { %v3184_v25 = vpack.c.bf16 %v3125_v52, %v3124_v21  ;;  %v2858_v28 = vadd.f32 %v4905_v56, %v5798_v49  ;;  %v3056_v62 = vadd.f32 %v5813_v60, %v2847_v40  ;;  %v3130_v4 = vmax.f32 %v3058_v47, 0.0 }
 0x59d   : > { %v2849_v57 = vpop.f32.mrf.mxu0 }
 0x59e   : > { %v3059_v46 = vadd.f32 %v5813_v60, %v2858_v28  ;;  %v2850_v1 = vadd.f32 %v2849_v57, %v5802_v51  ;;  %4978 = vmatprep.mubr.msk.bf16.mxu1 %vm3247_vm9, %v3184_v25  ;;  %v3128_v27 = vmax.f32 %v3056_v62, 0.0  ;;  %v5946_v62 = vpop.f32.mrf.mxu1 }
 0x59f   : > { %v4908_v42 = vpop.f32.mrf.mxu0  ;;  %4979 = vmatmul.mubr.msk.bf16.gmra.mxu1 %vm3247_vm9, %v3185_v26 }
 0x5a0   : > { %v3057_v45 = vadd.f32 %v5813_v60, %v2850_v1  ;;  %v3131_v49 = vmax.f32 %v3059_v46, 0.0  ;;  %v2871_v51 = vadd.f32 %v4908_v42, %v5804_v53 }
 0x5a1   : > { %v2862_v29 = vpop.f32.mrf.mxu0 }
 0x5a2   : > { %v3129_v31 = vmax.f32 %v3057_v45, 0.0  ;;  %v2863_v2 = vadd.f32 %v2862_v29, %v5806_v55  ;;  %v3187_v33 = vpack.c.bf16 %v3131_v49, %v3130_v4  ;;  %v3062_v55 = vadd.f32 %v5813_v60, %v2871_v51 }
 0x5a3   : > { %v4909_v6 = vpop.f32.mrf.mxu0 }
 0x5a4   : > { %v3186_v7 = vpack.c.bf16 %v3129_v31, %v3128_v27  ;;  %v2874_v50 = vadd.f32 %v4909_v6, %v5808_v59  ;;  %v3060_v13 = vadd.f32 %v5813_v60, %v2863_v2  ;;  %v3134_v39 = vmax.f32 %v3062_v55, 0.0  ;;  %v5951_v2 = vpop.f32.mrf.mxu1 }
 0x5a5   : > { %v2865_v8 = vpop.f32.mrf.mxu0 }
 0x5a6   : > { %v3063_v15 = vadd.f32 %v5813_v60, %v2874_v50  ;;  %v2866_v36 = vadd.f32 %v2865_v8, %v5815_v63  ;;  %4982 = vmatprep.mubr.msk.bf16.mxu1 %vm3247_vm9, %v3186_v7  ;;  %v3132_v37 = vmax.f32 %v3060_v13, 0.0 }
 0x5a7   : > { %v4912_v38 = vpop.f32.mrf.mxu0  ;;  %4983 = vmatmul.mubr.msk.bf16.gmra.mxu1 %vm3247_vm9, %v3187_v33  ;;  %v5960_v33 = vpop.f32.mrf.mxu1 }
 0x5a8   : > { %v3061_v53 = vadd.f32 %v5813_v60, %v2866_v36  ;;  %v3135_v59 = vmax.f32 %v3063_v15, 0.0  ;;  %v2887_v63 = vadd.f32 %v4912_v38, %v5820_v5 }
 0x5a9   : > { %v2878_v17 = vpop.f32.mrf.mxu0 }
 0x5aa   : > { %v3133_v19 = vmax.f32 %v3061_v53, 0.0  ;;  %v2879_v35 = vadd.f32 %v2878_v17, %v5823_v9  ;;  %v3189_v40 = vpack.c.bf16 %v3135_v59, %v3134_v39  ;;  %v3066_v9 = vadd.f32 %v5813_v60, %v2887_v63 }
 0x5ab   : > { %v4913_v20 = vpop.f32.mrf.mxu0 }
 0x5ac   : > { %v3188_v21 = vpack.c.bf16 %v3133_v19, %v3132_v37  ;;  %v2890_v52 = vadd.f32 %v4913_v20, %v5825_v10  ;;  %v3064_v56 = vadd.f32 %v5813_v60, %v2879_v35  ;;  %v3138_v42 = vmax.f32 %v3066_v9, 0.0  ;;  %v5965_v37 = vpop.f32.mrf.mxu1 }
 0x5ad   : > { %v2881_v54 = vpop.f32.mrf.mxu0 }
 0x5ae   : > { %v3067_v25 = vadd.f32 %v5813_v60, %v2890_v52  ;;  %v2882_v28 = vadd.f32 %v2881_v54, %v5827_v24  ;;  %4986 = vmatprep.mubr.msk.bf16.mxu1 %vm3247_vm9, %v3188_v21  ;;  %v3136_v46 = vmax.f32 %v3064_v56, 0.0  ;;  %v5974_v21 = vpop.f32.mrf.mxu1 }
 0x5af   : > { %v4916_v26 = vpop.f32.mrf.mxu0  ;;  %4987 = vmatmul.mubr.msk.bf16.gmra.mxu1 %vm3247_vm9, %v3189_v40 }
 0x5b0   : > { %v3065_v5 = vadd.f32 %v5813_v60, %v2882_v28  ;;  %v3139_v10 = vmax.f32 %v3067_v25, 0.0  ;;  %v2903_v24 = vadd.f32 %v4916_v26, %v5835_v61 }
 0x5b1   : > { %v2894_v57 = vpop.f32.mrf.mxu0 }
 0x5b2   : > { %v3137_v1 = vmax.f32 %v3065_v5, 0.0  ;;  %v2895_v47 = vadd.f32 %v2894_v57, %v5839_v11  ;;  %v3191_v27 = vpack.c.bf16 %v3139_v10, %v3138_v42  ;;  %v3070_v11 = vadd.f32 %v5813_v60, %v2903_v24  ;;  %v2362_v10 = vpop.f32.mrf.mxu1 }
 0x5b3   : > { %v4917_v45 = vpop.f32.mrf.mxu0 }
 0x5b4   : > { %v3190_v49 = vpack.c.bf16 %v3137_v1, %v3136_v46  ;;  %v2906_v29 = vadd.f32 %v4917_v45, %v5848_v18  ;;  %v3068_v4 = vadd.f32 %v5813_v60, %v2895_v47  ;;  %v3142_v36 = vmax.f32 %v3070_v11, 0.0  ;;  %v4861_v24 = vpop.f32.mrf.mxu1 }
 0x5b5   : > { %v2897_v31 = vpop.f32.mrf.mxu0 }
 0x5b6   : > { %v3071_v51 = vadd.f32 %v5813_v60, %v2906_v29  ;;  %v2898_v6 = vadd.f32 %v2897_v31, %v5853_v58  ;;  %4990 = vmatprep.mubr.msk.bf16.mxu1 %vm3247_vm9, %v3190_v49  ;;  %v3140_v8 = vmax.f32 %v3068_v4, 0.0 }
 0x5b7   : > { %v4920_v7 = vpop.f32.mrf.mxu0  ;;  %4991 = vmatmul.mubr.msk.bf16.gmra.mxu1 %vm3247_vm9, %v3191_v27 }
 0x5b8   : > { %v3069_v61 = vadd.f32 %v5813_v60, %v2898_v6  ;;  %v3143_v18 = vmax.f32 %v3071_v51, 0.0  ;;  %v2919_v58 = vadd.f32 %v4920_v7, %v5862_v3  ;;  %v2365_v7 = vpop.f32.mrf.mxu1 }
 0x5b9   : > { %v2910_v50 = vpop.f32.mrf.mxu0 }
 0x5ba   : > { %v3141_v13 = vmax.f32 %v3069_v61, 0.0  ;;  %v2911_v15 = vadd.f32 %v2910_v50, %v5867_v16  ;;  %v3193_v59 = vpack.c.bf16 %v3143_v18, %v3142_v36  ;;  %v3074_v16 = vadd.f32 %v5813_v60, %v2919_v58 }
 0x5bb   : > { %v4921_v55 = vpop.f32.mrf.mxu0 }
 0x5bc   : > { %v3192_v38 = vpack.c.bf16 %v3141_v13, %v3140_v8  ;;  %v2922_v53 = vadd.f32 %v4921_v55, %v5876_v23  ;;  %v3072_v19 = vadd.f32 %v5813_v60, %v2911_v15  ;;  %v3146_v56 = vmax.f32 %v3074_v16, 0.0 }
 0x5bd   : > { %v2913_v17 = vpop.f32.mrf.mxu0 }
 0x5be   : > { %v3075_v35 = vadd.f32 %v5813_v60, %v2922_v53  ;;  %v2914_v39 = vadd.f32 %v2913_v17, %v5881_v0  ;;  %4994 = vmatprep.mubr.msk.bf16.mxu1 %vm3247_vm9, %v3192_v38  ;;  %v3144_v52 = vmax.f32 %v3072_v19, 0.0 }
 0x5bf   : > { %v4924_v63 = vpop.f32.mrf.mxu0  ;;  %4995 = vmatmul.mubr.msk.bf16.gmra.mxu1 %vm3247_vm9, %v3193_v59 }
 0x5c0   : > { %v3073_v3 = vadd.f32 %v5813_v60, %v2914_v39  ;;  %v3147_v23 = vmax.f32 %v3075_v35, 0.0  ;;  %v2935_v0 = vadd.f32 %v4924_v63, %v5890_v32 }
 0x5c1   : > { %v2926_v20 = vpop.f32.mrf.mxu0 }
 0x5c2   : > { %v3145_v40 = vmax.f32 %v3073_v3, 0.0  ;;  %v2927_v54 = vadd.f32 %v2926_v20, %v5895_v34  ;;  %v3195_v26 = vpack.c.bf16 %v3147_v23, %v3146_v56  ;;  %v3078_v34 = vadd.f32 %v5813_v60, %v2935_v0 }
 0x5c3   : > { %v4925_v25 = vpop.f32.mrf.mxu0 }
 0x5c4   : > { %v3194_v28 = vpack.c.bf16 %v3145_v40, %v3144_v52  ;;  %v2938_v9 = vadd.f32 %v4925_v25, %v5904_v14  ;;  %v3076_v57 = vadd.f32 %v5813_v60, %v2927_v54  ;;  %v3150_v27 = vmax.f32 %v3078_v34, 0.0 }
 0x5c5   : > { %v2929_v5 = vpop.f32.mrf.mxu0 }
 0x5c6   : > { %v3079_v46 = vadd.f32 %v5813_v60, %v2938_v9  ;;  %v2930_v1 = vadd.f32 %v2929_v5, %v5909_v30  ;;  %4998 = vmatprep.mubr.msk.bf16.mxu1 %vm3247_vm9, %v3194_v28  ;;  %v3148_v45 = vmax.f32 %v3076_v57, 0.0 }
 0x5c7   : > { %v4928_v47 = vpop.f32.mrf.mxu0  ;;  %4999 = vmatmul.mubr.msk.bf16.gmra.mxu1 %vm3247_vm9, %v3195_v26 }
 0x5c8   : > { %v3077_v32 = vadd.f32 %v5813_v60, %v2930_v1  ;;  %v3151_v42 = vmax.f32 %v3079_v46, 0.0  ;;  %v2951_v31 = vadd.f32 %v4928_v47, %v5918_v48  ;;  %v4864_v48 = vpop.f32.mrf.mxu1 }
 0x5c9   : > { %v2942_v14 = vpop.f32.mrf.mxu0 }
 0x5ca   : > { %v3149_v49 = vmax.f32 %v3077_v32, 0.0  ;;  %v2943_v29 = vadd.f32 %v2942_v14, %v5923_v12  ;;  %v3197_v6 = vpack.c.bf16 %v3151_v42, %v3150_v27  ;;  %v3082_v12 = vadd.f32 %v5813_v60, %v2951_v31  ;;  %v2378_v59 = vpop.f32.mrf.mxu1 }
 0x5cb   : > { %v4929_v30 = vpop.f32.mrf.mxu0 }
 0x5cc   : > { %v3196_v4 = vpack.c.bf16 %v3149_v49, %v3148_v45  ;;  %v2954_v51 = vadd.f32 %v4929_v30, %v5932_v22  ;;  %v3080_v61 = vadd.f32 %v5813_v60, %v2943_v29  ;;  %v3154_v38 = vmax.f32 %v3082_v12, 0.0 }
 0x5cd   : > { %v2945_v11 = vpop.f32.mrf.mxu0 }
 0x5ce   : > { %v3083_v18 = vadd.f32 %v5813_v60, %v2954_v51  ;;  %v2946_v50 = vadd.f32 %v2945_v11, %v5937_v41  ;;  %5002 = vmatprep.mubr.msk.bf16.mxu1 %vm3247_vm9, %v3196_v4  ;;  %v3152_v36 = vmax.f32 %v3080_v61, 0.0 }
 0x5cf   : > { %v4932_v8 = vpop.f32.mrf.mxu0  ;;  %5003 = vmatmul.mubr.msk.bf16.gmra.mxu1 %vm3247_vm9, %v3197_v6 }
 0x5d0   : > { %v3081_v13 = vadd.f32 %v5813_v60, %v2946_v50  ;;  %v3155_v22 = vmax.f32 %v3083_v18, 0.0  ;;  %v2967_v53 = vadd.f32 %v4932_v8, %v5946_v62  ;;  %v4865_v62 = vpop.f32.mrf.mxu1 }
 0x5d1   : > { %v2958_v15 = vpop.f32.mrf.mxu0 }
 0x5d2   : > { %v3153_v58 = vmax.f32 %v3081_v13, 0.0  ;;  %v2959_v55 = vadd.f32 %v2958_v15, %v5951_v2  ;;  %v3199_v35 = vpack.c.bf16 %v3155_v22, %v3154_v38  ;;  %v3086_v2 = vadd.f32 %v5813_v60, %v2967_v53 }
 0x5d3   : > { %v4933_v41 = vpop.f32.mrf.mxu0 }
 0x5d4   : > { %v3198_v17 = vpack.c.bf16 %v3153_v58, %v3152_v36  ;;  %v2970_v19 = vadd.f32 %v4933_v41, %v5960_v33  ;;  %v3084_v16 = vadd.f32 %v5813_v60, %v2959_v55  ;;  %v3158_v0 = vmax.f32 %v3086_v2, 0.0 }
 0x5d5   : > { %v2961_v39 = vpop.f32.mrf.mxu0 }
 0x5d6   : > { %v3087_v63 = vadd.f32 %v5813_v60, %v2970_v19  ;;  %v2962_v3 = vadd.f32 %v2961_v39, %v5965_v37  ;;  %5006 = vmatprep.mubr.msk.bf16.mxu1 %vm3247_vm9, %v3198_v17  ;;  %v3156_v40 = vmax.f32 %v3084_v16, 0.0  ;;  %v2381_v37 = vpop.f32.mrf.mxu1 }
 0x5d7   : > { %v4936_v23 = vpop.f32.mrf.mxu0  ;;  %5007 = vmatmul.mubr.msk.bf16.gmra.mxu1 %vm3247_vm9, %v3199_v35 }
 0x5d8   : > { %v3085_v20 = vadd.f32 %v5813_v60, %v2962_v3  ;;  %v3159_v52 = vmax.f32 %v3087_v63, 0.0  ;;  %v2983_v25 = vadd.f32 %v4936_v23, %v5974_v21  ;;  %v4868_v32 = vpop.f32.mrf.mxu1 }
 0x5d9   : > { %v2974_v33 = vpop.f32.mrf.mxu0 }
 0x5da   : > { %v3157_v54 = vmax.f32 %v3085_v20, 0.0  ;;  %v2975_v56 = vadd.f32 %v2974_v33, %v2362_v10  ;;  %v3201_v5 = vpack.c.bf16 %v3159_v52, %v3158_v0  ;;  %v3090_v47 = vadd.f32 %v5813_v60, %v2983_v25  ;;  %v2394_v4 = vpop.f32.mrf.mxu1  ;;  %v6033_v0 = vld [vmem:[%s6253_s17] ss:$0 sm:$0xff] }
 0x5db   : > { %v4937_v28 = vpop.f32.mrf.mxu0 }
 0x5dc   : > { %v3200_v9 = vpack.c.bf16 %v3157_v54, %v3156_v40  ;;  %v2986_v26 = vadd.f32 %v4937_v28, %v4861_v24  ;;  %v3088_v46 = vadd.f32 %v5813_v60, %v2975_v56  ;;  %v3162_v27 = vmax.f32 %v3090_v47, 0.0  ;;  %v5168_v54 = vld [vmem:[%s6275_s26 + $0x4] ss:$20 sps:$4 sm:$0xff]  }
 0x5dd   : > { %v2977_v57 = vpop.f32.mrf.mxu0  ;;  %3874 = vmatprep.mubr.bf16.mxu0 %v5168_v54 }
 0x5de   : > { %v3091_v1 = vadd.f32 %v5813_v60, %v2986_v26  ;;  %v2978_v34 = vadd.f32 %v2977_v57, %v2365_v7  ;;  %5010 = vmatprep.mubr.msk.bf16.mxu1 %vm3247_vm9, %v3200_v9  ;;  %v3160_v45 = vmax.f32 %v3088_v46, 0.0 }
 0x5df   : > { %5011 = vmatmul.mubr.msk.bf16.gmra.mxu1 %vm3247_vm9, %v3201_v5  ;;  %v4940_v10 = vpop.f32.mrf.mxu0 }
 0x5e0   : > { %v3089_v21 = vadd.f32 %v5813_v60, %v2978_v34  ;;  %v2999_v42 = vadd.f32 %v4940_v10, %v4864_v48  ;;  %v3163_v14 = vmax.f32 %v3091_v1, 0.0  ;;  %v4869_v48 = vpop.f32.mrf.mxu1 }
 0x5e1   : > { %v2990_v24 = vpop.f32.mrf.mxu0 }
 0x5e2   : > { %v3161_v49 = vmax.f32 %v3089_v21, 0.0  ;;  %v2991_v29 = vadd.f32 %v2990_v24, %v2378_v59  ;;  %v3094_v31 = vadd.f32 %v5813_v60, %v2999_v42  ;;  %v3203_v7 = vpack.c.bf16 %v3163_v14, %v3162_v27  ;;  %v2397_v17 = vpop.f32.mrf.mxu1 }
 0x5e3   : > { %v4941_v30 = vpop.f32.mrf.mxu0 }
 0x5e4   : > { %v3202_v51 = vpack.c.bf16 %v3161_v49, %v3160_v45  ;;  %v3092_v6 = vadd.f32 %v5813_v60, %v2991_v29  ;;  %v3002_v11 = vadd.f32 %v4941_v30, %v4865_v62  ;;  %v3166_v12 = vmax.f32 %v3094_v31, 0.0 }
 0x5e5   : > { %v2993_v61 = vpop.f32.mrf.mxu0 }
 0x5e6   : > { %5014 = vmatprep.mubr.msk.bf16.mxu1 %vm3247_vm9, %v3202_v51  ;;  %v3095_v18 = vadd.f32 %v5813_v60, %v3002_v11  ;;  %v2994_v50 = vadd.f32 %v2993_v61, %v2381_v37  ;;  %v3164_v13 = vmax.f32 %v3092_v6, 0.0 }
 0x5e7   : > { %5015 = vmatmul.mubr.msk.bf16.gmra.mxu1 %vm3247_vm9, %v3203_v7  ;;  %v4944_v8 = vpop.f32.mrf.mxu0 }
 0x5e8   : > { %v3167_v22 = vmax.f32 %v3095_v18, 0.0  ;;  %v3093_v15 = vadd.f32 %v5813_v60, %v2994_v50  ;;  %v3015_v36 = vadd.f32 %v4944_v8, %v4868_v32 }
 0x5e9   : > { %v3006_v58 = vpop.f32.mrf.mxu0 }
 0x5ea   : > { %v3165_v55 = vmax.f32 %v3093_v15, 0.0  ;;  %v3007_v38 = vadd.f32 %v3006_v58, %v2394_v4  ;;  %v3205_v53 = vpack.c.bf16 %v3167_v22, %v3166_v12  ;;  %v3098_v41 = vadd.f32 %v5813_v60, %v3015_v36 }
 0x5eb   : > { %v4945_v59 = vpop.f32.mrf.mxu0 }
 0x5ec   : > { %v3204_v19 = vpack.c.bf16 %v3165_v55, %v3164_v13  ;;  %v3096_v35 = vadd.f32 %v5813_v60, %v3007_v38  ;;  %v3018_v39 = vadd.f32 %v4945_v59, %v4869_v48  ;;  %v3170_v2 = vmax.f32 %v3098_v41, 0.0 }
 0x5ed   : > { %v3009_v16 = vpop.f32.mrf.mxu0 }
 0x5ee   : > { %v3099_v63 = vadd.f32 %v5813_v60, %v3018_v39  ;;  %v3010_v3 = vadd.f32 %v3009_v16, %v2397_v17  ;;  %5018 = vmatprep.mubr.msk.bf16.mxu1 %vm3247_vm9, %v3204_v19  ;;  %v3168_v23 = vmax.f32 %v3096_v35, 0.0 }
 0x5ef   : > { %5019 = vmatmul.mubr.msk.bf16.gmra.mxu1 %vm3247_vm9, %v3205_v53 }
 0x5f0   : > { %v3171_v62 = vmax.f32 %v3099_v63, 0.0  ;;  %v3097_v20 = vadd.f32 %v5813_v60, %v3010_v3 }
 0x5f2   : > { %v3169_v52 = vmax.f32 %v3097_v20, 0.0  ;;  %v3207_v33 = vpack.c.bf16 %v3171_v62, %v3170_v2 }
 0x5f4   : > { %v3206_v40 = vpack.c.bf16 %v3169_v52, %v3168_v23 }
 0x5f6   : > { %5022 = vmatprep.mubr.msk.bf16.mxu1 %vm3247_vm9, %v3206_v40 }
 0x5f7   : > { %5023 = vmatmul.mubr.msk.bf16.gmra.mxu1 %vm3247_vm9, %v3207_v33 }
 0x62f   : > { %v4956_v56 = vpop.f32.mrf.mxu1 }
 0x630   : > { %v3399_v60 = vadd.f32 %v4956_v56, %v6033_v0 }
 0x631   : > { %v3390_v25 = vpop.f32.mrf.mxu1 }
 0x632   : > { %v3391_v37 = vadd.f32 %v6033_v0, %v3390_v25  ;;  %v3679_v5 = vmax.f32 %v3399_v60, 0.0 }
 0x633   : > { %v4957_v28 = vpop.f32.mrf.mxu1 }
 0x634   : > { %v3402_v9 = vadd.f32 %v4957_v28, %v6033_v0  ;;  %v3677_v34 = vmax.f32 %v3391_v37, 0.0 }
 0x635   : > { %v3393_v26 = vpop.f32.mrf.mxu1 }
 0x636   : > { %v3680_v57 = vmax.f32 %v3402_v9, 0.0  ;;  %v3394_v46 = vadd.f32 %v6033_v0, %v3393_v26 }
 0x637   : > { %v4960_v1 = vpop.f32.mrf.mxu1 }
 0x638   : > { %v6039_v47 = vpack.c.bf16 %v3680_v57, %v3679_v5  ;;  %v3678_v10 = vmax.f32 %v3394_v46, 0.0  ;;  %v3415_v42 = vadd.f32 %v4960_v1, %v6033_v0 }
 0x639   : > { %v3406_v32 = vpop.f32.mrf.mxu1 }
 0x63a   : > { %v6041_v21 = vpack.c.bf16 %v3678_v10, %v3677_v34  ;;  %v3407_v24 = vadd.f32 %v6033_v0, %v3406_v32  ;;  %v3683_v29 = vmax.f32 %v3415_v42, 0.0 }
 0x63b   : > { %v4961_v14 = vpop.f32.mrf.mxu1 }
 0x63c   : > { %v3418_v45 = vadd.f32 %v4961_v14, %v6033_v0  ;;  %v3681_v4 = vmax.f32 %v3407_v24, 0.0 }
 0x63d   : > { %v3409_v49 = vpop.f32.mrf.mxu1 }
 0x63e   : > { %v3684_v27 = vmax.f32 %v3418_v45, 0.0  ;;  %v3410_v31 = vadd.f32 %v6033_v0, %v3409_v49 }
 0x63f   : > { %v4964_v30 = vpop.f32.mrf.mxu1 }
 0x640   : > { %v6047_v51 = vpack.c.bf16 %v3684_v27, %v3683_v29  ;;  %v3682_v6 = vmax.f32 %v3410_v31, 0.0  ;;  %v3431_v45 = vadd.f32 %v4964_v30, %v6033_v0 }
 0x641   : > { %v6049_v11 = vpop.f32.mrf.mxu1 }
 0x642   : > { %v6051_v7 = vpack.c.bf16 %v3682_v6, %v3681_v4 }
 0x643   : > { %v4965_v61 = vpop.f32.mrf.mxu1 }
 0x644   : > { %v3434_v26 = vadd.f32 %v4965_v61, %v6033_v0 }
 0x645   : > { %v3425_v18 = vpop.f32.mrf.mxu1 }
 0x646   : > { %v3688_v31 = vmax.f32 %v3434_v26, 0.0 }
 0x647   : > { %v4968_v50 = vpop.f32.mrf.mxu1 }
 0x648   : > { %v3447_v3 = vadd.f32 %v4968_v50, %v6033_v0  ;;  %v3426_v50 = vadd.f32 %v6033_v0, %v3425_v18 }
 0x649   : > { %v3438_v12 = vpop.f32.mrf.mxu1 }
 0x64a   : > { %v3691_v60 = vmax.f32 %v3447_v3, 0.0  ;;  %v3439_v28 = vadd.f32 %v6033_v0, %v3438_v12 }
 0x64b   : > { %v4969_v8 = vpop.f32.mrf.mxu1 }
 0x64c   : > { %v3450_v39 = vadd.f32 %v4969_v8, %v6033_v0  ;;  %v3689_v49 = vmax.f32 %v3439_v28, 0.0 }
 0x64d   : > { %v3441_v48 = vpop.f32.mrf.mxu1 }
 0x64e   : > { %v3692_v20 = vmax.f32 %v3450_v39, 0.0  ;;  %v3442_v52 = vadd.f32 %v6033_v0, %v3441_v48  ;;  %v3687_v39 = vmax.f32 %v3431_v45, 0.0 }
 0x64f   : > { %v6053_v13 = vpop.f32.mrf.mxu1 }
 0x650   : > { %v3765_v1 = vpack.c.bf16 %v3692_v20, %v3691_v60  ;;  %v3690_v34 = vmax.f32 %v3442_v52, 0.0 }
 0x651   : > { %v6055_v22 = vpop.f32.mrf.mxu1 }
 0x652   : > { %v3764_v12 = vpack.c.bf16 %v3690_v34, %v3689_v49 }
 0x653   : > { %v6057_v15 = vpop.f32.mrf.mxu1 }
 0x655   : > { %v6059_v36 = vpop.f32.mrf.mxu1 }
 0x656   : > { %v3458_v49 = vadd.f32 %v6033_v0, %v6059_v36 }
 0x657   : > { %v4976_v58 = vpop.f32.mrf.mxu1 }
 0x659   : > { %v6061_v55 = vpop.f32.mrf.mxu1 }
 0x65a   : > { %v3471_v60 = vadd.f32 %v6033_v0, %v6061_v55 }
 0x65b   : > { %v4977_v38 = vpop.f32.mrf.mxu1 }
 0x65c   : > { %v3482_v8 = vadd.f32 %v4977_v38, %v6033_v0 }
 0x65d   : > { %v6063_v53 = vpop.f32.mrf.mxu1 }
 0x65e   : > { %v3700_v20 = vmax.f32 %v3482_v8, 0.0 }
 0x65f   : > { %v4980_v41 = vpop.f32.mrf.mxu1 }
 0x660   : > { %v3495_v37 = vadd.f32 %v4980_v41, %v6033_v0 }
 0x661   : > { %v3486_v59 = vpop.f32.mrf.mxu1 }
 0x662   : > { %v3703_v29 = vmax.f32 %v3495_v37, 0.0  ;;  %v3487_v4 = vadd.f32 %v6033_v0, %v3486_v59  ;;  %v3423_v59 = vadd.f32 %v6033_v0, %v6049_v11 }
 0x663   : > { %v4981_v17 = vpop.f32.mrf.mxu1 }
 0x664   : > { %v3498_v33 = vadd.f32 %v4981_v17, %v6033_v0  ;;  %v3701_v3 = vmax.f32 %v3487_v4, 0.0  ;;  %v3455_v4 = vadd.f32 %v6033_v0, %v6055_v22 }
 0x665   : > { %v3489_v19 = vpop.f32.mrf.mxu1 }
 0x666   : > { %v3704_v10 = vmax.f32 %v3498_v33, 0.0  ;;  %v3490_v42 = vadd.f32 %v6033_v0, %v3489_v19  ;;  %v3474_v33 = vadd.f32 %v6033_v0, %v6063_v53  ;;  %v3466_v53 = vadd.f32 %v6057_v15, %v6033_v0 }
 0x667   : > { %v4984_v35 = vpop.f32.mrf.mxu1  ;;  %v3693_v8 = vmax.f32 %v3455_v4, 0.0 }
 0x668   : > { %v3511_v63 = vadd.f32 %v4984_v35, %v6033_v0  ;;  %v3771_v48 = vpack.c.bf16 %v3704_v10, %v3703_v29  ;;  %v3702_v30 = vmax.f32 %v3490_v42, 0.0  ;;  %v3463_v10 = vadd.f32 %v6053_v13, %v6033_v0 }
 0x669   : > { %v3502_v16 = vpop.f32.mrf.mxu1  ;;  %v3696_v45 = vmax.f32 %v3466_v53, 0.0 }
 0x66a   : > { %v3503_v23 = vadd.f32 %v6033_v0, %v3502_v16  ;;  %v3707_v54 = vmax.f32 %v3511_v63, 0.0  ;;  %v3479_v16 = vadd.f32 %v4976_v58, %v6033_v0  ;;  %v3685_v58 = vmax.f32 %v3423_v59, 0.0 }
 0x66b   : > { %v4985_v2 = vpop.f32.mrf.mxu1  ;;  %v3695_v13 = vmax.f32 %v3463_v10, 0.0 }
 0x66c   : > { %v3514_v62 = vadd.f32 %v4985_v2, %v6033_v0  ;;  %v3705_v5 = vmax.f32 %v3503_v23, 0.0  ;;  %v3763_v23 = vpack.c.bf16 %v3688_v31, %v3687_v39 }
 0x66d   : > { %v3505_v40 = vpop.f32.mrf.mxu1 }
 0x66e   : > { %v3708_v56 = vmax.f32 %v3514_v62, 0.0  ;;  %v3506_v25 = vadd.f32 %v6033_v0, %v3505_v40  ;;  %v3686_v62 = vmax.f32 %v3426_v50, 0.0  ;;  %v3770_v40 = vpack.c.bf16 %v3702_v30, %v3701_v3  ;;  %v5166_v30 = vld [vmem:[%s6275_s26] ss:$20 sps:$4 sm:$0xff]  }
 0x66f   : > { %v4988_v9 = vpop.f32.mrf.mxu1  ;;  %v3694_v50 = vmax.f32 %v3458_v49, 0.0 }
 0x670   : > { %v3773_v57 = vpack.c.bf16 %v3708_v56, %v3707_v54  ;;  %v3706_v46 = vmax.f32 %v3506_v25, 0.0  ;;  %v3527_v24 = vadd.f32 %v4988_v9, %v6033_v0  ;;  %v3699_v56 = vmax.f32 %v3479_v16, 0.0  ;;  %v5173_v16 = vld [vmem:[%s6275_s26 + $0xc] ss:$20 sps:$4 sm:$0xff]  }
 0x671   : > { %v3518_v32 = vpop.f32.mrf.mxu1  ;;  %v3762_v9 = vpack.c.bf16 %v3686_v62, %v3685_v58 }
 0x672   : > { %v3772_v14 = vpack.c.bf16 %v3706_v46, %v3705_v5  ;;  %4652 = vmatprep.subr.bf16.mxu0 %v3773_v57  ;;  %v3519_v6 = vadd.f32 %v6033_v0, %v3518_v32  ;;  %v3711_v17 = vmax.f32 %v3527_v24, 0.0  ;;  %v3769_v26 = vpack.c.bf16 %v3700_v20, %v3699_v56 }
 0x673   : > { %v4989_v27 = vpop.f32.mrf.mxu1  ;;  %4653 = vmatpush3.bf16.msra.mxu0 %v3765_v1  ;;  %v3698_v57 = vmax.f32 %v3474_v33, 0.0  ;;  %v3697_v32 = vmax.f32 %v3471_v60, 0.0 }
 0x674   : > { %v3530_v61 = vadd.f32 %v4989_v27, %v6033_v0  ;;  %4654 = vmatprep.subr.bf16.mxu0 %v3772_v14  ;;  %v3709_v18 = vmax.f32 %v3519_v6, 0.0 }
 0x675   : > { %v3521_v41 = vpop.f32.mrf.mxu1  ;;  %v3768_v29 = vpack.c.bf16 %v3698_v57, %v3697_v32 }
 0x676   : > { %v3712_v19 = vmax.f32 %v3530_v61, 0.0  ;;  %v3522_v35 = vadd.f32 %v6033_v0, %v3521_v41  ;;  %v3767_v61 = vpack.c.bf16 %v3696_v45, %v3695_v13 }
 0x677   : > { %v4992_v63 = vpop.f32.mrf.mxu1  ;;  %4655 = vmatpush3.bf16.msra.mxu0 %v3764_v12 }
 0x678   : > { %v6088_v2 = vpack.c.bf16 %v3712_v19, %v3711_v17  ;;  %v3710_v38 = vmax.f32 %v3522_v35, 0.0  ;;  %4656 = vmatprep.subr.bf16.mxu0 %v3771_v48  ;;  %v3543_v11 = vadd.f32 %v4992_v63, %v6033_v0  ;;  %v3766_v48 = vpack.c.bf16 %v3694_v50, %v3693_v8 }
 0x679   : > { %v3534_v52 = vpop.f32.mrf.mxu1 }
 0x67a   : > { %v6092_v54 = vpack.c.bf16 %v3710_v38, %v3709_v18  ;;  %v3535_v28 = vadd.f32 %v6033_v0, %v3534_v52  ;;  %v3715_v46 = vmax.f32 %v3543_v11, 0.0 }
 0x67b   : > { %v4993_v25 = vpop.f32.mrf.mxu1  ;;  %4657 = vmatpush3.bf16.msra.mxu0 %v3763_v23 }
 0x67c   : > { %v3546_v37 = vadd.f32 %v4993_v25, %v6033_v0  ;;  %4658 = vmatprep.subr.bf16.mxu0 %v3770_v40  ;;  %v3713_v42 = vmax.f32 %v3535_v28, 0.0 }
 0x67d   : > { %v3537_v5 = vpop.f32.mrf.mxu1 }
 0x67e   : > { %v3716_v1 = vmax.f32 %v3546_v37, 0.0  ;;  %v3538_v34 = vadd.f32 %v6033_v0, %v3537_v5 }
 0x67f   : > { %v6104_v55 = vpop.f32.mrf.mxu1  ;;  %4659 = vmatpush3.bf16.msra.mxu0 %v3762_v9 }
 0x680   : > { %v6106_v14 = vpack.c.bf16 %v3716_v1, %v3715_v46  ;;  %v3714_v24 = vmax.f32 %v3538_v34, 0.0  ;;  %4660 = vmatprep.subr.bf16.mxu0 %v3769_v26  ;;  %v3559_v50 = vadd.f32 %v6104_v55, %v6033_v0 }
 0x681   : > { %v6108_v15 = vpop.f32.mrf.mxu1 }
 0x682   : > { %v6112_v27 = vpack.c.bf16 %v3714_v24, %v3713_v42  ;;  %v3551_v55 = vadd.f32 %v6033_v0, %v6108_v15 }
 0x683   : > { %v4997_v31 = vpop.f32.mrf.mxu1  ;;  %4661 = vmatpush3.bf16.msra.mxu0 %v6047_v51  ;;  %v3755_v51 = vld [vmem:[%s6275_s26 + $0x28] sm:$0xff] }
 0x684   : > { %4662 = vmatprep.subr.bf16.mxu0 %v3768_v29  ;;  %v4482_v39 = vcombine.low %v3755_v51, %v3755_v51  ;;  %v3562_v24 = vadd.f32 %v4997_v31, %v6033_v0 }
 0x685   : > { %v6117_v6 = vpop.f32.mrf.mxu1 }
 0x686   : > { %v3720_v31 = vmax.f32 %v3562_v24, 0.0 }
 0x687   : > { %v5000_v12 = vpop.f32.mrf.mxu1  ;;  %4663 = vmatpush3.bf16.msra.mxu0 %v6051_v7  ;;  %v4483_v7 = vcombine.high %v3755_v51, %v3755_v51 }
 0x688   : > { %4664 = vmatprep.subr.bf16.mxu0 %v3767_v61  ;;  %v3575_v11 = vadd.f32 %v5000_v12, %v6033_v0 }
 0x689   : > { %v3566_v36 = vpop.f32.mrf.mxu1 }
 0x68a   : > { %v3723_v57 = vmax.f32 %v3575_v11, 0.0  ;;  %v3567_v46 = vadd.f32 %v6033_v0, %v3566_v36 }
 0x68b   : > { %v5001_v41 = vpop.f32.mrf.mxu1  ;;  %4665 = vmatpush3.bf16.msra.mxu0 %v6039_v47 }
 0x68c   : > { %4666 = vmatprep.subr.bf16.mxu0 %v3766_v48  ;;  %v3578_v52 = vadd.f32 %v5001_v41, %v6033_v0  ;;  %v3721_v12 = vmax.f32 %v3567_v46, 0.0  ;;  %v3554_v41 = vadd.f32 %v6033_v0, %v6117_v6 }
 0x68d   : > { %v3569_v22 = vpop.f32.mrf.mxu1 }
 0x68e   : > { %v3724_v60 = vmax.f32 %v3578_v52, 0.0  ;;  %v3570_v28 = vadd.f32 %v6033_v0, %v3569_v22 }
 0x68f   : > { %v6127_v17 = vpop.f32.mrf.mxu1  ;;  %4667 = vmatpush3.bf16.msra.mxu0 %v6041_v21 }
 0x690   : > { %v3781_v45 = vpack.c.bf16 %v3724_v60, %v3723_v57  ;;  %v3722_v49 = vmax.f32 %v3570_v28, 0.0 }
 0x691   : > { %v6130_v19 = vpop.f32.mrf.mxu1 }
 0x692   : > { %3875 = vmatmul.mubr.bf16.vlgmr.msra.gmra.mxu0 %v5166_v30  ;;  %v3780_v51 = vpack.c.bf16 %v3722_v49, %v3721_v12 }
 0x693   : > { %v6132_v35 = vpop.f32.mrf.mxu1  ;;  %3882 = vmatprep.mubr.bf16.mxu0 %v4483_v7 }
 0x695   : > { %v6134_v47 = vpop.f32.mrf.mxu1 }
 0x696   : > { %v3586_v28 = vadd.f32 %v6033_v0, %v6134_v47 }
 0x697   : > { %v5008_v59 = vpop.f32.mrf.mxu1 }
 0x699   : > { %v6139_v63 = vpop.f32.mrf.mxu1 }
 0x69a   : > { %3883 = vmatmul.mubr.bf16.gmra.mxu0 %v4482_v39  ;;  %v3719_v39 = vmax.f32 %v3559_v50, 0.0  ;;  %v3599_v11 = vadd.f32 %v6033_v0, %v6139_v63  ;;  %v3583_v63 = vadd.f32 %v6033_v0, %v6130_v19 }
 0x69b   : > { %v5009_v3 = vpop.f32.mrf.mxu1  ;;  %3922 = vmatprep.mubr.bf16.mxu0 %v5173_v16 }
 0x69c   : > { %v3610_v22 = vadd.f32 %v5009_v3, %v6033_v0  ;;  %v3729_v60 = vmax.f32 %v3599_v11, 0.0  ;;  %v3725_v46 = vmax.f32 %v3583_v63, 0.0 }
 0x69d   : > { %v3601_v21 = vpop.f32.mrf.mxu1 }
 0x69e   : > { %v3602_v6 = vadd.f32 %v6033_v0, %v3601_v21  ;;  %v3591_v21 = vadd.f32 %v6127_v17, %v6033_v0 }
 0x69f   : > { %v5012_v18 = vpop.f32.mrf.mxu1 }
 0x6a0   : > { %v3623_v34 = vadd.f32 %v5012_v18, %v6033_v0  ;;  %v3607_v18 = vadd.f32 %v5008_v59, %v6033_v0  ;;  %v3594_v59 = vadd.f32 %v6132_v35, %v6033_v0 }
 0x6a1   : > { %v3614_v38 = vpop.f32.mrf.mxu1 }
 0x6a2   : > { %v3735_v36 = vmax.f32 %v3623_v34, 0.0  ;;  %v3615_v48 = vadd.f32 %v6033_v0, %v3614_v38  ;;  %v3779_v38 = vpack.c.bf16 %v3720_v31, %v3719_v39 }
 0x6a3   : > { %v5013_v23 = vpop.f32.mrf.mxu1 }
 0x6a4   : > { %v3626_v9 = vadd.f32 %v5013_v23, %v6033_v0  ;;  %v3733_v23 = vmax.f32 %v3615_v48, 0.0 }
 0x6a5   : > { %v3617_v62 = vpop.f32.mrf.mxu1 }
 0x6a6   : > { %v3736_v13 = vmax.f32 %v3626_v9, 0.0  ;;  %v3618_v4 = vadd.f32 %v6033_v0, %v3617_v62  ;;  %v3718_v62 = vmax.f32 %v3554_v41, 0.0 }
 0x6a7   : > { %v5016_v20 = vpop.f32.mrf.mxu1 }
 0x6a8   : > { %v3639_v40 = vadd.f32 %v5016_v20, %v6033_v0  ;;  %v3787_v30 = vpack.c.bf16 %v3736_v13, %v3735_v36  ;;  %v3734_v7 = vmax.f32 %v3618_v4, 0.0  ;;  %v3732_v20 = vmax.f32 %v3610_v22, 0.0  ;;  %v5171_v4 = vld [vmem:[%s6275_s26 + $0x8] ss:$20 sps:$4 sm:$0xff]   ;;  %v5179_v22 = vld [vmem:[%s6255_s19] sm:$0xff]  }
 0x6a9   : > { %v3630_v33 = vpop.f32.mrf.mxu1 }
 0x6aa   : > { %v3631_v56 = vadd.f32 %v6033_v0, %v3630_v33  ;;  %v3739_v53 = vmax.f32 %v3639_v40, 0.0  ;;  %v3786_v52 = vpack.c.bf16 %v3734_v7, %v3733_v23  ;;  %v3717_v33 = vmax.f32 %v3551_v55, 0.0 }
 0x6ab   : > { %v5017_v58 = vpop.f32.mrf.mxu1  ;;  %v3731_v40 = vmax.f32 %v3607_v18, 0.0 }
 0x6ac   : > { %v3642_v25 = vadd.f32 %v5017_v58, %v6033_v0  ;;  %v3737_v10 = vmax.f32 %v3631_v56, 0.0  ;;  %v3778_v15 = vpack.c.bf16 %v3718_v62, %v3717_v33  ;;  %v3730_v56 = vmax.f32 %v3602_v6, 0.0 }
 0x6ad   : > { %v3633_v37 = vpop.f32.mrf.mxu1  ;;  %v3785_v58 = vpack.c.bf16 %v3732_v20, %v3731_v40 }
 0x6ae   : > { %v3740_v26 = vmax.f32 %v3642_v25, 0.0  ;;  %v3634_v5 = vadd.f32 %v6033_v0, %v3633_v37  ;;  %v3728_v37 = vmax.f32 %v3594_v59, 0.0  ;;  %v3784_v9 = vpack.c.bf16 %v3730_v56, %v3729_v60 }
 0x6af   : > { %v6150_v1 = vpop.f32.mrf.mxu1 }
 0x6b0   : > { %v3789_v32 = vpack.c.bf16 %v3740_v26, %v3739_v53  ;;  %v3738_v42 = vmax.f32 %v3634_v5, 0.0  ;;  %v3727_v53 = vmax.f32 %v3591_v21, 0.0  ;;  %v3726_v26 = vmax.f32 %v3586_v28, 0.0 }
 0x6b1   : > { %v6154_v29 = vpop.f32.mrf.mxu1  ;;  %v3655_v24 = vadd.f32 %v6150_v1, %v6033_v0 }
 0x6b2   : > { %v3788_v61 = vpack.c.bf16 %v3738_v42, %v3737_v10  ;;  %4680 = vmatprep.subr.bf16.mxu0 %v3789_v32  ;;  %v3783_v5 = vpack.c.bf16 %v3728_v37, %v3727_v53  ;;  %v3782_v34 = vpack.c.bf16 %v3726_v26, %v3725_v46  ;;  %v3756_v42 = vld [vmem:[%s6275_s26 + $0x30] sm:$0xff]  ;;  %v3647_v50 = vadd.f32 %v6033_v0, %v6154_v29  ;;  %v5178_v29 = vld [vmem:[%s6255_s19 + $0x8] sm:$0xff]  }
 0x6b3   : > { %4681 = vmatpush3.bf16.msra.mxu0 %v3781_v45  ;;  %v5021_v8 = vpop.f32.mrf.mxu1  ;;  %v4484_v41 = vcombine.low %v3756_v42, %v3756_v42 }
 0x6b4   : > { %4682 = vmatprep.subr.bf16.mxu0 %v3788_v61  ;;  %v3743_v61 = vmax.f32 %v3655_v24, 0.0  ;;  %v4497_v24 = vld [vmem:[%s6256_s20] ss:$0 sm:$0xff] }
 0x6b5   : > { %v3649_v16 = vpop.f32.mrf.mxu1 }
 0x6b6   : > { %v3650_v1 = vadd.f32 %v6033_v0, %v3649_v16 }
 0x6b7   : > { %4683 = vmatpush3.bf16.msra.mxu0 %v3780_v51  ;;  %v5024_v3 = vpop.f32.mrf.mxu1 }
 0x6b8   : > { %4684 = vmatprep.subr.bf16.mxu0 %v3787_v30  ;;  %v3671_v57 = vadd.f32 %v5024_v3, %v6033_v0  ;;  %v3742_v31 = vmax.f32 %v3650_v1, 0.0  ;;  %v5180_v30 = vld [vmem:[%s6254_s18 + $0x8] sm:$0xff]  }
 0x6b9   : > { %v3662_v25 = vpop.f32.mrf.mxu1 }
 0x6ba   : > { %v3747_v10 = vmax.f32 %v3671_v57, 0.0  ;;  %v3663_v19 = vadd.f32 %v6033_v0, %v3662_v25 }
 0x6bb   : > { %4685 = vmatpush3.bf16.msra.mxu0 %v3779_v38  ;;  %v5025_v35 = vpop.f32.mrf.mxu1 }
 0x6bc   : > { %4686 = vmatprep.subr.bf16.mxu0 %v3786_v52  ;;  %v3674_v17 = vadd.f32 %v5025_v35, %v6033_v0  ;;  %v3745_v45 = vmax.f32 %v3663_v19, 0.0 }
 0x6bd   : > { %v3665_v47 = vpop.f32.mrf.mxu1 }
 0x6be   : > { %v3748_v32 = vmax.f32 %v3674_v17, 0.0 }
 0x6bf   : > { %4687 = vmatpush3.bf16.msra.mxu0 %v3778_v15 }
 0x6c0   : > { %4688 = vmatprep.subr.bf16.mxu0 %v3785_v58  ;;  %v3793_v49 = vpack.c.bf16 %v3748_v32, %v3747_v10 }
 0x6c3   : > { %4689 = vmatpush3.bf16.msra.mxu0 %v6106_v14  ;;  %v3666_v14 = vadd.f32 %v6033_v0, %v3665_v47 }
 0x6c4   : > { %4690 = vmatprep.subr.bf16.mxu0 %v3784_v9 }
 0x6c5   : > { %v3746_v13 = vmax.f32 %v3666_v14, 0.0 }
 0x6c7   : > { %4691 = vmatpush3.bf16.msra.mxu0 %v6112_v27  ;;  %v3658_v27 = vadd.f32 %v5021_v8, %v6033_v0  ;;  %v3792_v36 = vpack.c.bf16 %v3746_v13, %v3745_v45  ;;  %v3741_v8 = vmax.f32 %v3647_v50, 0.0  ;;  %v5177_v0 = vld [vmem:[%s6275_s26 + $0x38] ss:$0 sps:$4 sm:$0xff]  }
 0x6c8   : > { %4692 = vmatprep.subr.bf16.mxu0 %v3783_v5 }
 0x6c9   : > { %v3744_v12 = vmax.f32 %v3658_v27, 0.0  ;;  %v3790_v51 = vpack.c.bf16 %v3742_v31, %v3741_v8 }
 0x6cb   : > { %4693 = vmatpush3.bf16.msra.mxu0 %v6088_v2  ;;  %v4485_v2 = vcombine.high %v3756_v42, %v3756_v42  ;;  %v3791_v48 = vpack.c.bf16 %v3744_v12, %v3743_v61 }
 0x6cc   : > { %4694 = vmatprep.subr.bf16.mxu0 %v3782_v34  ;;  %v5181_v34 = vld [vmem:[%s6254_s18] sm:$0xff]  }
 0x6cf   : > { %4695 = vmatpush3.bf16.msra.mxu0 %v6092_v54  ;;  %v5176_v54 = vld [vmem:[%s6275_s26 + $0x10] ss:$20 sps:$4 sm:$0xff]  }
 0x6d0   : > { %5026 = vmatprep.subr.bf16.mxu0 %v3793_v49 }
 0x6d2   : > { %3923 = vmatmul.mubr.bf16.vlgmr.msra.gmra.mxu0 %v5171_v4 }
 0x6d3   : > { %5027 = vmatpush3.bf16.msra.mxu0 %v3793_v49  ;;  %3930 = vmatprep.mubr.bf16.mxu0 %v4485_v2 }
 0x6d4   : > { %5028 = vmatprep.subr.bf16.mxu0 %v3792_v36 }
 0x6d7   : > { %5029 = vmatpush3.bf16.msra.mxu0 %v3792_v36 }
 0x6d8   : > { %5030 = vmatprep.subr.bf16.mxu0 %v3791_v48 }
 0x6da   : > { %3931 = vmatmul.mubr.bf16.gmra.mxu0 %v4484_v41 }
 0x6db   : > { %5031 = vmatpush3.bf16.msra.mxu0 %v3791_v48  ;;  %5034 = vmatprep.mubr.msk.bf16.mxu0 %vm3247_vm9, %v5176_v54 }
 0x6dc   : > { %5032 = vmatprep.subr.bf16.mxu0 %v3790_v51 }
 0x6df   : > { %5033 = vmatpush3.bf16.msra.mxu0 %v3790_v51 }
 0x6e0   : > { %5038 = vmatprep.subr.bf16.mxu0 %v5178_v29 }
 0x6e2   : > { %5035 = vmatmul.mubr.msk.bf16.vlgmr.msra.gmra.mxu0 %vm3247_vm9, %v5177_v0 }
 0x6e3   : > { %5039 = vmatpush3.bf16.msra.mxu0 %v5178_v29 }
 0x6e4   : > { %5040 = vmatprep.subr.bf16.mxu0 %v5179_v22 }
 0x6e7   : > { %5041 = vmatpush3.bf16.msra.mxu0 %v5179_v22 }
 0x6e8   : > { %5046 = vmatprep.subr.bf16.mxu0 %v5180_v30 }
 0x752   : > { %v4668_v7 = vpop.f32.mrf.mxu0 }
 0x754   : > { %v4669_v39 = vpop.f32.mrf.mxu0 }
 0x755   : > { %v4670_v55 = vadd.f32 %v4669_v39, %v4668_v7 }
 0x756   : > { %v4671_v16 = vpop.f32.mrf.mxu0 }
 0x758   : > { %v4672_v18 = vpop.f32.mrf.mxu0 }
 0x759   : > { %v4673_v23 = vadd.f32 %v4672_v18, %v4671_v16 }
 0x75a   : > { %v4674_v38 = vpop.f32.mrf.mxu0 }
 0x75c   : > { %v4675_v62 = vpop.f32.mrf.mxu0 }
 0x75d   : > { %v4676_v20 = vadd.f32 %v4675_v62, %v4674_v38 }
 0x75e   : > { %v4677_v6 = vpop.f32.mrf.mxu0 }
 0x760   : > { %v4678_v52 = vpop.f32.mrf.mxu0 }
 0x792   : > { %v4696_v33 = vpop.f32.mrf.mxu0 }
 0x794   : > { %v4697_v3 = vpop.f32.mrf.mxu0 }
 0x795   : > { %v4698_v60 = vadd.f32 %v4697_v3, %v4696_v33 }
 0x796   : > { %v4699_v40 = vpop.f32.mrf.mxu0 }
 0x797   : > { %v3925_v35 = vadd.f32 %v4698_v60, %v4670_v55 }
 0x798   : > { %v4700_v11 = vpop.f32.mrf.mxu0 }
 0x799   : > { %v4701_v28 = vadd.f32 %v4700_v11, %v4699_v40 }
 0x79a   : > { %v4702_v15 = vpop.f32.mrf.mxu0 }
 0x79b   : > { %v3928_v53 = vadd.f32 %v4701_v28, %v4673_v23 }
 0x79c   : > { %v4703_v59 = vpop.f32.mrf.mxu0 }
 0x79d   : > { %v4704_v25 = vadd.f32 %v4703_v59, %v4702_v15 }
 0x79e   : > { %v4705_v58 = vpop.f32.mrf.mxu0 }
 0x79f   : > { %v3933_v9 = vadd.f32 %v4704_v25, %v4676_v20 }
 0x7a0   : > { %v4706_v56 = vpop.f32.mrf.mxu0 }
 0x7a2   : > { %v5036_v21 = vpop.f32.mrf.mxu0 }
 0x7a3   : > { %v3981_v26 = vadd.f32 %v5036_v21, %v3933_v9 }
 0x7a4   : > { %v3972_v37 = vpop.f32.mrf.mxu0 }
 0x7a5   : > { %v3973_v57 = vadd.f32 %v3972_v37, %v3925_v35  ;;  %v3991_v47 = vpack.c.bf16 %v3981_v26, %v3981_v26 }
 0x7a6   : > { %v5037_v63 = vpop.f32.mrf.mxu0 }
 0x7a8   : > { %v3975_v5 = vpop.f32.mrf.mxu0 }
 0x7a9   : > { %v3976_v17 = vadd.f32 %v3975_v5, %v3928_v53 }
 0x7ab   : > { %v3990_v46 = vpack.c.bf16 %v3976_v17, %v3973_v57 }
 0x7ad   : > { %5042 = vmatprep.mubr.msk.bf16.mxu0 %vm1434_vm2, %v3990_v46 }
 0x7ae   : > { %5043 = vmatmul.mubr.msk.bf16.vlgmr.msra.gmra.mxu0 %vm1434_vm2, %v3991_v47 }
 0x7af   : > { %5047 = vmatpush3.bf16.msra.mxu0 %v5180_v30  ;;  %5050 = vmatprep.mubr.msk.bf16.mxu0 %vm1434_vm2, %v5436_v43 }
 0x7b0   : > { %5048 = vmatprep.subr.bf16.mxu0 %v5181_v34 }
 0x7b3   : > { %5049 = vmatpush3.bf16.msra.mxu0 %v5181_v34 }
 0x7b6   : > { %5051 = vmatmul.mubr.msk.bf16.vlgmr.msra.gmra.mxu0 %vm1434_vm2, %v5438_v44 }
 0x86e   : > { %v5044_v10 = vpop.f32.mrf.mxu0 }
 0x870   : > { %v4048_v19 = vpop.f32.mrf.mxu0 }
 0x872   : > { %v5045_v32 = vpop.f32.mrf.mxu0 }
 0x874   : > { %v4051_v14 = vpop.f32.mrf.mxu0 }
 0x876   : > { %v5052_v42 = vpop.f32.mrf.mxu0 }
 0x877   : > { %v4117_v27 = vadd.f32 %v5052_v42, %v5044_v10 }
 0x878   : > { %v4108_v45 = vpop.f32.mrf.mxu0 }
 0x879   : > { %v4131_v49 = vadd.f32 %v4497_v24, %v4117_v27  ;;  %v4109_v13 = vadd.f32 %v4108_v45, %v4048_v19 }
 0x87a   : > { %v5053_v43 = vpop.f32.mrf.mxu0 }
 0x87b   : > { %v4134_v44 = vmax.f32 %v4131_v49, 0.0  ;;  %v4129_v4 = vadd.f32 %v4497_v24, %v4109_v13 }
 0x87c   : > { %v4111_v2 = vpop.f32.mrf.mxu0 }
 0x87d   : > { %4137 = vst.msk [vmem:[%s711_s1 + $0x10] sm:$0xff] %vm1434_vm2, %v4134_v44  ;;  %v4132_v61 = vmax.f32 %v4129_v4, 0.0  ;;  %v4112_v50 = vadd.f32 %v4111_v2, %v4051_v14 }
 0x87f   : > { %4135 = vst.msk [vmem:[%s711_s1] sm:$0xff] %vm1434_vm2, %v4132_v61  ;;  %v4130_v12 = vadd.f32 %v4497_v24, %v4112_v50 }
 0x881   : > { %v4133_v1 = vmax.f32 %v4130_v12, 0.0 }
 0x883   : > { %4136 = vst.msk [vmem:[%s711_s1 + $0x8] sm:$0xff] %vm1434_vm2, %v4133_v1 }
 0x884 PF: > { %s35_s29 = sadd.s32 1, %s5188_s29  }
 0x885   : > { %p32_p4 = scmp.ge.s32.totalorder %s35_s29, 4  }
 0x887   :  { %34 = sbr.rel (!%p32_p4) target bundleno = 8 (0x8), region = 155 }

// kernel: neg.4
= control target key start
LH: loop header
LB: loop body
LE: loop exit
PB: predicated region body
PF: predicated region fallthrough
CT: control target
= control target key end

     0   :  { %s104_s0 = inlined_call_operand.vmem [shape: f32[2,6,12], index: 0, kind: input, shape index: {}]   ;;  %s105_s1 = inlined_call_operand.vmem [shape: f32[2,6,12], index: 1, kind: output, shape index: {}]  }
   0x1   :  { %v2_v0 = vld [vmem:[%s104_s0] sm:$0x3]  ;;  %v48_v1 = vld [vmem:[%s104_s0 + $0x2] sm:$0x3]  ;;  %v50_v2 = vld [vmem:[%s104_s0 + $0x4] sm:$0x3] }
   0x2   :  { %v5_v3 = vxor.u32 2147483648, %v2_v0  ;;  %v12_v4 = vxor.u32 2147483648, %v48_v1  ;;  %v20_v5 = vxor.u32 2147483648, %v50_v2  ;;  %v52_v6 = vld [vmem:[%s104_s0 + $0x6] sm:$0x3] }
   0x3   :  { %v28_v7 = vxor.u32 2147483648, %v52_v6  ;;  %v54_v8 = vld [vmem:[%s104_s0 + $0x8] sm:$0x3]  ;;  %v56_v9 = vld [vmem:[%s104_s0 + $0xa] sm:$0x3] }
   0x4   :  { %7 = vst [vmem:[%s105_s1] sm:$0x3] %v5_v3  ;;  %49 = vst [vmem:[%s105_s1 + $0x2] sm:$0x3] %v12_v4  ;;  %v36_v10 = vxor.u32 2147483648, %v54_v8  ;;  %v44_v11 = vxor.u32 2147483648, %v56_v9 }
   0x5   :  { %51 = vst [vmem:[%s105_s1 + $0x4] sm:$0x3] %v20_v5  ;;  %53 = vst [vmem:[%s105_s1 + $0x6] sm:$0x3] %v28_v7 }
   0x6   :  { %55 = vst [vmem:[%s105_s1 + $0x8] sm:$0x3] %v36_v10  ;;  %57 = vst [vmem:[%s105_s1 + $0xa] sm:$0x3] %v44_v11 }

// kernel: forward.8
= control target key start
LH: loop header
LB: loop body
LE: loop exit
PB: predicated region body
PF: predicated region fallthrough
CT: control target
= control target key end

     0   :  { %v370_v0 = vmov 0   ;;  %vm128_vm0 = vcmask 523264   ;;  %vm260_vm2 = vcmask 785408   ;;  %v190_v38 = vlaneseq  ;;  %s491_s1 = inlined_call_operand.vmem [shape: bf16[192,96], index: 1, kind: input, shape index: {}]   ;;  %s492_s0 = inlined_call_operand.vmem [shape: f32[8,192], index: 0, kind: input, shape index: {}]   ;;  %s493_s3 = inlined_call_operand.vmem [shape: bf16[96,240], index: 3, kind: input, shape index: {}]   ;;  %s494_s2 = inlined_call_operand.vmem [shape: f32[1,96], index: 2, kind: input, shape index: {}]   ;;  %s495_s4 = inlined_call_operand.vmem [shape: f32[1,240], index: 4, kind: input, shape index: {}]   ;;  %s496_s5 = inlined_call_operand.vmem [shape: f32[8,240], index: 5, kind: output, shape index: {}]  }
   0x1   :  { %132 = vmatprep.subr.bf16.mxu0 %v370_v0  ;;  %v340_v1 = vld [vmem:[%s491_s1 + $0x38] sm:$0xff]   ;;  %296 = vmatprep.mubr.bf16.mxu1 %v370_v0  ;;  %v341_v2 = vld [vmem:[%s491_s1 + $0x30] sm:$0xff]   ;;  %v342_v3 = vld [vmem:[%s491_s1 + $0x28] sm:$0xff]   ;;  %vm306_vm3 = vcmask 916480  }
   0x2   :  { %133 = vmatpush1.bf16.msra.mxu0 %v340_v1  ;;  %v343_v4 = vld [vmem:[%s491_s1 + $0x20] sm:$0xff]   ;;  %v344_v5 = vld [vmem:[%s491_s1 + $0x18] sm:$0xff]   ;;  %v22_v6 = vld [vmem:[%s492_s0 + $0x8] sm:$0xff]  ;;  %v191_v39 = vshrl.u32 %v190_v38, 7 }
   0x3   :  { %134 = vmatprep.subr.bf16.mxu0 %v370_v0  ;;  %v24_v7 = vpack.c.bf16 %v22_v6, %v22_v6  ;;  %v352_v8 = vld [vmem:[%s493_s3 + $0x54] ss:$8 sps:$4 sm:$0xff]   ;;  %v354_v9 = vld [vmem:[%s493_s3 + $0x50] ss:$8 sps:$4 sm:$0xff]   ;;  %v355_v10 = vld [vmem:[%s493_s3 + $0x44] ss:$8 sps:$4 sm:$0xff]  }
   0x4   :  { %268 = vmatprep.subr.bf16.mxu1 %v352_v8  ;;  %v345_v11 = vld [vmem:[%s491_s1 + $0x10] sm:$0xff]   ;;  %v357_v12 = vld [vmem:[%s493_s3 + $0x40] ss:$8 sps:$4 sm:$0xff]   ;;  %v361_v16 = vld [vmem:[%s493_s3 + $0x24] ss:$8 sps:$4 sm:$0xff]   ;;  %v192_v40 = vsub.s32 0, %v191_v39 }
   0x5   :  { %325 = vmatprep.mubr.msk.bf16.mxu0 %vm128_vm0, %v24_v7  ;;  %269 = vmatpush1.bf16.msra.mxu1 %v354_v9  ;;  %v358_v13 = vld [vmem:[%s493_s3 + $0x34] ss:$8 sps:$4 sm:$0xff]   ;;  %v360_v14 = vld [vmem:[%s493_s3 + $0x30] ss:$8 sps:$4 sm:$0xff]   ;;  %v346_v15 = vld [vmem:[%s491_s1 + $0x8] sm:$0xff]   ;;  %v196_v42 = vsub.s32 1, %v191_v39 }
   0x6   :  { %135 = vmatpush1.bf16.msra.mxu0 %v341_v2  ;;  %270 = vmatprep.subr.bf16.mxu1 %v355_v10  ;;  %v363_v17 = vld [vmem:[%s493_s3 + $0x20] ss:$8 sps:$4 sm:$0xff]   ;;  %v348_v19 = vld [vmem:[%s491_s1 + $0x58] sm:$0xff]   ;;  %v349_v20 = vld [vmem:[%s491_s1 + $0x50] sm:$0xff]  }
   0x7   :  { %136 = vmatprep.subr.bf16.mxu0 %v370_v0  ;;  %v347_v18 = vld [vmem:[%s491_s1] sm:$0xff]   ;;  %v350_v21 = vld [vmem:[%s491_s1 + $0x48] sm:$0xff]   ;;  %v364_v25 = vld [vmem:[%s493_s3 + $0x14] ss:$8 sps:$4 sm:$0xff]  }
   0x8   :  { %v351_v22 = vld [vmem:[%s491_s1 + $0x40] sm:$0xff]   ;;  %v366_v26 = vld [vmem:[%s493_s3 + $0x10] ss:$8 sps:$4 sm:$0xff]  }
   0x9   :  { %271 = vmatpush1.bf16.msra.mxu1 %v357_v12  ;;  %v21_v23 = vld [vmem:[%s492_s0] sm:$0xff] }
   0xa   :  { %137 = vmatpush1.bf16.msra.mxu0 %v342_v3  ;;  %272 = vmatprep.subr.bf16.mxu1 %v358_v13  ;;  %v23_v24 = vpack.c.bf16 %v21_v23, %v21_v23  ;;  %v367_v27 = vld [vmem:[%s493_s3 + $0x4] ss:$8 sps:$4 sm:$0xff]   ;;  %v369_v28 = vld [vmem:[%s493_s3] ss:$8 sps:$4 sm:$0xff]  }
   0xb   :  { %138 = vmatprep.subr.bf16.mxu0 %v370_v0  ;;  %v312_v29 = vld [vmem:[%s494_s2] ss:$0 sm:$0xff] }
   0xc   :  { %v188_v41 = vld [vmem:[%s495_s4] sm:$0x3] }
   0xd   :  { %273 = vmatpush1.bf16.msra.mxu1 %v360_v14  ;;  %v193_v43 = vrot.slane %v188_v41, %v192_v40  ;;  %v197_v44 = vrot.slane %v188_v41, %v196_v42 }
   0xe   :  { %139 = vmatpush1.bf16.msra.mxu0 %v343_v4  ;;  %274 = vmatprep.subr.bf16.mxu1 %v361_v16 }
   0xf   :  { %140 = vmatprep.subr.bf16.mxu0 %v370_v0 }
  0x11   :  { %275 = vmatpush1.bf16.msra.mxu1 %v363_v17 }
  0x12   :  { %141 = vmatpush1.bf16.msra.mxu0 %v344_v5  ;;  %276 = vmatprep.subr.bf16.mxu1 %v364_v25 }
  0x13   :  { %142 = vmatprep.subr.bf16.mxu0 %v370_v0 }
  0x15   :  { %277 = vmatpush1.bf16.msra.mxu1 %v366_v26 }
  0x16   :  { %143 = vmatpush1.bf16.msra.mxu0 %v345_v11  ;;  %278 = vmatprep.subr.bf16.mxu1 %v367_v27 }
  0x17   :  { %144 = vmatprep.subr.bf16.mxu0 %v370_v0 }
  0x19   :  { %279 = vmatpush1.bf16.msra.mxu1 %v369_v28 }
  0x1a   :  { %145 = vmatpush1.bf16.msra.mxu0 %v346_v15 }
  0x1b   :  { %146 = vmatprep.subr.bf16.mxu0 %v370_v0 }
  0x1e   :  { %147 = vmatpush1.bf16.msra.mxu0 %v347_v18 }
  0x1f   :  { %156 = vmatprep.subr.bf16.mxu0 %v370_v0 }
  0x22   :  { %157 = vmatpush2.bf16.msra.mxu0 %v348_v19 }
  0x23   :  { %158 = vmatprep.subr.bf16.mxu0 %v370_v0 }
  0x26   :  { %159 = vmatpush2.bf16.msra.mxu0 %v349_v20 }
  0x27   :  { %160 = vmatprep.subr.bf16.mxu0 %v370_v0 }
  0x2a   :  { %161 = vmatpush2.bf16.msra.mxu0 %v350_v21 }
  0x2b   :  { %162 = vmatprep.subr.bf16.mxu0 %v370_v0 }
  0x2e   :  { %163 = vmatpush2.bf16.msra.mxu0 %v351_v22 }
  0x31   :  { %165 = vmatmul.mubr.bf16.vlgmr.msra.gmra.mxu0 %v23_v24 }
  0xf1   :  { %v166_v30 = vpop.f32.mrf.mxu0 }
  0xf2   :  { %v167_v31 = vadd.f32 %v312_v29, %v166_v30 }
  0xf3   :  { %v168_v32 = vpop.f32.mrf.mxu0 }
  0xf4   :  { %vm172_vm1 = vcmp.ge.f32.partialorder %v167_v31, 0.0  ;;  %v173_v33 = vmul.f32 0.2, %v167_v31 }
  0xf5   :  { %v169_v34 = vpop.f32.mrf.mxu0 }
  0xf6   :  { %v174_v35 = vsel %vm172_vm1, %v167_v31, %v173_v33 }
  0xf7   :  { %v175_v36 = vpack.c.bf16 %v174_v35, %v174_v35  ;;  %v170_v37 = vpop.f32.mrf.mxu0 }
  0xf9   :  { %338 = vmatmul.mubr.msk.bf16.vlgmr.msra.gmra.mxu1 %vm260_vm2, %v175_v36 }
 0x1b9   :  { %v298_v45 = vpop.f32.mrf.mxu1 }
 0x1ba   :  { %v299_v46 = vadd.f32 %v298_v45, %v193_v43 }
 0x1bb   :  { %v300_v47 = vpop.f32.mrf.mxu1 }
 0x1bc   :  { %305 = vst [vmem:[%s496_s5] sm:$0xff] %v299_v46  ;;  %v301_v48 = vadd.f32 %v300_v47, %v197_v44 }
 0x1bd   :  { %v302_v49 = vpop.f32.mrf.mxu1 }
 0x1be   :  { %307 = vst.msk [vmem:[%s496_s5 + $0x8] sm:$0xff] %vm306_vm3, %v301_v48 }
 0x1bf   :  { %v303_v50 = vpop.f32.mrf.mxu1 }

// kernel: neg.5
= control target key start
LH: loop header
LB: loop body
LE: loop exit
PB: predicated region body
PF: predicated region fallthrough
CT: control target
= control target key end

     0   :  { %s104_s0 = inlined_call_operand.vmem [shape: f32[2,6,6], index: 0, kind: input, shape index: {}]   ;;  %s105_s1 = inlined_call_operand.vmem [shape: f32[2,6,6], index: 1, kind: output, shape index: {}]  }
   0x1   :  { %v2_v0 = vld [vmem:[%s104_s0] sm:$0x3]  ;;  %v48_v1 = vld [vmem:[%s104_s0 + $0x2] sm:$0x3]  ;;  %v50_v2 = vld [vmem:[%s104_s0 + $0x4] sm:$0x3] }
   0x2   :  { %v5_v3 = vxor.u32 2147483648, %v2_v0  ;;  %v12_v4 = vxor.u32 2147483648, %v48_v1  ;;  %v20_v5 = vxor.u32 2147483648, %v50_v2  ;;  %v52_v6 = vld [vmem:[%s104_s0 + $0x6] sm:$0x3] }
   0x3   :  { %v28_v7 = vxor.u32 2147483648, %v52_v6  ;;  %v54_v8 = vld [vmem:[%s104_s0 + $0x8] sm:$0x3]  ;;  %v56_v9 = vld [vmem:[%s104_s0 + $0xa] sm:$0x3] }
   0x4   :  { %7 = vst [vmem:[%s105_s1] sm:$0x3] %v5_v3  ;;  %49 = vst [vmem:[%s105_s1 + $0x2] sm:$0x3] %v12_v4  ;;  %v36_v10 = vxor.u32 2147483648, %v54_v8  ;;  %v44_v11 = vxor.u32 2147483648, %v56_v9 }
   0x5   :  { %51 = vst [vmem:[%s105_s1 + $0x4] sm:$0x3] %v20_v5  ;;  %53 = vst [vmem:[%s105_s1 + $0x6] sm:$0x3] %v28_v7 }
   0x6   :  { %55 = vst [vmem:[%s105_s1 + $0x8] sm:$0x3] %v36_v10  ;;  %57 = vst [vmem:[%s105_s1 + $0xa] sm:$0x3] %v44_v11 }

// kernel: forward.7
= control target key start
LH: loop header
LB: loop body
LE: loop exit
PB: predicated region body
PF: predicated region fallthrough
CT: control target
= control target key end

     0   :  { %s2960_s29 = smov 0   ;;  %s3360_s0 = inlined_call_operand.vmem [shape: f32[2,4,12,10], index: 0, kind: input, shape index: {}]   ;;  %s3361_s1 = inlined_call_operand.vmem [shape: f32[2,4,12,32], index: 1, kind: input, shape index: {}]   ;;  %s3362_s2 = inlined_call_operand.vmem [shape: bf16[144,12], index: 2, kind: input, shape index: {}]   ;;  %s3363_s3 = inlined_call_operand.vmem [shape: bf16[144,12], index: 3, kind: input, shape index: {}]   ;;  %s3364_s4 = inlined_call_operand.vmem [shape: bf16[12,144], index: 4, kind: input, shape index: {}]   ;;  %s3365_s5 = inlined_call_operand.vmem [shape: bf16[10,10], index: 5, kind: input, shape index: {}]   ;;  %s3366_s6 = inlined_call_operand.vmem [shape: f32[1,10], index: 6, kind: input, shape index: {}]   ;;  %s3367_s7 = inlined_call_operand.vmem [shape: bf16[10,10], index: 7, kind: input, shape index: {}]   ;;  %s3368_s8 = inlined_call_operand.vmem [shape: f32[1,10], index: 8, kind: input, shape index: {}]   ;;  %s3369_s9 = inlined_call_operand.vmem [shape: f32[1,10], index: 9, kind: input, shape index: {}]   ;;  %s3370_s10 = inlined_call_operand.<no memory space> [shape: f32[1,1], index: 10, kind: input, shape index: {}]   ;;  %s3371_s11 = inlined_call_operand.vmem [shape: bf16[32,32], index: 11, kind: input, shape index: {}]   ;;  %s3372_s12 = inlined_call_operand.vmem [shape: f32[1,32], index: 12, kind: input, shape index: {}]   ;;  %s3373_s13 = inlined_call_operand.vmem [shape: bf16[32,64], index: 13, kind: input, shape index: {}]   ;;  %s3374_s14 = inlined_call_operand.vmem [shape: bf16[32,64], index: 14, kind: input, shape index: {}]   ;;  %s3375_s15 = inlined_call_operand.vmem [shape: f32[1,64], index: 15, kind: input, shape index: {}]   ;;  %s3376_s16 = inlined_call_operand.vmem [shape: bf16[64,32], index: 16, kind: input, shape index: {}]   ;;  %s3377_s17 = inlined_call_operand.vmem [shape: f32[1,32], index: 17, kind: input, shape index: {}]   ;;  %s3378_s18 = inlined_call_operand.vmem [shape: bf16[32,32], index: 18, kind: input, shape index: {}]   ;;  %s3379_s19 = inlined_call_operand.vmem [shape: bf16[32,32], index: 19, kind: input, shape index: {}]   ;;  %s3380_s20 = inlined_call_operand.vmem [shape: f32[1,32], index: 20, kind: input, shape index: {}]   ;;  %s3381_s21 = inlined_call_operand.vmem [shape: f32[2,12,32], index: 21, kind: output, shape index: {0}]   ;;  %s3382_s22 = inlined_call_operand.vmem [shape: f32[2,1,32], index: 22, kind: output, shape index: {1}]  }
   0x1   :  { %3386 = sst [smem:[#allocation3_spill]] %s3360_s0  ;;  %v28_v0 = vstv %s3370_s10 }
   0x2   :  { %3387 = sst [smem:[#allocation4_spill]] %s3361_s1  ;;  %29 = vst [vmem:[#allocation2] sm:$0x1] %v28_v0 }
   0x3   :  { %3388 = sst [smem:[#allocation5_spill]] %s3362_s2 }
   0x4   :  { %3389 = sst [smem:[#allocation6_spill]] %s3363_s3 }
   0x5   :  { %3390 = sst [smem:[#allocation7_spill]] %s3364_s4 }
   0x6   :  { %3391 = sst [smem:[#allocation8_spill]] %s3365_s5 }
   0x7   :  { %3392 = sst [smem:[#allocation9_spill]] %s3366_s6 }
   0x8 LB: > { %s2394_s30 = sadd.s32 4294967295, %s2837_s29   ;;  %p2398_p0 = scmp.ge.s32.totalorder %s2837_s29, 1  ;;  %s2837_s29 = sphi %s2960_s29, %s35_s29  }
   0x9   : > { %p627_p1 = scmp.lt.s32.totalorder %s2837_s29, 3 }
   0xb   : > { %p628_p2 = pnand %p2398_p0, %p627_p1 }
   0xc   : > { %s3393_s0 = sld [smem:[#allocation8_spill]] (!%p628_p2)  ;;  %p697_p3 = scmp.lt.s32.totalorder (!%p628_p2), %s2394_s30, 1 }
   0xd   : > { %631 = sbr.rel (%p628_p2) target bundleno = 2058 (0x80a), region = 104  ;;  %s3394_s24 = sld [smem:[#allocation3_spill]] (!%p628_p2) }
   0xe   : > { %s3395_s3 = sld [smem:[#allocation9_spill]] (!%p628_p2) }
   0xf   : > { %s3396_s2 = sld [smem:[#allocation4_spill]] (!%p628_p2) }
  0x10   : > { %s3398_s25 = sld [smem:[#allocation5_spill]] (!%p628_p2) }
  0x12   : > { %vm737_vm0 = vcmask 1044480   ;;  %v2839_v1 = vmov 0.0   ;;  %v2794_v2 = vld [vmem:[%s3393_s0] sm:$0x1f]   ;;  %vm2840_vm1 = vmmov 0   ;;  %s3401_s30 = smov (!%p697_p3, %s2394_s30), 1 }
  0x13   : > { %2571 = vmatprep.subr.bf16.mxu0 %v2839_v1  ;;  %2577 = vmatprep.subr.bf16.mxu1 %v2839_v1  ;;  %v739_v3 = vsel %vm737_vm0, %v2794_v2, 0  ;;  %s2504_s23 = sshll.u32 %s3401_s30, 6  ;;  %vm733_vm2 = vcmask 80896   ;;  %v2795_v16 = vld [vmem:[%s3367_s7] sm:$0x1f]   ;;  %vm860_vm3 = vcmask 76800  }
  0x14   : > { %2573 = vmatprep.mubr.msk.bf16.mxu0 %vm2840_vm1, %v2839_v1  ;;  %2579 = vmatprep.mubr.msk.bf16.mxu1 %vm2840_vm1, %v2839_v1  ;;  %s701_s6 = scalar_lea.vmem %s3394_s24, %s2504_s23  ;;  %v803_v17 = vsel %vm737_vm0, %v2795_v16, 0  ;;  %v2405_v18 = vld [vmem:[%s3395_s3] ss:$0 sm:$0xff]  ;;  %vm1283_vm4 = vcmask 261120   ;;  %vm1335_vm7 = vcmask 257024   ;;  %vm1344_vm8 = vcmask 253952  }
  0x15   : > { %2572 = vmatpush3.bf16.msra.mxu0 %v739_v3  ;;  %v716_v4 = vld [vmem:[%s701_s6] sm:$0xff]  ;;  %v717_v5 = vld [vmem:[%s701_s6 + $0x8] sm:$0xf]  ;;  %v2413_v7 = vld [vmem:[%s701_s6 + $0x10] sm:$0xff]  ;;  %2578 = vmatpush3.bf16.msra.mxu1 %v803_v17  ;;  %s706_s27 = scalar_lea.vmem %s3396_s2, %s2504_s23  ;;  %s714_s2 = scalar_lea.vmem %s3382_s22, %s3401_s30  ;;  %vm1575_vm9 = vcmask 1045504   ;;  %vm1547_vm10 = vcmask 97280  }
  0x16   : > { %2583 = vmatprep.subr.bf16.mxu0 %v2839_v1  ;;  %v718_v6 = vpack.c.bf16 %v717_v5, %v716_v4  ;;  %v2414_v8 = vld [vmem:[%s701_s6 + $0x18] sm:$0xf]  ;;  %v2419_v10 = vld [vmem:[%s701_s6 + $0x20] sm:$0xff]  ;;  %v2420_v11 = vld [vmem:[%s701_s6 + $0x28] sm:$0xf]  ;;  %2589 = vmatprep.subr.bf16.mxu1 %v2839_v1  ;;  %s3397_s3 = sld [smem:[#allocation6_spill]] }
  0x17   : > { %v890_v9 = vpack.c.bf16 %v2414_v8, %v2413_v7  ;;  %v1014_v12 = vpack.c.bf16 %v2420_v11, %v2419_v10  ;;  %v2425_v13 = vld [vmem:[%s701_s6 + $0x30] sm:$0xff]  ;;  %v2426_v14 = vld [vmem:[%s701_s6 + $0x38] sm:$0xf]  ;;  %v2408_v55 = vld [vmem:[%s3368_s8] ss:$0 sm:$0xff]  ;;  %vm1955_vm11 = vcmask 523264  }
  0x18   : > { %2574 = vmatmul.mubr.msk.bf16.vlgmr.msra.gmra.mxu0 %vm733_vm2, %v718_v6  ;;  %v1138_v15 = vpack.c.bf16 %v2426_v14, %v2425_v13  ;;  %v2411_v59 = vld [vmem:[%s3369_s9] ss:$0 sm:$0xff]  ;;  %vm2126_vm12 = vcmask 130048   ;;  %s2506_s4 = sshll.u32 %s3401_s30, 4 }
  0x19   : > { %2584 = vmatpush3.bf16.msra.mxu0 %v739_v3  ;;  %2585 = vmatprep.mubr.msk.bf16.mxu0 %vm2840_vm1, %v2839_v1  ;;  %s711_s5 = scalar_lea.vmem %s3381_s21, %s2506_s4 }
  0x1a   : > { %2595 = vmatprep.subr.bf16.mxu0 %v2839_v1 }
  0x20   : > { %2586 = vmatmul.mubr.msk.bf16.vlgmr.msra.gmra.mxu0 %vm733_vm2, %v890_v9 }
  0x21   : > { %2596 = vmatpush3.bf16.msra.mxu0 %v739_v3  ;;  %2597 = vmatprep.mubr.msk.bf16.mxu0 %vm2840_vm1, %v2839_v1 }
  0x22   : > { %2607 = vmatprep.subr.bf16.mxu0 %v2839_v1 }
  0x28   : > { %2598 = vmatmul.mubr.msk.bf16.vlgmr.msra.gmra.mxu0 %vm733_vm2, %v1014_v12 }
  0x29   : > { %2608 = vmatpush3.bf16.msra.mxu0 %v739_v3  ;;  %2609 = vmatprep.mubr.msk.bf16.mxu0 %vm2840_vm1, %v2839_v1 }
  0x2a   : > { %2619 = vmatprep.subr.bf16.mxu0 %v2839_v1 }
  0x30   : > { %2610 = vmatmul.mubr.msk.bf16.vlgmr.msra.gmra.mxu0 %vm733_vm2, %v1138_v15 }
  0x31   : > { %2623 = vmatprep.mubr.msk.bf16.mxu0 %vm2840_vm1, %v2839_v1 }
  0xd8   : > { %v775_v19 = vpop.f32.mrf.mxu0 }
  0xd9   : > { %v776_v21 = vadd.f32 %v2405_v18, %v775_v19 }
  0xda   : > { %v2575_v20 = vpop.f32.mrf.mxu0 }
  0xdb   : > { %v782_v25 = vmax.f32 %v776_v21, 0.0 }
  0xdc   : > { %v778_v22 = vpop.f32.mrf.mxu0 }
  0xdd   : > { %v779_v23 = vadd.f32 %v2405_v18, %v778_v22  ;;  %v2841_v22 = vmov 0  }
  0xde   : > { %v2576_v24 = vpop.f32.mrf.mxu0  ;;  %2792 = vset.pattern.permute.xlu0 %v2841_v22  ;;  %2793 = vset.pattern.permute.xlu1 %v2841_v22 }
  0xdf   : > { %v783_v26 = vmax.f32 %v779_v23, 0.0 }
  0xe0   : > { %v928_v27 = vpop.f32.mrf.mxu0 }
  0xe1   : > { %v784_v28 = vpack.c.bf16 %v783_v26, %v782_v25  ;;  %v929_v30 = vadd.f32 %v2405_v18, %v928_v27 }
  0xe2   : > { %v2587_v29 = vpop.f32.mrf.mxu0 }
  0xe3   : > { %2580 = vmatmul.mubr.msk.bf16.vlgmr.msra.gmra.mxu1 %vm733_vm2, %v784_v28  ;;  %v935_v34 = vmax.f32 %v929_v30, 0.0 }
  0xe4   : > { %v931_v31 = vpop.f32.mrf.mxu0  ;;  %2590 = vmatpush3.bf16.msra.mxu1 %v803_v17  ;;  %2591 = vmatprep.mubr.msk.bf16.mxu1 %vm2840_vm1, %v2839_v1 }
  0xe5   : > { %v932_v32 = vadd.f32 %v2405_v18, %v931_v31  ;;  %2601 = vmatprep.subr.bf16.mxu1 %v2839_v1 }
  0xe6   : > { %v2588_v33 = vpop.f32.mrf.mxu0 }
  0xe7   : > { %v936_v35 = vmax.f32 %v932_v32, 0.0 }
  0xe8   : > { %v1052_v36 = vpop.f32.mrf.mxu0 }
  0xe9   : > { %v937_v37 = vpack.c.bf16 %v936_v35, %v935_v34  ;;  %v1053_v39 = vadd.f32 %v2405_v18, %v1052_v36 }
  0xea   : > { %v2599_v38 = vpop.f32.mrf.mxu0 }
  0xeb   : > { %2592 = vmatmul.mubr.msk.bf16.vlgmr.msra.gmra.mxu1 %vm733_vm2, %v937_v37  ;;  %v1059_v43 = vmax.f32 %v1053_v39, 0.0 }
  0xec   : > { %v1055_v40 = vpop.f32.mrf.mxu0  ;;  %2602 = vmatpush3.bf16.msra.mxu1 %v803_v17  ;;  %2603 = vmatprep.mubr.msk.bf16.mxu1 %vm2840_vm1, %v2839_v1 }
  0xed   : > { %v1056_v41 = vadd.f32 %v2405_v18, %v1055_v40  ;;  %2613 = vmatprep.subr.bf16.mxu1 %v2839_v1 }
  0xee   : > { %v2600_v42 = vpop.f32.mrf.mxu0 }
  0xef   : > { %v1060_v44 = vmax.f32 %v1056_v41, 0.0 }
  0xf0   : > { %v1176_v45 = vpop.f32.mrf.mxu0 }
  0xf1   : > { %v1061_v46 = vpack.c.bf16 %v1060_v44, %v1059_v43  ;;  %v1177_v48 = vadd.f32 %v2405_v18, %v1176_v45  ;;  %v2412_v43 = vld [vmem:[#allocation2] ss:$0 sm:$0xff] }
  0xf2   : > { %v2611_v47 = vpop.f32.mrf.mxu0 }
  0xf3   : > { %2604 = vmatmul.mubr.msk.bf16.vlgmr.msra.gmra.mxu1 %vm733_vm2, %v1061_v46  ;;  %v1183_v52 = vmax.f32 %v1177_v48, 0.0 }
  0xf4   : > { %v1179_v49 = vpop.f32.mrf.mxu0  ;;  %2614 = vmatpush3.bf16.msra.mxu1 %v803_v17  ;;  %2615 = vmatprep.mubr.msk.bf16.mxu1 %vm2840_vm1, %v2839_v1 }
  0xf5   : > { %v1180_v50 = vadd.f32 %v2405_v18, %v1179_v49  ;;  %2627 = vmatprep.subr.bf16.mxu1 %v2839_v1 }
  0xf6   : > { %v2612_v51 = vpop.f32.mrf.mxu0 }
  0xf7   : > { %v1184_v53 = vmax.f32 %v1180_v50, 0.0 }
  0xf9   : > { %v1185_v54 = vpack.c.bf16 %v1184_v53, %v1183_v52 }
  0xfb   : > { %2616 = vmatmul.mubr.msk.bf16.vlgmr.msra.gmra.mxu1 %vm733_vm2, %v1185_v54 }
  0xfc   : > { %2631 = vmatprep.mubr.msk.bf16.mxu1 %vm2840_vm1, %v2839_v1 }
 0x1a3   : > { %v839_v56 = vpop.f32.mrf.mxu1 }
 0x1a4   : > { %v840_v57 = vadd.f32 %v2408_v55, %v839_v56 }
 0x1a5   : > { %v2581_v58 = vpop.f32.mrf.mxu1 }
 0x1a6   : > { %v846_v60 = vmax.f32 %v840_v57, 0.0  ;;  %v2796_v57 = vld [vmem:[%s3371_s11 + $0x8] sm:$0xff]  }
 0x1a7   : > { %v842_v61 = vpop.f32.mrf.mxu1  ;;  %2620 = vmatpush3.bf16.msra.mxu0 %v2796_v57 }
 0x1a8   : > { %v843_v62 = vadd.f32 %v2408_v55, %v842_v61  ;;  %v855_v63 = vmul.f32 %v2411_v59, %v846_v60  ;;  %2621 = vmatprep.subr.bf16.mxu0 %v2839_v1  ;;  %v2797_v60 = vld [vmem:[%s3371_s11] sm:$0xff]  }
 0x1a9   : > { %v2582_v0 = vpop.f32.mrf.mxu1 }
 0x1aa   : > { %v847_v2 = vmax.f32 %v843_v62, 0.0  ;;  %v857_v3 = vsel %vm733_vm2, %v855_v63, 0.0 }
 0x1ab   : > { %858 = vadd.xlane.f32.xlu0 %v857_v3  ;;  %v975_v4 = vpop.f32.mrf.mxu1  ;;  %2622 = vmatpush3.bf16.msra.mxu0 %v2797_v60  ;;  %v2417_v3 = vld [vmem:[%s706_s27 + $0x10] sm:$0xff] }
 0x1ac   : > { %v976_v5 = vadd.f32 %v2408_v55, %v975_v4  ;;  %v856_v6 = vmul.f32 %v2411_v59, %v847_v2  ;;  %2635 = vmatprep.subr.bf16.mxu0 %v2839_v1  ;;  %v2418_v4 = vld [vmem:[%s706_s27 + $0x18] sm:$0xf] }
 0x1ad   : > { %v2593_v7 = vpop.f32.mrf.mxu1 }
 0x1ae   : > { %v982_v8 = vmax.f32 %v976_v5, 0.0  ;;  %v861_v9 = vsel %vm860_vm3, %v856_v6, 0.0  ;;  %v873_v6 = vld [vmem:[%s706_s27] sm:$0xff] }
 0x1af   : > { %862 = vadd.xlane.f32.xlu0 %v861_v9  ;;  %v978_v10 = vpop.f32.mrf.mxu1  ;;  %v2423_v9 = vld [vmem:[%s706_s27 + $0x20] sm:$0xff] }
 0x1b0   : > { %v979_v11 = vadd.f32 %v2408_v55, %v978_v10  ;;  %v984_v12 = vmul.f32 %v2411_v59, %v982_v8  ;;  %v874_v8 = vld [vmem:[%s706_s27 + $0x8] sm:$0xf] }
 0x1b1   : > { %v2594_v13 = vpop.f32.mrf.mxu1  ;;  %v2424_v10 = vld [vmem:[%s706_s27 + $0x28] sm:$0xf] }
 0x1b2   : > { %v983_v14 = vmax.f32 %v979_v11, 0.0  ;;  %v986_v15 = vsel %vm733_vm2, %v984_v12, 0.0  ;;  %v2429_v13 = vld [vmem:[%s706_s27 + $0x30] sm:$0xff] }
 0x1b3   : > { %987 = vadd.xlane.f32.xlu1 %v986_v15  ;;  %v1099_v16 = vpop.f32.mrf.mxu1 }
 0x1b4   : > { %v1100_v17 = vadd.f32 %v2408_v55, %v1099_v16  ;;  %v985_v18 = vmul.f32 %v2411_v59, %v983_v14 }
 0x1b5   : > { %v2605_v19 = vpop.f32.mrf.mxu1 }
 0x1b6   : > { %v1106_v20 = vmax.f32 %v1100_v17, 0.0  ;;  %v989_v21 = vsel %vm860_vm3, %v985_v18, 0.0  ;;  %v2430_v19 = vld [vmem:[%s706_s27 + $0x38] sm:$0xf]  ;;  %s3399_s27 = sld [smem:[#allocation7_spill]] }
 0x1b7   : > { %990 = vadd.xlane.f32.xlu1 %v989_v21  ;;  %v1102_v23 = vpop.f32.mrf.mxu1 }
 0x1b8   : > { %v1103_v24 = vadd.f32 %v2408_v55, %v1102_v23  ;;  %v1108_v25 = vmul.f32 %v2411_v59, %v1106_v20 }
 0x1b9   : > { %v2606_v26 = vpop.f32.mrf.mxu1 }
 0x1ba   : > { %v1107_v27 = vmax.f32 %v1103_v24, 0.0  ;;  %v1110_v28 = vsel %vm733_vm2, %v1108_v25, 0.0 }
 0x1bb   : > { %1111 = vadd.xlane.f32.xlu0 %v1110_v28  ;;  %v1223_v29 = vpop.f32.mrf.mxu1 }
 0x1bc   : > { %v1224_v30 = vadd.f32 %v2408_v55, %v1223_v29  ;;  %v1109_v31 = vmul.f32 %v2411_v59, %v1107_v27 }
 0x1bd   : > { %v2617_v32 = vpop.f32.mrf.mxu1 }
 0x1be   : > { %v1230_v33 = vmax.f32 %v1224_v30, 0.0  ;;  %v1113_v34 = vsel %vm860_vm3, %v1109_v31, 0.0  ;;  %v2798_v31 = vld [vmem:[%s3373_s13 + $0x8] sm:$0xff]  }
 0x1bf   : > { %1114 = vadd.xlane.f32.xlu1 %v1113_v34  ;;  %v1226_v35 = vpop.f32.mrf.mxu1  ;;  %v2799_v32 = vld [vmem:[%s3374_s14 + $0x8] sm:$0xff]   ;;  %2628 = vmatpush3.bf16.msra.mxu1 %v2798_v31  ;;  %v2801_v34 = vld [vmem:[%s3374_s14] sm:$0xff]  }
 0x1c0   : > { %v1227_v36 = vadd.f32 %v2408_v55, %v1226_v35  ;;  %v1232_v37 = vmul.f32 %v2411_v59, %v1230_v33  ;;  %2629 = vmatprep.subr.bf16.mxu1 %v2839_v1  ;;  %v2800_v33 = vld [vmem:[%s3373_s13] sm:$0xff]  }
 0x1c1   : > { %v2618_v38 = vpop.f32.mrf.mxu1  ;;  %v2431_v35 = vld [vmem:[%s3372_s12] ss:$0 sm:$0xff] }
 0x1c2   : > { %v1231_v39 = vmax.f32 %v1227_v36, 0.0  ;;  %v1234_v40 = vsel %vm733_vm2, %v1232_v37, 0.0 }
 0x1c3   : > { %1235 = vadd.xlane.f32.xlu0 %v1234_v40  ;;  %2630 = vmatpush3.bf16.msra.mxu1 %v2800_v33 }
 0x1c4   : > { %v1233_v41 = vmul.f32 %v2411_v59, %v1231_v39  ;;  %2779 = vmatprep.subr.bf16.mxu1 %v2839_v1 }
 0x1c6   : > { %v1237_v42 = vsel %vm860_vm3, %v1233_v41, 0.0 }
 0x1c7   : > { %1238 = vadd.xlane.f32.xlu1 %v1237_v42 }
 0x234   : > { %v859_v44 = vpop.xlane.xlu0 %858 }
 0x235   : > { %v871_v45 = vadd.f32 %v2412_v43, %v859_v44 }
 0x237   : > { %877 = vperm.xlu0 %2792, %v871_v45  }
 0x238   : > { %v863_v46 = vpop.xlane.xlu0 %862 }
 0x239   : > { %v872_v47 = vadd.f32 %v2412_v43, %v863_v46 }
 0x23b   : > { %882 = vperm.xlu1 %2793, %v872_v47  }
 0x23c   : > { %v988_v48 = vpop.xlane.xlu1 %987 }
 0x23d   : > { %v992_v49 = vadd.f32 %v2412_v43, %v988_v48 }
 0x23f   : > { %999 = vperm.xlu1 %2793, %v992_v49  }
 0x240   : > { %v991_v50 = vpop.xlane.xlu1 %990 }
 0x241   : > { %v993_v51 = vadd.f32 %v2412_v43, %v991_v50 }
 0x243   : > { %1004 = vperm.xlu1 %2793, %v993_v51  }
 0x244   : > { %v1112_v52 = vpop.xlane.xlu0 %1111 }
 0x245   : > { %v1116_v53 = vadd.f32 %v2412_v43, %v1112_v52 }
 0x247   : > { %1123 = vperm.xlu1 %2793, %v1116_v53  }
 0x248   : > { %v1115_v54 = vpop.xlane.xlu1 %1114 }
 0x249   : > { %v1117_v55 = vadd.f32 %v2412_v43, %v1115_v54 }
 0x24b   : > { %1128 = vperm.xlu1 %2793, %v1117_v55  }
 0x24c   : > { %v1236_v56 = vpop.xlane.xlu0 %1235 }
 0x24d   : > { %v1240_v58 = vadd.f32 %v2412_v43, %v1236_v56 }
 0x24f   : > { %1247 = vperm.xlu1 %2793, %v1240_v58  }
 0x250   : > { %v1239_v59 = vpop.xlane.xlu1 %1238 }
 0x251   : > { %v1241_v61 = vadd.f32 %v2412_v43, %v1239_v59 }
 0x253   : > { %1252 = vperm.xlu1 %2793, %v1241_v61  }
 0x2b2   : > { %v878_v7 = vpop.permute.xlu0 %877 }
 0x2b3   : > { %v885_v15 = vmul.f32 %v878_v7, %v873_v6  ;;  %v2803_v7 = vld [vmem:[%s3397_s3 + $0x8] sm:$0xff]  }
 0x2b6   : > { %v883_v62 = vpop.permute.xlu1 %882 }
 0x2b7   : > { %v886_v16 = vmul.f32 %v883_v62, %v874_v8  ;;  %v2808_v8 = vld [vmem:[%s3397_s3 + $0x18] sm:$0xff]  }
 0x2ba   : > { %v1000_v63 = vpop.permute.xlu1 %999 }
 0x2bb   : > { %v1007_v11 = vmul.f32 %v2417_v3, %v1000_v63 }
 0x2bd   : > { %v1009_v20 = vadd.f32 %v1007_v11, %v885_v15  ;;  %v2805_v11 = vld [vmem:[%s3398_s25 + $0x8] sm:$0xff]   ;;  %v2809_v15 = vld [vmem:[%s3398_s25 + $0x18] sm:$0xff]  }
 0x2be   : > { %v1005_v0 = vpop.permute.xlu1 %1004 }
 0x2bf   : > { %v1008_v12 = vmul.f32 %v2418_v4, %v1005_v0  ;;  %v2802_v4 = vld [vmem:[%s3397_s3] sm:$0xff]  }
 0x2c1   : > { %v1010_v21 = vadd.f32 %v1008_v12, %v886_v16  ;;  %v2812_v12 = vld [vmem:[%s3397_s3 + $0x28] sm:$0xff]   ;;  %v2816_v16 = vld [vmem:[%s3397_s3 + $0x38] sm:$0xff]  }
 0x2c2   : > { %v1124_v2 = vpop.permute.xlu1 %1123 }
 0x2c3   : > { %v1131_v17 = vmul.f32 %v2423_v9, %v1124_v2  ;;  %v2804_v9 = vld [vmem:[%s3398_s25] sm:$0xff]  }
 0x2c5   : > { %v1133_v25 = vadd.f32 %v1131_v17, %v1009_v20  ;;  %v2811_v17 = vld [vmem:[%s3398_s25 + $0x20] sm:$0xff]   ;;  %v2815_v20 = vld [vmem:[%s3398_s25 + $0x30] sm:$0xff]  }
 0x2c6   : > { %v1129_v5 = vpop.permute.xlu1 %1128 }
 0x2c7   : > { %v1132_v18 = vmul.f32 %v2424_v10, %v1129_v5  ;;  %v2806_v5 = vld [vmem:[%s3397_s3 + $0x10] sm:$0xff]   ;;  %v2810_v10 = vld [vmem:[%s3397_s3 + $0x20] sm:$0xff]  }
 0x2c9   : > { %v1134_v26 = vadd.f32 %v1132_v18, %v1010_v21  ;;  %v2818_v18 = vld [vmem:[%s3397_s3 + $0x40] sm:$0xff]   ;;  %v2817_v21 = vld [vmem:[%s3398_s25 + $0x38] sm:$0xff]  }
 0x2ca   : > { %v1248_v14 = vpop.permute.xlu1 %1247 }
 0x2cb   : > { %v1255_v23 = vmul.f32 %v2429_v13, %v1248_v14  ;;  %v2807_v13 = vld [vmem:[%s3398_s25 + $0x10] sm:$0xff]  }
 0x2cc   : > { %v2814_v14 = vld [vmem:[%s3397_s3 + $0x30] sm:$0xff]  }
 0x2cd   : > { %v1257_v28 = vadd.f32 %v1255_v23, %v1133_v25  ;;  %v2820_v23 = vld [vmem:[%s3376_s16 + $0x18] sm:$0xff]   ;;  %v2821_v25 = vld [vmem:[%s3376_s16 + $0x10] sm:$0xff]  }
 0x2ce   : > { %v1253_v24 = vpop.permute.xlu1 %1252 }
 0x2cf   : > { %v1256_v27 = vmul.f32 %v2430_v19, %v1253_v24  ;;  %v2813_v19 = vld [vmem:[%s3398_s25 + $0x28] sm:$0xff]   ;;  %v2819_v24 = vld [vmem:[%s3398_s25 + $0x40] sm:$0xff]  }
 0x2d1   : > { %v1258_v29 = vadd.f32 %v1256_v27, %v1134_v26  ;;  %v2822_v26 = vld [vmem:[%s3376_s16 + $0x8] sm:$0xff]   ;;  %v2823_v27 = vld [vmem:[%s3376_s16] sm:$0xff]  }
 0x2d3   : > { %v1259_v30 = vpack.c.bf16 %v1258_v29, %v1257_v28 }
 0x2d5   : > { %2624 = vmatmul.mubr.msk.bf16.vlgmr.msra.gmra.mxu0 %vm1283_vm4, %v1259_v30 }
 0x2d6   : > { %2639 = vmatprep.mubr.msk.bf16.mxu0 %vm2840_vm1, %v2839_v1  ;;  %2636 = vmatpush3.bf16.msra.mxu0 %v2799_v32 }
 0x2d7   : > { %2637 = vmatprep.subr.bf16.mxu0 %v2839_v1 }
 0x2da   : > { %2638 = vmatpush3.bf16.msra.mxu0 %v2801_v34 }
 0x2db   : > { %2643 = vmatprep.subr.bf16.mxu0 %v2839_v1 }
 0x395   : > { %v1321_v36 = vpop.f32.mrf.mxu0 }
 0x396   : > { %v1322_v37 = vadd.f32 %v2431_v35, %v1321_v36 }
 0x397   : > { %v2625_v38 = vpop.f32.mrf.mxu0 }
 0x398   : > { %v1330_v39 = vmul.f32 0.2, %v1322_v37  ;;  %vm1328_vm5 = vcmp.ge.f32.partialorder %v1322_v37, 0.0 }
 0x399   : > { %v1324_v40 = vpop.f32.mrf.mxu0 }
 0x39a   : > { %v1325_v41 = vadd.f32 %v2431_v35, %v1324_v40  ;;  %v1332_v43 = vsel %vm1328_vm5, %v1322_v37, %v1330_v39 }
 0x39b   : > { %v2626_v42 = vpop.f32.mrf.mxu0  ;;  %v1334_v46 = vsel %vm1283_vm4, %v1332_v43, -inf }
 0x39c   : > { %vm1329_vm6 = vcmp.ge.f32.partialorder %v1325_v41, 0.0  ;;  %v1331_v44 = vmul.f32 0.2, %v1325_v41 }
 0x39e   : > { %v1333_v45 = vsel %vm1329_vm6, %v1325_v41, %v1331_v44 }
 0x39f   : > { %v1336_v47 = vsel %vm1335_vm7, %v1333_v45, -inf  ;;  %v3078_v48 = vpack.c.bf16 %v1333_v45, %v1332_v43 }
 0x3a0   : > { %v1337_v49 = vmax.f32 %v1334_v46, %v1336_v47  ;;  %v3221_v47 = vld [vmem:[%s3375_s15] ss:$0 sm:$0xff] }
 0x3a1   : > { %2632 = vmatmul.mubr.msk.bf16.vlgmr.msra.gmra.mxu1 %vm1283_vm4, %v3078_v48  ;;  %2640 = vmatmul.mubr.msk.bf16.vlgmr.msra.gmra.mxu0 %vm1283_vm4, %v3078_v48 }
 0x3a2   : > { %v1338_v50 = vrot.slane %v1337_v49, 4  ;;  %2645 = vmatprep.mubr.msk.bf16.mxu0 %vm2840_vm1, %v2839_v1  ;;  %2653 = vmatprep.mubr.msk.bf16.mxu1 %vm2840_vm1, %v2839_v1 }
 0x3a4   : > { %v1339_v51 = vmax.f32 %v1337_v49, %v1338_v50 }
 0x3a6   : > { %v1340_v52 = vrot.slane %v1339_v51, 2 }
 0x3a8   : > { %v1341_v53 = vmax.f32 %v1339_v51, %v1340_v52 }
 0x3aa   : > { %v1342_v54 = vrot.slane %v1341_v53, 1 }
 0x3ac   : > { %v1343_v55 = vmax.f32 %v1341_v53, %v1342_v54 }
 0x3ae   : > { %1345 = vst.msk [vmem:[%s714_s2] sm:$0x1] %vm1344_vm8, %v1343_v55 }
 0x461   : > { %v1400_v56 = vpop.f32.mrf.mxu1  ;;  %v1457_v57 = vpop.f32.mrf.mxu0 }
 0x463   : > { %v2633_v58 = vpop.f32.mrf.mxu1  ;;  %v2641_v59 = vpop.f32.mrf.mxu0 }
 0x465   : > { %v1403_v60 = vpop.f32.mrf.mxu1  ;;  %v1460_v61 = vpop.f32.mrf.mxu0 }
 0x466   : > { %v1501_v62 = vpack.c.bf16 %v1460_v61, %v1457_v57  ;;  %v1482_v2 = vpack.c.bf16 %v1403_v60, %v1400_v56 }
 0x467   : > { %v2634_v63 = vpop.f32.mrf.mxu1  ;;  %v2642_v0 = vpop.f32.mrf.mxu0 }
 0x468   : > { %v1577_v3 = vsel %vm1575_vm9, %v1501_v62, 0  ;;  %v1757_v6 = vsel %vm1575_vm9, %v1482_v2, 0 }
 0x469   : > { %2644 = vmatpush3.bf16.msra.mxu0 %v1577_v3  ;;  %2780 = vmatpush3.bf16.msra.mxu1 %v1577_v3 }
 0x46a   : > { %2681 = vmatprep.subr.bf16.mxu0 %v2839_v1  ;;  %2719 = vmatprep.subr.bf16.mxu1 %v2839_v1 }
 0x46c   : > { %2646 = vmatmul.mubr.msk.bf16.vlgmr.msra.gmra.mxu0 %vm1547_vm10, %v2802_v4  ;;  %2654 = vmatmul.mubr.msk.bf16.vlgmr.msra.gmra.mxu1 %vm1547_vm10, %v2806_v5 }
 0x46d   : > { %2682 = vmatpush3.bf16.msra.mxu0 %v1757_v6  ;;  %2649 = vmatprep.mubr.msk.bf16.mxu0 %vm2840_vm1, %v2839_v1 }
 0x46e   : > { %2657 = vmatprep.mubr.msk.bf16.mxu1 %vm2840_vm1, %v2839_v1  ;;  %2130 = vmatprep.subr.bf16.mxu0 %v2841_v22 }
 0x46f   : > { %2720 = vmatpush3.bf16.msra.mxu1 %v2820_v23 }
 0x470   : > { %2721 = vmatprep.subr.bf16.mxu1 %v2839_v1 }
 0x473   : > { %2722 = vmatpush3.bf16.msra.mxu1 %v2821_v25 }
 0x474   : > { %2650 = vmatmul.mubr.msk.bf16.gmra.mxu0 %vm1547_vm10, %v2803_v7  ;;  %2658 = vmatmul.mubr.msk.bf16.gmra.mxu1 %vm1547_vm10, %v2808_v8 }
 0x475   : > { %2683 = vmatprep.mubr.msk.bf16.mxu0 %vm2840_vm1, %v2839_v1  ;;  %2661 = vmatprep.mubr.msk.bf16.mxu1 %vm2840_vm1, %v2839_v1 }
 0x476   : > { %2723 = vmatprep.subr.bf16.mxu1 %v2839_v1 }
 0x477   : > { %2724 = vmatpush3.bf16.msra.mxu1 %v2822_v26 }
 0x478   : > { %2725 = vmatprep.subr.bf16.mxu1 %v2839_v1 }
 0x47b   : > { %2726 = vmatpush3.bf16.msra.mxu1 %v2823_v27 }
 0x47c   : > { %2684 = vmatmul.mubr.msk.bf16.vlgmr.msra.gmra.mxu0 %vm1547_vm10, %v2804_v9  ;;  %2662 = vmatmul.mubr.msk.bf16.gmra.mxu1 %vm1547_vm10, %v2810_v10 }
 0x47d   : > { %2687 = vmatprep.mubr.msk.bf16.mxu0 %vm2840_vm1, %v2839_v1  ;;  %2665 = vmatprep.mubr.msk.bf16.mxu1 %vm2840_vm1, %v2839_v1 }
 0x484   : > { %2688 = vmatmul.mubr.msk.bf16.gmra.mxu0 %vm1547_vm10, %v2805_v11  ;;  %2666 = vmatmul.mubr.msk.bf16.gmra.mxu1 %vm1547_vm10, %v2812_v12 }
 0x485   : > { %2691 = vmatprep.mubr.msk.bf16.mxu0 %vm2840_vm1, %v2839_v1  ;;  %2669 = vmatprep.mubr.msk.bf16.mxu1 %vm2840_vm1, %v2839_v1 }
 0x48c   : > { %2692 = vmatmul.mubr.msk.bf16.gmra.mxu0 %vm1547_vm10, %v2807_v13  ;;  %2670 = vmatmul.mubr.msk.bf16.gmra.mxu1 %vm1547_vm10, %v2814_v14 }
 0x48d   : > { %2695 = vmatprep.mubr.msk.bf16.mxu0 %vm2840_vm1, %v2839_v1  ;;  %2673 = vmatprep.mubr.msk.bf16.mxu1 %vm2840_vm1, %v2839_v1 }
 0x494   : > { %2696 = vmatmul.mubr.msk.bf16.gmra.mxu0 %vm1547_vm10, %v2809_v15  ;;  %2674 = vmatmul.mubr.msk.bf16.gmra.mxu1 %vm1547_vm10, %v2816_v16 }
 0x495   : > { %2699 = vmatprep.mubr.msk.bf16.mxu0 %vm2840_vm1, %v2839_v1  ;;  %2677 = vmatprep.mubr.msk.bf16.mxu1 %vm2840_vm1, %v2839_v1 }
 0x49c   : > { %2700 = vmatmul.mubr.msk.bf16.gmra.mxu0 %vm1547_vm10, %v2811_v17  ;;  %2678 = vmatmul.mubr.msk.bf16.gmra.mxu1 %vm1547_vm10, %v2818_v18 }
 0x49d   : > { %2703 = vmatprep.mubr.msk.bf16.mxu0 %vm2840_vm1, %v2839_v1  ;;  %2727 = vmatprep.mubr.msk.bf16.mxu1 %vm2840_vm1, %v2839_v1 }
 0x4a4   : > { %2704 = vmatmul.mubr.msk.bf16.gmra.mxu0 %vm1547_vm10, %v2813_v19 }
 0x4a5   : > { %2707 = vmatprep.mubr.msk.bf16.mxu0 %vm2840_vm1, %v2839_v1 }
 0x4ac   : > { %2708 = vmatmul.mubr.msk.bf16.gmra.mxu0 %vm1547_vm10, %v2815_v20 }
 0x4ad   : > { %2711 = vmatprep.mubr.msk.bf16.mxu0 %vm2840_vm1, %v2839_v1 }
 0x4b4   : > { %2712 = vmatmul.mubr.msk.bf16.gmra.mxu0 %vm1547_vm10, %v2817_v21 }
 0x4b5   : > { %2715 = vmatprep.mubr.msk.bf16.mxu0 %vm2840_vm1, %v2839_v1 }
 0x4bc   : > { %2716 = vmatmul.mubr.msk.bf16.gmra.mxu0 %vm1547_vm10, %v2819_v24 }
 0x52c   : > { %v1613_v28 = vpop.f32.mrf.mxu0  ;;  %v1629_v29 = vpop.f32.mrf.mxu1 }
 0x52e   : > { %v2647_v30 = vpop.f32.mrf.mxu0  ;;  %v2655_v31 = vpop.f32.mrf.mxu1 }
 0x530   : > { %v1616_v32 = vpop.f32.mrf.mxu0  ;;  %v1632_v33 = vpop.f32.mrf.mxu1 }
 0x532   : > { %v2648_v34 = vpop.f32.mrf.mxu0  ;;  %v2656_v35 = vpop.f32.mrf.mxu1 }
 0x534   : > { %v1621_v36 = vpop.f32.mrf.mxu0  ;;  %v1637_v37 = vpop.f32.mrf.mxu1 }
 0x536   : > { %v2651_v38 = vpop.f32.mrf.mxu0  ;;  %v2659_v39 = vpop.f32.mrf.mxu1 }
 0x538   : > { %v1624_v40 = vpop.f32.mrf.mxu0  ;;  %v1640_v41 = vpop.f32.mrf.mxu1 }
 0x53a   : > { %v2652_v42 = vpop.f32.mrf.mxu0  ;;  %v2660_v43 = vpop.f32.mrf.mxu1 }
 0x53c   : > { %v1793_v44 = vpop.f32.mrf.mxu0  ;;  %v3216_v45 = vpop.f32.mrf.mxu1 }
 0x53d   : > { %v1794_v46 = vadd.f32 %v1793_v44, %v1613_v28 }
 0x53e   : > { %v2685_v49 = vpop.f32.mrf.mxu0  ;;  %v2663_v50 = vpop.f32.mrf.mxu1 }
 0x53f   : > { %v1871_v53 = vadd.f32 %v3221_v47, %v1794_v46 }
 0x540   : > { %v1796_v51 = vpop.f32.mrf.mxu0  ;;  %v3223_v52 = vpop.f32.mrf.mxu1 }
 0x541   : > { %v1797_v54 = vadd.f32 %v1796_v51, %v1616_v32  ;;  %v1889_v60 = vmax.f32 %v1871_v53, 0.0 }
 0x542   : > { %v2686_v55 = vpop.f32.mrf.mxu0  ;;  %v2664_v56 = vpop.f32.mrf.mxu1 }
 0x543   : > { %v1872_v57 = vadd.f32 %v3221_v47, %v1797_v54 }
 0x544   : > { %v1801_v58 = vpop.f32.mrf.mxu0  ;;  %v3227_v59 = vpop.f32.mrf.mxu1 }
 0x545   : > { %v1890_v61 = vmax.f32 %v1872_v57, 0.0  ;;  %v1802_v62 = vadd.f32 %v1801_v58, %v1621_v36 }
 0x546   : > { %v2689_v63 = vpop.f32.mrf.mxu0  ;;  %v2667_v0 = vpop.f32.mrf.mxu1 }
 0x547   : > { %v1907_v2 = vpack.c.bf16 %v1890_v61, %v1889_v60  ;;  %v1873_v5 = vadd.f32 %v3221_v47, %v1802_v62 }
 0x548   : > { %v1804_v3 = vpop.f32.mrf.mxu0  ;;  %v3229_v4 = vpop.f32.mrf.mxu1 }
 0x549   : > { %v1805_v6 = vadd.f32 %v1804_v3, %v1624_v40  ;;  %2728 = vmatmul.mubr.msk.bf16.vlgmr.msra.gmra.mxu1 %vm1955_vm11, %v1907_v2  ;;  %v1891_v12 = vmax.f32 %v1873_v5, 0.0 }
 0x54a   : > { %v2690_v7 = vpop.f32.mrf.mxu0  ;;  %2731 = vmatprep.mubr.msk.bf16.mxu1 %vm2840_vm1, %v2839_v1  ;;  %v2668_v8 = vpop.f32.mrf.mxu1 }
 0x54b   : > { %v1874_v9 = vadd.f32 %v3221_v47, %v1805_v6 }
 0x54c   : > { %v1809_v10 = vpop.f32.mrf.mxu0  ;;  %v3236_v11 = vpop.f32.mrf.mxu1 }
 0x54d   : > { %v1892_v13 = vmax.f32 %v1874_v9, 0.0  ;;  %v1810_v14 = vadd.f32 %v1809_v10, %v1629_v29 }
 0x54e   : > { %v2693_v15 = vpop.f32.mrf.mxu0  ;;  %v2671_v16 = vpop.f32.mrf.mxu1 }
 0x54f   : > { %v1908_v17 = vpack.c.bf16 %v1892_v13, %v1891_v12  ;;  %v1875_v20 = vadd.f32 %v3221_v47, %v1810_v14 }
 0x550   : > { %v1812_v18 = vpop.f32.mrf.mxu0  ;;  %v3238_v19 = vpop.f32.mrf.mxu1 }
 0x551   : > { %v1813_v21 = vadd.f32 %v1812_v18, %v1632_v33  ;;  %2732 = vmatmul.mubr.msk.bf16.gmra.mxu1 %vm1955_vm11, %v1908_v17  ;;  %v1893_v28 = vmax.f32 %v1875_v20, 0.0 }
 0x552   : > { %v2694_v23 = vpop.f32.mrf.mxu0  ;;  %2735 = vmatprep.mubr.msk.bf16.mxu1 %vm2840_vm1, %v2839_v1  ;;  %v2672_v24 = vpop.f32.mrf.mxu1 }
 0x553   : > { %v1876_v25 = vadd.f32 %v3221_v47, %v1813_v21 }
 0x554   : > { %v1817_v26 = vpop.f32.mrf.mxu0  ;;  %v1669_v27 = vpop.f32.mrf.mxu1 }
 0x555   : > { %v1894_v29 = vmax.f32 %v1876_v25, 0.0  ;;  %v1818_v30 = vadd.f32 %v1817_v26, %v1637_v37 }
 0x556   : > { %v2697_v31 = vpop.f32.mrf.mxu0  ;;  %v2675_v32 = vpop.f32.mrf.mxu1 }
 0x557   : > { %v1909_v34 = vpack.c.bf16 %v1894_v29, %v1893_v28  ;;  %v1877_v33 = vadd.f32 %v3221_v47, %v1818_v30 }
 0x558   : > { %v1820_v35 = vpop.f32.mrf.mxu0  ;;  %v1672_v36 = vpop.f32.mrf.mxu1 }
 0x559   : > { %v1821_v38 = vadd.f32 %v1820_v35, %v1640_v41  ;;  %2736 = vmatmul.mubr.msk.bf16.gmra.mxu1 %vm1955_vm11, %v1909_v34  ;;  %v1895_v37 = vmax.f32 %v1877_v33, 0.0 }
 0x55a   : > { %v2698_v39 = vpop.f32.mrf.mxu0  ;;  %2739 = vmatprep.mubr.msk.bf16.mxu1 %vm2840_vm1, %v2839_v1  ;;  %v2676_v40 = vpop.f32.mrf.mxu1 }
 0x55b   : > { %v1878_v42 = vadd.f32 %v3221_v47, %v1821_v38 }
 0x55c   : > { %v1825_v43 = vpop.f32.mrf.mxu0  ;;  %v1677_v44 = vpop.f32.mrf.mxu1 }
 0x55d   : > { %v1896_v46 = vmax.f32 %v1878_v42, 0.0  ;;  %v1826_v49 = vadd.f32 %v1825_v43, %v3216_v45 }
 0x55e   : > { %v2701_v50 = vpop.f32.mrf.mxu0  ;;  %v2679_v51 = vpop.f32.mrf.mxu1 }
 0x55f   : > { %v1910_v53 = vpack.c.bf16 %v1896_v46, %v1895_v37  ;;  %v1879_v55 = vadd.f32 %v3221_v47, %v1826_v49  ;;  %v3288_v46 = vld [vmem:[%s3377_s17] ss:$0 sm:$0xff] }
 0x560   : > { %v1828_v54 = vpop.f32.mrf.mxu0  ;;  %v1680_v41 = vpop.f32.mrf.mxu1 }
 0x561   : > { %v1829_v56 = vadd.f32 %v1828_v54, %v3223_v52  ;;  %2740 = vmatmul.mubr.msk.bf16.gmra.mxu1 %vm1955_vm11, %v1910_v53  ;;  %v1897_v45 = vmax.f32 %v1879_v55, 0.0 }
 0x562   : > { %v2702_v57 = vpop.f32.mrf.mxu0  ;;  %2743 = vmatprep.mubr.msk.bf16.mxu1 %vm2840_vm1, %v2839_v1  ;;  %v2680_v58 = vpop.f32.mrf.mxu1 }
 0x563   : > { %v1880_v60 = vadd.f32 %v3221_v47, %v1829_v56 }
 0x564   : > { %v1833_v61 = vpop.f32.mrf.mxu0 }
 0x565   : > { %v1898_v62 = vmax.f32 %v1880_v60, 0.0  ;;  %v1834_v63 = vadd.f32 %v1833_v61, %v3227_v59 }
 0x566   : > { %v2705_v0 = vpop.f32.mrf.mxu0 }
 0x567   : > { %v1911_v2 = vpack.c.bf16 %v1898_v62, %v1897_v45  ;;  %v1881_v5 = vadd.f32 %v3221_v47, %v1834_v63 }
 0x568   : > { %v1836_v3 = vpop.f32.mrf.mxu0 }
 0x569   : > { %v1837_v52 = vadd.f32 %v1836_v3, %v3229_v4  ;;  %2744 = vmatmul.mubr.msk.bf16.gmra.mxu1 %vm1955_vm11, %v1911_v2  ;;  %v1899_v9 = vmax.f32 %v1881_v5, 0.0 }
 0x56a   : > { %v2706_v6 = vpop.f32.mrf.mxu0  ;;  %2747 = vmatprep.mubr.msk.bf16.mxu1 %vm2840_vm1, %v2839_v1 }
 0x56b   : > { %v1882_v7 = vadd.f32 %v3221_v47, %v1837_v52 }
 0x56c   : > { %v1841_v8 = vpop.f32.mrf.mxu0 }
 0x56d   : > { %v1900_v10 = vmax.f32 %v1882_v7, 0.0  ;;  %v1842_v59 = vadd.f32 %v1841_v8, %v3236_v11 }
 0x56e   : > { %v2709_v12 = vpop.f32.mrf.mxu0 }
 0x56f   : > { %v1912_v13 = vpack.c.bf16 %v1900_v10, %v1899_v9  ;;  %v1883_v15 = vadd.f32 %v3221_v47, %v1842_v59 }
 0x570   : > { %v1844_v14 = vpop.f32.mrf.mxu0 }
 0x571   : > { %v1845_v4 = vadd.f32 %v1844_v14, %v3238_v19  ;;  %2748 = vmatmul.mubr.msk.bf16.gmra.mxu1 %vm1955_vm11, %v1912_v13  ;;  %v1901_v20 = vmax.f32 %v1883_v15, 0.0 }
 0x572   : > { %v2710_v16 = vpop.f32.mrf.mxu0  ;;  %2751 = vmatprep.mubr.msk.bf16.mxu1 %vm2840_vm1, %v2839_v1 }
 0x573   : > { %v1884_v17 = vadd.f32 %v3221_v47, %v1845_v4 }
 0x574   : > { %v1849_v18 = vpop.f32.mrf.mxu0 }
 0x575   : > { %v1902_v21 = vmax.f32 %v1884_v17, 0.0  ;;  %v1850_v23 = vadd.f32 %v1849_v18, %v1669_v27 }
 0x576   : > { %v2713_v11 = vpop.f32.mrf.mxu0 }
 0x577   : > { %v1913_v24 = vpack.c.bf16 %v1902_v21, %v1901_v20  ;;  %v1885_v26 = vadd.f32 %v3221_v47, %v1850_v23 }
 0x578   : > { %v1852_v25 = vpop.f32.mrf.mxu0 }
 0x579   : > { %v1853_v28 = vadd.f32 %v1852_v25, %v1672_v36  ;;  %2752 = vmatmul.mubr.msk.bf16.gmra.mxu1 %vm1955_vm11, %v1913_v24  ;;  %v1903_v31 = vmax.f32 %v1885_v26, 0.0 }
 0x57a   : > { %v2714_v19 = vpop.f32.mrf.mxu0  ;;  %2755 = vmatprep.mubr.msk.bf16.mxu1 %vm2840_vm1, %v2839_v1 }
 0x57b   : > { %v1886_v29 = vadd.f32 %v3221_v47, %v1853_v28 }
 0x57c   : > { %v1857_v30 = vpop.f32.mrf.mxu0 }
 0x57d   : > { %v1904_v32 = vmax.f32 %v1886_v29, 0.0  ;;  %v1858_v34 = vadd.f32 %v1857_v30, %v1677_v44  ;;  %v2826_v44 = vld [vmem:[%s3399_s27 + $0x4] ss:$8 sps:$4 sm:$0x3f]  }
 0x57e   : > { %v2717_v35 = vpop.f32.mrf.mxu0  ;;  %2494 = vmatprep.mubr.msk.bf16.mxu0 %vm2126_vm12, %v2826_v44 }
 0x57f   : > { %v1914_v27 = vpack.c.bf16 %v1904_v32, %v1903_v31  ;;  %v1887_v33 = vadd.f32 %v3221_v47, %v1858_v34 }
 0x580   : > { %v1860_v38 = vpop.f32.mrf.mxu0 }
 0x581   : > { %2756 = vmatmul.mubr.msk.bf16.gmra.mxu1 %vm1955_vm11, %v1914_v27  ;;  %v1861_v36 = vadd.f32 %v1860_v38, %v1680_v41  ;;  %v1905_v40 = vmax.f32 %v1887_v33, 0.0 }
 0x582   : > { %2759 = vmatprep.mubr.msk.bf16.mxu1 %vm2840_vm1, %v2839_v1  ;;  %v2718_v39 = vpop.f32.mrf.mxu0 }
 0x583   : > { %v1888_v42 = vadd.f32 %v3221_v47, %v1861_v36 }
 0x585   : > { %v1906_v43 = vmax.f32 %v1888_v42, 0.0 }
 0x587   : > { %v1915_v37 = vpack.c.bf16 %v1906_v43, %v1905_v40 }
 0x589   : > { %2760 = vmatmul.mubr.msk.bf16.gmra.mxu1 %vm1955_vm11, %v1915_v37 }
 0x609   : > { %v2017_v49 = vpop.f32.mrf.mxu1 }
 0x60a   : > { %v2018_v51 = vadd.f32 %v3288_v46, %v2017_v49 }
 0x60b   : > { %v2729_v50 = vpop.f32.mrf.mxu1 }
 0x60c   : > { %v2088_v41 = vmax.f32 %v2018_v51, 0.0 }
 0x60d   : > { %v2020_v47 = vpop.f32.mrf.mxu1 }
 0x60e   : > { %v2021_v53 = vadd.f32 %v3288_v46, %v2020_v47 }
 0x60f   : > { %v2730_v54 = vpop.f32.mrf.mxu1 }
 0x610   : > { %v2089_v55 = vmax.f32 %v2021_v53, 0.0 }
 0x611   : > { %v2025_v56 = vpop.f32.mrf.mxu1 }
 0x612   : > { %v3292_v57 = vpack.c.bf16 %v2089_v55, %v2088_v41  ;;  %v2026_v60 = vadd.f32 %v3288_v46, %v2025_v56 }
 0x613   : > { %v2733_v58 = vpop.f32.mrf.mxu1 }
 0x614   : > { %v2090_v63 = vmax.f32 %v2026_v60, 0.0 }
 0x615   : > { %v2028_v61 = vpop.f32.mrf.mxu1 }
 0x616   : > { %v2029_v45 = vadd.f32 %v3288_v46, %v2028_v61 }
 0x617   : > { %v2734_v62 = vpop.f32.mrf.mxu1 }
 0x618   : > { %v2091_v0 = vmax.f32 %v2029_v45, 0.0 }
 0x619   : > { %v2033_v2 = vpop.f32.mrf.mxu1 }
 0x61a   : > { %v3296_v3 = vpack.c.bf16 %v2091_v0, %v2090_v63  ;;  %v2034_v60 = vadd.f32 %v3288_v46, %v2033_v2 }
 0x61b   : > { %v2737_v5 = vpop.f32.mrf.mxu1 }
 0x61c   : > { %v2092_v63 = vmax.f32 %v2034_v60, 0.0 }
 0x61d   : > { %v2036_v52 = vpop.f32.mrf.mxu1 }
 0x61e   : > { %v2037_v55 = vadd.f32 %v3288_v46, %v2036_v52 }
 0x61f   : > { %v2738_v6 = vpop.f32.mrf.mxu1 }
 0x620   : > { %v2093_v45 = vmax.f32 %v2037_v55, 0.0 }
 0x621   : > { %v2041_v7 = vpop.f32.mrf.mxu1 }
 0x622   : > { %v2042_v54 = vadd.f32 %v3288_v46, %v2041_v7  ;;  %v2110_v0 = vpack.c.bf16 %v2093_v45, %v2092_v63 }
 0x623   : > { %v2741_v8 = vpop.f32.mrf.mxu1 }
 0x624   : > { %v2094_v61 = vmax.f32 %v2042_v54, 0.0  ;;  %v2824_v8 = vld [vmem:[%s3399_s27] ss:$8 sps:$4 sm:$0x3f]  }
 0x625   : > { %v2044_v9 = vpop.f32.mrf.mxu1 }
 0x626   : > { %v2045_v51 = vadd.f32 %v3288_v46, %v2044_v9 }
 0x627   : > { %v2742_v10 = vpop.f32.mrf.mxu1 }
 0x628   : > { %v2095_v56 = vmax.f32 %v2045_v51, 0.0  ;;  %v2829_v10 = vld [vmem:[%s3378_s18 + $0x8] sm:$0xff]  }
 0x629   : > { %v2049_v59 = vpop.f32.mrf.mxu1 }
 0x62a   : > { %v2050_v49 = vadd.f32 %v3288_v46, %v2049_v59  ;;  %v2111_v62 = vpack.c.bf16 %v2095_v56, %v2094_v61 }
 0x62b   : > { %v2745_v12 = vpop.f32.mrf.mxu1 }
 0x62c   : > { %v2096_v41 = vmax.f32 %v2050_v49, 0.0 }
 0x62d   : > { %v2052_v13 = vpop.f32.mrf.mxu1 }
 0x62e   : > { %v2053_v42 = vadd.f32 %v3288_v46, %v2052_v13  ;;  %v2830_v13 = vld [vmem:[%s3378_s18] sm:$0xff]  }
 0x62f   : > { %v2746_v14 = vpop.f32.mrf.mxu1 }
 0x630   : > { %v2097_v47 = vmax.f32 %v2053_v42, 0.0 }
 0x631   : > { %v2057_v15 = vpop.f32.mrf.mxu1 }
 0x632   : > { %v2058_v36 = vadd.f32 %v3288_v46, %v2057_v15  ;;  %v2112_v58 = vpack.c.bf16 %v2097_v47, %v2096_v41 }
 0x633   : > { %v2749_v4 = vpop.f32.mrf.mxu1 }
 0x634   : > { %v2098_v50 = vmax.f32 %v2058_v36, 0.0 }
 0x635   : > { %v2060_v16 = vpop.f32.mrf.mxu1 }
 0x636   : > { %v2061_v35 = vadd.f32 %v3288_v46, %v2060_v16 }
 0x637   : > { %v2750_v17 = vpop.f32.mrf.mxu1 }
 0x638   : > { %v2099_v43 = vmax.f32 %v2061_v35, 0.0 }
 0x639   : > { %v2065_v18 = vpop.f32.mrf.mxu1 }
 0x63a   : > { %v2066_v30 = vadd.f32 %v3288_v46, %v2065_v18  ;;  %v2113_v53 = vpack.c.bf16 %v2099_v43, %v2098_v50  ;;  %v2501_v18 = vld [vmem:[%s3380_s20] ss:$0 sm:$0xff] }
 0x63b   : > { %v2753_v20 = vpop.f32.mrf.mxu1 }
 0x63c   : > { %v2100_v39 = vmax.f32 %v2066_v30, 0.0 }
 0x63d   : > { %v2068_v21 = vpop.f32.mrf.mxu1 }
 0x63e   : > { %v2069_v28 = vadd.f32 %v3288_v46, %v2068_v21 }
 0x63f   : > { %v2754_v23 = vpop.f32.mrf.mxu1 }
 0x640   : > { %v2101_v27 = vmax.f32 %v2069_v28, 0.0 }
 0x641   : > { %v2073_v11 = vpop.f32.mrf.mxu1 }
 0x642   : > { %v2074_v25 = vadd.f32 %v3288_v46, %v2073_v11  ;;  %v2114_v37 = vpack.c.bf16 %v2101_v27, %v2100_v39 }
 0x643   : > { %v2757_v24 = vpop.f32.mrf.mxu1 }
 0x644   : > { %v2102_v31 = vmax.f32 %v2074_v25, 0.0 }
 0x645   : > { %v2076_v26 = vpop.f32.mrf.mxu1 }
 0x646   : > { %v2077_v19 = vadd.f32 %v3288_v46, %v2076_v26 }
 0x647   : > { %v2758_v29 = vpop.f32.mrf.mxu1 }
 0x648   : > { %v2103_v32 = vmax.f32 %v2077_v19, 0.0 }
 0x649   : > { %v2081_v34 = vpop.f32.mrf.mxu1 }
 0x64a   : > { %v2115_v33 = vpack.c.bf16 %v2103_v32, %v2102_v31  ;;  %v2082_v5 = vadd.f32 %v3288_v46, %v2081_v34 }
 0x64b   : > { %v2761_v38 = vpop.f32.mrf.mxu1 }
 0x64c   : > { %2131 = vmatpush1.bf16.msra.mxu0 %v2115_v33  ;;  %v2104_v2 = vmax.f32 %v2082_v5, 0.0 }
 0x64d   : > { %2132 = vmatprep.subr.bf16.mxu0 %v2841_v22  ;;  %v2084_v40 = vpop.f32.mrf.mxu1 }
 0x64e   : > { %v2085_v52 = vadd.f32 %v3288_v46, %v2084_v40  ;;  %v2827_v46 = vld [vmem:[%s3379_s19 + $0x8] sm:$0xff]  }
 0x64f   : > { %v2762_v44 = vpop.f32.mrf.mxu1 }
 0x650   : > { %2133 = vmatpush1.bf16.msra.mxu0 %v2114_v37  ;;  %v2105_v6 = vmax.f32 %v2085_v52, 0.0 }
 0x651   : > { %2134 = vmatprep.subr.bf16.mxu0 %v2841_v22 }
 0x652   : > { %v2116_v7 = vpack.c.bf16 %v2105_v6, %v2104_v2 }
 0x654   : > { %2135 = vmatpush1.bf16.msra.mxu0 %v2113_v53 }
 0x655   : > { %2136 = vmatprep.subr.bf16.mxu0 %v2841_v22 }
 0x658   : > { %2137 = vmatpush1.bf16.msra.mxu0 %v2112_v58 }
 0x659   : > { %2138 = vmatprep.subr.bf16.mxu0 %v2841_v22 }
 0x65c   : > { %2139 = vmatpush1.bf16.msra.mxu0 %v2111_v62 }
 0x65d   : > { %2140 = vmatprep.subr.bf16.mxu0 %v2841_v22 }
 0x660   : > { %2141 = vmatpush1.bf16.msra.mxu0 %v2110_v0 }
 0x661   : > { %2142 = vmatprep.subr.bf16.mxu0 %v2841_v22 }
 0x664   : > { %2143 = vmatpush1.bf16.msra.mxu0 %v3296_v3 }
 0x665   : > { %2144 = vmatprep.subr.bf16.mxu0 %v2841_v22 }
 0x668   : > { %2145 = vmatpush1.bf16.msra.mxu0 %v3292_v57 }
 0x669   : > { %2160 = vmatprep.subr.bf16.mxu0 %v2841_v22  ;;  %v2828_v22 = vld [vmem:[%s3379_s19] sm:$0xff]  }
 0x66c   : > { %2161 = vmatpush2.bf16.msra.mxu0 %v2116_v7 }
 0x66d   : > { %2763 = vmatprep.subr.bf16.mxu0 %v2839_v1 }
 0x66f   : > { %2163 = vmatmul.mubr.bf16.vlgmr.msra.gmra.mxu0 %v2824_v8 }
 0x670   : > { %2767 = vmatprep.mubr.msk.bf16.mxu0 %vm2840_vm1, %v2839_v1  ;;  %2764 = vmatpush3.bf16.msra.mxu0 %v2827_v46 }
 0x671   : > { %2765 = vmatprep.subr.bf16.mxu0 %v2839_v1 }
 0x674   : > { %2766 = vmatpush3.bf16.msra.mxu0 %v2828_v22 }
 0x675   : > { %2771 = vmatprep.subr.bf16.mxu0 %v2839_v1 }
 0x72f   : > { %v2164_v57 = vpop.f32.mrf.mxu0 }
 0x731   : > { %v2166_v3 = vpop.f32.mrf.mxu0 }
 0x733   : > { %v2167_v9 = vpop.f32.mrf.mxu0 }
 0x734   : > { %v2175_v59 = vpack.c.bf16 %v2167_v9, %v2164_v57 }
 0x735   : > { %v2169_v12 = vpop.f32.mrf.mxu0 }
 0x736   : > { %2768 = vmatmul.mubr.msk.bf16.vlgmr.msra.gmra.mxu0 %vm1283_vm4, %v2175_v59 }
 0x737   : > { %2772 = vmatpush3.bf16.msra.mxu0 %v2829_v10  ;;  %2775 = vmatprep.mubr.msk.bf16.mxu0 %vm2840_vm1, %v2839_v1 }
 0x738   : > { %2773 = vmatprep.subr.bf16.mxu0 %v2839_v1 }
 0x73b   : > { %2774 = vmatpush3.bf16.msra.mxu0 %v2830_v13 }
 0x73e   : > { %2776 = vmatmul.mubr.msk.bf16.vlgmr.msra.gmra.mxu0 %vm1283_vm4, %v3078_v48 }
 0x7f6   : > { %v2229_v14 = vpop.f32.mrf.mxu0 }
 0x7f8   : > { %v2769_v15 = vpop.f32.mrf.mxu0 }
 0x7fa   : > { %v2232_v4 = vpop.f32.mrf.mxu0 }
 0x7fc   : > { %v2770_v16 = vpop.f32.mrf.mxu0 }
 0x7fe   : > { %v2282_v17 = vpop.f32.mrf.mxu0 }
 0x7ff   : > { %v2283_v20 = vadd.f32 %v2282_v17, %v2229_v14 }
 0x800   : > { %v2777_v21 = vpop.f32.mrf.mxu0 }
 0x801   : > { %v2296_v23 = vadd.f32 %v2501_v18, %v2283_v20 }
 0x802   : > { %v2285_v1 = vpop.f32.mrf.mxu0 }
 0x803   : > { %v2298_v11 = vmax.f32 %v2296_v23, 0.0  ;;  %v2286_v48 = vadd.f32 %v2285_v1, %v2232_v4 }
 0x804   : > { %v2778_v24 = vpop.f32.mrf.mxu0 }
 0x805   : > { %2300 = vst.msk [vmem:[%s711_s5] sm:$0xff] %vm1283_vm4, %v2298_v11  ;;  %v2297_v25 = vadd.f32 %v2501_v18, %v2286_v48 }
 0x807   : > { %v2299_v26 = vmax.f32 %v2297_v25, 0.0 }
 0x809   : > { %2301 = vst.msk [vmem:[%s711_s5 + $0x8] sm:$0xf] %vm1335_vm7, %v2299_v26 }
 0x80a PF: > { %s35_s29 = sadd.s32 1, %s2837_s29  }
 0x80b   : > { %p32_p4 = scmp.ge.s32.totalorder %s35_s29, 4  }
 0x80d   :  { %34 = sbr.rel (!%p32_p4) target bundleno = 8 (0x8), region = 155 }

// kernel: forward.9
= control target key start
LH: loop header
LB: loop body
LE: loop exit
PB: predicated region body
PF: predicated region fallthrough
CT: control target
= control target key end

     0   :  { %s2304_s0 = inlined_call_operand.vmem [shape: f32[2,4,6,10], index: 0, kind: input, shape index: {}]   ;;  %s2305_s1 = inlined_call_operand.vmem [shape: f32[2,4,6,32], index: 1, kind: input, shape index: {}]   ;;  %s2306_s2 = inlined_call_operand.vmem [shape: f32[2,1,32], index: 2, kind: input, shape index: {}]   ;;  %s2307_s3 = inlined_call_operand.vmem [shape: f32[2,1,32], index: 3, kind: input, shape index: {}]   ;;  %s2308_s4 = inlined_call_operand.vmem [shape: bf16[10,10], index: 4, kind: input, shape index: {}]   ;;  %s2309_s5 = inlined_call_operand.vmem [shape: f32[1,10], index: 5, kind: input, shape index: {}]   ;;  %s2310_s6 = inlined_call_operand.vmem [shape: bf16[10,10], index: 6, kind: input, shape index: {}]   ;;  %s2311_s7 = inlined_call_operand.vmem [shape: f32[1,10], index: 7, kind: input, shape index: {}]   ;;  %s2312_s8 = inlined_call_operand.vmem [shape: f32[1,10], index: 8, kind: input, shape index: {}]   ;;  %s2313_s9 = inlined_call_operand.<no memory space> [shape: f32[1,1], index: 9, kind: input, shape index: {}]   ;;  %s2314_s10 = inlined_call_operand.vmem [shape: bf16[32,32], index: 10, kind: input, shape index: {}]   ;;  %s2315_s11 = inlined_call_operand.vmem [shape: f32[1,32], index: 11, kind: input, shape index: {}]   ;;  %s2316_s12 = inlined_call_operand.vmem [shape: bf16[32,32], index: 12, kind: input, shape index: {}]   ;;  %s2317_s13 = inlined_call_operand.vmem [shape: bf16[32,32], index: 13, kind: input, shape index: {}]   ;;  %s2318_s14 = inlined_call_operand.vmem [shape: bf16[32,32], index: 14, kind: input, shape index: {}]   ;;  %s2319_s15 = inlined_call_operand.vmem [shape: f32[1,32], index: 15, kind: input, shape index: {}]   ;;  %s2320_s16 = inlined_call_operand.vmem [shape: bf16[32,32], index: 16, kind: input, shape index: {}]   ;;  %s2321_s17 = inlined_call_operand.vmem [shape: f32[1,32], index: 17, kind: input, shape index: {}]   ;;  %s2322_s18 = inlined_call_operand.vmem [shape: bf16[32,2], index: 18, kind: input, shape index: {}]   ;;  %s2323_s19 = inlined_call_operand.vmem [shape: f32[1,2], index: 19, kind: input, shape index: {}]   ;;  %s2324_s20 = inlined_call_operand.hbm [shape: f32[2,1,2], index: 20, kind: output, shape index: {}]  }
   0x1   :  { %2325 = sst [smem:[#allocation6_spill]] %s2304_s0  ;;  %v25_v0 = vstv %s2313_s9 }
   0x2   :  { %2326 = sst [smem:[#allocation7_spill]] %s2305_s1  ;;  %26 = vst [vmem:[#allocation2] sm:$0x1] %v25_v0 }
   0x3   :  { %2327 = sst [smem:[#allocation8_spill]] %s2306_s2 }
   0x4   :  { %2328 = sst [smem:[#allocation9_spill]] %s2307_s3 }
   0x5   :  { %2329 = sst [smem:[#allocation10_spill]] %s2308_s4 }
   0x6   :  { %2330 = sst [smem:[#allocation11_spill]] %s2309_s5 }
   0x7   :  { %2331 = sst [smem:[#allocation12_spill]] %s2310_s6 }
   0x8   :  { %2332 = sst [smem:[#allocation13_spill]] %s2311_s7 }
   0x9   :  { %2333 = sst [smem:[#allocation14_spill]] %s2312_s8 }
   0xa   :  { %27 = vsyncpa [#allocation4], 0 }
   0xb   :  { %29 = vsyncpa [#allocation4 + $0x1], 0  ;;  %s2056_s23 = smov 0   ;;  %s2058_s24 = smov 0  }
   0xc   :  { %s2060_s2 = smov 0   ;;  %s2062_s25 = smov 0  }
   0xd LB: > { %s2077_s9 = sadd.s32 4294967295, %s1942_s25   ;;  %s1642_s3 = sadd.s32 4294967294, %s1942_s25   ;;  %s1942_s25 = sphi %s2062_s25, %s2348_s25   ;;  %s1938_s2 = sphi %s2060_s2, %s2347_s2   ;;  %s1934_s24 = sphi %s2058_s24, %s2346_s24   ;;  %s1930_s23 = sphi %s2056_s23, %s2345_s23  }
   0xe   : > { %s2081_s26 = sadd.s32 1, %s1942_s25   ;;  %s482_s27 = sadd.s32 1, %s1938_s2 }
   0xf   : > { %s479_s28 = ssub.s32 %s1942_s25, %s2081_s26  ;;  %p492_p0 = scmp.ne.s32.totalorder %s1938_s2, %s1934_s24 }
  0x10   : > { %p480_p1 = scmp.eq.s32.totalorder %s479_s28, 0  ;;  %p493_p2 = scmp.eq.s32.totalorder %s2077_s9, 1 }
  0x11   : > { %p498_p3 = scmp.ne.s32.totalorder %s1934_s24, %s1930_s23  ;;  %p499_p4 = scmp.eq.s32.totalorder %s1642_s3, 1 }
  0x12   : > { %s2092_s4 = scalar_select %p480_p1, %s1938_s2, %s482_s27  }
  0x13   : > { %p2094_p5 = por %p493_p2, %p492_p0  ;;  %p2098_p6 = por %p499_p4, %p498_p3 }
  0x14   : > { %p1645_p7 = scmp.ge.s32.totalorder %s1942_s25, 1  ;;  %p593_p8 = scmp.lt.s32.totalorder %s1942_s25, 3 }
  0x16   : > { %p594_p9 = pnand %p1645_p7, %p593_p8 }
  0x17   : > { %s2336_s1 = sld [smem:[#allocation10_spill]] (!%p594_p9)  ;;  %p661_p10 = scmp.lt.s32.totalorder (!%p594_p9), %s2077_s9, 1 }
  0x18   : > { %597 = sbr.rel (%p594_p9) target bundleno = 1553 (0x611), region = 100  ;;  %s2337_s0 = sld [smem:[#allocation6_spill]] (!%p594_p9) }
  0x19   : > { %s2338_s6 = sld [smem:[#allocation12_spill]] (!%p594_p9) }
  0x1a   : > { %s2339_s5 = sld [smem:[#allocation11_spill]] (!%p594_p9) }
  0x1b   : > { %s2340_s7 = sld [smem:[#allocation13_spill]] (!%p594_p9) }
  0x1c   : > { %s2341_s8 = sld [smem:[#allocation14_spill]] (!%p594_p9) }
  0x1d   : > { %vm698_vm0 = vcmask 1044480   ;;  %v1944_v1 = vmov 0.0   ;;  %v1868_v2 = vld [vmem:[%s2336_s1] sm:$0x1f]   ;;  %vm1945_vm1 = vmmov 0   ;;  %s2116_s22 = scalar_select %p661_p10, %s2077_s9, 1 }
  0x1e   : > { %1728 = vmatprep.subr.bf16.mxu0 %v1944_v1  ;;  %1734 = vmatprep.subr.bf16.mxu1 %v1944_v1  ;;  %v700_v3 = vsel %vm698_vm0, %v1868_v2, 0  ;;  %vm694_vm2 = vcmask 80896   ;;  %vm813_vm3 = vcmask 78848   ;;  %v1946_v2 = vmov 0   ;;  %s659_s1 = sand.u32 1, %s1934_s24  }
  0x1f   : > { %1730 = vmatprep.mubr.msk.bf16.mxu0 %vm1945_vm1, %v1944_v1  ;;  %1736 = vmatprep.mubr.msk.bf16.mxu1 %vm1945_vm1, %v1944_v1  ;;  %s1692_s3 = sshll.u32 %s2116_s22, 5  ;;  %v1869_v12 = vld [vmem:[%s2338_s6] sm:$0x1f]   ;;  %vm1174_vm4 = vcmask 261120   ;;  %vm1221_vm6 = vcmask 259072   ;;  %vm1542_vm9 = vcmask 8192  }
  0x20   : > { %1729 = vmatpush3.bf16.msra.mxu0 %v700_v3  ;;  %s665_s21 = scalar_lea.vmem %s2337_s0, %s1692_s3  ;;  %v762_v13 = vsel %vm698_vm0, %v1869_v12, 0  ;;  %v1650_v14 = vld [vmem:[%s2339_s5] ss:$0 sm:$0xff]  ;;  %1866 = vset.pattern.permute.xlu0 %v1946_v2  ;;  %s2342_s0 = sld [smem:[#allocation7_spill]] }
  0x21   : > { %1740 = vmatprep.subr.bf16.mxu0 %v1944_v1  ;;  %v678_v4 = vld [vmem:[%s665_s21] sm:$0x3f]  ;;  %v1658_v6 = vld [vmem:[%s665_s21 + $0x8] sm:$0x3f]  ;;  %v1662_v8 = vld [vmem:[%s665_s21 + $0x10] sm:$0x3f]  ;;  %1735 = vmatpush3.bf16.msra.mxu1 %v762_v13 }
  0x22   : > { %v679_v5 = vpack.c.bf16 %v678_v4, %v678_v4  ;;  %v834_v7 = vpack.c.bf16 %v1658_v6, %v1658_v6  ;;  %v940_v9 = vpack.c.bf16 %v1662_v8, %v1662_v8  ;;  %v1666_v10 = vld [vmem:[%s665_s21 + $0x18] sm:$0x3f]  ;;  %1746 = vmatprep.subr.bf16.mxu1 %v1944_v1  ;;  %v1653_v43 = vld [vmem:[%s2340_s7] ss:$0 sm:$0xff]  ;;  %1867 = vset.pattern.permute.xlu1 %v1946_v2  ;;  %s2344_s7 = sld [smem:[#allocation8_spill]]  ;;  %s1545_s5 = scalar_lea.sflag [#allocation4], %s659_s1 }
  0x23   : > { %v1046_v11 = vpack.c.bf16 %v1666_v10, %v1666_v10  ;;  %v1656_v47 = vld [vmem:[%s2341_s8] ss:$0 sm:$0xff] }
  0x24   : > { %1731 = vmatmul.mubr.msk.bf16.vlgmr.msra.gmra.mxu0 %vm694_vm2, %v679_v5 }
  0x25   : > { %1741 = vmatpush3.bf16.msra.mxu0 %v700_v3  ;;  %1742 = vmatprep.mubr.msk.bf16.mxu0 %vm1945_vm1, %v1944_v1 }
  0x26   : > { %1752 = vmatprep.subr.bf16.mxu0 %v1944_v1  ;;  %s670_s21 = scalar_lea.vmem %s2342_s0, %s1692_s3  ;;  %s1947_s3 = smov [#allocation3]  }
  0x27   : > { %s1886_s27 = sshll.u32 %s1947_s3, 4  ;;  %s1887_s27 = int_to_ptr.vmem [resolvable:$false] %s1886_s27 }
  0x28   : > { %s673_s8 = scalar_lea.vmem %s2344_s7, %s2116_s22  ;;  %s1888_s7 = scalar_lea.vmem %s1887_s27, 32 }
  0x2c   : > { %1743 = vmatmul.mubr.msk.bf16.vlgmr.msra.gmra.mxu0 %vm694_vm2, %v834_v7 }
  0x2d   : > { %1753 = vmatpush3.bf16.msra.mxu0 %v700_v3  ;;  %1754 = vmatprep.mubr.msk.bf16.mxu0 %vm1945_vm1, %v1944_v1 }
  0x2e   : > { %1764 = vmatprep.subr.bf16.mxu0 %v1944_v1 }
  0x34   : > { %1755 = vmatmul.mubr.msk.bf16.vlgmr.msra.gmra.mxu0 %vm694_vm2, %v940_v9 }
  0x35   : > { %1765 = vmatpush3.bf16.msra.mxu0 %v700_v3  ;;  %1766 = vmatprep.mubr.msk.bf16.mxu0 %vm1945_vm1, %v1944_v1 }
  0x36   : > { %1776 = vmatprep.subr.bf16.mxu0 %v1944_v1 }
  0x3c   : > { %1767 = vmatmul.mubr.msk.bf16.vlgmr.msra.gmra.mxu0 %vm694_vm2, %v1046_v11 }
  0x3d   : > { %1780 = vmatprep.mubr.msk.bf16.mxu0 %vm1945_vm1, %v1944_v1 }
  0xe4   : > { %v736_v15 = vpop.f32.mrf.mxu0 }
  0xe5   : > { %v737_v16 = vadd.f32 %v1650_v14, %v736_v15  ;;  %v1657_v15 = vld [vmem:[#allocation2] ss:$0 sm:$0xff] }
  0xe6   : > { %v1732_v17 = vpop.f32.mrf.mxu0 }
  0xe7   : > { %v742_v18 = vmax.f32 %v737_v16, 0.0 }
  0xe8   : > { %v739_v19 = vpop.f32.mrf.mxu0 }
  0xe9   : > { %v743_v20 = vpack.c.bf16 %v742_v18, %v742_v18 }
  0xea   : > { %v1733_v21 = vpop.f32.mrf.mxu0 }
  0xeb   : > { %1737 = vmatmul.mubr.msk.bf16.vlgmr.msra.gmra.mxu1 %vm694_vm2, %v743_v20 }
  0xec   : > { %1747 = vmatpush3.bf16.msra.mxu1 %v762_v13  ;;  %v872_v22 = vpop.f32.mrf.mxu0  ;;  %1748 = vmatprep.mubr.msk.bf16.mxu1 %vm1945_vm1, %v1944_v1 }
  0xed   : > { %v873_v23 = vadd.f32 %v1650_v14, %v872_v22  ;;  %1758 = vmatprep.subr.bf16.mxu1 %v1944_v1  ;;  %v1870_v22 = vld [vmem:[%s2314_s10 + $0x8] sm:$0xff]  }
  0xee   : > { %v1744_v24 = vpop.f32.mrf.mxu0  ;;  %1777 = vmatpush3.bf16.msra.mxu0 %v1870_v22 }
  0xef   : > { %v878_v25 = vmax.f32 %v873_v23, 0.0  ;;  %1778 = vmatprep.subr.bf16.mxu0 %v1944_v1  ;;  %v1871_v24 = vld [vmem:[%s2314_s10] sm:$0xff]  }
  0xf0   : > { %v875_v26 = vpop.f32.mrf.mxu0 }
  0xf1   : > { %v879_v27 = vpack.c.bf16 %v878_v25, %v878_v25 }
  0xf2   : > { %v1745_v28 = vpop.f32.mrf.mxu0  ;;  %1779 = vmatpush3.bf16.msra.mxu0 %v1871_v24 }
  0xf3   : > { %1749 = vmatmul.mubr.msk.bf16.vlgmr.msra.gmra.mxu1 %vm694_vm2, %v879_v27  ;;  %1792 = vmatprep.subr.bf16.mxu0 %v1944_v1  ;;  %v1661_v27 = vld [vmem:[%s670_s21 + $0x8] sm:$0x3f]  ;;  %v825_v28 = vld [vmem:[%s670_s21] sm:$0x3f] }
  0xf4   : > { %1759 = vmatpush3.bf16.msra.mxu1 %v762_v13  ;;  %v978_v29 = vpop.f32.mrf.mxu0  ;;  %1760 = vmatprep.mubr.msk.bf16.mxu1 %vm1945_vm1, %v1944_v1 }
  0xf5   : > { %v979_v30 = vadd.f32 %v1650_v14, %v978_v29  ;;  %1770 = vmatprep.subr.bf16.mxu1 %v1944_v1 }
  0xf6   : > { %v1756_v31 = vpop.f32.mrf.mxu0 }
  0xf7   : > { %v984_v32 = vmax.f32 %v979_v30, 0.0  ;;  %v1665_v30 = vld [vmem:[%s670_s21 + $0x10] sm:$0x3f] }
  0xf8   : > { %v981_v33 = vpop.f32.mrf.mxu0 }
  0xf9   : > { %v985_v34 = vpack.c.bf16 %v984_v32, %v984_v32 }
  0xfa   : > { %v1757_v35 = vpop.f32.mrf.mxu0 }
  0xfb   : > { %1761 = vmatmul.mubr.msk.bf16.vlgmr.msra.gmra.mxu1 %vm694_vm2, %v985_v34  ;;  %v1669_v35 = vld [vmem:[%s670_s21 + $0x18] sm:$0x3f]  ;;  %s2343_s21 = sld [smem:[#allocation9_spill]] }
  0xfc   : > { %1771 = vmatpush3.bf16.msra.mxu1 %v762_v13  ;;  %v1084_v36 = vpop.f32.mrf.mxu0  ;;  %1772 = vmatprep.mubr.msk.bf16.mxu1 %vm1945_vm1, %v1944_v1 }
  0xfd   : > { %v1085_v37 = vadd.f32 %v1650_v14, %v1084_v36  ;;  %1784 = vmatprep.subr.bf16.mxu1 %v1944_v1 }
  0xfe   : > { %v1768_v38 = vpop.f32.mrf.mxu0 }
  0xff   : > { %v1090_v39 = vmax.f32 %v1085_v37, 0.0 }
 0x100   : > { %v1087_v40 = vpop.f32.mrf.mxu0 }
 0x101   : > { %v1091_v41 = vpack.c.bf16 %v1090_v39, %v1090_v39  ;;  %s676_s6 = scalar_lea.vmem %s2343_s21, %s2116_s22 }
 0x102   : > { %v1769_v42 = vpop.f32.mrf.mxu0 }
 0x103   : > { %1773 = vmatmul.mubr.msk.bf16.vlgmr.msra.gmra.mxu1 %vm694_vm2, %v1091_v41  ;;  %v1872_v42 = vld [vmem:[%s2317_s13 + $0x8] sm:$0xff]  }
 0x104   : > { %1788 = vmatprep.mubr.msk.bf16.mxu1 %vm1945_vm1, %v1944_v1  ;;  %1785 = vmatpush3.bf16.msra.mxu1 %v1872_v42 }
 0x105   : > { %1786 = vmatprep.subr.bf16.mxu1 %v1944_v1 }
 0x1ab   : > { %v798_v44 = vpop.f32.mrf.mxu1 }
 0x1ac   : > { %v799_v45 = vadd.f32 %v1653_v43, %v798_v44  ;;  %v1874_v44 = vld [vmem:[%s2316_s12 + $0x8] sm:$0xff]  }
 0x1ad   : > { %v1738_v46 = vpop.f32.mrf.mxu1 }
 0x1ae   : > { %v804_v48 = vmax.f32 %v799_v45, 0.0  ;;  %v1235_v45 = vld [vmem:[%s676_s6] sm:$0x1]  ;;  %s660_s6 = scalar_lea.vmem [#allocation3], %s659_s1 }
 0x1af   : > { %v801_v49 = vpop.f32.mrf.mxu1  ;;  %v1236_v46 = vpack.c.bf16 %v1235_v45, %v1235_v45  ;;  %s1557_s28 = sshll.u32 %s660_s6, 4  ;;  %s2265_s28 = int_to_ptr.vmem [resolvable:$true] %s1557_s28 }
 0x1b0   : > { %v812_v50 = vmul.f32 %v1656_v47, %v804_v48  ;;  %v1229_v48 = vld [vmem:[%s673_s8] sm:$0x1]  ;;  %s1689_s8 = sshll.u32 %s2077_s9, 4  ;;  %s1882_s9 = scalar_lea.vmem %s2265_s28, 16 }
 0x1b1   : > { %v1739_v51 = vpop.f32.mrf.mxu1  ;;  %v1230_v49 = vpack.c.bf16 %v1229_v48, %v1229_v48  ;;  %s2263_s22 = scalar_lea.hbm %s2324_s20, %s1689_s8  ;;  %p1883_p11 = scmp.ne.s32.totalorder %s2265_s28, %s1882_s9 }
 0x1b2   : > { %v814_v52 = vsel %vm813_vm3, %v812_v50, 0.0  ;;  %v1876_v50 = vld [vmem:[%s2318_s14 + $0x8] sm:$0xff]   ;;  %v1877_v51 = vld [vmem:[%s2318_s14] sm:$0xff]   ;;  %p1889_p0 = scmp.lt.s32.totalorder %s2265_s28, %s1887_s27  ;;  %p1890_p1 = scmp.lt.s32.totalorder %s1888_s7, %s1882_s9 }
 0x1b3   : > { %815 = vadd.xlane.f32.xlu0 %v814_v52  ;;  %v917_v53 = vpop.f32.mrf.mxu1  ;;  %v1670_v52 = vld [vmem:[%s2315_s11] ss:$0 sm:$0xff]  ;;  %p1884_p12 = pnand %p1883_p11, %p2094_p5 }
 0x1b4   : > { %v918_v54 = vadd.f32 %v1653_v43, %v917_v53  ;;  %p1891_p2 = por %p1890_p1, %p1889_p0 }
 0x1b5   : > { %v1750_v55 = vpop.f32.mrf.mxu1  ;;  %p1885_p13 = pneg %p1884_p12 }
 0x1b6   : > { %v923_v56 = vmax.f32 %v918_v54, 0.0 }
 0x1b7   : > { %v920_v57 = vpop.f32.mrf.mxu1  ;;  %p1892_p3 = pnand %p1891_p2, %p1885_p13 }
 0x1b8   : > { %v924_v58 = vmul.f32 %v1656_v47, %v923_v56 }
 0x1b9   : > { %v1751_v59 = vpop.f32.mrf.mxu1 }
 0x1ba   : > { %v925_v60 = vsel %vm813_vm3, %v924_v58, 0.0 }
 0x1bb   : > { %926 = vadd.xlane.f32.xlu0 %v925_v60  ;;  %v1023_v61 = vpop.f32.mrf.mxu1 }
 0x1bc   : > { %v1024_v62 = vadd.f32 %v1653_v43, %v1023_v61 }
 0x1bd   : > { %v1762_v63 = vpop.f32.mrf.mxu1 }
 0x1be   : > { %v1029_v0 = vmax.f32 %v1024_v62, 0.0 }
 0x1bf   : > { %v1026_v3 = vpop.f32.mrf.mxu1 }
 0x1c0   : > { %v1030_v4 = vmul.f32 %v1656_v47, %v1029_v0 }
 0x1c1   : > { %v1763_v5 = vpop.f32.mrf.mxu1 }
 0x1c2   : > { %v1031_v6 = vsel %vm813_vm3, %v1030_v4, 0.0 }
 0x1c3   : > { %1032 = vadd.xlane.f32.xlu1 %v1031_v6  ;;  %v1129_v7 = vpop.f32.mrf.mxu1 }
 0x1c4   : > { %v1130_v8 = vadd.f32 %v1653_v43, %v1129_v7  ;;  %v1873_v43 = vld [vmem:[%s2317_s13] sm:$0xff]  }
 0x1c5   : > { %v1774_v9 = vpop.f32.mrf.mxu1  ;;  %1787 = vmatpush3.bf16.msra.mxu1 %v1873_v43 }
 0x1c6   : > { %v1135_v10 = vmax.f32 %v1130_v8, 0.0  ;;  %1800 = vmatprep.subr.bf16.mxu1 %v1944_v1 }
 0x1c7   : > { %v1132_v11 = vpop.f32.mrf.mxu1 }
 0x1c8   : > { %v1136_v12 = vmul.f32 %v1656_v47, %v1135_v10  ;;  %1789 = vmatmul.mubr.msk.bf16.vlgmr.msra.gmra.mxu1 %vm1174_vm4, %v1236_v46  ;;  %v1875_v47 = vld [vmem:[%s2316_s12] sm:$0xff]  }
 0x1c9   : > { %v1775_v13 = vpop.f32.mrf.mxu1  ;;  %1804 = vmatprep.mubr.msk.bf16.mxu1 %vm1945_vm1, %v1944_v1  ;;  %1801 = vmatpush3.bf16.msra.mxu1 %v1876_v50 }
 0x1ca   : > { %v1137_v14 = vsel %vm813_vm3, %v1136_v12, 0.0  ;;  %1802 = vmatprep.subr.bf16.mxu1 %v1944_v1 }
 0x1cb   : > { %1138 = vadd.xlane.f32.xlu1 %v1137_v14  ;;  %v1878_v14 = vld [vmem:[%s2320_s16 + $0x8] sm:$0xff]  }
 0x1cd   : > { %1803 = vmatpush3.bf16.msra.mxu1 %v1877_v51 }
 0x1ce   : > { %1816 = vmatprep.subr.bf16.mxu1 %v1944_v1 }
 0x23c   : > { %v816_v16 = vpop.xlane.xlu0 %815 }
 0x23d   : > { %v824_v17 = vadd.f32 %v1657_v15, %v816_v16 }
 0x23f   : > { %828 = vperm.xlu0 %1866, %v824_v17   ;;  %v1412_v17 = vld [vmem:[%s2319_s15] sm:$0x1] }
 0x244   : > { %v927_v18 = vpop.xlane.xlu0 %926 }
 0x245   : > { %v928_v19 = vadd.f32 %v1657_v15, %v927_v18 }
 0x247   : > { %933 = vperm.xlu1 %1867, %v928_v19  }
 0x24c   : > { %v1033_v20 = vpop.xlane.xlu1 %1032 }
 0x24d   : > { %v1034_v21 = vadd.f32 %v1657_v15, %v1033_v20 }
 0x24f   : > { %1039 = vperm.xlu1 %1867, %v1034_v21  }
 0x254   : > { %v1139_v23 = vpop.xlane.xlu1 %1138 }
 0x255   : > { %v1140_v25 = vadd.f32 %v1657_v15, %v1139_v23  ;;  %v1879_v15 = vld [vmem:[%s2320_s16] sm:$0xff]  }
 0x257   : > { %1145 = vperm.xlu1 %1867, %v1140_v25  }
 0x288   : > { %v1290_v5 = vpop.f32.mrf.mxu1 }
 0x28a   : > { %v1790_v6 = vpop.f32.mrf.mxu1 }
 0x28c   : > { %v1293_v7 = vpop.f32.mrf.mxu1 }
 0x28e   : > { %v1791_v8 = vpop.f32.mrf.mxu1 }
 0x2ba   : > { %v829_v29 = vpop.permute.xlu0 %828 }
 0x2bb   : > { %v831_v33 = vmul.f32 %v829_v29, %v825_v28  ;;  %v1422_v28 = vld [vmem:[%s2321_s17] sm:$0x1] }
 0x2c2   : > { %v934_v26 = vpop.permute.xlu1 %933 }
 0x2c3   : > { %v936_v32 = vmul.f32 %v1661_v27, %v934_v26  ;;  %v1880_v26 = vld [vmem:[%s2322_s18 + $0x8] sm:$0xff]   ;;  %v1881_v27 = vld [vmem:[%s2322_s18] sm:$0xff]  }
 0x2c5   : > { %v937_v36 = vadd.f32 %v936_v32, %v831_v33 }
 0x2ca   : > { %v1040_v31 = vpop.permute.xlu1 %1039 }
 0x2cb   : > { %v1042_v34 = vmul.f32 %v1665_v30, %v1040_v31 }
 0x2cd   : > { %v1043_v38 = vadd.f32 %v1042_v34, %v937_v36 }
 0x2d2   : > { %v1146_v37 = vpop.permute.xlu1 %1145 }
 0x2d3   : > { %v1148_v39 = vmul.f32 %v1669_v35, %v1146_v37 }
 0x2d5   : > { %v1149_v40 = vadd.f32 %v1148_v39, %v1043_v38 }
 0x2d7   : > { %v1150_v41 = vpack.c.bf16 %v1149_v40, %v1149_v40 }
 0x2d9   : > { %1781 = vmatmul.mubr.msk.bf16.vlgmr.msra.gmra.mxu0 %vm1174_vm4, %v1150_v41 }
 0x2da   : > { %1796 = vmatprep.mubr.msk.bf16.mxu0 %vm1945_vm1, %v1944_v1  ;;  %1793 = vmatpush3.bf16.msra.mxu0 %v1874_v44 }
 0x2db   : > { %1794 = vmatprep.subr.bf16.mxu0 %v1944_v1 }
 0x2de   : > { %1795 = vmatpush3.bf16.msra.mxu0 %v1875_v47 }
 0x2df   : > { %1808 = vmatprep.subr.bf16.mxu0 %v1944_v1 }
 0x2e1   : > { %1797 = vmatmul.mubr.msk.bf16.vlgmr.msra.gmra.mxu0 %vm1174_vm4, %v1230_v49 }
 0x2e2   : > { %1812 = vmatprep.mubr.msk.bf16.mxu0 %vm1945_vm1, %v1944_v1  ;;  %1809 = vmatpush3.bf16.msra.mxu0 %v1878_v14 }
 0x2e3   : > { %1810 = vmatprep.subr.bf16.mxu0 %v1944_v1 }
 0x2e6   : > { %1811 = vmatpush3.bf16.msra.mxu0 %v1879_v15 }
 0x399   : > { %v1212_v53 = vpop.f32.mrf.mxu0 }
 0x39a   : > { %v1213_v54 = vadd.f32 %v1670_v52, %v1212_v53 }
 0x39b   : > { %v1782_v55 = vpop.f32.mrf.mxu0 }
 0x39c   : > { %vm1218_vm5 = vcmp.ge.f32.partialorder %v1213_v54, 0.0  ;;  %v1219_v56 = vmul.f32 0.2, %v1213_v54 }
 0x39d   : > { %v1215_v57 = vpop.f32.mrf.mxu0 }
 0x39e   : > { %v1220_v58 = vsel %vm1218_vm5, %v1213_v54, %v1219_v56 }
 0x39f   : > { %v1222_v59 = vsel %vm1221_vm6, %v1220_v58, -inf  ;;  %v1783_v60 = vpop.f32.mrf.mxu0 }
 0x3a0   : > { %v1223_v61 = vrot.slane %v1222_v59, 4 }
 0x3a1   : > { %v1345_v9 = vpop.f32.mrf.mxu0 }
 0x3a2   : > { %v1224_v62 = vmax.f32 %v1222_v59, %v1223_v61  ;;  %v1346_v10 = vadd.f32 %v1345_v9, %v1290_v5 }
 0x3a3   : > { %v1798_v11 = vpop.f32.mrf.mxu0 }
 0x3a4   : > { %v1225_v63 = vrot.slane %v1224_v62, 2 }
 0x3a5   : > { %v1348_v12 = vpop.f32.mrf.mxu0 }
 0x3a6   : > { %v1226_v0 = vmax.f32 %v1224_v62, %v1225_v63 }
 0x3a7   : > { %v1799_v13 = vpop.f32.mrf.mxu0 }
 0x3a8   : > { %v1227_v2 = vrot.slane %v1226_v0, 1 }
 0x3aa   : > { %v1228_v3 = vmax.f32 %v1226_v0, %v1227_v2 }
 0x3ac   : > { %v1351_v4 = vpack.c.bf16 %v1228_v3, %v1228_v3 }
 0x3ae   : > { %1805 = vmatmul.mubr.msk.bf16.vlgmr.msra.gmra.mxu1 %vm1174_vm4, %v1351_v4 }
 0x3af   : > { %1820 = vmatprep.mubr.msk.bf16.mxu1 %vm1945_vm1, %v1944_v1  ;;  %1817 = vmatpush3.bf16.msra.mxu1 %v1880_v26 }
 0x3b0   : > { %1818 = vmatprep.subr.bf16.mxu1 %v1944_v1  ;;  %v1486_v1 = vld [vmem:[%s2323_s19] sm:$0x1] }
 0x3b3   : > { %1819 = vmatpush3.bf16.msra.mxu1 %v1881_v27 }
 0x46e   : > { %v1405_v16 = vpop.f32.mrf.mxu1 }
 0x46f   : > { %v1411_v18 = vadd.f32 %v1405_v16, %v1346_v10 }
 0x470   : > { %v1806_v19 = vpop.f32.mrf.mxu1 }
 0x471   : > { %v1413_v20 = vadd.f32 %v1412_v17, %v1411_v18 }
 0x472   : > { %v1408_v21 = vpop.f32.mrf.mxu1 }
 0x473   : > { %vm1414_vm7 = vcmp.ge.f32.partialorder %v1413_v20, 0.0  ;;  %v1415_v22 = vmul.f32 0.2, %v1413_v20 }
 0x474   : > { %v1807_v23 = vpop.f32.mrf.mxu1 }
 0x475   : > { %v1416_v24 = vsel %vm1414_vm7, %v1413_v20, %v1415_v22 }
 0x476   : > { %v1417_v25 = vpack.c.bf16 %v1416_v24, %v1416_v24 }
 0x478   : > { %1813 = vmatmul.mubr.msk.bf16.vlgmr.msra.gmra.mxu0 %vm1174_vm4, %v1417_v25 }
 0x538   : > { %v1472_v29 = vpop.f32.mrf.mxu0 }
 0x539   : > { %v1473_v30 = vadd.f32 %v1472_v29, %v1422_v28 }
 0x53a   : > { %v1814_v31 = vpop.f32.mrf.mxu0 }
 0x53b   : > { %vm1478_vm8 = vcmp.ge.f32.partialorder %v1473_v30, 0.0  ;;  %v1479_v32 = vmul.f32 0.2, %v1473_v30 }
 0x53c   : > { %v1475_v33 = vpop.f32.mrf.mxu0 }
 0x53d   : > { %v1480_v34 = vsel %vm1478_vm8, %v1473_v30, %v1479_v32 }
 0x53e   : > { %v1481_v35 = vpack.c.bf16 %v1480_v34, %v1480_v34  ;;  %v1815_v36 = vpop.f32.mrf.mxu0 }
 0x540   : > { %1821 = vmatmul.mubr.msk.bf16.vlgmr.msra.gmra.mxu1 %vm1174_vm4, %v1481_v35 }
 0x600   : > { %v1536_v37 = vpop.f32.mrf.mxu1 }
 0x601   : > { %v1537_v38 = vadd.f32 %v1536_v37, %v1486_v1 }
 0x602   : > { %v1822_v39 = vpop.f32.mrf.mxu1 }
 0x603   : > { %1543 = vst.msk [vmem:[%s660_s6] sm:$0x1] %vm1542_vm9, %v1537_v38 }
 0x604   : > { %v1539_v40 = vpop.f32.mrf.mxu1 }
 0x605   : > { %1895 = shalt.err (!%p1892_p3)
}
 0x606   : > { %s1896_s8 = scalar_lea.hbm %s2263_s22, 16  ;;  %s1900_s0 = scalar_lea.hbm %s2324_s20, 32 }
 0x607   : > { %p1897_p4 = scmp.ne.s32.totalorder %s2263_s22, %s1896_s8  ;;  %p1901_p9 = scmp.lt.s32.totalorder %s2263_s22, %s2324_s20 }
 0x608   : > { %p1902_p10 = scmp.lt.s32.totalorder %s1900_s0, %s1896_s8 }
 0x609   : > { %p1898_p7 = pnand %p1897_p4, %p2094_p5 }
 0x60a   : > { %p1903_p11 = por %p1902_p10, %p1901_p9 }
 0x60b   : > { %p1899_p8 = pneg %p1898_p7 }
 0x60d   : > { %p1904_p12 = pnand %p1903_p11, %p1899_p8 }
 0x60f   : > { %1907 = shalt.err (!%p1904_p12)
}
 0x610   : > { %1824 = dma.vmem_to_hbm [thread:$0]  (%p2094_p5), %s2265_s28, 16, %s2263_s22, %s1545_s5   ;;  %v1823_v41 = vpop.f32.mrf.mxu1 }
 0x611 PF: > { %p1830_p13 = scmp.ge.s32.totalorder %s1942_s25, 2  ;;  %s1569_s9 = sand.u32 1, %s1930_s23  }
 0x612   : > { %s1570_s27 = scalar_lea.sflag [#allocation4], %s1569_s9 }
 0x613   : > { %p1827_p0 = pnand %p1830_p13, %p2098_p6 }
 0x615   : > { %p1828_p1 = pneg %p1827_p0 }
 0x617   : > { %1925 = dma.done.wait (%p1828_p1), %s1570_s27, 16  }
 0x618   : > { %1927 = vsyncadd (%p1828_p1), %s1570_s27, 4294967280  ;;  %p32_p2 = scmp.ge.s32.totalorder %s2081_s26, 4   ;;  %s2345_s23 = smov %s1934_s24 }
 0x619   : > { %s2346_s24 = smov %s1938_s2  ;;  %s2347_s2 = smov %s2092_s4 }
 0x61a   : > { %s2348_s25 = smov %s2081_s26  ;;  %34 = sbr.rel (!%p32_p2) target bundleno = 13 (0xd), region = 150 }
 0x61f   :  { %1574 = vsyncpa [#allocation4], 1 }
 0x620   :  { %1576 = vsyncpa [#allocation4 + $0x1], 1 }

</bundles_post_ra>
